<compile_context>
chip_gen: v7x
topology: tpu7x:2x2x1
jax: 0.10.0
libtpu: 0.0.40
codegen_flags: <defaults>
</compile_context>

<pallas_src>
import jax
import jax.numpy as jnp
from jax.experimental import pallas as pl
from jax.experimental.pallas import tpu as pltpu


def _sigmoid_kernel(x_ref, o_ref):
    # Pure elementwise op on the resident VMEM tile (EUP exp + reciprocal).
    # Kernel is HBM-bandwidth bound on all generations, so the exact sigmoid
    # form is irrelevant to wall-clock (tanh-form rewrite left for a v7x
    # bundle-dump verified follow-up).
    o_ref[...] = jax.nn.sigmoid(x_ref[...])


# --- tiling policy -----------------------------------------------------------
# ~4 MiB of payload per buffer per grid step amortizes the ~0.35 us per-step
# overhead (pushes toward ~90-95% of HBM roofline). in+out, double-buffered
# -> ~16 MiB resident; the scoped-VMEM limit is raised to 32 MiB explicitly so
# this also holds on v5e (16 MiB scoped default, 128 MiB physical).
_TARGET_TILE_BYTES = 4 * 1024 * 1024
_VMEM_LIMIT_BYTES = 32 * 1024 * 1024
# Below this, XLA's fused elementwise sigmoid (already at HBM roofline) beats
# a pallas_call launch with too few pipeline steps.
_MIN_PALLAS_BYTES = 2 * 1024 * 1024
# Lane widths tried when the natural last dim is tiny/awkward (free reshape of
# a contiguous array, no pad).
_FALLBACK_LANES = (512, 256, 128)


def _choose_tile_rows(rows: int, cols: int, itemsize: int) -> int:
    """Rows per grid step: ~_TARGET_TILE_BYTES per buffer, >=2 grid steps."""
    if rows < 8:
        return rows  # full (tiny) row extent: always a legal block shape
    tile_r = max(8, _TARGET_TILE_BYTES // (cols * itemsize))
    # Keep at least 2 grid steps so dimension_semantics=("parallel",) can shard
    # the grid across the 2 TensorCores on v7x (no effect on v5e/v6e).
    tile_r = min(tile_r, max(rows // 2, 8))
    return max(8, (tile_r // 8) * 8)  # sublane multiple of 8


def _sigmoid_2d(x2: jax.Array) -> jax.Array:
    rows, cols = x2.shape
    tile_r = _choose_tile_rows(rows, cols, x2.dtype.itemsize)
    grid = (pl.cdiv(rows, tile_r),)  # partial last block is masked by Pallas
    return pl.pallas_call(
        _sigmoid_kernel,
        out_shape=jax.ShapeDtypeStruct((rows, cols), x2.dtype),
        grid=grid,
        in_specs=[pl.BlockSpec((tile_r, cols), lambda i: (i, 0))],
        out_specs=pl.BlockSpec((tile_r, cols), lambda i: (i, 0)),
        compiler_params=pltpu.CompilerParams(
            dimension_semantics=("parallel",),
            vmem_limit_bytes=_VMEM_LIMIT_BYTES,
        ),
    )(x2)


def yzy_forward(x: jax.Array) -> jax.Array:
    """Pallas equivalent of the PyTorch `yzy` module forward: sigmoid(x).

    (The ReLU declared in __init__ is unused in the forward pass.)
    """
    n = x.size
    itemsize = x.dtype.itemsize

    # Small inputs (like the module's 2x2 example): XLA's fused sigmoid is
    # already at HBM roofline; a pallas_call launch only adds overhead.
    if n * itemsize < _MIN_PALLAS_BYTES:
        return jax.nn.sigmoid(x)

    # Preferred path: collapse leading dims (free reshape), block over the full
    # last dim, mask the boundary block. No pad, no post-kernel slice.
    if x.ndim >= 2:
        cols = x.shape[-1]
        if cols >= 128 and cols * itemsize * 8 <= _TARGET_TILE_BYTES:
            rows = n // cols
            return _sigmoid_2d(x.reshape(rows, cols)).reshape(x.shape)

    # Tiny/awkward last dim: re-lane the flat array if its size divides a
    # lane-dense width (still a free reshape of contiguous data).
    for lane in _FALLBACK_LANES:
        if n % lane == 0:
            return _sigmoid_2d(x.reshape(n // lane, lane)).reshape(x.shape)

    # Last resort (rare): pad to the next lane multiple (<=127 elements).
    # TODO(synk): this pad + trailing slice costs two extra full HBM round
    # trips; acceptable only because this branch is essentially never hit.
    lane = 128
    n_pad = pl.cdiv(n, lane) * lane
    flat = jnp.pad(x.reshape(-1), (0, n_pad - n))
    out2 = _sigmoid_2d(flat.reshape(n_pad // lane, lane))
    return out2.reshape(-1)[:n].reshape(x.shape)


if __name__ == "__main__":
    # The module's example input: [[1, -0.5], [-1, 3]] (float32) -> fast path.
    x_example = jnp.array([[1.0, -0.5], [-1.0, 3.0]], dtype=jnp.float32)

    key = jax.random.PRNGKey(0)
    k1, k2, k3, k4, k5 = jax.random.split(key, 5)

    cases = [
        x_example,                                                  # fast path
        jax.random.normal(k1, (2, 4, 16, 16), dtype=jnp.float32),   # fast path
        jax.random.normal(k2, (2048, 1024), dtype=jnp.float32),     # 2 x 4MiB tiles
        jax.random.normal(k3, (3000, 500), dtype=jnp.float32),      # masked boundary block
        jax.random.normal(k4, (262144, 8), dtype=jnp.float32),      # re-laned tiny last dim
        jax.random.normal(k5, (2048, 2048), dtype=jnp.bfloat16),    # dtype-scaled tile
    ]

    for x in cases:
        out = jax.block_until_ready(yzy_forward(x))
        ref = jax.nn.sigmoid(x)
        assert out.shape == x.shape and out.dtype == x.dtype
        atol = 1e-6 if x.dtype == jnp.float32 else 2e-2
        assert jnp.allclose(
            out.astype(jnp.float32), ref.astype(jnp.float32), atol=atol
        ), "mismatch vs reference sigmoid"

    print("KERNEL_OK")
</pallas_src>

<mosaic_0001>
module attributes {stable_mosaic.version = 11 : i64} {
  func.func @_sigmoid_kernel(%arg0: i32, %arg1: memref<1024x1024xf32, #tpu.memory_space<vmem>>, %arg2: memref<1024x1024xf32, #tpu.memory_space<vmem>>) attributes {dimension_semantics = [#tpu.dimension_semantics<parallel>], iteration_bounds = array<i64: 2>, scalar_prefetch = 0 : i64, scratch_operands = 0 : i64, tpu.core_type = #tpu.core_type<tc>, window_params = [{transform_indices = @transform_0, window_bounds = array<i64: 1024, 1024>}, {transform_indices = @transform_1, window_bounds = array<i64: 1024, 1024>}]} {
    %c0 = arith.constant 0 : index
    %c0_0 = arith.constant 0 : index
    %0 = vector.load %arg1[%c0, %c0_0] : memref<1024x1024xf32, #tpu.memory_space<vmem>>, vector<1024x1024xf32>
    %1 = arith.negf %0 : vector<1024x1024xf32>
    %2 = math.exp %1 : vector<1024x1024xf32>
    %cst = arith.constant 1.000000e+00 : f32
    %3 = vector.broadcast %cst : f32 to vector<1024x1024xf32>
    %4 = arith.addf %3, %2 : vector<1024x1024xf32>
    %5 = arith.divf %3, %4 : vector<1024x1024xf32>
    %c0_1 = arith.constant 0 : index
    %c0_2 = arith.constant 0 : index
    %6 = vector.load %arg2[%c0_1, %c0_2] : memref<1024x1024xf32, #tpu.memory_space<vmem>>, vector<1024x1024xf32>
    tpu.vector_store %arg2[%c0_1, %c0_2], %5 {strides = array<i32>} : memref<1024x1024xf32, #tpu.memory_space<vmem>>, vector<1024x1024xf32>,
    return
  }
  func.func @transform_0(%arg0: i32) -> (i32, i32) {
    %c0_i32 = arith.constant 0 : i32
    %c0_i32_0 = arith.constant 0 : i32
    return %arg0, %c0_i32 : i32, i32
  }
  func.func @transform_1(%arg0: i32) -> (i32, i32) {
    %c0_i32 = arith.constant 0 : i32
    %c0_i32_0 = arith.constant 0 : i32
    return %arg0, %c0_i32 : i32, i32
  }
}

</mosaic_0001>

<bundles_post_ra>
// kernel: tpu_custom_call.1
= control target key start
LH: loop header
LB: loop body
LE: loop exit
PB: predicated region body
PF: predicated region fallthrough
CT: control target
= control target key end

     0   :  { %6 = vsyncpa [#allocation3], 0  ;;  %s15941_s0 = inlined_call_operand.hbm [shape: f32[2048,1024], index: 0, kind: input, shape index: {}]   ;;  %s15942_s1 = inlined_call_operand.hbm [shape: f32[2048,1024], index: 1, kind: output, shape index: {}]  }
   0x1   :  { %8 = vsyncpa [#allocation3 + $0x1], 0 }
   0x2   :  { %9 = vsyncpa [#allocation4], 0 }
   0x3   :  { %11 = vsyncpa [#allocation4 + $0x1], 0  ;;  %s13722_s6 = smov 0   ;;  %s13724_s7 = smov 0  }
   0x4   :  { %s13726_s8 = smov 0   ;;  %s13728_s9 = smov 0  }
   0x5 LB: > { %s13743_s10 = sadd.s32 4294967295, %s13704_s9   ;;  %s8418_s11 = sadd.s32 4294967294, %s13704_s9   ;;  %s13704_s9 = sphi %s13728_s9, %s15955_s9   ;;  %s13700_s8 = sphi %s13726_s8, %s15954_s8   ;;  %s13696_s7 = sphi %s13724_s7, %s15953_s7   ;;  %s13692_s6 = sphi %s13722_s6, %s15952_s6  }
   0x6   : > { %s13747_s12 = sadd.s32 1, %s13704_s9   ;;  %s24_s13 = sadd.s32 1, %s13700_s8 }
   0x7   : > { %s21_s14 = ssub.s32 %s13704_s9, %s13747_s12  ;;  %p31_p0 = scmp.ne.s32.totalorder %s13700_s8, %s13696_s7 }
   0x8   : > { %p22_p1 = scmp.eq.s32.totalorder %s21_s14, 0  ;;  %p32_p2 = scmp.eq.s32.totalorder %s13704_s9, 0 }
   0x9   : > { %p37_p3 = scmp.ne.s32.totalorder %s13696_s7, %s13692_s6  ;;  %p38_p4 = scmp.eq.s32.totalorder %s13743_s10, 0 }
   0xa   : > { %s13759_s15 = scalar_select %p22_p1, %s13700_s8, %s24_s13  }
   0xb   : > { %p13761_p5 = por %p32_p2, %p31_p0  ;;  %p13765_p6 = por %p38_p4, %p37_p3 }
   0xc   : > { %p61_p7 = scmp.eq.s32.totalorder %s13743_s10, 1  ;;  %p67_p8 = scmp.eq.s32.totalorder %s8418_s11, 1 }
   0xd   : > { %p9474_p10 = scmp.lt.s32.totalorder %s13704_s9, 2  ;;  %s87_s20 = sand.u32 1, %s13700_s8  }
   0xe   : > { %p13772_p11 = por %p61_p7, %p31_p0  ;;  %p13776_p12 = por %p67_p8, %p37_p3 }
   0xf   : > { %s9459_s21 = sshll.u32 %s13704_s9, 17  ;;  %s8421_s22 = sshll.u32 %s87_s20, 13 }
  0x10   : > { %s15946_s18 = scalar_select %p13772_p11, 1, 0 }
  0x11   : > { %s15947_s19 = scalar_select %p13776_p12, 1, 0 }
  0x12   : > { %s13785_s25 = scalar_lea.hbm %s15941_s0, %s9459_s21  ;;  %s91_s26 = scalar_lea.vmem [#allocation2], %s8421_s22 }
  0x13   : > { %s99_s27 = sshll.u32 %s91_s26, 4  ;;  %p13789_p13 = pnand %p9474_p10, %p13761_p5  ;;  %s13793_s27 = int_to_ptr.vmem [resolvable:$true] %s99_s27 }
  0x14   : > { %s13795_s29 = scalar_lea.sflag [#allocation3], %s87_s20  ;;  %s13608_s30 = scalar_lea.hbm %s13785_s25, 131072 }
  0x15   : > { %p13609_p0 = scmp.ne.s32.totalorder %s13785_s25, %s13608_s30  ;;  %p13610_p1 = pneg %p13789_p13 }
  0x16   : > { %s13613_s4 = scalar_lea.hbm %s15941_s0, 262144  ;;  %p13614_p4 = scmp.lt.u32.totalorder %s13785_s25, %s15941_s0 }
  0x17   : > { %p13611_p2 = pnand %p13610_p1, %p13609_p0  ;;  %p13615_p5 = scmp.lt.u32.totalorder %s13613_s4, %s13608_s30 }
  0x18   : > { %p13617_p8 = scmp.lt.u32.totalorder %s13608_s30, %s13785_s25 }
  0x19   : > { %p13612_p3 = pneg %p13611_p2  ;;  %p13616_p7 = por %p13615_p5, %p13614_p4 }
  0x1b   : > { %p13618_p10 = por %p13617_p8, %p13616_p7 }
  0x1d   : > { %p13619_p9 = pnand %p13618_p10, %p13612_p3 }
  0x1f   : > { %13622 = shalt.err (!%p13619_p9)
}
  0x20   : > { %s13623_s13 = scalar_lea.vmem %s13793_s27, 131072  ;;  %s13706_s14 = smov [#allocation2]  }
  0x21   : > { %p13624_p0 = scmp.ne.s32.totalorder %s13793_s27, %s13623_s13  ;;  %s13628_s16 = sshll.u32 %s13706_s14, 4  ;;  %s13629_s16 = int_to_ptr.vmem [resolvable:$false] %s13628_s16 }
  0x22   : > { %s13630_s20 = scalar_lea.vmem %s13629_s16, 262144  ;;  %p13631_p11 = scmp.lt.s32.totalorder %s13793_s27, %s13629_s16 }
  0x23   : > { %p13626_p2 = pnand %p13624_p0, %p13610_p1  ;;  %p13632_p4 = scmp.lt.s32.totalorder %s13630_s20, %s13623_s13 }
  0x25   : > { %p13627_p12 = pneg %p13626_p2  ;;  %p13633_p5 = por %p13632_p4, %p13631_p11 }
  0x27   : > { %p13634_p7 = pnand %p13633_p5, %p13627_p12 }
  0x29   : > { %13637 = shalt.err (!%p13634_p7)
}
  0x2a   : > { %s13707_s21 = smov 1024   ;;  %s13708_s22 = smov 64  }
  0x2b   : > { %9469 = dma.hbm_to_vmem [thread:$0]  (!%p13789_p13), %s13785_s25, 131072, %s13793_s27, %s13795_s29, %s13707_s21, %s13707_s21, %s13708_s22  }
  0x2c   : > { %p8425_p9 = scmp.ge.s32.totalorder %s13704_s9, 1  ;;  %p107_p1 = scmp.lt.s32.totalorder %s13704_s9, 3 }
  0x2e   : > { %p108_p3 = pnand %p8425_p9, %p107_p1 }
  0x2f   : > { %s13826_s23 = sand.u32 (!%p108_p3), 1, %s13696_s7  }
  0x30   : > { %111 = sbr.rel (%p108_p3) target bundleno = 2135 (0x857), region = 24  ;;  %s8426_s24 = sshll.u32 (!%p108_p3), %s13826_s23, 13 }
  0x31   : > { %s114_s26 = scalar_lea.sflag (!%p108_p3), [#allocation3], %s13826_s23  ;;  %s13832_s30 = scalar_lea.vmem (!%p108_p3), [#allocation2], %s8426_s24 }
  0x37   : > { %13683 = dma.done.wait (%p13765_p6), %s114_s26, 131072  }
  0x38   : > { %13685 = vsyncadd (%p13765_p6), %s114_s26, 4294836224  ;;  %v138_v0 = vld [vmem:[%s13832_s30] sm:$0xff]  ;;  %v139_v1 = vld [vmem:[%s13832_s30 + $0x8] sm:$0xff]  ;;  %s13858_s17 = scalar_lea.vmem [#allocation5], %s8426_s24  ;;  %s9461_s25 = sshll.u32 %s13743_s10, 17 }
  0x39   : > { %v140_v2 = vld [vmem:[%s13832_s30 + $0x10] sm:$0xff]  ;;  %v8428_v3 = vmul.f32 -1.442695, %v138_v0  ;;  %v8429_v4 = vmul.f32 -1.442695, %v139_v1  ;;  %v141_v6 = vld [vmem:[%s13832_s30 + $0x18] sm:$0xff]  ;;  %s15892_s2 = scalar_lea.hbm %s15942_s1, %s9461_s25 }
  0x3a   : > { %v8430_v5 = vmul.f32 -1.442695, %v140_v2  ;;  %v142_v7 = vld [vmem:[%s13832_s30 + $0x20] sm:$0xff]  ;;  %v143_v8 = vld [vmem:[%s13832_s30 + $0x28] sm:$0xff]  ;;  %v8431_v9 = vmul.f32 -1.442695, %v141_v6 }
  0x3b   : > { %9512 = vpow2.f32 %v8428_v3  ;;  %v8432_v10 = vmul.f32 -1.442695, %v142_v7  ;;  %v8433_v11 = vmul.f32 -1.442695, %v143_v8  ;;  %v144_v12 = vld [vmem:[%s13832_s30 + $0x30] sm:$0xff]  ;;  %v145_v13 = vld [vmem:[%s13832_s30 + $0x38] sm:$0xff] }
  0x3c   : > { %9514 = vpow2.f32 %v8429_v4  ;;  %v146_v14 = vld [vmem:[%s13832_s30 + $0x40] sm:$0xff]  ;;  %v8434_v15 = vmul.f32 -1.442695, %v144_v12  ;;  %v8435_v16 = vmul.f32 -1.442695, %v145_v13  ;;  %v147_v17 = vld [vmem:[%s13832_s30 + $0x48] sm:$0xff] }
  0x3d   : > { %9516 = vpow2.f32 %v8430_v5  ;;  %v148_v18 = vld [vmem:[%s13832_s30 + $0x50] sm:$0xff]  ;;  %v8436_v19 = vmul.f32 -1.442695, %v146_v14  ;;  %v149_v20 = vld [vmem:[%s13832_s30 + $0x58] sm:$0xff]  ;;  %v8437_v21 = vmul.f32 -1.442695, %v147_v17 }
  0x3e   : > { %9518 = vpow2.f32 %v8431_v9  ;;  %v150_v22 = vld [vmem:[%s13832_s30 + $0x60] sm:$0xff]  ;;  %v8438_v23 = vmul.f32 -1.442695, %v148_v18  ;;  %v8439_v24 = vmul.f32 -1.442695, %v149_v20  ;;  %v151_v45 = vld [vmem:[%s13832_s30 + $0x68] sm:$0xff] }
  0x3f   : > { %9520 = vpow2.f32 %v8432_v10  ;;  %v8440_v25 = vmul.f32 -1.442695, %v150_v22  ;;  %v152_v48 = vld [vmem:[%s13832_s30 + $0x70] sm:$0xff]  ;;  %v153_v51 = vld [vmem:[%s13832_s30 + $0x78] sm:$0xff]  ;;  %v8441_v54 = vmul.f32 -1.442695, %v151_v45 }
  0x40   : > { %9522 = vpow2.f32 %v8433_v11  ;;  %v154_v55 = vld [vmem:[%s13832_s30 + $0x80] sm:$0xff]  ;;  %v8442_v58 = vmul.f32 -1.442695, %v152_v48  ;;  %v155_v59 = vld [vmem:[%s13832_s30 + $0x88] sm:$0xff]  ;;  %v8443_v61 = vmul.f32 -1.442695, %v153_v51 }
  0x41   : > { %9524 = vpow2.f32 %v8434_v15  ;;  %v156_v62 = vld [vmem:[%s13832_s30 + $0x90] sm:$0xff]  ;;  %v8444_v0 = vmul.f32 -1.442695, %v154_v55  ;;  %v157_v1 = vld [vmem:[%s13832_s30 + $0x98] sm:$0xff]  ;;  %v8445_v3 = vmul.f32 -1.442695, %v155_v59 }
  0x42   : > { %9526 = vpow2.f32 %v8435_v16  ;;  %v158_v4 = vld [vmem:[%s13832_s30 + $0xa0] sm:$0xff]  ;;  %v8446_v6 = vmul.f32 -1.442695, %v156_v62  ;;  %v159_v7 = vld [vmem:[%s13832_s30 + $0xa8] sm:$0xff]  ;;  %v8447_v9 = vmul.f32 -1.442695, %v157_v1 }
  0x43   : > { %9528 = vpow2.f32 %v8436_v19  ;;  %v160_v10 = vld [vmem:[%s13832_s30 + $0xb0] sm:$0xff]  ;;  %v8448_v12 = vmul.f32 -1.442695, %v158_v4  ;;  %v161_v13 = vld [vmem:[%s13832_s30 + $0xb8] sm:$0xff]  ;;  %v8449_v15 = vmul.f32 -1.442695, %v159_v7 }
  0x44   : > { %9530 = vpow2.f32 %v8437_v21  ;;  %v162_v16 = vld [vmem:[%s13832_s30 + $0xc0] sm:$0xff]  ;;  %v8450_v18 = vmul.f32 -1.442695, %v160_v10  ;;  %v163_v19 = vld [vmem:[%s13832_s30 + $0xc8] sm:$0xff]  ;;  %v8451_v21 = vmul.f32 -1.442695, %v161_v13 }
  0x45   : > { %v9513_v26 = vpop.eup %9512  ;;  %9532 = vpow2.f32 %v8438_v23  ;;  %v8452_v23 = vmul.f32 -1.442695, %v162_v16  ;;  %s8345_s27 = sshll.u32 %s13858_s17, 4  ;;  %s8331_s10 = scalar_lea.sflag [#allocation4], %s13826_s23  ;;  %s15894_s27 = int_to_ptr.vmem [resolvable:$true] %s8345_s27 }
  0x46   : > { %v9515_v27 = vpop.eup %9514  ;;  %v4234_v28 = vadd.f32 1.0, %v9513_v26  ;;  %9534 = vpow2.f32 %v8439_v24  ;;  %s13638_s3 = scalar_lea.vmem %s15894_s27, 131072  ;;  %p15949_p11 = scmp.ne.s32.totalorder %s15946_s18, 0 }
  0x47   : > { %v9517_v29 = vpop.eup %9516  ;;  %v4235_v30 = vadd.f32 1.0, %v9515_v27  ;;  %9536 = vpow2.f32 %v8440_v25  ;;  %v8453_v25 = vmul.f32 -1.442695, %v163_v19  ;;  %p13639_p6 = scmp.ne.s32.totalorder %s15894_s27, %s13638_s3  ;;  %s13709_s4 = smov [#allocation5]  }
  0x48   : > { %v9519_v31 = vpop.eup %9518  ;;  %9538 = vrcp.f32 %v4234_v28  ;;  %v4236_v32 = vadd.f32 1.0, %v9517_v29  ;;  %s13642_s5 = sshll.u32 %s13709_s4, 4  ;;  %s13643_s5 = int_to_ptr.vmem [resolvable:$false] %s13642_s5 }
  0x49   : > { %v9521_v33 = vpop.eup %9520  ;;  %9540 = vrcp.f32 %v4235_v30  ;;  %v4237_v34 = vadd.f32 1.0, %v9519_v31  ;;  %p13640_p12 = pnand %p13639_p6, %p15949_p11  ;;  %s13644_s11 = scalar_lea.vmem %s13643_s5, 262144 }
  0x4a   : > { %v9523_v35 = vpop.eup %9522  ;;  %9542 = vrcp.f32 %v4236_v32  ;;  %v4238_v36 = vadd.f32 1.0, %v9521_v33  ;;  %p13645_p8 = scmp.lt.s32.totalorder %s15894_s27, %s13643_s5  ;;  %p13646_p10 = scmp.lt.s32.totalorder %s13644_s11, %s13638_s3 }
  0x4b   : > { %v9525_v37 = vpop.eup %9524  ;;  %9544 = vrcp.f32 %v4237_v34  ;;  %v4239_v38 = vadd.f32 1.0, %v9523_v35  ;;  %p13641_p13 = pneg %p13640_p12 }
  0x4c   : > { %v9527_v39 = vpop.eup %9526  ;;  %9546 = vrcp.f32 %v4238_v36  ;;  %v4240_v40 = vadd.f32 1.0, %v9525_v37  ;;  %p13647_p0 = por %p13646_p10, %p13645_p8 }
  0x4d   : > { %v9529_v41 = vpop.eup %9528  ;;  %9548 = vrcp.f32 %v4239_v38  ;;  %v4241_v42 = vadd.f32 1.0, %v9527_v39 }
  0x4e   : > { %v9531_v43 = vpop.eup %9530  ;;  %9550 = vrcp.f32 %v4240_v40  ;;  %v4242_v44 = vadd.f32 1.0, %v9529_v41  ;;  %p13648_p2 = pnand %p13647_p0, %p13641_p13 }
  0x4f   : > { %v9533_v46 = vpop.eup %9532  ;;  %9552 = vrcp.f32 %v4241_v42  ;;  %v4243_v47 = vadd.f32 1.0, %v9531_v43 }
  0x50   : > { %v9535_v49 = vpop.eup %9534  ;;  %9554 = vrcp.f32 %v4242_v44  ;;  %v4244_v50 = vadd.f32 1.0, %v9533_v46  ;;  %v164_v46 = vld [vmem:[%s13832_s30 + $0xd0] sm:$0xff] }
  0x51   : > { %v9537_v52 = vpop.eup %9536  ;;  %9556 = vrcp.f32 %v4243_v47  ;;  %v4245_v53 = vadd.f32 1.0, %v9535_v49  ;;  %v165_v49 = vld [vmem:[%s13832_s30 + $0xd8] sm:$0xff]  ;;  %v8454_v55 = vmul.f32 -1.442695, %v164_v46 }
  0x52   : > { %v9539_v56 = vpop.eup %9538  ;;  %9558 = vrcp.f32 %v4244_v50  ;;  %v4246_v57 = vadd.f32 1.0, %v9537_v52  ;;  %v166_v52 = vld [vmem:[%s13832_s30 + $0xe0] sm:$0xff]  ;;  %v8455_v59 = vmul.f32 -1.442695, %v165_v49 }
  0x53   : > { %v9541_v60 = vpop.eup %9540  ;;  %7306 = vst [vmem:[%s13858_s17] sm:$0xff] %v9539_v56  ;;  %9560 = vrcp.f32 %v4245_v53  ;;  %v167_v56 = vld [vmem:[%s13832_s30 + $0xe8] sm:$0xff]  ;;  %v8456_v62 = vmul.f32 -1.442695, %v166_v52 }
  0x54   : > { %v9543_v63 = vpop.eup %9542  ;;  %7307 = vst [vmem:[%s13858_s17 + $0x8] sm:$0xff] %v9541_v60  ;;  %9562 = vrcp.f32 %v4246_v57  ;;  %v168_v60 = vld [vmem:[%s13832_s30 + $0xf0] sm:$0xff]  ;;  %v8457_v1 = vmul.f32 -1.442695, %v167_v56 }
  0x55   : > { %v9545_v2 = vpop.eup %9544  ;;  %7308 = vst [vmem:[%s13858_s17 + $0x10] sm:$0xff] %v9543_v63  ;;  %9564 = vpow2.f32 %v8441_v54  ;;  %v169_v63 = vld [vmem:[%s13832_s30 + $0xf8] sm:$0xff]  ;;  %v8458_v4 = vmul.f32 -1.442695, %v168_v60 }
  0x56   : > { %v9547_v5 = vpop.eup %9546  ;;  %7309 = vst [vmem:[%s13858_s17 + $0x18] sm:$0xff] %v9545_v2  ;;  %9566 = vpow2.f32 %v8442_v58  ;;  %v170_v2 = vld [vmem:[%s13832_s30 + $0x100] sm:$0xff]  ;;  %v8459_v7 = vmul.f32 -1.442695, %v169_v63 }
  0x57   : > { %v9549_v8 = vpop.eup %9548  ;;  %7310 = vst [vmem:[%s13858_s17 + $0x20] sm:$0xff] %v9547_v5  ;;  %9568 = vpow2.f32 %v8443_v61  ;;  %v171_v5 = vld [vmem:[%s13832_s30 + $0x108] sm:$0xff]  ;;  %v8460_v10 = vmul.f32 -1.442695, %v170_v2 }
  0x58   : > { %v9551_v11 = vpop.eup %9550  ;;  %7311 = vst [vmem:[%s13858_s17 + $0x28] sm:$0xff] %v9549_v8  ;;  %9570 = vpow2.f32 %v8444_v0  ;;  %v172_v8 = vld [vmem:[%s13832_s30 + $0x110] sm:$0xff]  ;;  %v8461_v13 = vmul.f32 -1.442695, %v171_v5 }
  0x59   : > { %v9553_v14 = vpop.eup %9552  ;;  %7312 = vst [vmem:[%s13858_s17 + $0x30] sm:$0xff] %v9551_v11  ;;  %9572 = vpow2.f32 %v8445_v3  ;;  %v173_v11 = vld [vmem:[%s13832_s30 + $0x118] sm:$0xff]  ;;  %v8462_v16 = vmul.f32 -1.442695, %v172_v8 }
  0x5a   : > { %v9555_v17 = vpop.eup %9554  ;;  %7313 = vst [vmem:[%s13858_s17 + $0x38] sm:$0xff] %v9553_v14  ;;  %9574 = vpow2.f32 %v8446_v6  ;;  %v174_v14 = vld [vmem:[%s13832_s30 + $0x120] sm:$0xff]  ;;  %v8463_v19 = vmul.f32 -1.442695, %v173_v11 }
  0x5b   : > { %v9557_v20 = vpop.eup %9556  ;;  %7314 = vst [vmem:[%s13858_s17 + $0x40] sm:$0xff] %v9555_v17  ;;  %9576 = vpow2.f32 %v8447_v9  ;;  %v175_v17 = vld [vmem:[%s13832_s30 + $0x128] sm:$0xff] }
  0x5c   : > { %v9559_v22 = vpop.eup %9558  ;;  %7315 = vst [vmem:[%s13858_s17 + $0x48] sm:$0xff] %v9557_v20  ;;  %9578 = vpow2.f32 %v8448_v12  ;;  %v176_v20 = vld [vmem:[%s13832_s30 + $0x130] sm:$0xff] }
  0x5d   : > { %v9561_v24 = vpop.eup %9560  ;;  %7316 = vst [vmem:[%s13858_s17 + $0x50] sm:$0xff] %v9559_v22  ;;  %9580 = vpow2.f32 %v8449_v15  ;;  %v8464_v22 = vmul.f32 -1.442695, %v174_v14 }
  0x5e   : > { %v9563_v26 = vpop.eup %9562  ;;  %7317 = vst [vmem:[%s13858_s17 + $0x58] sm:$0xff] %v9561_v24  ;;  %9582 = vpow2.f32 %v8450_v18  ;;  %v8465_v24 = vmul.f32 -1.442695, %v175_v17 }
  0x5f   : > { %v9565_v27 = vpop.eup %9564  ;;  %7318 = vst [vmem:[%s13858_s17 + $0x60] sm:$0xff] %v9563_v26  ;;  %9584 = vpow2.f32 %v8451_v21  ;;  %v8466_v26 = vmul.f32 -1.442695, %v176_v20 }
  0x60   : > { %v9567_v28 = vpop.eup %9566  ;;  %v4247_v29 = vadd.f32 1.0, %v9565_v27  ;;  %9586 = vpow2.f32 %v8452_v23 }
  0x61   : > { %v9569_v30 = vpop.eup %9568  ;;  %v4248_v31 = vadd.f32 1.0, %v9567_v28  ;;  %9588 = vpow2.f32 %v8453_v25 }
  0x62   : > { %v9571_v32 = vpop.eup %9570  ;;  %9590 = vrcp.f32 %v4247_v29  ;;  %v4249_v33 = vadd.f32 1.0, %v9569_v30 }
  0x63   : > { %v9573_v34 = vpop.eup %9572  ;;  %9592 = vrcp.f32 %v4248_v31  ;;  %v4250_v35 = vadd.f32 1.0, %v9571_v32 }
  0x64   : > { %v9575_v36 = vpop.eup %9574  ;;  %9594 = vrcp.f32 %v4249_v33  ;;  %v4251_v37 = vadd.f32 1.0, %v9573_v34 }
  0x65   : > { %v9577_v38 = vpop.eup %9576  ;;  %9596 = vrcp.f32 %v4250_v35  ;;  %v4252_v39 = vadd.f32 1.0, %v9575_v36 }
  0x66   : > { %v9579_v40 = vpop.eup %9578  ;;  %9598 = vrcp.f32 %v4251_v37  ;;  %v4253_v41 = vadd.f32 1.0, %v9577_v38 }
  0x67   : > { %v9581_v42 = vpop.eup %9580  ;;  %9600 = vrcp.f32 %v4252_v39  ;;  %v4254_v43 = vadd.f32 1.0, %v9579_v40 }
  0x68   : > { %v9583_v44 = vpop.eup %9582  ;;  %9602 = vrcp.f32 %v4253_v41  ;;  %v4255_v45 = vadd.f32 1.0, %v9581_v42 }
  0x69   : > { %v9585_v47 = vpop.eup %9584  ;;  %9604 = vrcp.f32 %v4254_v43  ;;  %v4256_v48 = vadd.f32 1.0, %v9583_v44 }
  0x6a   : > { %v9587_v50 = vpop.eup %9586  ;;  %9606 = vrcp.f32 %v4255_v45  ;;  %v4257_v51 = vadd.f32 1.0, %v9585_v47  ;;  %v177_v47 = vld [vmem:[%s13832_s30 + $0x138] sm:$0xff] }
  0x6b   : > { %v9589_v53 = vpop.eup %9588  ;;  %9608 = vrcp.f32 %v4256_v48  ;;  %v4258_v54 = vadd.f32 1.0, %v9587_v50  ;;  %v178_v50 = vld [vmem:[%s13832_s30 + $0x140] sm:$0xff]  ;;  %v8467_v56 = vmul.f32 -1.442695, %v177_v47 }
  0x6c   : > { %v9591_v57 = vpop.eup %9590  ;;  %9610 = vrcp.f32 %v4257_v51  ;;  %v4259_v58 = vadd.f32 1.0, %v9589_v53  ;;  %v179_v53 = vld [vmem:[%s13832_s30 + $0x148] sm:$0xff]  ;;  %v8468_v60 = vmul.f32 -1.442695, %v178_v50 }
  0x6d   : > { %v9593_v61 = vpop.eup %9592  ;;  %7319 = vst [vmem:[%s13858_s17 + $0x68] sm:$0xff] %v9591_v57  ;;  %9612 = vrcp.f32 %v4258_v54  ;;  %v180_v57 = vld [vmem:[%s13832_s30 + $0x150] sm:$0xff]  ;;  %v8469_v63 = vmul.f32 -1.442695, %v179_v53 }
  0x6e   : > { %v9595_v0 = vpop.eup %9594  ;;  %7320 = vst [vmem:[%s13858_s17 + $0x70] sm:$0xff] %v9593_v61  ;;  %9614 = vrcp.f32 %v4259_v58  ;;  %v181_v61 = vld [vmem:[%s13832_s30 + $0x158] sm:$0xff]  ;;  %v8470_v2 = vmul.f32 -1.442695, %v180_v57 }
  0x6f   : > { %v9597_v3 = vpop.eup %9596  ;;  %7321 = vst [vmem:[%s13858_s17 + $0x78] sm:$0xff] %v9595_v0  ;;  %9616 = vpow2.f32 %v8454_v55  ;;  %v182_v0 = vld [vmem:[%s13832_s30 + $0x160] sm:$0xff]  ;;  %v8471_v5 = vmul.f32 -1.442695, %v181_v61 }
  0x70   : > { %v9599_v6 = vpop.eup %9598  ;;  %7322 = vst [vmem:[%s13858_s17 + $0x80] sm:$0xff] %v9597_v3  ;;  %9618 = vpow2.f32 %v8455_v59  ;;  %v183_v3 = vld [vmem:[%s13832_s30 + $0x168] sm:$0xff]  ;;  %v8472_v8 = vmul.f32 -1.442695, %v182_v0 }
  0x71   : > { %v9601_v9 = vpop.eup %9600  ;;  %7323 = vst [vmem:[%s13858_s17 + $0x88] sm:$0xff] %v9599_v6  ;;  %9620 = vpow2.f32 %v8456_v62  ;;  %v184_v6 = vld [vmem:[%s13832_s30 + $0x170] sm:$0xff]  ;;  %v8473_v11 = vmul.f32 -1.442695, %v183_v3 }
  0x72   : > { %v9603_v12 = vpop.eup %9602  ;;  %7324 = vst [vmem:[%s13858_s17 + $0x90] sm:$0xff] %v9601_v9  ;;  %9622 = vpow2.f32 %v8457_v1  ;;  %v185_v9 = vld [vmem:[%s13832_s30 + $0x178] sm:$0xff]  ;;  %v8474_v14 = vmul.f32 -1.442695, %v184_v6 }
  0x73   : > { %v9605_v15 = vpop.eup %9604  ;;  %7325 = vst [vmem:[%s13858_s17 + $0x98] sm:$0xff] %v9603_v12  ;;  %9624 = vpow2.f32 %v8458_v4  ;;  %v186_v12 = vld [vmem:[%s13832_s30 + $0x180] sm:$0xff]  ;;  %v8475_v17 = vmul.f32 -1.442695, %v185_v9 }
  0x74   : > { %v9607_v18 = vpop.eup %9606  ;;  %7326 = vst [vmem:[%s13858_s17 + $0xa0] sm:$0xff] %v9605_v15  ;;  %9626 = vpow2.f32 %v8459_v7  ;;  %v187_v15 = vld [vmem:[%s13832_s30 + $0x188] sm:$0xff]  ;;  %v8476_v20 = vmul.f32 -1.442695, %v186_v12 }
  0x75   : > { %v9609_v21 = vpop.eup %9608  ;;  %7327 = vst [vmem:[%s13858_s17 + $0xa8] sm:$0xff] %v9607_v18  ;;  %9628 = vpow2.f32 %v8460_v10  ;;  %v188_v18 = vld [vmem:[%s13832_s30 + $0x190] sm:$0xff] }
  0x76   : > { %v9611_v23 = vpop.eup %9610  ;;  %7328 = vst [vmem:[%s13858_s17 + $0xb0] sm:$0xff] %v9609_v21  ;;  %9630 = vpow2.f32 %v8461_v13  ;;  %v189_v21 = vld [vmem:[%s13832_s30 + $0x198] sm:$0xff] }
  0x77   : > { %v9613_v25 = vpop.eup %9612  ;;  %7329 = vst [vmem:[%s13858_s17 + $0xb8] sm:$0xff] %v9611_v23  ;;  %9632 = vpow2.f32 %v8462_v16  ;;  %v8477_v23 = vmul.f32 -1.442695, %v187_v15 }
  0x78   : > { %v9615_v27 = vpop.eup %9614  ;;  %7330 = vst [vmem:[%s13858_s17 + $0xc0] sm:$0xff] %v9613_v25  ;;  %9634 = vpow2.f32 %v8463_v19  ;;  %v8478_v25 = vmul.f32 -1.442695, %v188_v18 }
  0x79   : > { %v9617_v28 = vpop.eup %9616  ;;  %7331 = vst [vmem:[%s13858_s17 + $0xc8] sm:$0xff] %v9615_v27  ;;  %9636 = vpow2.f32 %v8464_v22  ;;  %v8479_v27 = vmul.f32 -1.442695, %v189_v21 }
  0x7a   : > { %v9619_v29 = vpop.eup %9618  ;;  %v4260_v30 = vadd.f32 1.0, %v9617_v28  ;;  %9638 = vpow2.f32 %v8465_v24 }
  0x7b   : > { %v9621_v31 = vpop.eup %9620  ;;  %v4261_v32 = vadd.f32 1.0, %v9619_v29  ;;  %9640 = vpow2.f32 %v8466_v26 }
  0x7c   : > { %v9623_v33 = vpop.eup %9622  ;;  %9642 = vrcp.f32 %v4260_v30  ;;  %v4262_v34 = vadd.f32 1.0, %v9621_v31 }
  0x7d   : > { %v9625_v35 = vpop.eup %9624  ;;  %9644 = vrcp.f32 %v4261_v32  ;;  %v4263_v36 = vadd.f32 1.0, %v9623_v33 }
  0x7e   : > { %v9627_v37 = vpop.eup %9626  ;;  %9646 = vrcp.f32 %v4262_v34  ;;  %v4264_v38 = vadd.f32 1.0, %v9625_v35 }
  0x7f   : > { %v9629_v39 = vpop.eup %9628  ;;  %9648 = vrcp.f32 %v4263_v36  ;;  %v4265_v40 = vadd.f32 1.0, %v9627_v37 }
  0x80   : > { %v9631_v41 = vpop.eup %9630  ;;  %9650 = vrcp.f32 %v4264_v38  ;;  %v4266_v42 = vadd.f32 1.0, %v9629_v39 }
  0x81   : > { %v9633_v43 = vpop.eup %9632  ;;  %9652 = vrcp.f32 %v4265_v40  ;;  %v4267_v44 = vadd.f32 1.0, %v9631_v41 }
  0x82   : > { %v9635_v45 = vpop.eup %9634  ;;  %9654 = vrcp.f32 %v4266_v42  ;;  %v4268_v46 = vadd.f32 1.0, %v9633_v43 }
  0x83   : > { %v9637_v48 = vpop.eup %9636  ;;  %9656 = vrcp.f32 %v4267_v44  ;;  %v4269_v49 = vadd.f32 1.0, %v9635_v45 }
  0x84   : > { %v9639_v51 = vpop.eup %9638  ;;  %9658 = vrcp.f32 %v4268_v46  ;;  %v4270_v52 = vadd.f32 1.0, %v9637_v48  ;;  %v190_v48 = vld [vmem:[%s13832_s30 + $0x1a0] sm:$0xff] }
  0x85   : > { %v9641_v54 = vpop.eup %9640  ;;  %9660 = vrcp.f32 %v4269_v49  ;;  %v4271_v55 = vadd.f32 1.0, %v9639_v51  ;;  %v191_v51 = vld [vmem:[%s13832_s30 + $0x1a8] sm:$0xff]  ;;  %v8480_v57 = vmul.f32 -1.442695, %v190_v48 }
  0x86   : > { %v9643_v58 = vpop.eup %9642  ;;  %9662 = vrcp.f32 %v4270_v52  ;;  %v4272_v59 = vadd.f32 1.0, %v9641_v54  ;;  %v192_v54 = vld [vmem:[%s13832_s30 + $0x1b0] sm:$0xff]  ;;  %v8481_v61 = vmul.f32 -1.442695, %v191_v51 }
  0x87   : > { %v9645_v62 = vpop.eup %9644  ;;  %7332 = vst [vmem:[%s13858_s17 + $0xd0] sm:$0xff] %v9643_v58  ;;  %9664 = vrcp.f32 %v4271_v55  ;;  %v193_v58 = vld [vmem:[%s13832_s30 + $0x1b8] sm:$0xff]  ;;  %v8482_v0 = vmul.f32 -1.442695, %v192_v54 }
  0x88   : > { %v9647_v1 = vpop.eup %9646  ;;  %7333 = vst [vmem:[%s13858_s17 + $0xd8] sm:$0xff] %v9645_v62  ;;  %9666 = vrcp.f32 %v4272_v59  ;;  %v194_v62 = vld [vmem:[%s13832_s30 + $0x1c0] sm:$0xff]  ;;  %v8483_v3 = vmul.f32 -1.442695, %v193_v58 }
  0x89   : > { %v9649_v4 = vpop.eup %9648  ;;  %7334 = vst [vmem:[%s13858_s17 + $0xe0] sm:$0xff] %v9647_v1  ;;  %9668 = vpow2.f32 %v8467_v56  ;;  %v195_v1 = vld [vmem:[%s13832_s30 + $0x1c8] sm:$0xff]  ;;  %v8484_v6 = vmul.f32 -1.442695, %v194_v62 }
  0x8a   : > { %v9651_v7 = vpop.eup %9650  ;;  %7335 = vst [vmem:[%s13858_s17 + $0xe8] sm:$0xff] %v9649_v4  ;;  %9670 = vpow2.f32 %v8468_v60  ;;  %v196_v4 = vld [vmem:[%s13832_s30 + $0x1d0] sm:$0xff]  ;;  %v8485_v9 = vmul.f32 -1.442695, %v195_v1 }
  0x8b   : > { %v9653_v10 = vpop.eup %9652  ;;  %7336 = vst [vmem:[%s13858_s17 + $0xf0] sm:$0xff] %v9651_v7  ;;  %9672 = vpow2.f32 %v8469_v63  ;;  %v197_v7 = vld [vmem:[%s13832_s30 + $0x1d8] sm:$0xff]  ;;  %v8486_v12 = vmul.f32 -1.442695, %v196_v4 }
  0x8c   : > { %v9655_v13 = vpop.eup %9654  ;;  %7337 = vst [vmem:[%s13858_s17 + $0xf8] sm:$0xff] %v9653_v10  ;;  %9674 = vpow2.f32 %v8470_v2  ;;  %v198_v10 = vld [vmem:[%s13832_s30 + $0x1e0] sm:$0xff]  ;;  %v8487_v15 = vmul.f32 -1.442695, %v197_v7 }
  0x8d   : > { %v9657_v16 = vpop.eup %9656  ;;  %7338 = vst [vmem:[%s13858_s17 + $0x100] sm:$0xff] %v9655_v13  ;;  %9676 = vpow2.f32 %v8471_v5  ;;  %v199_v13 = vld [vmem:[%s13832_s30 + $0x1e8] sm:$0xff]  ;;  %v8488_v18 = vmul.f32 -1.442695, %v198_v10 }
  0x8e   : > { %v9659_v19 = vpop.eup %9658  ;;  %7339 = vst [vmem:[%s13858_s17 + $0x108] sm:$0xff] %v9657_v16  ;;  %9678 = vpow2.f32 %v8472_v8  ;;  %v200_v16 = vld [vmem:[%s13832_s30 + $0x1f0] sm:$0xff]  ;;  %v8489_v21 = vmul.f32 -1.442695, %v199_v13 }
  0x8f   : > { %v9661_v22 = vpop.eup %9660  ;;  %7340 = vst [vmem:[%s13858_s17 + $0x110] sm:$0xff] %v9659_v19  ;;  %9680 = vpow2.f32 %v8473_v11  ;;  %v201_v19 = vld [vmem:[%s13832_s30 + $0x1f8] sm:$0xff] }
  0x90   : > { %v9663_v24 = vpop.eup %9662  ;;  %7341 = vst [vmem:[%s13858_s17 + $0x118] sm:$0xff] %v9661_v22  ;;  %9682 = vpow2.f32 %v8474_v14  ;;  %v202_v22 = vld [vmem:[%s13832_s30 + $0x200] sm:$0xff] }
  0x91   : > { %v9665_v26 = vpop.eup %9664  ;;  %7342 = vst [vmem:[%s13858_s17 + $0x120] sm:$0xff] %v9663_v24  ;;  %9684 = vpow2.f32 %v8475_v17  ;;  %v8490_v24 = vmul.f32 -1.442695, %v200_v16 }
  0x92   : > { %v9667_v28 = vpop.eup %9666  ;;  %7343 = vst [vmem:[%s13858_s17 + $0x128] sm:$0xff] %v9665_v26  ;;  %9686 = vpow2.f32 %v8476_v20  ;;  %v8491_v26 = vmul.f32 -1.442695, %v201_v19 }
  0x93   : > { %v9669_v29 = vpop.eup %9668  ;;  %7344 = vst [vmem:[%s13858_s17 + $0x130] sm:$0xff] %v9667_v28  ;;  %9688 = vpow2.f32 %v8477_v23  ;;  %v8492_v28 = vmul.f32 -1.442695, %v202_v22 }
  0x94   : > { %v9671_v30 = vpop.eup %9670  ;;  %v4273_v31 = vadd.f32 1.0, %v9669_v29  ;;  %9690 = vpow2.f32 %v8478_v25 }
  0x95   : > { %v9673_v32 = vpop.eup %9672  ;;  %v4274_v33 = vadd.f32 1.0, %v9671_v30  ;;  %9692 = vpow2.f32 %v8479_v27 }
  0x96   : > { %v9675_v34 = vpop.eup %9674  ;;  %9694 = vrcp.f32 %v4273_v31  ;;  %v4275_v35 = vadd.f32 1.0, %v9673_v32 }
  0x97   : > { %v9677_v36 = vpop.eup %9676  ;;  %9696 = vrcp.f32 %v4274_v33  ;;  %v4276_v37 = vadd.f32 1.0, %v9675_v34 }
  0x98   : > { %v9679_v38 = vpop.eup %9678  ;;  %9698 = vrcp.f32 %v4275_v35  ;;  %v4277_v39 = vadd.f32 1.0, %v9677_v36 }
  0x99   : > { %v9681_v40 = vpop.eup %9680  ;;  %9700 = vrcp.f32 %v4276_v37  ;;  %v4278_v41 = vadd.f32 1.0, %v9679_v38 }
  0x9a   : > { %v9683_v42 = vpop.eup %9682  ;;  %9702 = vrcp.f32 %v4277_v39  ;;  %v4279_v43 = vadd.f32 1.0, %v9681_v40 }
  0x9b   : > { %v9685_v44 = vpop.eup %9684  ;;  %9704 = vrcp.f32 %v4278_v41  ;;  %v4280_v45 = vadd.f32 1.0, %v9683_v42 }
  0x9c   : > { %v9687_v46 = vpop.eup %9686  ;;  %9706 = vrcp.f32 %v4279_v43  ;;  %v4281_v47 = vadd.f32 1.0, %v9685_v44 }
  0x9d   : > { %v9689_v49 = vpop.eup %9688  ;;  %9708 = vrcp.f32 %v4280_v45  ;;  %v4282_v50 = vadd.f32 1.0, %v9687_v46 }
  0x9e   : > { %v9691_v52 = vpop.eup %9690  ;;  %9710 = vrcp.f32 %v4281_v47  ;;  %v4283_v53 = vadd.f32 1.0, %v9689_v49  ;;  %v203_v49 = vld [vmem:[%s13832_s30 + $0x208] sm:$0xff] }
  0x9f   : > { %v9693_v55 = vpop.eup %9692  ;;  %9712 = vrcp.f32 %v4282_v50  ;;  %v4284_v56 = vadd.f32 1.0, %v9691_v52  ;;  %v204_v52 = vld [vmem:[%s13832_s30 + $0x210] sm:$0xff]  ;;  %v8493_v58 = vmul.f32 -1.442695, %v203_v49 }
  0xa0   : > { %v9695_v59 = vpop.eup %9694  ;;  %9714 = vrcp.f32 %v4283_v53  ;;  %v4285_v60 = vadd.f32 1.0, %v9693_v55  ;;  %v205_v55 = vld [vmem:[%s13832_s30 + $0x218] sm:$0xff]  ;;  %v8494_v62 = vmul.f32 -1.442695, %v204_v52 }
  0xa1   : > { %v9697_v63 = vpop.eup %9696  ;;  %7345 = vst [vmem:[%s13858_s17 + $0x138] sm:$0xff] %v9695_v59  ;;  %9716 = vrcp.f32 %v4284_v56  ;;  %v206_v59 = vld [vmem:[%s13832_s30 + $0x220] sm:$0xff]  ;;  %v8495_v1 = vmul.f32 -1.442695, %v205_v55 }
  0xa2   : > { %v9699_v2 = vpop.eup %9698  ;;  %7346 = vst [vmem:[%s13858_s17 + $0x140] sm:$0xff] %v9697_v63  ;;  %9718 = vrcp.f32 %v4285_v60  ;;  %v207_v63 = vld [vmem:[%s13832_s30 + $0x228] sm:$0xff]  ;;  %v8496_v4 = vmul.f32 -1.442695, %v206_v59 }
  0xa3   : > { %v9701_v5 = vpop.eup %9700  ;;  %7347 = vst [vmem:[%s13858_s17 + $0x148] sm:$0xff] %v9699_v2  ;;  %9720 = vpow2.f32 %v8480_v57  ;;  %v208_v2 = vld [vmem:[%s13832_s30 + $0x230] sm:$0xff]  ;;  %v8497_v7 = vmul.f32 -1.442695, %v207_v63 }
  0xa4   : > { %v9703_v8 = vpop.eup %9702  ;;  %7348 = vst [vmem:[%s13858_s17 + $0x150] sm:$0xff] %v9701_v5  ;;  %9722 = vpow2.f32 %v8481_v61  ;;  %v209_v5 = vld [vmem:[%s13832_s30 + $0x238] sm:$0xff]  ;;  %v8498_v10 = vmul.f32 -1.442695, %v208_v2 }
  0xa5   : > { %v9705_v11 = vpop.eup %9704  ;;  %7349 = vst [vmem:[%s13858_s17 + $0x158] sm:$0xff] %v9703_v8  ;;  %9724 = vpow2.f32 %v8482_v0  ;;  %v210_v8 = vld [vmem:[%s13832_s30 + $0x240] sm:$0xff]  ;;  %v8499_v13 = vmul.f32 -1.442695, %v209_v5 }
  0xa6   : > { %v9707_v14 = vpop.eup %9706  ;;  %7350 = vst [vmem:[%s13858_s17 + $0x160] sm:$0xff] %v9705_v11  ;;  %9726 = vpow2.f32 %v8483_v3  ;;  %v211_v11 = vld [vmem:[%s13832_s30 + $0x248] sm:$0xff]  ;;  %v8500_v16 = vmul.f32 -1.442695, %v210_v8 }
  0xa7   : > { %v9709_v17 = vpop.eup %9708  ;;  %7351 = vst [vmem:[%s13858_s17 + $0x168] sm:$0xff] %v9707_v14  ;;  %9728 = vpow2.f32 %v8484_v6  ;;  %v212_v14 = vld [vmem:[%s13832_s30 + $0x250] sm:$0xff]  ;;  %v8501_v19 = vmul.f32 -1.442695, %v211_v11 }
  0xa8   : > { %v9711_v20 = vpop.eup %9710  ;;  %7352 = vst [vmem:[%s13858_s17 + $0x170] sm:$0xff] %v9709_v17  ;;  %9730 = vpow2.f32 %v8485_v9  ;;  %v213_v17 = vld [vmem:[%s13832_s30 + $0x258] sm:$0xff]  ;;  %v8502_v22 = vmul.f32 -1.442695, %v212_v14 }
  0xa9   : > { %v9713_v23 = vpop.eup %9712  ;;  %7353 = vst [vmem:[%s13858_s17 + $0x178] sm:$0xff] %v9711_v20  ;;  %9732 = vpow2.f32 %v8486_v12  ;;  %v214_v20 = vld [vmem:[%s13832_s30 + $0x260] sm:$0xff] }
  0xaa   : > { %v9715_v25 = vpop.eup %9714  ;;  %7354 = vst [vmem:[%s13858_s17 + $0x180] sm:$0xff] %v9713_v23  ;;  %9734 = vpow2.f32 %v8487_v15  ;;  %v215_v23 = vld [vmem:[%s13832_s30 + $0x268] sm:$0xff] }
  0xab   : > { %v9717_v27 = vpop.eup %9716  ;;  %7355 = vst [vmem:[%s13858_s17 + $0x188] sm:$0xff] %v9715_v25  ;;  %9736 = vpow2.f32 %v8488_v18  ;;  %v8503_v25 = vmul.f32 -1.442695, %v213_v17 }
  0xac   : > { %v9719_v29 = vpop.eup %9718  ;;  %7356 = vst [vmem:[%s13858_s17 + $0x190] sm:$0xff] %v9717_v27  ;;  %9738 = vpow2.f32 %v8489_v21  ;;  %v8504_v27 = vmul.f32 -1.442695, %v214_v20 }
  0xad   : > { %v9721_v30 = vpop.eup %9720  ;;  %7357 = vst [vmem:[%s13858_s17 + $0x198] sm:$0xff] %v9719_v29  ;;  %9740 = vpow2.f32 %v8490_v24  ;;  %v8505_v29 = vmul.f32 -1.442695, %v215_v23 }
  0xae   : > { %v9723_v31 = vpop.eup %9722  ;;  %v4286_v32 = vadd.f32 1.0, %v9721_v30  ;;  %9742 = vpow2.f32 %v8491_v26 }
  0xaf   : > { %v9725_v33 = vpop.eup %9724  ;;  %v4287_v34 = vadd.f32 1.0, %v9723_v31  ;;  %9744 = vpow2.f32 %v8492_v28 }
  0xb0   : > { %v9727_v35 = vpop.eup %9726  ;;  %9746 = vrcp.f32 %v4286_v32  ;;  %v4288_v36 = vadd.f32 1.0, %v9725_v33 }
  0xb1   : > { %v9729_v37 = vpop.eup %9728  ;;  %9748 = vrcp.f32 %v4287_v34  ;;  %v4289_v38 = vadd.f32 1.0, %v9727_v35 }
  0xb2   : > { %v9731_v39 = vpop.eup %9730  ;;  %9750 = vrcp.f32 %v4288_v36  ;;  %v4290_v40 = vadd.f32 1.0, %v9729_v37 }
  0xb3   : > { %v9733_v41 = vpop.eup %9732  ;;  %9752 = vrcp.f32 %v4289_v38  ;;  %v4291_v42 = vadd.f32 1.0, %v9731_v39 }
  0xb4   : > { %v9735_v43 = vpop.eup %9734  ;;  %9754 = vrcp.f32 %v4290_v40  ;;  %v4292_v44 = vadd.f32 1.0, %v9733_v41 }
  0xb5   : > { %v9737_v45 = vpop.eup %9736  ;;  %9756 = vrcp.f32 %v4291_v42  ;;  %v4293_v46 = vadd.f32 1.0, %v9735_v43 }
  0xb6   : > { %v9739_v47 = vpop.eup %9738  ;;  %9758 = vrcp.f32 %v4292_v44  ;;  %v4294_v48 = vadd.f32 1.0, %v9737_v45 }
  0xb7   : > { %v9741_v50 = vpop.eup %9740  ;;  %9760 = vrcp.f32 %v4293_v46  ;;  %v4295_v51 = vadd.f32 1.0, %v9739_v47 }
  0xb8   : > { %v9743_v53 = vpop.eup %9742  ;;  %9762 = vrcp.f32 %v4294_v48  ;;  %v4296_v54 = vadd.f32 1.0, %v9741_v50  ;;  %v216_v50 = vld [vmem:[%s13832_s30 + $0x270] sm:$0xff] }
  0xb9   : > { %v9745_v56 = vpop.eup %9744  ;;  %9764 = vrcp.f32 %v4295_v51  ;;  %v4297_v57 = vadd.f32 1.0, %v9743_v53  ;;  %v217_v53 = vld [vmem:[%s13832_s30 + $0x278] sm:$0xff]  ;;  %v8506_v59 = vmul.f32 -1.442695, %v216_v50 }
  0xba   : > { %v9747_v60 = vpop.eup %9746  ;;  %9766 = vrcp.f32 %v4296_v54  ;;  %v4298_v61 = vadd.f32 1.0, %v9745_v56  ;;  %v218_v56 = vld [vmem:[%s13832_s30 + $0x280] sm:$0xff]  ;;  %v8507_v63 = vmul.f32 -1.442695, %v217_v53 }
  0xbb   : > { %v9749_v0 = vpop.eup %9748  ;;  %7358 = vst [vmem:[%s13858_s17 + $0x1a0] sm:$0xff] %v9747_v60  ;;  %9768 = vrcp.f32 %v4297_v57  ;;  %v219_v60 = vld [vmem:[%s13832_s30 + $0x288] sm:$0xff]  ;;  %v8508_v2 = vmul.f32 -1.442695, %v218_v56 }
  0xbc   : > { %v9751_v3 = vpop.eup %9750  ;;  %7359 = vst [vmem:[%s13858_s17 + $0x1a8] sm:$0xff] %v9749_v0  ;;  %9770 = vrcp.f32 %v4298_v61  ;;  %v220_v0 = vld [vmem:[%s13832_s30 + $0x290] sm:$0xff]  ;;  %v8509_v5 = vmul.f32 -1.442695, %v219_v60 }
  0xbd   : > { %v9753_v6 = vpop.eup %9752  ;;  %7360 = vst [vmem:[%s13858_s17 + $0x1b0] sm:$0xff] %v9751_v3  ;;  %9772 = vpow2.f32 %v8493_v58  ;;  %v221_v3 = vld [vmem:[%s13832_s30 + $0x298] sm:$0xff]  ;;  %v8510_v8 = vmul.f32 -1.442695, %v220_v0 }
  0xbe   : > { %v9755_v9 = vpop.eup %9754  ;;  %7361 = vst [vmem:[%s13858_s17 + $0x1b8] sm:$0xff] %v9753_v6  ;;  %9774 = vpow2.f32 %v8494_v62  ;;  %v222_v6 = vld [vmem:[%s13832_s30 + $0x2a0] sm:$0xff]  ;;  %v8511_v11 = vmul.f32 -1.442695, %v221_v3 }
  0xbf   : > { %v9757_v12 = vpop.eup %9756  ;;  %7362 = vst [vmem:[%s13858_s17 + $0x1c0] sm:$0xff] %v9755_v9  ;;  %9776 = vpow2.f32 %v8495_v1  ;;  %v223_v9 = vld [vmem:[%s13832_s30 + $0x2a8] sm:$0xff]  ;;  %v8512_v14 = vmul.f32 -1.442695, %v222_v6 }
  0xc0   : > { %v9759_v15 = vpop.eup %9758  ;;  %7363 = vst [vmem:[%s13858_s17 + $0x1c8] sm:$0xff] %v9757_v12  ;;  %9778 = vpow2.f32 %v8496_v4  ;;  %v224_v12 = vld [vmem:[%s13832_s30 + $0x2b0] sm:$0xff]  ;;  %v8513_v17 = vmul.f32 -1.442695, %v223_v9 }
  0xc1   : > { %v9761_v18 = vpop.eup %9760  ;;  %7364 = vst [vmem:[%s13858_s17 + $0x1d0] sm:$0xff] %v9759_v15  ;;  %9780 = vpow2.f32 %v8497_v7  ;;  %v225_v15 = vld [vmem:[%s13832_s30 + $0x2b8] sm:$0xff]  ;;  %v8514_v20 = vmul.f32 -1.442695, %v224_v12 }
  0xc2   : > { %v9763_v21 = vpop.eup %9762  ;;  %7365 = vst [vmem:[%s13858_s17 + $0x1d8] sm:$0xff] %v9761_v18  ;;  %9782 = vpow2.f32 %v8498_v10  ;;  %v226_v18 = vld [vmem:[%s13832_s30 + $0x2c0] sm:$0xff]  ;;  %v8515_v23 = vmul.f32 -1.442695, %v225_v15 }
  0xc3   : > { %v9765_v24 = vpop.eup %9764  ;;  %7366 = vst [vmem:[%s13858_s17 + $0x1e0] sm:$0xff] %v9763_v21  ;;  %9784 = vpow2.f32 %v8499_v13  ;;  %v227_v21 = vld [vmem:[%s13832_s30 + $0x2c8] sm:$0xff] }
  0xc4   : > { %v9767_v26 = vpop.eup %9766  ;;  %7367 = vst [vmem:[%s13858_s17 + $0x1e8] sm:$0xff] %v9765_v24  ;;  %9786 = vpow2.f32 %v8500_v16  ;;  %v228_v24 = vld [vmem:[%s13832_s30 + $0x2d0] sm:$0xff] }
  0xc5   : > { %v9769_v28 = vpop.eup %9768  ;;  %7368 = vst [vmem:[%s13858_s17 + $0x1f0] sm:$0xff] %v9767_v26  ;;  %9788 = vpow2.f32 %v8501_v19  ;;  %v8516_v26 = vmul.f32 -1.442695, %v226_v18 }
  0xc6   : > { %v9771_v30 = vpop.eup %9770  ;;  %7369 = vst [vmem:[%s13858_s17 + $0x1f8] sm:$0xff] %v9769_v28  ;;  %9790 = vpow2.f32 %v8502_v22  ;;  %v8517_v28 = vmul.f32 -1.442695, %v227_v21 }
  0xc7   : > { %v9773_v31 = vpop.eup %9772  ;;  %7370 = vst [vmem:[%s13858_s17 + $0x200] sm:$0xff] %v9771_v30  ;;  %9792 = vpow2.f32 %v8503_v25  ;;  %v8518_v30 = vmul.f32 -1.442695, %v228_v24 }
  0xc8   : > { %v9775_v32 = vpop.eup %9774  ;;  %v4299_v33 = vadd.f32 1.0, %v9773_v31  ;;  %9794 = vpow2.f32 %v8504_v27 }
  0xc9   : > { %v9777_v34 = vpop.eup %9776  ;;  %v4300_v35 = vadd.f32 1.0, %v9775_v32  ;;  %9796 = vpow2.f32 %v8505_v29 }
  0xca   : > { %v9779_v36 = vpop.eup %9778  ;;  %9798 = vrcp.f32 %v4299_v33  ;;  %v4301_v37 = vadd.f32 1.0, %v9777_v34 }
  0xcb   : > { %v9781_v38 = vpop.eup %9780  ;;  %9800 = vrcp.f32 %v4300_v35  ;;  %v4302_v39 = vadd.f32 1.0, %v9779_v36 }
  0xcc   : > { %v9783_v40 = vpop.eup %9782  ;;  %9802 = vrcp.f32 %v4301_v37  ;;  %v4303_v41 = vadd.f32 1.0, %v9781_v38 }
  0xcd   : > { %v9785_v42 = vpop.eup %9784  ;;  %9804 = vrcp.f32 %v4302_v39  ;;  %v4304_v43 = vadd.f32 1.0, %v9783_v40 }
  0xce   : > { %v9787_v44 = vpop.eup %9786  ;;  %9806 = vrcp.f32 %v4303_v41  ;;  %v4305_v45 = vadd.f32 1.0, %v9785_v42 }
  0xcf   : > { %v9789_v46 = vpop.eup %9788  ;;  %9808 = vrcp.f32 %v4304_v43  ;;  %v4306_v47 = vadd.f32 1.0, %v9787_v44 }
  0xd0   : > { %v9791_v48 = vpop.eup %9790  ;;  %9810 = vrcp.f32 %v4305_v45  ;;  %v4307_v49 = vadd.f32 1.0, %v9789_v46 }
  0xd1   : > { %v9793_v51 = vpop.eup %9792  ;;  %9812 = vrcp.f32 %v4306_v47  ;;  %v4308_v52 = vadd.f32 1.0, %v9791_v48 }
  0xd2   : > { %v9795_v54 = vpop.eup %9794  ;;  %9814 = vrcp.f32 %v4307_v49  ;;  %v4309_v55 = vadd.f32 1.0, %v9793_v51  ;;  %v229_v51 = vld [vmem:[%s13832_s30 + $0x2d8] sm:$0xff] }
  0xd3   : > { %v9797_v57 = vpop.eup %9796  ;;  %9816 = vrcp.f32 %v4308_v52  ;;  %v4310_v58 = vadd.f32 1.0, %v9795_v54  ;;  %v230_v54 = vld [vmem:[%s13832_s30 + $0x2e0] sm:$0xff]  ;;  %v8519_v60 = vmul.f32 -1.442695, %v229_v51 }
  0xd4   : > { %v9799_v61 = vpop.eup %9798  ;;  %9818 = vrcp.f32 %v4309_v55  ;;  %v4311_v62 = vadd.f32 1.0, %v9797_v57  ;;  %v231_v57 = vld [vmem:[%s13832_s30 + $0x2e8] sm:$0xff]  ;;  %v8520_v0 = vmul.f32 -1.442695, %v230_v54 }
  0xd5   : > { %v9801_v1 = vpop.eup %9800  ;;  %7371 = vst [vmem:[%s13858_s17 + $0x208] sm:$0xff] %v9799_v61  ;;  %9820 = vrcp.f32 %v4310_v58  ;;  %v232_v61 = vld [vmem:[%s13832_s30 + $0x2f0] sm:$0xff]  ;;  %v8521_v3 = vmul.f32 -1.442695, %v231_v57 }
  0xd6   : > { %v9803_v4 = vpop.eup %9802  ;;  %7372 = vst [vmem:[%s13858_s17 + $0x210] sm:$0xff] %v9801_v1  ;;  %9822 = vrcp.f32 %v4311_v62  ;;  %v233_v1 = vld [vmem:[%s13832_s30 + $0x2f8] sm:$0xff]  ;;  %v8522_v6 = vmul.f32 -1.442695, %v232_v61 }
  0xd7   : > { %v9805_v7 = vpop.eup %9804  ;;  %7373 = vst [vmem:[%s13858_s17 + $0x218] sm:$0xff] %v9803_v4  ;;  %9824 = vpow2.f32 %v8506_v59  ;;  %v234_v4 = vld [vmem:[%s13832_s30 + $0x300] sm:$0xff]  ;;  %v8523_v9 = vmul.f32 -1.442695, %v233_v1 }
  0xd8   : > { %v9807_v10 = vpop.eup %9806  ;;  %7374 = vst [vmem:[%s13858_s17 + $0x220] sm:$0xff] %v9805_v7  ;;  %9826 = vpow2.f32 %v8507_v63  ;;  %v235_v7 = vld [vmem:[%s13832_s30 + $0x308] sm:$0xff]  ;;  %v8524_v12 = vmul.f32 -1.442695, %v234_v4 }
  0xd9   : > { %v9809_v13 = vpop.eup %9808  ;;  %7375 = vst [vmem:[%s13858_s17 + $0x228] sm:$0xff] %v9807_v10  ;;  %9828 = vpow2.f32 %v8508_v2  ;;  %v236_v10 = vld [vmem:[%s13832_s30 + $0x310] sm:$0xff]  ;;  %v8525_v15 = vmul.f32 -1.442695, %v235_v7 }
  0xda   : > { %v9811_v16 = vpop.eup %9810  ;;  %7376 = vst [vmem:[%s13858_s17 + $0x230] sm:$0xff] %v9809_v13  ;;  %9830 = vpow2.f32 %v8509_v5  ;;  %v237_v13 = vld [vmem:[%s13832_s30 + $0x318] sm:$0xff]  ;;  %v8526_v18 = vmul.f32 -1.442695, %v236_v10 }
  0xdb   : > { %v9813_v19 = vpop.eup %9812  ;;  %7377 = vst [vmem:[%s13858_s17 + $0x238] sm:$0xff] %v9811_v16  ;;  %9832 = vpow2.f32 %v8510_v8  ;;  %v238_v16 = vld [vmem:[%s13832_s30 + $0x320] sm:$0xff]  ;;  %v8527_v21 = vmul.f32 -1.442695, %v237_v13 }
  0xdc   : > { %v9815_v22 = vpop.eup %9814  ;;  %7378 = vst [vmem:[%s13858_s17 + $0x240] sm:$0xff] %v9813_v19  ;;  %9834 = vpow2.f32 %v8511_v11  ;;  %v239_v19 = vld [vmem:[%s13832_s30 + $0x328] sm:$0xff]  ;;  %v8528_v24 = vmul.f32 -1.442695, %v238_v16 }
  0xdd   : > { %v9817_v25 = vpop.eup %9816  ;;  %7379 = vst [vmem:[%s13858_s17 + $0x248] sm:$0xff] %v9815_v22  ;;  %9836 = vpow2.f32 %v8512_v14  ;;  %v240_v22 = vld [vmem:[%s13832_s30 + $0x330] sm:$0xff] }
  0xde   : > { %v9819_v27 = vpop.eup %9818  ;;  %7380 = vst [vmem:[%s13858_s17 + $0x250] sm:$0xff] %v9817_v25  ;;  %9838 = vpow2.f32 %v8513_v17  ;;  %v241_v25 = vld [vmem:[%s13832_s30 + $0x338] sm:$0xff] }
  0xdf   : > { %v9821_v29 = vpop.eup %9820  ;;  %7381 = vst [vmem:[%s13858_s17 + $0x258] sm:$0xff] %v9819_v27  ;;  %9840 = vpow2.f32 %v8514_v20  ;;  %v8529_v27 = vmul.f32 -1.442695, %v239_v19 }
  0xe0   : > { %v9823_v31 = vpop.eup %9822  ;;  %7382 = vst [vmem:[%s13858_s17 + $0x260] sm:$0xff] %v9821_v29  ;;  %9842 = vpow2.f32 %v8515_v23  ;;  %v8530_v29 = vmul.f32 -1.442695, %v240_v22 }
  0xe1   : > { %v9825_v32 = vpop.eup %9824  ;;  %7383 = vst [vmem:[%s13858_s17 + $0x268] sm:$0xff] %v9823_v31  ;;  %9844 = vpow2.f32 %v8516_v26  ;;  %v8531_v31 = vmul.f32 -1.442695, %v241_v25 }
  0xe2   : > { %v9827_v33 = vpop.eup %9826  ;;  %v4312_v34 = vadd.f32 1.0, %v9825_v32  ;;  %9846 = vpow2.f32 %v8517_v28 }
  0xe3   : > { %v9829_v35 = vpop.eup %9828  ;;  %v4313_v36 = vadd.f32 1.0, %v9827_v33  ;;  %9848 = vpow2.f32 %v8518_v30 }
  0xe4   : > { %v9831_v37 = vpop.eup %9830  ;;  %9850 = vrcp.f32 %v4312_v34  ;;  %v4314_v38 = vadd.f32 1.0, %v9829_v35 }
  0xe5   : > { %v9833_v39 = vpop.eup %9832  ;;  %9852 = vrcp.f32 %v4313_v36  ;;  %v4315_v40 = vadd.f32 1.0, %v9831_v37 }
  0xe6   : > { %v9835_v41 = vpop.eup %9834  ;;  %9854 = vrcp.f32 %v4314_v38  ;;  %v4316_v42 = vadd.f32 1.0, %v9833_v39 }
  0xe7   : > { %v9837_v43 = vpop.eup %9836  ;;  %9856 = vrcp.f32 %v4315_v40  ;;  %v4317_v44 = vadd.f32 1.0, %v9835_v41 }
  0xe8   : > { %v9839_v45 = vpop.eup %9838  ;;  %9858 = vrcp.f32 %v4316_v42  ;;  %v4318_v46 = vadd.f32 1.0, %v9837_v43 }
  0xe9   : > { %v9841_v47 = vpop.eup %9840  ;;  %9860 = vrcp.f32 %v4317_v44  ;;  %v4319_v48 = vadd.f32 1.0, %v9839_v45 }
  0xea   : > { %v9843_v49 = vpop.eup %9842  ;;  %9862 = vrcp.f32 %v4318_v46  ;;  %v4320_v50 = vadd.f32 1.0, %v9841_v47 }
  0xeb   : > { %v9845_v52 = vpop.eup %9844  ;;  %9864 = vrcp.f32 %v4319_v48  ;;  %v4321_v53 = vadd.f32 1.0, %v9843_v49 }
  0xec   : > { %v9847_v55 = vpop.eup %9846  ;;  %9866 = vrcp.f32 %v4320_v50  ;;  %v4322_v56 = vadd.f32 1.0, %v9845_v52  ;;  %v242_v52 = vld [vmem:[%s13832_s30 + $0x340] sm:$0xff] }
  0xed   : > { %v9849_v58 = vpop.eup %9848  ;;  %9868 = vrcp.f32 %v4321_v53  ;;  %v4323_v59 = vadd.f32 1.0, %v9847_v55  ;;  %v243_v55 = vld [vmem:[%s13832_s30 + $0x348] sm:$0xff]  ;;  %v8532_v61 = vmul.f32 -1.442695, %v242_v52 }
  0xee   : > { %v9851_v62 = vpop.eup %9850  ;;  %9870 = vrcp.f32 %v4322_v56  ;;  %v4324_v63 = vadd.f32 1.0, %v9849_v58  ;;  %v244_v58 = vld [vmem:[%s13832_s30 + $0x350] sm:$0xff]  ;;  %v8533_v1 = vmul.f32 -1.442695, %v243_v55 }
  0xef   : > { %v9853_v2 = vpop.eup %9852  ;;  %7384 = vst [vmem:[%s13858_s17 + $0x270] sm:$0xff] %v9851_v62  ;;  %9872 = vrcp.f32 %v4323_v59  ;;  %v245_v62 = vld [vmem:[%s13832_s30 + $0x358] sm:$0xff]  ;;  %v8534_v4 = vmul.f32 -1.442695, %v244_v58 }
  0xf0   : > { %v9855_v5 = vpop.eup %9854  ;;  %7385 = vst [vmem:[%s13858_s17 + $0x278] sm:$0xff] %v9853_v2  ;;  %9874 = vrcp.f32 %v4324_v63  ;;  %v246_v2 = vld [vmem:[%s13832_s30 + $0x360] sm:$0xff]  ;;  %v8535_v7 = vmul.f32 -1.442695, %v245_v62 }
  0xf1   : > { %v9857_v8 = vpop.eup %9856  ;;  %7386 = vst [vmem:[%s13858_s17 + $0x280] sm:$0xff] %v9855_v5  ;;  %9876 = vpow2.f32 %v8519_v60  ;;  %v247_v5 = vld [vmem:[%s13832_s30 + $0x368] sm:$0xff]  ;;  %v8536_v10 = vmul.f32 -1.442695, %v246_v2 }
  0xf2   : > { %v9859_v11 = vpop.eup %9858  ;;  %7387 = vst [vmem:[%s13858_s17 + $0x288] sm:$0xff] %v9857_v8  ;;  %9878 = vpow2.f32 %v8520_v0  ;;  %v248_v8 = vld [vmem:[%s13832_s30 + $0x370] sm:$0xff]  ;;  %v8537_v13 = vmul.f32 -1.442695, %v247_v5 }
  0xf3   : > { %v9861_v14 = vpop.eup %9860  ;;  %7388 = vst [vmem:[%s13858_s17 + $0x290] sm:$0xff] %v9859_v11  ;;  %9880 = vpow2.f32 %v8521_v3  ;;  %v249_v11 = vld [vmem:[%s13832_s30 + $0x378] sm:$0xff]  ;;  %v8538_v16 = vmul.f32 -1.442695, %v248_v8 }
  0xf4   : > { %v9863_v17 = vpop.eup %9862  ;;  %7389 = vst [vmem:[%s13858_s17 + $0x298] sm:$0xff] %v9861_v14  ;;  %9882 = vpow2.f32 %v8522_v6  ;;  %v250_v14 = vld [vmem:[%s13832_s30 + $0x380] sm:$0xff]  ;;  %v8539_v19 = vmul.f32 -1.442695, %v249_v11 }
  0xf5   : > { %v9865_v20 = vpop.eup %9864  ;;  %7390 = vst [vmem:[%s13858_s17 + $0x2a0] sm:$0xff] %v9863_v17  ;;  %9884 = vpow2.f32 %v8523_v9  ;;  %v251_v17 = vld [vmem:[%s13832_s30 + $0x388] sm:$0xff]  ;;  %v8540_v22 = vmul.f32 -1.442695, %v250_v14 }
  0xf6   : > { %v9867_v23 = vpop.eup %9866  ;;  %7391 = vst [vmem:[%s13858_s17 + $0x2a8] sm:$0xff] %v9865_v20  ;;  %9886 = vpow2.f32 %v8524_v12  ;;  %v252_v20 = vld [vmem:[%s13832_s30 + $0x390] sm:$0xff]  ;;  %v8541_v25 = vmul.f32 -1.442695, %v251_v17 }
  0xf7   : > { %v9869_v26 = vpop.eup %9868  ;;  %7392 = vst [vmem:[%s13858_s17 + $0x2b0] sm:$0xff] %v9867_v23  ;;  %9888 = vpow2.f32 %v8525_v15  ;;  %v253_v23 = vld [vmem:[%s13832_s30 + $0x398] sm:$0xff] }
  0xf8   : > { %v9871_v28 = vpop.eup %9870  ;;  %7393 = vst [vmem:[%s13858_s17 + $0x2b8] sm:$0xff] %v9869_v26  ;;  %9890 = vpow2.f32 %v8526_v18  ;;  %v254_v26 = vld [vmem:[%s13832_s30 + $0x3a0] sm:$0xff] }
  0xf9   : > { %v9873_v30 = vpop.eup %9872  ;;  %7394 = vst [vmem:[%s13858_s17 + $0x2c0] sm:$0xff] %v9871_v28  ;;  %9892 = vpow2.f32 %v8527_v21  ;;  %v8542_v28 = vmul.f32 -1.442695, %v252_v20 }
  0xfa   : > { %v9875_v32 = vpop.eup %9874  ;;  %7395 = vst [vmem:[%s13858_s17 + $0x2c8] sm:$0xff] %v9873_v30  ;;  %9894 = vpow2.f32 %v8528_v24  ;;  %v8543_v30 = vmul.f32 -1.442695, %v253_v23 }
  0xfb   : > { %v9877_v33 = vpop.eup %9876  ;;  %7396 = vst [vmem:[%s13858_s17 + $0x2d0] sm:$0xff] %v9875_v32  ;;  %9896 = vpow2.f32 %v8529_v27  ;;  %v8544_v32 = vmul.f32 -1.442695, %v254_v26 }
  0xfc   : > { %v9879_v34 = vpop.eup %9878  ;;  %v4325_v35 = vadd.f32 1.0, %v9877_v33  ;;  %9898 = vpow2.f32 %v8530_v29 }
  0xfd   : > { %v9881_v36 = vpop.eup %9880  ;;  %v4326_v37 = vadd.f32 1.0, %v9879_v34  ;;  %9900 = vpow2.f32 %v8531_v31 }
  0xfe   : > { %v9883_v38 = vpop.eup %9882  ;;  %9902 = vrcp.f32 %v4325_v35  ;;  %v4327_v39 = vadd.f32 1.0, %v9881_v36 }
  0xff   : > { %v9885_v40 = vpop.eup %9884  ;;  %9904 = vrcp.f32 %v4326_v37  ;;  %v4328_v41 = vadd.f32 1.0, %v9883_v38 }
 0x100   : > { %v9887_v42 = vpop.eup %9886  ;;  %9906 = vrcp.f32 %v4327_v39  ;;  %v4329_v43 = vadd.f32 1.0, %v9885_v40 }
 0x101   : > { %v9889_v44 = vpop.eup %9888  ;;  %9908 = vrcp.f32 %v4328_v41  ;;  %v4330_v45 = vadd.f32 1.0, %v9887_v42 }
 0x102   : > { %v9891_v46 = vpop.eup %9890  ;;  %9910 = vrcp.f32 %v4329_v43  ;;  %v4331_v47 = vadd.f32 1.0, %v9889_v44 }
 0x103   : > { %v9893_v48 = vpop.eup %9892  ;;  %9912 = vrcp.f32 %v4330_v45  ;;  %v4332_v49 = vadd.f32 1.0, %v9891_v46 }
 0x104   : > { %v9895_v50 = vpop.eup %9894  ;;  %9914 = vrcp.f32 %v4331_v47  ;;  %v4333_v51 = vadd.f32 1.0, %v9893_v48 }
 0x105   : > { %v9897_v53 = vpop.eup %9896  ;;  %9916 = vrcp.f32 %v4332_v49  ;;  %v4334_v54 = vadd.f32 1.0, %v9895_v50 }
 0x106   : > { %v9899_v56 = vpop.eup %9898  ;;  %9918 = vrcp.f32 %v4333_v51  ;;  %v4335_v57 = vadd.f32 1.0, %v9897_v53  ;;  %v255_v53 = vld [vmem:[%s13832_s30 + $0x3a8] sm:$0xff] }
 0x107   : > { %v9901_v59 = vpop.eup %9900  ;;  %9920 = vrcp.f32 %v4334_v54  ;;  %v4336_v60 = vadd.f32 1.0, %v9899_v56  ;;  %v256_v56 = vld [vmem:[%s13832_s30 + $0x3b0] sm:$0xff]  ;;  %v8545_v62 = vmul.f32 -1.442695, %v255_v53 }
 0x108   : > { %v9903_v63 = vpop.eup %9902  ;;  %9922 = vrcp.f32 %v4335_v57  ;;  %v4337_v0 = vadd.f32 1.0, %v9901_v59  ;;  %v257_v59 = vld [vmem:[%s13832_s30 + $0x3b8] sm:$0xff]  ;;  %v8546_v2 = vmul.f32 -1.442695, %v256_v56 }
 0x109   : > { %v9905_v3 = vpop.eup %9904  ;;  %7397 = vst [vmem:[%s13858_s17 + $0x2d8] sm:$0xff] %v9903_v63  ;;  %9924 = vrcp.f32 %v4336_v60  ;;  %v258_v63 = vld [vmem:[%s13832_s30 + $0x3c0] sm:$0xff]  ;;  %v8547_v5 = vmul.f32 -1.442695, %v257_v59 }
 0x10a   : > { %v9907_v6 = vpop.eup %9906  ;;  %7398 = vst [vmem:[%s13858_s17 + $0x2e0] sm:$0xff] %v9905_v3  ;;  %9926 = vrcp.f32 %v4337_v0  ;;  %v259_v3 = vld [vmem:[%s13832_s30 + $0x3c8] sm:$0xff]  ;;  %v8548_v8 = vmul.f32 -1.442695, %v258_v63 }
 0x10b   : > { %v9909_v9 = vpop.eup %9908  ;;  %7399 = vst [vmem:[%s13858_s17 + $0x2e8] sm:$0xff] %v9907_v6  ;;  %9928 = vpow2.f32 %v8532_v61  ;;  %v260_v6 = vld [vmem:[%s13832_s30 + $0x3d0] sm:$0xff]  ;;  %v8549_v11 = vmul.f32 -1.442695, %v259_v3 }
 0x10c   : > { %v9911_v12 = vpop.eup %9910  ;;  %7400 = vst [vmem:[%s13858_s17 + $0x2f0] sm:$0xff] %v9909_v9  ;;  %9930 = vpow2.f32 %v8533_v1  ;;  %v261_v9 = vld [vmem:[%s13832_s30 + $0x3d8] sm:$0xff]  ;;  %v8550_v14 = vmul.f32 -1.442695, %v260_v6 }
 0x10d   : > { %v9913_v15 = vpop.eup %9912  ;;  %7401 = vst [vmem:[%s13858_s17 + $0x2f8] sm:$0xff] %v9911_v12  ;;  %9932 = vpow2.f32 %v8534_v4  ;;  %v262_v12 = vld [vmem:[%s13832_s30 + $0x3e0] sm:$0xff]  ;;  %v8551_v17 = vmul.f32 -1.442695, %v261_v9 }
 0x10e   : > { %v9915_v18 = vpop.eup %9914  ;;  %7402 = vst [vmem:[%s13858_s17 + $0x300] sm:$0xff] %v9913_v15  ;;  %9934 = vpow2.f32 %v8535_v7  ;;  %v263_v15 = vld [vmem:[%s13832_s30 + $0x3e8] sm:$0xff]  ;;  %v8552_v20 = vmul.f32 -1.442695, %v262_v12 }
 0x10f   : > { %v9917_v21 = vpop.eup %9916  ;;  %7403 = vst [vmem:[%s13858_s17 + $0x308] sm:$0xff] %v9915_v18  ;;  %9936 = vpow2.f32 %v8536_v10  ;;  %v264_v18 = vld [vmem:[%s13832_s30 + $0x3f0] sm:$0xff]  ;;  %v8553_v23 = vmul.f32 -1.442695, %v263_v15 }
 0x110   : > { %v9919_v24 = vpop.eup %9918  ;;  %7404 = vst [vmem:[%s13858_s17 + $0x310] sm:$0xff] %v9917_v21  ;;  %9938 = vpow2.f32 %v8537_v13  ;;  %v265_v21 = vld [vmem:[%s13832_s30 + $0x3f8] sm:$0xff]  ;;  %v8554_v26 = vmul.f32 -1.442695, %v264_v18 }
 0x111   : > { %v9921_v27 = vpop.eup %9920  ;;  %7405 = vst [vmem:[%s13858_s17 + $0x318] sm:$0xff] %v9919_v24  ;;  %9940 = vpow2.f32 %v8538_v16  ;;  %v266_v24 = vld [vmem:[%s13832_s30 + $0x400] sm:$0xff] }
 0x112   : > { %v9923_v29 = vpop.eup %9922  ;;  %7406 = vst [vmem:[%s13858_s17 + $0x320] sm:$0xff] %v9921_v27  ;;  %9942 = vpow2.f32 %v8539_v19  ;;  %v267_v27 = vld [vmem:[%s13832_s30 + $0x408] sm:$0xff] }
 0x113   : > { %v9925_v31 = vpop.eup %9924  ;;  %7407 = vst [vmem:[%s13858_s17 + $0x328] sm:$0xff] %v9923_v29  ;;  %9944 = vpow2.f32 %v8540_v22  ;;  %v8555_v29 = vmul.f32 -1.442695, %v265_v21 }
 0x114   : > { %v9927_v33 = vpop.eup %9926  ;;  %7408 = vst [vmem:[%s13858_s17 + $0x330] sm:$0xff] %v9925_v31  ;;  %9946 = vpow2.f32 %v8541_v25  ;;  %v8556_v31 = vmul.f32 -1.442695, %v266_v24 }
 0x115   : > { %v9929_v34 = vpop.eup %9928  ;;  %7409 = vst [vmem:[%s13858_s17 + $0x338] sm:$0xff] %v9927_v33  ;;  %9948 = vpow2.f32 %v8542_v28  ;;  %v8557_v33 = vmul.f32 -1.442695, %v267_v27 }
 0x116   : > { %v9931_v35 = vpop.eup %9930  ;;  %v4338_v36 = vadd.f32 1.0, %v9929_v34  ;;  %9950 = vpow2.f32 %v8543_v30 }
 0x117   : > { %v9933_v37 = vpop.eup %9932  ;;  %v4339_v38 = vadd.f32 1.0, %v9931_v35  ;;  %9952 = vpow2.f32 %v8544_v32 }
 0x118   : > { %v9935_v39 = vpop.eup %9934  ;;  %9954 = vrcp.f32 %v4338_v36  ;;  %v4340_v40 = vadd.f32 1.0, %v9933_v37 }
 0x119   : > { %v9937_v41 = vpop.eup %9936  ;;  %9956 = vrcp.f32 %v4339_v38  ;;  %v4341_v42 = vadd.f32 1.0, %v9935_v39 }
 0x11a   : > { %v9939_v43 = vpop.eup %9938  ;;  %9958 = vrcp.f32 %v4340_v40  ;;  %v4342_v44 = vadd.f32 1.0, %v9937_v41 }
 0x11b   : > { %v9941_v45 = vpop.eup %9940  ;;  %9960 = vrcp.f32 %v4341_v42  ;;  %v4343_v46 = vadd.f32 1.0, %v9939_v43 }
 0x11c   : > { %v9943_v47 = vpop.eup %9942  ;;  %9962 = vrcp.f32 %v4342_v44  ;;  %v4344_v48 = vadd.f32 1.0, %v9941_v45 }
 0x11d   : > { %v9945_v49 = vpop.eup %9944  ;;  %9964 = vrcp.f32 %v4343_v46  ;;  %v4345_v50 = vadd.f32 1.0, %v9943_v47 }
 0x11e   : > { %v9947_v51 = vpop.eup %9946  ;;  %9966 = vrcp.f32 %v4344_v48  ;;  %v4346_v52 = vadd.f32 1.0, %v9945_v49 }
 0x11f   : > { %v9949_v54 = vpop.eup %9948  ;;  %9968 = vrcp.f32 %v4345_v50  ;;  %v4347_v55 = vadd.f32 1.0, %v9947_v51 }
 0x120   : > { %v9951_v57 = vpop.eup %9950  ;;  %9970 = vrcp.f32 %v4346_v52  ;;  %v4348_v58 = vadd.f32 1.0, %v9949_v54  ;;  %v268_v54 = vld [vmem:[%s13832_s30 + $0x410] sm:$0xff] }
 0x121   : > { %v9953_v60 = vpop.eup %9952  ;;  %9972 = vrcp.f32 %v4347_v55  ;;  %v4349_v61 = vadd.f32 1.0, %v9951_v57  ;;  %v269_v57 = vld [vmem:[%s13832_s30 + $0x418] sm:$0xff]  ;;  %v8558_v63 = vmul.f32 -1.442695, %v268_v54 }
 0x122   : > { %v9955_v0 = vpop.eup %9954  ;;  %9974 = vrcp.f32 %v4348_v58  ;;  %v4350_v1 = vadd.f32 1.0, %v9953_v60  ;;  %v270_v60 = vld [vmem:[%s13832_s30 + $0x420] sm:$0xff]  ;;  %v8559_v3 = vmul.f32 -1.442695, %v269_v57 }
 0x123   : > { %v9957_v4 = vpop.eup %9956  ;;  %7410 = vst [vmem:[%s13858_s17 + $0x340] sm:$0xff] %v9955_v0  ;;  %9976 = vrcp.f32 %v4349_v61  ;;  %v271_v0 = vld [vmem:[%s13832_s30 + $0x428] sm:$0xff]  ;;  %v8560_v6 = vmul.f32 -1.442695, %v270_v60 }
 0x124   : > { %v9959_v7 = vpop.eup %9958  ;;  %7411 = vst [vmem:[%s13858_s17 + $0x348] sm:$0xff] %v9957_v4  ;;  %9978 = vrcp.f32 %v4350_v1  ;;  %v272_v4 = vld [vmem:[%s13832_s30 + $0x430] sm:$0xff]  ;;  %v8561_v9 = vmul.f32 -1.442695, %v271_v0 }
 0x125   : > { %v9961_v10 = vpop.eup %9960  ;;  %7412 = vst [vmem:[%s13858_s17 + $0x350] sm:$0xff] %v9959_v7  ;;  %9980 = vpow2.f32 %v8545_v62  ;;  %v273_v7 = vld [vmem:[%s13832_s30 + $0x438] sm:$0xff]  ;;  %v8562_v12 = vmul.f32 -1.442695, %v272_v4 }
 0x126   : > { %v9963_v13 = vpop.eup %9962  ;;  %7413 = vst [vmem:[%s13858_s17 + $0x358] sm:$0xff] %v9961_v10  ;;  %9982 = vpow2.f32 %v8546_v2  ;;  %v274_v10 = vld [vmem:[%s13832_s30 + $0x440] sm:$0xff]  ;;  %v8563_v15 = vmul.f32 -1.442695, %v273_v7 }
 0x127   : > { %v9965_v16 = vpop.eup %9964  ;;  %7414 = vst [vmem:[%s13858_s17 + $0x360] sm:$0xff] %v9963_v13  ;;  %9984 = vpow2.f32 %v8547_v5  ;;  %v275_v13 = vld [vmem:[%s13832_s30 + $0x448] sm:$0xff]  ;;  %v8564_v18 = vmul.f32 -1.442695, %v274_v10 }
 0x128   : > { %v9967_v19 = vpop.eup %9966  ;;  %7415 = vst [vmem:[%s13858_s17 + $0x368] sm:$0xff] %v9965_v16  ;;  %9986 = vpow2.f32 %v8548_v8  ;;  %v276_v16 = vld [vmem:[%s13832_s30 + $0x450] sm:$0xff]  ;;  %v8565_v21 = vmul.f32 -1.442695, %v275_v13 }
 0x129   : > { %v9969_v22 = vpop.eup %9968  ;;  %7416 = vst [vmem:[%s13858_s17 + $0x370] sm:$0xff] %v9967_v19  ;;  %9988 = vpow2.f32 %v8549_v11  ;;  %v277_v19 = vld [vmem:[%s13832_s30 + $0x458] sm:$0xff]  ;;  %v8566_v24 = vmul.f32 -1.442695, %v276_v16 }
 0x12a   : > { %v9971_v25 = vpop.eup %9970  ;;  %7417 = vst [vmem:[%s13858_s17 + $0x378] sm:$0xff] %v9969_v22  ;;  %9990 = vpow2.f32 %v8550_v14  ;;  %v278_v22 = vld [vmem:[%s13832_s30 + $0x460] sm:$0xff]  ;;  %v8567_v27 = vmul.f32 -1.442695, %v277_v19 }
 0x12b   : > { %v9973_v28 = vpop.eup %9972  ;;  %7418 = vst [vmem:[%s13858_s17 + $0x380] sm:$0xff] %v9971_v25  ;;  %9992 = vpow2.f32 %v8551_v17  ;;  %v279_v25 = vld [vmem:[%s13832_s30 + $0x468] sm:$0xff] }
 0x12c   : > { %v9975_v30 = vpop.eup %9974  ;;  %7419 = vst [vmem:[%s13858_s17 + $0x388] sm:$0xff] %v9973_v28  ;;  %9994 = vpow2.f32 %v8552_v20  ;;  %v280_v28 = vld [vmem:[%s13832_s30 + $0x470] sm:$0xff] }
 0x12d   : > { %v9977_v32 = vpop.eup %9976  ;;  %7420 = vst [vmem:[%s13858_s17 + $0x390] sm:$0xff] %v9975_v30  ;;  %9996 = vpow2.f32 %v8553_v23  ;;  %v8568_v30 = vmul.f32 -1.442695, %v278_v22 }
 0x12e   : > { %v9979_v34 = vpop.eup %9978  ;;  %7421 = vst [vmem:[%s13858_s17 + $0x398] sm:$0xff] %v9977_v32  ;;  %9998 = vpow2.f32 %v8554_v26  ;;  %v8569_v32 = vmul.f32 -1.442695, %v279_v25 }
 0x12f   : > { %v9981_v35 = vpop.eup %9980  ;;  %7422 = vst [vmem:[%s13858_s17 + $0x3a0] sm:$0xff] %v9979_v34  ;;  %10000 = vpow2.f32 %v8555_v29  ;;  %v8570_v34 = vmul.f32 -1.442695, %v280_v28 }
 0x130   : > { %v9983_v36 = vpop.eup %9982  ;;  %v4351_v37 = vadd.f32 1.0, %v9981_v35  ;;  %10002 = vpow2.f32 %v8556_v31 }
 0x131   : > { %v9985_v38 = vpop.eup %9984  ;;  %v4352_v39 = vadd.f32 1.0, %v9983_v36  ;;  %10004 = vpow2.f32 %v8557_v33 }
 0x132   : > { %v9987_v40 = vpop.eup %9986  ;;  %10006 = vrcp.f32 %v4351_v37  ;;  %v4353_v41 = vadd.f32 1.0, %v9985_v38 }
 0x133   : > { %v9989_v42 = vpop.eup %9988  ;;  %10008 = vrcp.f32 %v4352_v39  ;;  %v4354_v43 = vadd.f32 1.0, %v9987_v40 }
 0x134   : > { %v9991_v44 = vpop.eup %9990  ;;  %10010 = vrcp.f32 %v4353_v41  ;;  %v4355_v45 = vadd.f32 1.0, %v9989_v42 }
 0x135   : > { %v9993_v46 = vpop.eup %9992  ;;  %10012 = vrcp.f32 %v4354_v43  ;;  %v4356_v47 = vadd.f32 1.0, %v9991_v44 }
 0x136   : > { %v9995_v48 = vpop.eup %9994  ;;  %10014 = vrcp.f32 %v4355_v45  ;;  %v4357_v49 = vadd.f32 1.0, %v9993_v46 }
 0x137   : > { %v9997_v50 = vpop.eup %9996  ;;  %10016 = vrcp.f32 %v4356_v47  ;;  %v4358_v51 = vadd.f32 1.0, %v9995_v48 }
 0x138   : > { %v9999_v52 = vpop.eup %9998  ;;  %10018 = vrcp.f32 %v4357_v49  ;;  %v4359_v53 = vadd.f32 1.0, %v9997_v50 }
 0x139   : > { %v10001_v55 = vpop.eup %10000  ;;  %10020 = vrcp.f32 %v4358_v51  ;;  %v4360_v56 = vadd.f32 1.0, %v9999_v52 }
 0x13a   : > { %v10003_v58 = vpop.eup %10002  ;;  %10022 = vrcp.f32 %v4359_v53  ;;  %v4361_v59 = vadd.f32 1.0, %v10001_v55  ;;  %v281_v55 = vld [vmem:[%s13832_s30 + $0x478] sm:$0xff] }
 0x13b   : > { %v10005_v61 = vpop.eup %10004  ;;  %10024 = vrcp.f32 %v4360_v56  ;;  %v4362_v62 = vadd.f32 1.0, %v10003_v58  ;;  %v282_v58 = vld [vmem:[%s13832_s30 + $0x480] sm:$0xff]  ;;  %v8571_v0 = vmul.f32 -1.442695, %v281_v55 }
 0x13c   : > { %v10007_v1 = vpop.eup %10006  ;;  %10026 = vrcp.f32 %v4361_v59  ;;  %v4363_v2 = vadd.f32 1.0, %v10005_v61  ;;  %v283_v61 = vld [vmem:[%s13832_s30 + $0x488] sm:$0xff]  ;;  %v8572_v4 = vmul.f32 -1.442695, %v282_v58 }
 0x13d   : > { %v10009_v5 = vpop.eup %10008  ;;  %7423 = vst [vmem:[%s13858_s17 + $0x3a8] sm:$0xff] %v10007_v1  ;;  %10028 = vrcp.f32 %v4362_v62  ;;  %v284_v1 = vld [vmem:[%s13832_s30 + $0x490] sm:$0xff]  ;;  %v8573_v7 = vmul.f32 -1.442695, %v283_v61 }
 0x13e   : > { %v10011_v8 = vpop.eup %10010  ;;  %7424 = vst [vmem:[%s13858_s17 + $0x3b0] sm:$0xff] %v10009_v5  ;;  %10030 = vrcp.f32 %v4363_v2  ;;  %v285_v5 = vld [vmem:[%s13832_s30 + $0x498] sm:$0xff]  ;;  %v8574_v10 = vmul.f32 -1.442695, %v284_v1 }
 0x13f   : > { %v10013_v11 = vpop.eup %10012  ;;  %7425 = vst [vmem:[%s13858_s17 + $0x3b8] sm:$0xff] %v10011_v8  ;;  %10032 = vpow2.f32 %v8558_v63  ;;  %v286_v8 = vld [vmem:[%s13832_s30 + $0x4a0] sm:$0xff]  ;;  %v8575_v13 = vmul.f32 -1.442695, %v285_v5 }
 0x140   : > { %v10015_v14 = vpop.eup %10014  ;;  %7426 = vst [vmem:[%s13858_s17 + $0x3c0] sm:$0xff] %v10013_v11  ;;  %10034 = vpow2.f32 %v8559_v3  ;;  %v287_v11 = vld [vmem:[%s13832_s30 + $0x4a8] sm:$0xff]  ;;  %v8576_v16 = vmul.f32 -1.442695, %v286_v8 }
 0x141   : > { %v10017_v17 = vpop.eup %10016  ;;  %7427 = vst [vmem:[%s13858_s17 + $0x3c8] sm:$0xff] %v10015_v14  ;;  %10036 = vpow2.f32 %v8560_v6  ;;  %v288_v14 = vld [vmem:[%s13832_s30 + $0x4b0] sm:$0xff]  ;;  %v8577_v19 = vmul.f32 -1.442695, %v287_v11 }
 0x142   : > { %v10019_v20 = vpop.eup %10018  ;;  %7428 = vst [vmem:[%s13858_s17 + $0x3d0] sm:$0xff] %v10017_v17  ;;  %10038 = vpow2.f32 %v8561_v9  ;;  %v289_v17 = vld [vmem:[%s13832_s30 + $0x4b8] sm:$0xff]  ;;  %v8578_v22 = vmul.f32 -1.442695, %v288_v14 }
 0x143   : > { %v10021_v23 = vpop.eup %10020  ;;  %7429 = vst [vmem:[%s13858_s17 + $0x3d8] sm:$0xff] %v10019_v20  ;;  %10040 = vpow2.f32 %v8562_v12  ;;  %v290_v20 = vld [vmem:[%s13832_s30 + $0x4c0] sm:$0xff]  ;;  %v8579_v25 = vmul.f32 -1.442695, %v289_v17 }
 0x144   : > { %v10023_v26 = vpop.eup %10022  ;;  %7430 = vst [vmem:[%s13858_s17 + $0x3e0] sm:$0xff] %v10021_v23  ;;  %10042 = vpow2.f32 %v8563_v15  ;;  %v291_v23 = vld [vmem:[%s13832_s30 + $0x4c8] sm:$0xff]  ;;  %v8580_v28 = vmul.f32 -1.442695, %v290_v20 }
 0x145   : > { %v10025_v29 = vpop.eup %10024  ;;  %7431 = vst [vmem:[%s13858_s17 + $0x3e8] sm:$0xff] %v10023_v26  ;;  %10044 = vpow2.f32 %v8564_v18  ;;  %v292_v26 = vld [vmem:[%s13832_s30 + $0x4d0] sm:$0xff] }
 0x146   : > { %v10027_v31 = vpop.eup %10026  ;;  %7432 = vst [vmem:[%s13858_s17 + $0x3f0] sm:$0xff] %v10025_v29  ;;  %10046 = vpow2.f32 %v8565_v21  ;;  %v293_v29 = vld [vmem:[%s13832_s30 + $0x4d8] sm:$0xff] }
 0x147   : > { %v10029_v33 = vpop.eup %10028  ;;  %7433 = vst [vmem:[%s13858_s17 + $0x3f8] sm:$0xff] %v10027_v31  ;;  %10048 = vpow2.f32 %v8566_v24  ;;  %v8581_v31 = vmul.f32 -1.442695, %v291_v23 }
 0x148   : > { %v10031_v35 = vpop.eup %10030  ;;  %7434 = vst [vmem:[%s13858_s17 + $0x400] sm:$0xff] %v10029_v33  ;;  %10050 = vpow2.f32 %v8567_v27  ;;  %v8582_v33 = vmul.f32 -1.442695, %v292_v26 }
 0x149   : > { %v10033_v36 = vpop.eup %10032  ;;  %7435 = vst [vmem:[%s13858_s17 + $0x408] sm:$0xff] %v10031_v35  ;;  %10052 = vpow2.f32 %v8568_v30  ;;  %v8583_v35 = vmul.f32 -1.442695, %v293_v29 }
 0x14a   : > { %v10035_v37 = vpop.eup %10034  ;;  %v4364_v38 = vadd.f32 1.0, %v10033_v36  ;;  %10054 = vpow2.f32 %v8569_v32 }
 0x14b   : > { %v10037_v39 = vpop.eup %10036  ;;  %v4365_v40 = vadd.f32 1.0, %v10035_v37  ;;  %10056 = vpow2.f32 %v8570_v34 }
 0x14c   : > { %v10039_v41 = vpop.eup %10038  ;;  %10058 = vrcp.f32 %v4364_v38  ;;  %v4366_v42 = vadd.f32 1.0, %v10037_v39 }
 0x14d   : > { %v10041_v43 = vpop.eup %10040  ;;  %10060 = vrcp.f32 %v4365_v40  ;;  %v4367_v44 = vadd.f32 1.0, %v10039_v41 }
 0x14e   : > { %v10043_v45 = vpop.eup %10042  ;;  %10062 = vrcp.f32 %v4366_v42  ;;  %v4368_v46 = vadd.f32 1.0, %v10041_v43 }
 0x14f   : > { %v10045_v47 = vpop.eup %10044  ;;  %10064 = vrcp.f32 %v4367_v44  ;;  %v4369_v48 = vadd.f32 1.0, %v10043_v45 }
 0x150   : > { %v10047_v49 = vpop.eup %10046  ;;  %10066 = vrcp.f32 %v4368_v46  ;;  %v4370_v50 = vadd.f32 1.0, %v10045_v47 }
 0x151   : > { %v10049_v51 = vpop.eup %10048  ;;  %10068 = vrcp.f32 %v4369_v48  ;;  %v4371_v52 = vadd.f32 1.0, %v10047_v49 }
 0x152   : > { %v10051_v53 = vpop.eup %10050  ;;  %10070 = vrcp.f32 %v4370_v50  ;;  %v4372_v54 = vadd.f32 1.0, %v10049_v51 }
 0x153   : > { %v10053_v56 = vpop.eup %10052  ;;  %10072 = vrcp.f32 %v4371_v52  ;;  %v4373_v57 = vadd.f32 1.0, %v10051_v53 }
 0x154   : > { %v10055_v59 = vpop.eup %10054  ;;  %10074 = vrcp.f32 %v4372_v54  ;;  %v4374_v60 = vadd.f32 1.0, %v10053_v56  ;;  %v294_v56 = vld [vmem:[%s13832_s30 + $0x4e0] sm:$0xff] }
 0x155   : > { %v10057_v62 = vpop.eup %10056  ;;  %10076 = vrcp.f32 %v4373_v57  ;;  %v4375_v63 = vadd.f32 1.0, %v10055_v59  ;;  %v295_v59 = vld [vmem:[%s13832_s30 + $0x4e8] sm:$0xff]  ;;  %v8584_v1 = vmul.f32 -1.442695, %v294_v56 }
 0x156   : > { %v10059_v2 = vpop.eup %10058  ;;  %10078 = vrcp.f32 %v4374_v60  ;;  %v4376_v3 = vadd.f32 1.0, %v10057_v62  ;;  %v296_v62 = vld [vmem:[%s13832_s30 + $0x4f0] sm:$0xff]  ;;  %v8585_v5 = vmul.f32 -1.442695, %v295_v59 }
 0x157   : > { %v10061_v6 = vpop.eup %10060  ;;  %7436 = vst [vmem:[%s13858_s17 + $0x410] sm:$0xff] %v10059_v2  ;;  %10080 = vrcp.f32 %v4375_v63  ;;  %v297_v2 = vld [vmem:[%s13832_s30 + $0x4f8] sm:$0xff]  ;;  %v8586_v8 = vmul.f32 -1.442695, %v296_v62 }
 0x158   : > { %v10063_v9 = vpop.eup %10062  ;;  %7437 = vst [vmem:[%s13858_s17 + $0x418] sm:$0xff] %v10061_v6  ;;  %10082 = vrcp.f32 %v4376_v3  ;;  %v298_v6 = vld [vmem:[%s13832_s30 + $0x500] sm:$0xff]  ;;  %v8587_v11 = vmul.f32 -1.442695, %v297_v2 }
 0x159   : > { %v10065_v12 = vpop.eup %10064  ;;  %7438 = vst [vmem:[%s13858_s17 + $0x420] sm:$0xff] %v10063_v9  ;;  %10084 = vpow2.f32 %v8571_v0  ;;  %v299_v9 = vld [vmem:[%s13832_s30 + $0x508] sm:$0xff]  ;;  %v8588_v14 = vmul.f32 -1.442695, %v298_v6 }
 0x15a   : > { %v10067_v15 = vpop.eup %10066  ;;  %7439 = vst [vmem:[%s13858_s17 + $0x428] sm:$0xff] %v10065_v12  ;;  %10086 = vpow2.f32 %v8572_v4  ;;  %v300_v12 = vld [vmem:[%s13832_s30 + $0x510] sm:$0xff]  ;;  %v8589_v17 = vmul.f32 -1.442695, %v299_v9 }
 0x15b   : > { %v10069_v18 = vpop.eup %10068  ;;  %7440 = vst [vmem:[%s13858_s17 + $0x430] sm:$0xff] %v10067_v15  ;;  %10088 = vpow2.f32 %v8573_v7  ;;  %v301_v15 = vld [vmem:[%s13832_s30 + $0x518] sm:$0xff]  ;;  %v8590_v20 = vmul.f32 -1.442695, %v300_v12 }
 0x15c   : > { %v10071_v21 = vpop.eup %10070  ;;  %7441 = vst [vmem:[%s13858_s17 + $0x438] sm:$0xff] %v10069_v18  ;;  %10090 = vpow2.f32 %v8574_v10  ;;  %v302_v18 = vld [vmem:[%s13832_s30 + $0x520] sm:$0xff]  ;;  %v8591_v23 = vmul.f32 -1.442695, %v301_v15 }
 0x15d   : > { %v10073_v24 = vpop.eup %10072  ;;  %7442 = vst [vmem:[%s13858_s17 + $0x440] sm:$0xff] %v10071_v21  ;;  %10092 = vpow2.f32 %v8575_v13  ;;  %v303_v21 = vld [vmem:[%s13832_s30 + $0x528] sm:$0xff]  ;;  %v8592_v26 = vmul.f32 -1.442695, %v302_v18 }
 0x15e   : > { %v10075_v27 = vpop.eup %10074  ;;  %7443 = vst [vmem:[%s13858_s17 + $0x448] sm:$0xff] %v10073_v24  ;;  %10094 = vpow2.f32 %v8576_v16  ;;  %v304_v24 = vld [vmem:[%s13832_s30 + $0x530] sm:$0xff]  ;;  %v8593_v29 = vmul.f32 -1.442695, %v303_v21 }
 0x15f   : > { %v10077_v30 = vpop.eup %10076  ;;  %7444 = vst [vmem:[%s13858_s17 + $0x450] sm:$0xff] %v10075_v27  ;;  %10096 = vpow2.f32 %v8577_v19  ;;  %v305_v27 = vld [vmem:[%s13832_s30 + $0x538] sm:$0xff] }
 0x160   : > { %v10079_v32 = vpop.eup %10078  ;;  %7445 = vst [vmem:[%s13858_s17 + $0x458] sm:$0xff] %v10077_v30  ;;  %10098 = vpow2.f32 %v8578_v22  ;;  %v306_v30 = vld [vmem:[%s13832_s30 + $0x540] sm:$0xff] }
 0x161   : > { %v10081_v34 = vpop.eup %10080  ;;  %7446 = vst [vmem:[%s13858_s17 + $0x460] sm:$0xff] %v10079_v32  ;;  %10100 = vpow2.f32 %v8579_v25  ;;  %v8594_v32 = vmul.f32 -1.442695, %v304_v24 }
 0x162   : > { %v10083_v36 = vpop.eup %10082  ;;  %7447 = vst [vmem:[%s13858_s17 + $0x468] sm:$0xff] %v10081_v34  ;;  %10102 = vpow2.f32 %v8580_v28  ;;  %v8595_v34 = vmul.f32 -1.442695, %v305_v27 }
 0x163   : > { %v10085_v37 = vpop.eup %10084  ;;  %7448 = vst [vmem:[%s13858_s17 + $0x470] sm:$0xff] %v10083_v36  ;;  %10104 = vpow2.f32 %v8581_v31  ;;  %v8596_v36 = vmul.f32 -1.442695, %v306_v30 }
 0x164   : > { %v10087_v38 = vpop.eup %10086  ;;  %v4377_v39 = vadd.f32 1.0, %v10085_v37  ;;  %10106 = vpow2.f32 %v8582_v33 }
 0x165   : > { %v10089_v40 = vpop.eup %10088  ;;  %v4378_v41 = vadd.f32 1.0, %v10087_v38  ;;  %10108 = vpow2.f32 %v8583_v35 }
 0x166   : > { %v10091_v42 = vpop.eup %10090  ;;  %10110 = vrcp.f32 %v4377_v39  ;;  %v4379_v43 = vadd.f32 1.0, %v10089_v40 }
 0x167   : > { %v10093_v44 = vpop.eup %10092  ;;  %10112 = vrcp.f32 %v4378_v41  ;;  %v4380_v45 = vadd.f32 1.0, %v10091_v42 }
 0x168   : > { %v10095_v46 = vpop.eup %10094  ;;  %10114 = vrcp.f32 %v4379_v43  ;;  %v4381_v47 = vadd.f32 1.0, %v10093_v44 }
 0x169   : > { %v10097_v48 = vpop.eup %10096  ;;  %10116 = vrcp.f32 %v4380_v45  ;;  %v4382_v49 = vadd.f32 1.0, %v10095_v46 }
 0x16a   : > { %v10099_v50 = vpop.eup %10098  ;;  %10118 = vrcp.f32 %v4381_v47  ;;  %v4383_v51 = vadd.f32 1.0, %v10097_v48 }
 0x16b   : > { %v10101_v52 = vpop.eup %10100  ;;  %10120 = vrcp.f32 %v4382_v49  ;;  %v4384_v53 = vadd.f32 1.0, %v10099_v50 }
 0x16c   : > { %v10103_v54 = vpop.eup %10102  ;;  %10122 = vrcp.f32 %v4383_v51  ;;  %v4385_v55 = vadd.f32 1.0, %v10101_v52 }
 0x16d   : > { %v10105_v57 = vpop.eup %10104  ;;  %10124 = vrcp.f32 %v4384_v53  ;;  %v4386_v58 = vadd.f32 1.0, %v10103_v54 }
 0x16e   : > { %v10107_v60 = vpop.eup %10106  ;;  %10126 = vrcp.f32 %v4385_v55  ;;  %v4387_v61 = vadd.f32 1.0, %v10105_v57  ;;  %v307_v57 = vld [vmem:[%s13832_s30 + $0x548] sm:$0xff] }
 0x16f   : > { %v10109_v63 = vpop.eup %10108  ;;  %10128 = vrcp.f32 %v4386_v58  ;;  %v4388_v0 = vadd.f32 1.0, %v10107_v60  ;;  %v308_v60 = vld [vmem:[%s13832_s30 + $0x550] sm:$0xff]  ;;  %v8597_v2 = vmul.f32 -1.442695, %v307_v57 }
 0x170   : > { %v10111_v3 = vpop.eup %10110  ;;  %10130 = vrcp.f32 %v4387_v61  ;;  %v4389_v4 = vadd.f32 1.0, %v10109_v63  ;;  %v309_v63 = vld [vmem:[%s13832_s30 + $0x558] sm:$0xff]  ;;  %v8598_v6 = vmul.f32 -1.442695, %v308_v60 }
 0x171   : > { %v10113_v7 = vpop.eup %10112  ;;  %7449 = vst [vmem:[%s13858_s17 + $0x478] sm:$0xff] %v10111_v3  ;;  %10132 = vrcp.f32 %v4388_v0  ;;  %v310_v3 = vld [vmem:[%s13832_s30 + $0x560] sm:$0xff]  ;;  %v8599_v9 = vmul.f32 -1.442695, %v309_v63 }
 0x172   : > { %v10115_v10 = vpop.eup %10114  ;;  %7450 = vst [vmem:[%s13858_s17 + $0x480] sm:$0xff] %v10113_v7  ;;  %10134 = vrcp.f32 %v4389_v4  ;;  %v311_v7 = vld [vmem:[%s13832_s30 + $0x568] sm:$0xff]  ;;  %v8600_v12 = vmul.f32 -1.442695, %v310_v3 }
 0x173   : > { %v10117_v13 = vpop.eup %10116  ;;  %7451 = vst [vmem:[%s13858_s17 + $0x488] sm:$0xff] %v10115_v10  ;;  %10136 = vpow2.f32 %v8584_v1  ;;  %v312_v10 = vld [vmem:[%s13832_s30 + $0x570] sm:$0xff]  ;;  %v8601_v15 = vmul.f32 -1.442695, %v311_v7 }
 0x174   : > { %v10119_v16 = vpop.eup %10118  ;;  %7452 = vst [vmem:[%s13858_s17 + $0x490] sm:$0xff] %v10117_v13  ;;  %10138 = vpow2.f32 %v8585_v5  ;;  %v313_v13 = vld [vmem:[%s13832_s30 + $0x578] sm:$0xff]  ;;  %v8602_v18 = vmul.f32 -1.442695, %v312_v10 }
 0x175   : > { %v10121_v19 = vpop.eup %10120  ;;  %7453 = vst [vmem:[%s13858_s17 + $0x498] sm:$0xff] %v10119_v16  ;;  %10140 = vpow2.f32 %v8586_v8  ;;  %v314_v16 = vld [vmem:[%s13832_s30 + $0x580] sm:$0xff]  ;;  %v8603_v21 = vmul.f32 -1.442695, %v313_v13 }
 0x176   : > { %v10123_v22 = vpop.eup %10122  ;;  %7454 = vst [vmem:[%s13858_s17 + $0x4a0] sm:$0xff] %v10121_v19  ;;  %10142 = vpow2.f32 %v8587_v11  ;;  %v315_v19 = vld [vmem:[%s13832_s30 + $0x588] sm:$0xff]  ;;  %v8604_v24 = vmul.f32 -1.442695, %v314_v16 }
 0x177   : > { %v10125_v25 = vpop.eup %10124  ;;  %7455 = vst [vmem:[%s13858_s17 + $0x4a8] sm:$0xff] %v10123_v22  ;;  %10144 = vpow2.f32 %v8588_v14  ;;  %v316_v22 = vld [vmem:[%s13832_s30 + $0x590] sm:$0xff]  ;;  %v8605_v27 = vmul.f32 -1.442695, %v315_v19 }
 0x178   : > { %v10127_v28 = vpop.eup %10126  ;;  %7456 = vst [vmem:[%s13858_s17 + $0x4b0] sm:$0xff] %v10125_v25  ;;  %10146 = vpow2.f32 %v8589_v17  ;;  %v317_v25 = vld [vmem:[%s13832_s30 + $0x598] sm:$0xff]  ;;  %v8606_v30 = vmul.f32 -1.442695, %v316_v22 }
 0x179   : > { %v10129_v31 = vpop.eup %10128  ;;  %7457 = vst [vmem:[%s13858_s17 + $0x4b8] sm:$0xff] %v10127_v28  ;;  %10148 = vpow2.f32 %v8590_v20  ;;  %v318_v28 = vld [vmem:[%s13832_s30 + $0x5a0] sm:$0xff] }
 0x17a   : > { %v10131_v33 = vpop.eup %10130  ;;  %7458 = vst [vmem:[%s13858_s17 + $0x4c0] sm:$0xff] %v10129_v31  ;;  %10150 = vpow2.f32 %v8591_v23  ;;  %v319_v31 = vld [vmem:[%s13832_s30 + $0x5a8] sm:$0xff] }
 0x17b   : > { %v10133_v35 = vpop.eup %10132  ;;  %7459 = vst [vmem:[%s13858_s17 + $0x4c8] sm:$0xff] %v10131_v33  ;;  %10152 = vpow2.f32 %v8592_v26  ;;  %v8607_v33 = vmul.f32 -1.442695, %v317_v25 }
 0x17c   : > { %v10135_v37 = vpop.eup %10134  ;;  %7460 = vst [vmem:[%s13858_s17 + $0x4d0] sm:$0xff] %v10133_v35  ;;  %10154 = vpow2.f32 %v8593_v29  ;;  %v8608_v35 = vmul.f32 -1.442695, %v318_v28 }
 0x17d   : > { %v10137_v38 = vpop.eup %10136  ;;  %7461 = vst [vmem:[%s13858_s17 + $0x4d8] sm:$0xff] %v10135_v37  ;;  %10156 = vpow2.f32 %v8594_v32  ;;  %v8609_v37 = vmul.f32 -1.442695, %v319_v31 }
 0x17e   : > { %v10139_v39 = vpop.eup %10138  ;;  %v4390_v40 = vadd.f32 1.0, %v10137_v38  ;;  %10158 = vpow2.f32 %v8595_v34 }
 0x17f   : > { %v10141_v41 = vpop.eup %10140  ;;  %v4391_v42 = vadd.f32 1.0, %v10139_v39  ;;  %10160 = vpow2.f32 %v8596_v36 }
 0x180   : > { %v10143_v43 = vpop.eup %10142  ;;  %10162 = vrcp.f32 %v4390_v40  ;;  %v4392_v44 = vadd.f32 1.0, %v10141_v41 }
 0x181   : > { %v10145_v45 = vpop.eup %10144  ;;  %10164 = vrcp.f32 %v4391_v42  ;;  %v4393_v46 = vadd.f32 1.0, %v10143_v43 }
 0x182   : > { %v10147_v47 = vpop.eup %10146  ;;  %10166 = vrcp.f32 %v4392_v44  ;;  %v4394_v48 = vadd.f32 1.0, %v10145_v45 }
 0x183   : > { %v10149_v49 = vpop.eup %10148  ;;  %10168 = vrcp.f32 %v4393_v46  ;;  %v4395_v50 = vadd.f32 1.0, %v10147_v47 }
 0x184   : > { %v10151_v51 = vpop.eup %10150  ;;  %10170 = vrcp.f32 %v4394_v48  ;;  %v4396_v52 = vadd.f32 1.0, %v10149_v49 }
 0x185   : > { %v10153_v53 = vpop.eup %10152  ;;  %10172 = vrcp.f32 %v4395_v50  ;;  %v4397_v54 = vadd.f32 1.0, %v10151_v51 }
 0x186   : > { %v10155_v55 = vpop.eup %10154  ;;  %10174 = vrcp.f32 %v4396_v52  ;;  %v4398_v56 = vadd.f32 1.0, %v10153_v53 }
 0x187   : > { %v10157_v58 = vpop.eup %10156  ;;  %10176 = vrcp.f32 %v4397_v54  ;;  %v4399_v59 = vadd.f32 1.0, %v10155_v55 }
 0x188   : > { %v10159_v61 = vpop.eup %10158  ;;  %10178 = vrcp.f32 %v4398_v56  ;;  %v4400_v62 = vadd.f32 1.0, %v10157_v58  ;;  %v320_v58 = vld [vmem:[%s13832_s30 + $0x5b0] sm:$0xff] }
 0x189   : > { %v10161_v0 = vpop.eup %10160  ;;  %10180 = vrcp.f32 %v4399_v59  ;;  %v4401_v1 = vadd.f32 1.0, %v10159_v61  ;;  %v321_v61 = vld [vmem:[%s13832_s30 + $0x5b8] sm:$0xff]  ;;  %v8610_v3 = vmul.f32 -1.442695, %v320_v58 }
 0x18a   : > { %v10163_v4 = vpop.eup %10162  ;;  %10182 = vrcp.f32 %v4400_v62  ;;  %v4402_v5 = vadd.f32 1.0, %v10161_v0  ;;  %v322_v0 = vld [vmem:[%s13832_s30 + $0x5c0] sm:$0xff]  ;;  %v8611_v7 = vmul.f32 -1.442695, %v321_v61 }
 0x18b   : > { %v10165_v8 = vpop.eup %10164  ;;  %7462 = vst [vmem:[%s13858_s17 + $0x4e0] sm:$0xff] %v10163_v4  ;;  %10184 = vrcp.f32 %v4401_v1  ;;  %v323_v4 = vld [vmem:[%s13832_s30 + $0x5c8] sm:$0xff]  ;;  %v8612_v10 = vmul.f32 -1.442695, %v322_v0 }
 0x18c   : > { %v10167_v11 = vpop.eup %10166  ;;  %7463 = vst [vmem:[%s13858_s17 + $0x4e8] sm:$0xff] %v10165_v8  ;;  %10186 = vrcp.f32 %v4402_v5  ;;  %v324_v8 = vld [vmem:[%s13832_s30 + $0x5d0] sm:$0xff]  ;;  %v8613_v13 = vmul.f32 -1.442695, %v323_v4 }
 0x18d   : > { %v10169_v14 = vpop.eup %10168  ;;  %7464 = vst [vmem:[%s13858_s17 + $0x4f0] sm:$0xff] %v10167_v11  ;;  %10188 = vpow2.f32 %v8597_v2  ;;  %v325_v11 = vld [vmem:[%s13832_s30 + $0x5d8] sm:$0xff]  ;;  %v8614_v16 = vmul.f32 -1.442695, %v324_v8 }
 0x18e   : > { %v10171_v17 = vpop.eup %10170  ;;  %7465 = vst [vmem:[%s13858_s17 + $0x4f8] sm:$0xff] %v10169_v14  ;;  %10190 = vpow2.f32 %v8598_v6  ;;  %v326_v14 = vld [vmem:[%s13832_s30 + $0x5e0] sm:$0xff]  ;;  %v8615_v19 = vmul.f32 -1.442695, %v325_v11 }
 0x18f   : > { %v10173_v20 = vpop.eup %10172  ;;  %7466 = vst [vmem:[%s13858_s17 + $0x500] sm:$0xff] %v10171_v17  ;;  %10192 = vpow2.f32 %v8599_v9  ;;  %v327_v17 = vld [vmem:[%s13832_s30 + $0x5e8] sm:$0xff]  ;;  %v8616_v22 = vmul.f32 -1.442695, %v326_v14 }
 0x190   : > { %v10175_v23 = vpop.eup %10174  ;;  %7467 = vst [vmem:[%s13858_s17 + $0x508] sm:$0xff] %v10173_v20  ;;  %10194 = vpow2.f32 %v8600_v12  ;;  %v328_v20 = vld [vmem:[%s13832_s30 + $0x5f0] sm:$0xff]  ;;  %v8617_v25 = vmul.f32 -1.442695, %v327_v17 }
 0x191   : > { %v10177_v26 = vpop.eup %10176  ;;  %7468 = vst [vmem:[%s13858_s17 + $0x510] sm:$0xff] %v10175_v23  ;;  %10196 = vpow2.f32 %v8601_v15  ;;  %v329_v23 = vld [vmem:[%s13832_s30 + $0x5f8] sm:$0xff]  ;;  %v8618_v28 = vmul.f32 -1.442695, %v328_v20 }
 0x192   : > { %v10179_v29 = vpop.eup %10178  ;;  %7469 = vst [vmem:[%s13858_s17 + $0x518] sm:$0xff] %v10177_v26  ;;  %10198 = vpow2.f32 %v8602_v18  ;;  %v330_v26 = vld [vmem:[%s13832_s30 + $0x600] sm:$0xff]  ;;  %v8619_v31 = vmul.f32 -1.442695, %v329_v23 }
 0x193   : > { %v10181_v32 = vpop.eup %10180  ;;  %7470 = vst [vmem:[%s13858_s17 + $0x520] sm:$0xff] %v10179_v29  ;;  %10200 = vpow2.f32 %v8603_v21  ;;  %v331_v29 = vld [vmem:[%s13832_s30 + $0x608] sm:$0xff] }
 0x194   : > { %v10183_v34 = vpop.eup %10182  ;;  %7471 = vst [vmem:[%s13858_s17 + $0x528] sm:$0xff] %v10181_v32  ;;  %10202 = vpow2.f32 %v8604_v24  ;;  %v332_v32 = vld [vmem:[%s13832_s30 + $0x610] sm:$0xff] }
 0x195   : > { %v10185_v36 = vpop.eup %10184  ;;  %7472 = vst [vmem:[%s13858_s17 + $0x530] sm:$0xff] %v10183_v34  ;;  %10204 = vpow2.f32 %v8605_v27  ;;  %v8620_v34 = vmul.f32 -1.442695, %v330_v26 }
 0x196   : > { %v10187_v38 = vpop.eup %10186  ;;  %7473 = vst [vmem:[%s13858_s17 + $0x538] sm:$0xff] %v10185_v36  ;;  %10206 = vpow2.f32 %v8606_v30  ;;  %v8621_v36 = vmul.f32 -1.442695, %v331_v29 }
 0x197   : > { %v10189_v39 = vpop.eup %10188  ;;  %7474 = vst [vmem:[%s13858_s17 + $0x540] sm:$0xff] %v10187_v38  ;;  %10208 = vpow2.f32 %v8607_v33  ;;  %v8622_v38 = vmul.f32 -1.442695, %v332_v32 }
 0x198   : > { %v10191_v40 = vpop.eup %10190  ;;  %v4403_v41 = vadd.f32 1.0, %v10189_v39  ;;  %10210 = vpow2.f32 %v8608_v35 }
 0x199   : > { %v10193_v42 = vpop.eup %10192  ;;  %v4404_v43 = vadd.f32 1.0, %v10191_v40  ;;  %10212 = vpow2.f32 %v8609_v37 }
 0x19a   : > { %v10195_v44 = vpop.eup %10194  ;;  %10214 = vrcp.f32 %v4403_v41  ;;  %v4405_v45 = vadd.f32 1.0, %v10193_v42 }
 0x19b   : > { %v10197_v46 = vpop.eup %10196  ;;  %10216 = vrcp.f32 %v4404_v43  ;;  %v4406_v47 = vadd.f32 1.0, %v10195_v44 }
 0x19c   : > { %v10199_v48 = vpop.eup %10198  ;;  %10218 = vrcp.f32 %v4405_v45  ;;  %v4407_v49 = vadd.f32 1.0, %v10197_v46 }
 0x19d   : > { %v10201_v50 = vpop.eup %10200  ;;  %10220 = vrcp.f32 %v4406_v47  ;;  %v4408_v51 = vadd.f32 1.0, %v10199_v48 }
 0x19e   : > { %v10203_v52 = vpop.eup %10202  ;;  %10222 = vrcp.f32 %v4407_v49  ;;  %v4409_v53 = vadd.f32 1.0, %v10201_v50 }
 0x19f   : > { %v10205_v54 = vpop.eup %10204  ;;  %10224 = vrcp.f32 %v4408_v51  ;;  %v4410_v55 = vadd.f32 1.0, %v10203_v52 }
 0x1a0   : > { %v10207_v56 = vpop.eup %10206  ;;  %10226 = vrcp.f32 %v4409_v53  ;;  %v4411_v57 = vadd.f32 1.0, %v10205_v54 }
 0x1a1   : > { %v10209_v59 = vpop.eup %10208  ;;  %10228 = vrcp.f32 %v4410_v55  ;;  %v4412_v60 = vadd.f32 1.0, %v10207_v56 }
 0x1a2   : > { %v10211_v62 = vpop.eup %10210  ;;  %10230 = vrcp.f32 %v4411_v57  ;;  %v4413_v63 = vadd.f32 1.0, %v10209_v59  ;;  %v333_v59 = vld [vmem:[%s13832_s30 + $0x618] sm:$0xff] }
 0x1a3   : > { %v10213_v1 = vpop.eup %10212  ;;  %10232 = vrcp.f32 %v4412_v60  ;;  %v4414_v2 = vadd.f32 1.0, %v10211_v62  ;;  %v334_v62 = vld [vmem:[%s13832_s30 + $0x620] sm:$0xff]  ;;  %v8623_v4 = vmul.f32 -1.442695, %v333_v59 }
 0x1a4   : > { %v10215_v5 = vpop.eup %10214  ;;  %10234 = vrcp.f32 %v4413_v63  ;;  %v4415_v6 = vadd.f32 1.0, %v10213_v1  ;;  %v335_v1 = vld [vmem:[%s13832_s30 + $0x628] sm:$0xff]  ;;  %v8624_v8 = vmul.f32 -1.442695, %v334_v62 }
 0x1a5   : > { %v10217_v9 = vpop.eup %10216  ;;  %7475 = vst [vmem:[%s13858_s17 + $0x548] sm:$0xff] %v10215_v5  ;;  %10236 = vrcp.f32 %v4414_v2  ;;  %v336_v5 = vld [vmem:[%s13832_s30 + $0x630] sm:$0xff]  ;;  %v8625_v11 = vmul.f32 -1.442695, %v335_v1 }
 0x1a6   : > { %v10219_v12 = vpop.eup %10218  ;;  %7476 = vst [vmem:[%s13858_s17 + $0x550] sm:$0xff] %v10217_v9  ;;  %10238 = vrcp.f32 %v4415_v6  ;;  %v337_v9 = vld [vmem:[%s13832_s30 + $0x638] sm:$0xff]  ;;  %v8626_v14 = vmul.f32 -1.442695, %v336_v5 }
 0x1a7   : > { %v10221_v15 = vpop.eup %10220  ;;  %7477 = vst [vmem:[%s13858_s17 + $0x558] sm:$0xff] %v10219_v12  ;;  %10240 = vpow2.f32 %v8610_v3  ;;  %v338_v12 = vld [vmem:[%s13832_s30 + $0x640] sm:$0xff]  ;;  %v8627_v17 = vmul.f32 -1.442695, %v337_v9 }
 0x1a8   : > { %v10223_v18 = vpop.eup %10222  ;;  %7478 = vst [vmem:[%s13858_s17 + $0x560] sm:$0xff] %v10221_v15  ;;  %10242 = vpow2.f32 %v8611_v7  ;;  %v339_v15 = vld [vmem:[%s13832_s30 + $0x648] sm:$0xff]  ;;  %v8628_v20 = vmul.f32 -1.442695, %v338_v12 }
 0x1a9   : > { %v10225_v21 = vpop.eup %10224  ;;  %7479 = vst [vmem:[%s13858_s17 + $0x568] sm:$0xff] %v10223_v18  ;;  %10244 = vpow2.f32 %v8612_v10  ;;  %v340_v18 = vld [vmem:[%s13832_s30 + $0x650] sm:$0xff]  ;;  %v8629_v23 = vmul.f32 -1.442695, %v339_v15 }
 0x1aa   : > { %v10227_v24 = vpop.eup %10226  ;;  %7480 = vst [vmem:[%s13858_s17 + $0x570] sm:$0xff] %v10225_v21  ;;  %10246 = vpow2.f32 %v8613_v13  ;;  %v341_v21 = vld [vmem:[%s13832_s30 + $0x658] sm:$0xff]  ;;  %v8630_v26 = vmul.f32 -1.442695, %v340_v18 }
 0x1ab   : > { %v10229_v27 = vpop.eup %10228  ;;  %7481 = vst [vmem:[%s13858_s17 + $0x578] sm:$0xff] %v10227_v24  ;;  %10248 = vpow2.f32 %v8614_v16  ;;  %v342_v24 = vld [vmem:[%s13832_s30 + $0x660] sm:$0xff]  ;;  %v8631_v29 = vmul.f32 -1.442695, %v341_v21 }
 0x1ac   : > { %v10231_v30 = vpop.eup %10230  ;;  %7482 = vst [vmem:[%s13858_s17 + $0x580] sm:$0xff] %v10229_v27  ;;  %10250 = vpow2.f32 %v8615_v19  ;;  %v343_v27 = vld [vmem:[%s13832_s30 + $0x668] sm:$0xff]  ;;  %v8632_v32 = vmul.f32 -1.442695, %v342_v24 }
 0x1ad   : > { %v10233_v33 = vpop.eup %10232  ;;  %7483 = vst [vmem:[%s13858_s17 + $0x588] sm:$0xff] %v10231_v30  ;;  %10252 = vpow2.f32 %v8616_v22  ;;  %v344_v30 = vld [vmem:[%s13832_s30 + $0x670] sm:$0xff] }
 0x1ae   : > { %v10235_v35 = vpop.eup %10234  ;;  %7484 = vst [vmem:[%s13858_s17 + $0x590] sm:$0xff] %v10233_v33  ;;  %10254 = vpow2.f32 %v8617_v25  ;;  %v345_v33 = vld [vmem:[%s13832_s30 + $0x678] sm:$0xff] }
 0x1af   : > { %v10237_v37 = vpop.eup %10236  ;;  %7485 = vst [vmem:[%s13858_s17 + $0x598] sm:$0xff] %v10235_v35  ;;  %10256 = vpow2.f32 %v8618_v28  ;;  %v8633_v35 = vmul.f32 -1.442695, %v343_v27 }
 0x1b0   : > { %v10239_v39 = vpop.eup %10238  ;;  %7486 = vst [vmem:[%s13858_s17 + $0x5a0] sm:$0xff] %v10237_v37  ;;  %10258 = vpow2.f32 %v8619_v31  ;;  %v8634_v37 = vmul.f32 -1.442695, %v344_v30 }
 0x1b1   : > { %v10241_v40 = vpop.eup %10240  ;;  %7487 = vst [vmem:[%s13858_s17 + $0x5a8] sm:$0xff] %v10239_v39  ;;  %10260 = vpow2.f32 %v8620_v34  ;;  %v8635_v39 = vmul.f32 -1.442695, %v345_v33 }
 0x1b2   : > { %v10243_v41 = vpop.eup %10242  ;;  %v4416_v42 = vadd.f32 1.0, %v10241_v40  ;;  %10262 = vpow2.f32 %v8621_v36 }
 0x1b3   : > { %v10245_v43 = vpop.eup %10244  ;;  %v4417_v44 = vadd.f32 1.0, %v10243_v41  ;;  %10264 = vpow2.f32 %v8622_v38 }
 0x1b4   : > { %v10247_v45 = vpop.eup %10246  ;;  %10266 = vrcp.f32 %v4416_v42  ;;  %v4418_v46 = vadd.f32 1.0, %v10245_v43 }
 0x1b5   : > { %v10249_v47 = vpop.eup %10248  ;;  %10268 = vrcp.f32 %v4417_v44  ;;  %v4419_v48 = vadd.f32 1.0, %v10247_v45 }
 0x1b6   : > { %v10251_v49 = vpop.eup %10250  ;;  %10270 = vrcp.f32 %v4418_v46  ;;  %v4420_v50 = vadd.f32 1.0, %v10249_v47 }
 0x1b7   : > { %v10253_v51 = vpop.eup %10252  ;;  %10272 = vrcp.f32 %v4419_v48  ;;  %v4421_v52 = vadd.f32 1.0, %v10251_v49 }
 0x1b8   : > { %v10255_v53 = vpop.eup %10254  ;;  %10274 = vrcp.f32 %v4420_v50  ;;  %v4422_v54 = vadd.f32 1.0, %v10253_v51 }
 0x1b9   : > { %v10257_v55 = vpop.eup %10256  ;;  %10276 = vrcp.f32 %v4421_v52  ;;  %v4423_v56 = vadd.f32 1.0, %v10255_v53 }
 0x1ba   : > { %v10259_v57 = vpop.eup %10258  ;;  %10278 = vrcp.f32 %v4422_v54  ;;  %v4424_v58 = vadd.f32 1.0, %v10257_v55 }
 0x1bb   : > { %v10261_v60 = vpop.eup %10260  ;;  %10280 = vrcp.f32 %v4423_v56  ;;  %v4425_v61 = vadd.f32 1.0, %v10259_v57 }
 0x1bc   : > { %v10263_v63 = vpop.eup %10262  ;;  %10282 = vrcp.f32 %v4424_v58  ;;  %v4426_v0 = vadd.f32 1.0, %v10261_v60  ;;  %v346_v60 = vld [vmem:[%s13832_s30 + $0x680] sm:$0xff] }
 0x1bd   : > { %v10265_v2 = vpop.eup %10264  ;;  %10284 = vrcp.f32 %v4425_v61  ;;  %v4427_v3 = vadd.f32 1.0, %v10263_v63  ;;  %v347_v63 = vld [vmem:[%s13832_s30 + $0x688] sm:$0xff]  ;;  %v8636_v5 = vmul.f32 -1.442695, %v346_v60 }
 0x1be   : > { %v10267_v6 = vpop.eup %10266  ;;  %10286 = vrcp.f32 %v4426_v0  ;;  %v4428_v7 = vadd.f32 1.0, %v10265_v2  ;;  %v348_v2 = vld [vmem:[%s13832_s30 + $0x690] sm:$0xff]  ;;  %v8637_v9 = vmul.f32 -1.442695, %v347_v63 }
 0x1bf   : > { %v10269_v10 = vpop.eup %10268  ;;  %7488 = vst [vmem:[%s13858_s17 + $0x5b0] sm:$0xff] %v10267_v6  ;;  %10288 = vrcp.f32 %v4427_v3  ;;  %v349_v6 = vld [vmem:[%s13832_s30 + $0x698] sm:$0xff]  ;;  %v8638_v12 = vmul.f32 -1.442695, %v348_v2 }
 0x1c0   : > { %v10271_v13 = vpop.eup %10270  ;;  %7489 = vst [vmem:[%s13858_s17 + $0x5b8] sm:$0xff] %v10269_v10  ;;  %10290 = vrcp.f32 %v4428_v7  ;;  %v350_v10 = vld [vmem:[%s13832_s30 + $0x6a0] sm:$0xff]  ;;  %v8639_v15 = vmul.f32 -1.442695, %v349_v6 }
 0x1c1   : > { %v10273_v16 = vpop.eup %10272  ;;  %7490 = vst [vmem:[%s13858_s17 + $0x5c0] sm:$0xff] %v10271_v13  ;;  %10292 = vpow2.f32 %v8623_v4  ;;  %v351_v13 = vld [vmem:[%s13832_s30 + $0x6a8] sm:$0xff]  ;;  %v8640_v18 = vmul.f32 -1.442695, %v350_v10 }
 0x1c2   : > { %v10275_v19 = vpop.eup %10274  ;;  %7491 = vst [vmem:[%s13858_s17 + $0x5c8] sm:$0xff] %v10273_v16  ;;  %10294 = vpow2.f32 %v8624_v8  ;;  %v352_v16 = vld [vmem:[%s13832_s30 + $0x6b0] sm:$0xff]  ;;  %v8641_v21 = vmul.f32 -1.442695, %v351_v13 }
 0x1c3   : > { %v10277_v22 = vpop.eup %10276  ;;  %7492 = vst [vmem:[%s13858_s17 + $0x5d0] sm:$0xff] %v10275_v19  ;;  %10296 = vpow2.f32 %v8625_v11  ;;  %v353_v19 = vld [vmem:[%s13832_s30 + $0x6b8] sm:$0xff]  ;;  %v8642_v24 = vmul.f32 -1.442695, %v352_v16 }
 0x1c4   : > { %v10279_v25 = vpop.eup %10278  ;;  %7493 = vst [vmem:[%s13858_s17 + $0x5d8] sm:$0xff] %v10277_v22  ;;  %10298 = vpow2.f32 %v8626_v14  ;;  %v354_v22 = vld [vmem:[%s13832_s30 + $0x6c0] sm:$0xff]  ;;  %v8643_v27 = vmul.f32 -1.442695, %v353_v19 }
 0x1c5   : > { %v10281_v28 = vpop.eup %10280  ;;  %7494 = vst [vmem:[%s13858_s17 + $0x5e0] sm:$0xff] %v10279_v25  ;;  %10300 = vpow2.f32 %v8627_v17  ;;  %v355_v25 = vld [vmem:[%s13832_s30 + $0x6c8] sm:$0xff]  ;;  %v8644_v30 = vmul.f32 -1.442695, %v354_v22 }
 0x1c6   : > { %v10283_v31 = vpop.eup %10282  ;;  %7495 = vst [vmem:[%s13858_s17 + $0x5e8] sm:$0xff] %v10281_v28  ;;  %10302 = vpow2.f32 %v8628_v20  ;;  %v356_v28 = vld [vmem:[%s13832_s30 + $0x6d0] sm:$0xff]  ;;  %v8645_v33 = vmul.f32 -1.442695, %v355_v25 }
 0x1c7   : > { %v10285_v34 = vpop.eup %10284  ;;  %7496 = vst [vmem:[%s13858_s17 + $0x5f0] sm:$0xff] %v10283_v31  ;;  %10304 = vpow2.f32 %v8629_v23  ;;  %v357_v31 = vld [vmem:[%s13832_s30 + $0x6d8] sm:$0xff] }
 0x1c8   : > { %v10287_v36 = vpop.eup %10286  ;;  %7497 = vst [vmem:[%s13858_s17 + $0x5f8] sm:$0xff] %v10285_v34  ;;  %10306 = vpow2.f32 %v8630_v26  ;;  %v358_v34 = vld [vmem:[%s13832_s30 + $0x6e0] sm:$0xff] }
 0x1c9   : > { %v10289_v38 = vpop.eup %10288  ;;  %7498 = vst [vmem:[%s13858_s17 + $0x600] sm:$0xff] %v10287_v36  ;;  %10308 = vpow2.f32 %v8631_v29  ;;  %v8646_v36 = vmul.f32 -1.442695, %v356_v28 }
 0x1ca   : > { %v10291_v40 = vpop.eup %10290  ;;  %7499 = vst [vmem:[%s13858_s17 + $0x608] sm:$0xff] %v10289_v38  ;;  %10310 = vpow2.f32 %v8632_v32  ;;  %v8647_v38 = vmul.f32 -1.442695, %v357_v31 }
 0x1cb   : > { %v10293_v41 = vpop.eup %10292  ;;  %7500 = vst [vmem:[%s13858_s17 + $0x610] sm:$0xff] %v10291_v40  ;;  %10312 = vpow2.f32 %v8633_v35  ;;  %v8648_v40 = vmul.f32 -1.442695, %v358_v34 }
 0x1cc   : > { %v10295_v42 = vpop.eup %10294  ;;  %v4429_v43 = vadd.f32 1.0, %v10293_v41  ;;  %10314 = vpow2.f32 %v8634_v37 }
 0x1cd   : > { %v10297_v44 = vpop.eup %10296  ;;  %v4430_v45 = vadd.f32 1.0, %v10295_v42  ;;  %10316 = vpow2.f32 %v8635_v39 }
 0x1ce   : > { %v10299_v46 = vpop.eup %10298  ;;  %10318 = vrcp.f32 %v4429_v43  ;;  %v4431_v47 = vadd.f32 1.0, %v10297_v44 }
 0x1cf   : > { %v10301_v48 = vpop.eup %10300  ;;  %10320 = vrcp.f32 %v4430_v45  ;;  %v4432_v49 = vadd.f32 1.0, %v10299_v46 }
 0x1d0   : > { %v10303_v50 = vpop.eup %10302  ;;  %10322 = vrcp.f32 %v4431_v47  ;;  %v4433_v51 = vadd.f32 1.0, %v10301_v48 }
 0x1d1   : > { %v10305_v52 = vpop.eup %10304  ;;  %10324 = vrcp.f32 %v4432_v49  ;;  %v4434_v53 = vadd.f32 1.0, %v10303_v50 }
 0x1d2   : > { %v10307_v54 = vpop.eup %10306  ;;  %10326 = vrcp.f32 %v4433_v51  ;;  %v4435_v55 = vadd.f32 1.0, %v10305_v52 }
 0x1d3   : > { %v10309_v56 = vpop.eup %10308  ;;  %10328 = vrcp.f32 %v4434_v53  ;;  %v4436_v57 = vadd.f32 1.0, %v10307_v54 }
 0x1d4   : > { %v10311_v58 = vpop.eup %10310  ;;  %10330 = vrcp.f32 %v4435_v55  ;;  %v4437_v59 = vadd.f32 1.0, %v10309_v56 }
 0x1d5   : > { %v10313_v61 = vpop.eup %10312  ;;  %10332 = vrcp.f32 %v4436_v57  ;;  %v4438_v62 = vadd.f32 1.0, %v10311_v58 }
 0x1d6   : > { %v10315_v0 = vpop.eup %10314  ;;  %10334 = vrcp.f32 %v4437_v59  ;;  %v4439_v1 = vadd.f32 1.0, %v10313_v61  ;;  %v359_v61 = vld [vmem:[%s13832_s30 + $0x6e8] sm:$0xff] }
 0x1d7   : > { %v10317_v3 = vpop.eup %10316  ;;  %10336 = vrcp.f32 %v4438_v62  ;;  %v4440_v4 = vadd.f32 1.0, %v10315_v0  ;;  %v360_v0 = vld [vmem:[%s13832_s30 + $0x6f0] sm:$0xff]  ;;  %v8649_v6 = vmul.f32 -1.442695, %v359_v61 }
 0x1d8   : > { %v10319_v7 = vpop.eup %10318  ;;  %10338 = vrcp.f32 %v4439_v1  ;;  %v4441_v8 = vadd.f32 1.0, %v10317_v3  ;;  %v361_v3 = vld [vmem:[%s13832_s30 + $0x6f8] sm:$0xff]  ;;  %v8650_v10 = vmul.f32 -1.442695, %v360_v0 }
 0x1d9   : > { %v10321_v11 = vpop.eup %10320  ;;  %7501 = vst [vmem:[%s13858_s17 + $0x618] sm:$0xff] %v10319_v7  ;;  %10340 = vrcp.f32 %v4440_v4  ;;  %v362_v7 = vld [vmem:[%s13832_s30 + $0x700] sm:$0xff]  ;;  %v8651_v13 = vmul.f32 -1.442695, %v361_v3 }
 0x1da   : > { %v10323_v14 = vpop.eup %10322  ;;  %7502 = vst [vmem:[%s13858_s17 + $0x620] sm:$0xff] %v10321_v11  ;;  %10342 = vrcp.f32 %v4441_v8  ;;  %v363_v11 = vld [vmem:[%s13832_s30 + $0x708] sm:$0xff]  ;;  %v8652_v16 = vmul.f32 -1.442695, %v362_v7 }
 0x1db   : > { %v10325_v17 = vpop.eup %10324  ;;  %7503 = vst [vmem:[%s13858_s17 + $0x628] sm:$0xff] %v10323_v14  ;;  %10344 = vpow2.f32 %v8636_v5  ;;  %v364_v14 = vld [vmem:[%s13832_s30 + $0x710] sm:$0xff]  ;;  %v8653_v19 = vmul.f32 -1.442695, %v363_v11 }
 0x1dc   : > { %v10327_v20 = vpop.eup %10326  ;;  %7504 = vst [vmem:[%s13858_s17 + $0x630] sm:$0xff] %v10325_v17  ;;  %10346 = vpow2.f32 %v8637_v9  ;;  %v365_v17 = vld [vmem:[%s13832_s30 + $0x718] sm:$0xff]  ;;  %v8654_v22 = vmul.f32 -1.442695, %v364_v14 }
 0x1dd   : > { %v10329_v23 = vpop.eup %10328  ;;  %7505 = vst [vmem:[%s13858_s17 + $0x638] sm:$0xff] %v10327_v20  ;;  %10348 = vpow2.f32 %v8638_v12  ;;  %v366_v20 = vld [vmem:[%s13832_s30 + $0x720] sm:$0xff]  ;;  %v8655_v25 = vmul.f32 -1.442695, %v365_v17 }
 0x1de   : > { %v10331_v26 = vpop.eup %10330  ;;  %7506 = vst [vmem:[%s13858_s17 + $0x640] sm:$0xff] %v10329_v23  ;;  %10350 = vpow2.f32 %v8639_v15  ;;  %v367_v23 = vld [vmem:[%s13832_s30 + $0x728] sm:$0xff]  ;;  %v8656_v28 = vmul.f32 -1.442695, %v366_v20 }
 0x1df   : > { %v10333_v29 = vpop.eup %10332  ;;  %7507 = vst [vmem:[%s13858_s17 + $0x648] sm:$0xff] %v10331_v26  ;;  %10352 = vpow2.f32 %v8640_v18  ;;  %v368_v26 = vld [vmem:[%s13832_s30 + $0x730] sm:$0xff]  ;;  %v8657_v31 = vmul.f32 -1.442695, %v367_v23 }
 0x1e0   : > { %v10335_v32 = vpop.eup %10334  ;;  %7508 = vst [vmem:[%s13858_s17 + $0x650] sm:$0xff] %v10333_v29  ;;  %10354 = vpow2.f32 %v8641_v21  ;;  %v369_v29 = vld [vmem:[%s13832_s30 + $0x738] sm:$0xff]  ;;  %v8658_v34 = vmul.f32 -1.442695, %v368_v26 }
 0x1e1   : > { %v10337_v35 = vpop.eup %10336  ;;  %7509 = vst [vmem:[%s13858_s17 + $0x658] sm:$0xff] %v10335_v32  ;;  %10356 = vpow2.f32 %v8642_v24  ;;  %v370_v32 = vld [vmem:[%s13832_s30 + $0x740] sm:$0xff] }
 0x1e2   : > { %v10339_v37 = vpop.eup %10338  ;;  %7510 = vst [vmem:[%s13858_s17 + $0x660] sm:$0xff] %v10337_v35  ;;  %10358 = vpow2.f32 %v8643_v27  ;;  %v371_v35 = vld [vmem:[%s13832_s30 + $0x748] sm:$0xff] }
 0x1e3   : > { %v10341_v39 = vpop.eup %10340  ;;  %7511 = vst [vmem:[%s13858_s17 + $0x668] sm:$0xff] %v10339_v37  ;;  %10360 = vpow2.f32 %v8644_v30  ;;  %v8659_v37 = vmul.f32 -1.442695, %v369_v29 }
 0x1e4   : > { %v10343_v41 = vpop.eup %10342  ;;  %7512 = vst [vmem:[%s13858_s17 + $0x670] sm:$0xff] %v10341_v39  ;;  %10362 = vpow2.f32 %v8645_v33  ;;  %v8660_v39 = vmul.f32 -1.442695, %v370_v32 }
 0x1e5   : > { %v10345_v42 = vpop.eup %10344  ;;  %7513 = vst [vmem:[%s13858_s17 + $0x678] sm:$0xff] %v10343_v41  ;;  %10364 = vpow2.f32 %v8646_v36  ;;  %v8661_v41 = vmul.f32 -1.442695, %v371_v35 }
 0x1e6   : > { %v10347_v43 = vpop.eup %10346  ;;  %v4442_v44 = vadd.f32 1.0, %v10345_v42  ;;  %10366 = vpow2.f32 %v8647_v38 }
 0x1e7   : > { %v10349_v45 = vpop.eup %10348  ;;  %v4443_v46 = vadd.f32 1.0, %v10347_v43  ;;  %10368 = vpow2.f32 %v8648_v40 }
 0x1e8   : > { %v10351_v47 = vpop.eup %10350  ;;  %10370 = vrcp.f32 %v4442_v44  ;;  %v4444_v48 = vadd.f32 1.0, %v10349_v45 }
 0x1e9   : > { %v10353_v49 = vpop.eup %10352  ;;  %10372 = vrcp.f32 %v4443_v46  ;;  %v4445_v50 = vadd.f32 1.0, %v10351_v47 }
 0x1ea   : > { %v10355_v51 = vpop.eup %10354  ;;  %10374 = vrcp.f32 %v4444_v48  ;;  %v4446_v52 = vadd.f32 1.0, %v10353_v49 }
 0x1eb   : > { %v10357_v53 = vpop.eup %10356  ;;  %10376 = vrcp.f32 %v4445_v50  ;;  %v4447_v54 = vadd.f32 1.0, %v10355_v51 }
 0x1ec   : > { %v10359_v55 = vpop.eup %10358  ;;  %10378 = vrcp.f32 %v4446_v52  ;;  %v4448_v56 = vadd.f32 1.0, %v10357_v53 }
 0x1ed   : > { %v10361_v57 = vpop.eup %10360  ;;  %10380 = vrcp.f32 %v4447_v54  ;;  %v4449_v58 = vadd.f32 1.0, %v10359_v55 }
 0x1ee   : > { %v10363_v59 = vpop.eup %10362  ;;  %10382 = vrcp.f32 %v4448_v56  ;;  %v4450_v60 = vadd.f32 1.0, %v10361_v57 }
 0x1ef   : > { %v10365_v62 = vpop.eup %10364  ;;  %10384 = vrcp.f32 %v4449_v58  ;;  %v4451_v63 = vadd.f32 1.0, %v10363_v59 }
 0x1f0   : > { %v10367_v1 = vpop.eup %10366  ;;  %10386 = vrcp.f32 %v4450_v60  ;;  %v4452_v2 = vadd.f32 1.0, %v10365_v62  ;;  %v372_v62 = vld [vmem:[%s13832_s30 + $0x750] sm:$0xff] }
 0x1f1   : > { %v10369_v4 = vpop.eup %10368  ;;  %10388 = vrcp.f32 %v4451_v63  ;;  %v4453_v5 = vadd.f32 1.0, %v10367_v1  ;;  %v373_v1 = vld [vmem:[%s13832_s30 + $0x758] sm:$0xff]  ;;  %v8662_v7 = vmul.f32 -1.442695, %v372_v62 }
 0x1f2   : > { %v10371_v8 = vpop.eup %10370  ;;  %10390 = vrcp.f32 %v4452_v2  ;;  %v4454_v9 = vadd.f32 1.0, %v10369_v4  ;;  %v374_v4 = vld [vmem:[%s13832_s30 + $0x760] sm:$0xff]  ;;  %v8663_v11 = vmul.f32 -1.442695, %v373_v1 }
 0x1f3   : > { %v10373_v12 = vpop.eup %10372  ;;  %7514 = vst [vmem:[%s13858_s17 + $0x680] sm:$0xff] %v10371_v8  ;;  %10392 = vrcp.f32 %v4453_v5  ;;  %v375_v8 = vld [vmem:[%s13832_s30 + $0x768] sm:$0xff]  ;;  %v8664_v14 = vmul.f32 -1.442695, %v374_v4 }
 0x1f4   : > { %v10375_v15 = vpop.eup %10374  ;;  %7515 = vst [vmem:[%s13858_s17 + $0x688] sm:$0xff] %v10373_v12  ;;  %10394 = vrcp.f32 %v4454_v9  ;;  %v376_v12 = vld [vmem:[%s13832_s30 + $0x770] sm:$0xff]  ;;  %v8665_v17 = vmul.f32 -1.442695, %v375_v8 }
 0x1f5   : > { %v10377_v18 = vpop.eup %10376  ;;  %7516 = vst [vmem:[%s13858_s17 + $0x690] sm:$0xff] %v10375_v15  ;;  %10396 = vpow2.f32 %v8649_v6  ;;  %v377_v15 = vld [vmem:[%s13832_s30 + $0x778] sm:$0xff]  ;;  %v8666_v20 = vmul.f32 -1.442695, %v376_v12 }
 0x1f6   : > { %v10379_v21 = vpop.eup %10378  ;;  %7517 = vst [vmem:[%s13858_s17 + $0x698] sm:$0xff] %v10377_v18  ;;  %10398 = vpow2.f32 %v8650_v10  ;;  %v378_v18 = vld [vmem:[%s13832_s30 + $0x780] sm:$0xff]  ;;  %v8667_v23 = vmul.f32 -1.442695, %v377_v15 }
 0x1f7   : > { %v10381_v24 = vpop.eup %10380  ;;  %7518 = vst [vmem:[%s13858_s17 + $0x6a0] sm:$0xff] %v10379_v21  ;;  %10400 = vpow2.f32 %v8651_v13  ;;  %v379_v21 = vld [vmem:[%s13832_s30 + $0x788] sm:$0xff]  ;;  %v8668_v26 = vmul.f32 -1.442695, %v378_v18 }
 0x1f8   : > { %v10383_v27 = vpop.eup %10382  ;;  %7519 = vst [vmem:[%s13858_s17 + $0x6a8] sm:$0xff] %v10381_v24  ;;  %10402 = vpow2.f32 %v8652_v16  ;;  %v380_v24 = vld [vmem:[%s13832_s30 + $0x790] sm:$0xff]  ;;  %v8669_v29 = vmul.f32 -1.442695, %v379_v21 }
 0x1f9   : > { %v10385_v30 = vpop.eup %10384  ;;  %7520 = vst [vmem:[%s13858_s17 + $0x6b0] sm:$0xff] %v10383_v27  ;;  %10404 = vpow2.f32 %v8653_v19  ;;  %v381_v27 = vld [vmem:[%s13832_s30 + $0x798] sm:$0xff]  ;;  %v8670_v32 = vmul.f32 -1.442695, %v380_v24 }
 0x1fa   : > { %v10387_v33 = vpop.eup %10386  ;;  %7521 = vst [vmem:[%s13858_s17 + $0x6b8] sm:$0xff] %v10385_v30  ;;  %10406 = vpow2.f32 %v8654_v22  ;;  %v382_v30 = vld [vmem:[%s13832_s30 + $0x7a0] sm:$0xff]  ;;  %v8671_v35 = vmul.f32 -1.442695, %v381_v27 }
 0x1fb   : > { %v10389_v36 = vpop.eup %10388  ;;  %7522 = vst [vmem:[%s13858_s17 + $0x6c0] sm:$0xff] %v10387_v33  ;;  %10408 = vpow2.f32 %v8655_v25  ;;  %v383_v33 = vld [vmem:[%s13832_s30 + $0x7a8] sm:$0xff] }
 0x1fc   : > { %v10391_v38 = vpop.eup %10390  ;;  %7523 = vst [vmem:[%s13858_s17 + $0x6c8] sm:$0xff] %v10389_v36  ;;  %10410 = vpow2.f32 %v8656_v28  ;;  %v384_v36 = vld [vmem:[%s13832_s30 + $0x7b0] sm:$0xff] }
 0x1fd   : > { %v10393_v40 = vpop.eup %10392  ;;  %7524 = vst [vmem:[%s13858_s17 + $0x6d0] sm:$0xff] %v10391_v38  ;;  %10412 = vpow2.f32 %v8657_v31  ;;  %v8672_v38 = vmul.f32 -1.442695, %v382_v30 }
 0x1fe   : > { %v10395_v42 = vpop.eup %10394  ;;  %7525 = vst [vmem:[%s13858_s17 + $0x6d8] sm:$0xff] %v10393_v40  ;;  %10414 = vpow2.f32 %v8658_v34  ;;  %v8673_v40 = vmul.f32 -1.442695, %v383_v33 }
 0x1ff   : > { %v10397_v43 = vpop.eup %10396  ;;  %7526 = vst [vmem:[%s13858_s17 + $0x6e0] sm:$0xff] %v10395_v42  ;;  %10416 = vpow2.f32 %v8659_v37  ;;  %v8674_v42 = vmul.f32 -1.442695, %v384_v36 }
 0x200   : > { %v10399_v44 = vpop.eup %10398  ;;  %v4455_v45 = vadd.f32 1.0, %v10397_v43  ;;  %10418 = vpow2.f32 %v8660_v39 }
 0x201   : > { %v10401_v46 = vpop.eup %10400  ;;  %v4456_v47 = vadd.f32 1.0, %v10399_v44  ;;  %10420 = vpow2.f32 %v8661_v41 }
 0x202   : > { %v10403_v48 = vpop.eup %10402  ;;  %10422 = vrcp.f32 %v4455_v45  ;;  %v4457_v49 = vadd.f32 1.0, %v10401_v46 }
 0x203   : > { %v10405_v50 = vpop.eup %10404  ;;  %10424 = vrcp.f32 %v4456_v47  ;;  %v4458_v51 = vadd.f32 1.0, %v10403_v48 }
 0x204   : > { %v10407_v52 = vpop.eup %10406  ;;  %10426 = vrcp.f32 %v4457_v49  ;;  %v4459_v53 = vadd.f32 1.0, %v10405_v50 }
 0x205   : > { %v10409_v54 = vpop.eup %10408  ;;  %10428 = vrcp.f32 %v4458_v51  ;;  %v4460_v55 = vadd.f32 1.0, %v10407_v52 }
 0x206   : > { %v10411_v56 = vpop.eup %10410  ;;  %10430 = vrcp.f32 %v4459_v53  ;;  %v4461_v57 = vadd.f32 1.0, %v10409_v54 }
 0x207   : > { %v10413_v58 = vpop.eup %10412  ;;  %10432 = vrcp.f32 %v4460_v55  ;;  %v4462_v59 = vadd.f32 1.0, %v10411_v56 }
 0x208   : > { %v10415_v60 = vpop.eup %10414  ;;  %10434 = vrcp.f32 %v4461_v57  ;;  %v4463_v61 = vadd.f32 1.0, %v10413_v58 }
 0x209   : > { %v10417_v63 = vpop.eup %10416  ;;  %10436 = vrcp.f32 %v4462_v59  ;;  %v4464_v0 = vadd.f32 1.0, %v10415_v60 }
 0x20a   : > { %v10419_v2 = vpop.eup %10418  ;;  %10438 = vrcp.f32 %v4463_v61  ;;  %v4465_v3 = vadd.f32 1.0, %v10417_v63  ;;  %v385_v63 = vld [vmem:[%s13832_s30 + $0x7b8] sm:$0xff] }
 0x20b   : > { %v10421_v5 = vpop.eup %10420  ;;  %10440 = vrcp.f32 %v4464_v0  ;;  %v4466_v6 = vadd.f32 1.0, %v10419_v2  ;;  %v386_v2 = vld [vmem:[%s13832_s30 + $0x7c0] sm:$0xff]  ;;  %v8675_v8 = vmul.f32 -1.442695, %v385_v63 }
 0x20c   : > { %v10423_v9 = vpop.eup %10422  ;;  %10442 = vrcp.f32 %v4465_v3  ;;  %v4467_v10 = vadd.f32 1.0, %v10421_v5  ;;  %v387_v5 = vld [vmem:[%s13832_s30 + $0x7c8] sm:$0xff]  ;;  %v8676_v12 = vmul.f32 -1.442695, %v386_v2 }
 0x20d   : > { %v10425_v13 = vpop.eup %10424  ;;  %7527 = vst [vmem:[%s13858_s17 + $0x6e8] sm:$0xff] %v10423_v9  ;;  %10444 = vrcp.f32 %v4466_v6  ;;  %v388_v9 = vld [vmem:[%s13832_s30 + $0x7d0] sm:$0xff]  ;;  %v8677_v15 = vmul.f32 -1.442695, %v387_v5 }
 0x20e   : > { %v10427_v16 = vpop.eup %10426  ;;  %7528 = vst [vmem:[%s13858_s17 + $0x6f0] sm:$0xff] %v10425_v13  ;;  %10446 = vrcp.f32 %v4467_v10  ;;  %v389_v13 = vld [vmem:[%s13832_s30 + $0x7d8] sm:$0xff]  ;;  %v8678_v18 = vmul.f32 -1.442695, %v388_v9 }
 0x20f   : > { %v10429_v19 = vpop.eup %10428  ;;  %7529 = vst [vmem:[%s13858_s17 + $0x6f8] sm:$0xff] %v10427_v16  ;;  %10448 = vpow2.f32 %v8662_v7  ;;  %v390_v16 = vld [vmem:[%s13832_s30 + $0x7e0] sm:$0xff]  ;;  %v8679_v21 = vmul.f32 -1.442695, %v389_v13 }
 0x210   : > { %v10431_v22 = vpop.eup %10430  ;;  %7530 = vst [vmem:[%s13858_s17 + $0x700] sm:$0xff] %v10429_v19  ;;  %10450 = vpow2.f32 %v8663_v11  ;;  %v391_v19 = vld [vmem:[%s13832_s30 + $0x7e8] sm:$0xff]  ;;  %v8680_v24 = vmul.f32 -1.442695, %v390_v16 }
 0x211   : > { %v10433_v25 = vpop.eup %10432  ;;  %7531 = vst [vmem:[%s13858_s17 + $0x708] sm:$0xff] %v10431_v22  ;;  %10452 = vpow2.f32 %v8664_v14  ;;  %v392_v22 = vld [vmem:[%s13832_s30 + $0x7f0] sm:$0xff]  ;;  %v8681_v27 = vmul.f32 -1.442695, %v391_v19 }
 0x212   : > { %v10435_v28 = vpop.eup %10434  ;;  %7532 = vst [vmem:[%s13858_s17 + $0x710] sm:$0xff] %v10433_v25  ;;  %10454 = vpow2.f32 %v8665_v17  ;;  %v393_v25 = vld [vmem:[%s13832_s30 + $0x7f8] sm:$0xff]  ;;  %v8682_v30 = vmul.f32 -1.442695, %v392_v22 }
 0x213   : > { %v10437_v31 = vpop.eup %10436  ;;  %7533 = vst [vmem:[%s13858_s17 + $0x718] sm:$0xff] %v10435_v28  ;;  %10456 = vpow2.f32 %v8666_v20  ;;  %v394_v28 = vld [vmem:[%s13832_s30 + $0x800] sm:$0xff]  ;;  %v8683_v33 = vmul.f32 -1.442695, %v393_v25 }
 0x214   : > { %v10439_v34 = vpop.eup %10438  ;;  %7534 = vst [vmem:[%s13858_s17 + $0x720] sm:$0xff] %v10437_v31  ;;  %10458 = vpow2.f32 %v8667_v23  ;;  %v395_v31 = vld [vmem:[%s13832_s30 + $0x808] sm:$0xff]  ;;  %v8684_v36 = vmul.f32 -1.442695, %v394_v28 }
 0x215   : > { %v10441_v37 = vpop.eup %10440  ;;  %7535 = vst [vmem:[%s13858_s17 + $0x728] sm:$0xff] %v10439_v34  ;;  %10460 = vpow2.f32 %v8668_v26  ;;  %v396_v34 = vld [vmem:[%s13832_s30 + $0x810] sm:$0xff] }
 0x216   : > { %v10443_v39 = vpop.eup %10442  ;;  %7536 = vst [vmem:[%s13858_s17 + $0x730] sm:$0xff] %v10441_v37  ;;  %10462 = vpow2.f32 %v8669_v29  ;;  %v397_v37 = vld [vmem:[%s13832_s30 + $0x818] sm:$0xff] }
 0x217   : > { %v10445_v41 = vpop.eup %10444  ;;  %7537 = vst [vmem:[%s13858_s17 + $0x738] sm:$0xff] %v10443_v39  ;;  %10464 = vpow2.f32 %v8670_v32  ;;  %v8685_v39 = vmul.f32 -1.442695, %v395_v31 }
 0x218   : > { %v10447_v43 = vpop.eup %10446  ;;  %7538 = vst [vmem:[%s13858_s17 + $0x740] sm:$0xff] %v10445_v41  ;;  %10466 = vpow2.f32 %v8671_v35  ;;  %v8686_v41 = vmul.f32 -1.442695, %v396_v34 }
 0x219   : > { %v10449_v44 = vpop.eup %10448  ;;  %7539 = vst [vmem:[%s13858_s17 + $0x748] sm:$0xff] %v10447_v43  ;;  %10468 = vpow2.f32 %v8672_v38  ;;  %v8687_v43 = vmul.f32 -1.442695, %v397_v37 }
 0x21a   : > { %v10451_v45 = vpop.eup %10450  ;;  %v4468_v46 = vadd.f32 1.0, %v10449_v44  ;;  %10470 = vpow2.f32 %v8673_v40 }
 0x21b   : > { %v10453_v47 = vpop.eup %10452  ;;  %v4469_v48 = vadd.f32 1.0, %v10451_v45  ;;  %10472 = vpow2.f32 %v8674_v42 }
 0x21c   : > { %v10455_v49 = vpop.eup %10454  ;;  %10474 = vrcp.f32 %v4468_v46  ;;  %v4470_v50 = vadd.f32 1.0, %v10453_v47 }
 0x21d   : > { %v10457_v51 = vpop.eup %10456  ;;  %10476 = vrcp.f32 %v4469_v48  ;;  %v4471_v52 = vadd.f32 1.0, %v10455_v49 }
 0x21e   : > { %v10459_v53 = vpop.eup %10458  ;;  %10478 = vrcp.f32 %v4470_v50  ;;  %v4472_v54 = vadd.f32 1.0, %v10457_v51 }
 0x21f   : > { %v10461_v55 = vpop.eup %10460  ;;  %10480 = vrcp.f32 %v4471_v52  ;;  %v4473_v56 = vadd.f32 1.0, %v10459_v53 }
 0x220   : > { %v10463_v57 = vpop.eup %10462  ;;  %10482 = vrcp.f32 %v4472_v54  ;;  %v4474_v58 = vadd.f32 1.0, %v10461_v55 }
 0x221   : > { %v10465_v59 = vpop.eup %10464  ;;  %10484 = vrcp.f32 %v4473_v56  ;;  %v4475_v60 = vadd.f32 1.0, %v10463_v57 }
 0x222   : > { %v10467_v61 = vpop.eup %10466  ;;  %10486 = vrcp.f32 %v4474_v58  ;;  %v4476_v62 = vadd.f32 1.0, %v10465_v59 }
 0x223   : > { %v10469_v0 = vpop.eup %10468  ;;  %10488 = vrcp.f32 %v4475_v60  ;;  %v4477_v1 = vadd.f32 1.0, %v10467_v61 }
 0x224   : > { %v10471_v3 = vpop.eup %10470  ;;  %10490 = vrcp.f32 %v4476_v62  ;;  %v4478_v4 = vadd.f32 1.0, %v10469_v0  ;;  %v398_v0 = vld [vmem:[%s13832_s30 + $0x820] sm:$0xff] }
 0x225   : > { %v10473_v6 = vpop.eup %10472  ;;  %10492 = vrcp.f32 %v4477_v1  ;;  %v4479_v7 = vadd.f32 1.0, %v10471_v3  ;;  %v399_v3 = vld [vmem:[%s13832_s30 + $0x828] sm:$0xff]  ;;  %v8688_v9 = vmul.f32 -1.442695, %v398_v0 }
 0x226   : > { %v10475_v10 = vpop.eup %10474  ;;  %10494 = vrcp.f32 %v4478_v4  ;;  %v4480_v11 = vadd.f32 1.0, %v10473_v6  ;;  %v400_v6 = vld [vmem:[%s13832_s30 + $0x830] sm:$0xff]  ;;  %v8689_v13 = vmul.f32 -1.442695, %v399_v3 }
 0x227   : > { %v10477_v14 = vpop.eup %10476  ;;  %7540 = vst [vmem:[%s13858_s17 + $0x750] sm:$0xff] %v10475_v10  ;;  %10496 = vrcp.f32 %v4479_v7  ;;  %v401_v10 = vld [vmem:[%s13832_s30 + $0x838] sm:$0xff]  ;;  %v8690_v16 = vmul.f32 -1.442695, %v400_v6 }
 0x228   : > { %v10479_v17 = vpop.eup %10478  ;;  %7541 = vst [vmem:[%s13858_s17 + $0x758] sm:$0xff] %v10477_v14  ;;  %10498 = vrcp.f32 %v4480_v11  ;;  %v402_v14 = vld [vmem:[%s13832_s30 + $0x840] sm:$0xff]  ;;  %v8691_v19 = vmul.f32 -1.442695, %v401_v10 }
 0x229   : > { %v10481_v20 = vpop.eup %10480  ;;  %7542 = vst [vmem:[%s13858_s17 + $0x760] sm:$0xff] %v10479_v17  ;;  %10500 = vpow2.f32 %v8675_v8  ;;  %v403_v17 = vld [vmem:[%s13832_s30 + $0x848] sm:$0xff]  ;;  %v8692_v22 = vmul.f32 -1.442695, %v402_v14 }
 0x22a   : > { %v10483_v23 = vpop.eup %10482  ;;  %7543 = vst [vmem:[%s13858_s17 + $0x768] sm:$0xff] %v10481_v20  ;;  %10502 = vpow2.f32 %v8676_v12  ;;  %v404_v20 = vld [vmem:[%s13832_s30 + $0x850] sm:$0xff]  ;;  %v8693_v25 = vmul.f32 -1.442695, %v403_v17 }
 0x22b   : > { %v10485_v26 = vpop.eup %10484  ;;  %7544 = vst [vmem:[%s13858_s17 + $0x770] sm:$0xff] %v10483_v23  ;;  %10504 = vpow2.f32 %v8677_v15  ;;  %v405_v23 = vld [vmem:[%s13832_s30 + $0x858] sm:$0xff]  ;;  %v8694_v28 = vmul.f32 -1.442695, %v404_v20 }
 0x22c   : > { %v10487_v29 = vpop.eup %10486  ;;  %7545 = vst [vmem:[%s13858_s17 + $0x778] sm:$0xff] %v10485_v26  ;;  %10506 = vpow2.f32 %v8678_v18  ;;  %v406_v26 = vld [vmem:[%s13832_s30 + $0x860] sm:$0xff]  ;;  %v8695_v31 = vmul.f32 -1.442695, %v405_v23 }
 0x22d   : > { %v10489_v32 = vpop.eup %10488  ;;  %7546 = vst [vmem:[%s13858_s17 + $0x780] sm:$0xff] %v10487_v29  ;;  %10508 = vpow2.f32 %v8679_v21  ;;  %v407_v29 = vld [vmem:[%s13832_s30 + $0x868] sm:$0xff]  ;;  %v8696_v34 = vmul.f32 -1.442695, %v406_v26 }
 0x22e   : > { %v10491_v35 = vpop.eup %10490  ;;  %7547 = vst [vmem:[%s13858_s17 + $0x788] sm:$0xff] %v10489_v32  ;;  %10510 = vpow2.f32 %v8680_v24  ;;  %v408_v32 = vld [vmem:[%s13832_s30 + $0x870] sm:$0xff]  ;;  %v8697_v37 = vmul.f32 -1.442695, %v407_v29 }
 0x22f   : > { %v10493_v38 = vpop.eup %10492  ;;  %7548 = vst [vmem:[%s13858_s17 + $0x790] sm:$0xff] %v10491_v35  ;;  %10512 = vpow2.f32 %v8681_v27  ;;  %v409_v35 = vld [vmem:[%s13832_s30 + $0x878] sm:$0xff] }
 0x230   : > { %v10495_v40 = vpop.eup %10494  ;;  %7549 = vst [vmem:[%s13858_s17 + $0x798] sm:$0xff] %v10493_v38  ;;  %10514 = vpow2.f32 %v8682_v30  ;;  %v410_v38 = vld [vmem:[%s13832_s30 + $0x880] sm:$0xff] }
 0x231   : > { %v10497_v42 = vpop.eup %10496  ;;  %7550 = vst [vmem:[%s13858_s17 + $0x7a0] sm:$0xff] %v10495_v40  ;;  %10516 = vpow2.f32 %v8683_v33  ;;  %v8698_v40 = vmul.f32 -1.442695, %v408_v32 }
 0x232   : > { %v10499_v44 = vpop.eup %10498  ;;  %7551 = vst [vmem:[%s13858_s17 + $0x7a8] sm:$0xff] %v10497_v42  ;;  %10518 = vpow2.f32 %v8684_v36  ;;  %v8699_v42 = vmul.f32 -1.442695, %v409_v35 }
 0x233   : > { %v10501_v45 = vpop.eup %10500  ;;  %7552 = vst [vmem:[%s13858_s17 + $0x7b0] sm:$0xff] %v10499_v44  ;;  %10520 = vpow2.f32 %v8685_v39  ;;  %v8700_v44 = vmul.f32 -1.442695, %v410_v38 }
 0x234   : > { %v10503_v46 = vpop.eup %10502  ;;  %v4481_v47 = vadd.f32 1.0, %v10501_v45  ;;  %10522 = vpow2.f32 %v8686_v41 }
 0x235   : > { %v10505_v48 = vpop.eup %10504  ;;  %v4482_v49 = vadd.f32 1.0, %v10503_v46  ;;  %10524 = vpow2.f32 %v8687_v43 }
 0x236   : > { %v10507_v50 = vpop.eup %10506  ;;  %10526 = vrcp.f32 %v4481_v47  ;;  %v4483_v51 = vadd.f32 1.0, %v10505_v48 }
 0x237   : > { %v10509_v52 = vpop.eup %10508  ;;  %10528 = vrcp.f32 %v4482_v49  ;;  %v4484_v53 = vadd.f32 1.0, %v10507_v50 }
 0x238   : > { %v10511_v54 = vpop.eup %10510  ;;  %10530 = vrcp.f32 %v4483_v51  ;;  %v4485_v55 = vadd.f32 1.0, %v10509_v52 }
 0x239   : > { %v10513_v56 = vpop.eup %10512  ;;  %10532 = vrcp.f32 %v4484_v53  ;;  %v4486_v57 = vadd.f32 1.0, %v10511_v54 }
 0x23a   : > { %v10515_v58 = vpop.eup %10514  ;;  %10534 = vrcp.f32 %v4485_v55  ;;  %v4487_v59 = vadd.f32 1.0, %v10513_v56 }
 0x23b   : > { %v10517_v60 = vpop.eup %10516  ;;  %10536 = vrcp.f32 %v4486_v57  ;;  %v4488_v61 = vadd.f32 1.0, %v10515_v58 }
 0x23c   : > { %v10519_v62 = vpop.eup %10518  ;;  %10538 = vrcp.f32 %v4487_v59  ;;  %v4489_v63 = vadd.f32 1.0, %v10517_v60 }
 0x23d   : > { %v10521_v1 = vpop.eup %10520  ;;  %10540 = vrcp.f32 %v4488_v61  ;;  %v4490_v2 = vadd.f32 1.0, %v10519_v62 }
 0x23e   : > { %v10523_v4 = vpop.eup %10522  ;;  %10542 = vrcp.f32 %v4489_v63  ;;  %v4491_v5 = vadd.f32 1.0, %v10521_v1  ;;  %v411_v1 = vld [vmem:[%s13832_s30 + $0x888] sm:$0xff] }
 0x23f   : > { %v10525_v7 = vpop.eup %10524  ;;  %10544 = vrcp.f32 %v4490_v2  ;;  %v4492_v8 = vadd.f32 1.0, %v10523_v4  ;;  %v412_v4 = vld [vmem:[%s13832_s30 + $0x890] sm:$0xff]  ;;  %v8701_v10 = vmul.f32 -1.442695, %v411_v1 }
 0x240   : > { %v10527_v11 = vpop.eup %10526  ;;  %10546 = vrcp.f32 %v4491_v5  ;;  %v4493_v12 = vadd.f32 1.0, %v10525_v7  ;;  %v413_v7 = vld [vmem:[%s13832_s30 + $0x898] sm:$0xff]  ;;  %v8702_v14 = vmul.f32 -1.442695, %v412_v4 }
 0x241   : > { %v10529_v15 = vpop.eup %10528  ;;  %7553 = vst [vmem:[%s13858_s17 + $0x7b8] sm:$0xff] %v10527_v11  ;;  %10548 = vrcp.f32 %v4492_v8  ;;  %v414_v11 = vld [vmem:[%s13832_s30 + $0x8a0] sm:$0xff]  ;;  %v8703_v17 = vmul.f32 -1.442695, %v413_v7 }
 0x242   : > { %v10531_v18 = vpop.eup %10530  ;;  %7554 = vst [vmem:[%s13858_s17 + $0x7c0] sm:$0xff] %v10529_v15  ;;  %10550 = vrcp.f32 %v4493_v12  ;;  %v415_v15 = vld [vmem:[%s13832_s30 + $0x8a8] sm:$0xff]  ;;  %v8704_v20 = vmul.f32 -1.442695, %v414_v11 }
 0x243   : > { %v10533_v21 = vpop.eup %10532  ;;  %7555 = vst [vmem:[%s13858_s17 + $0x7c8] sm:$0xff] %v10531_v18  ;;  %10552 = vpow2.f32 %v8688_v9  ;;  %v416_v18 = vld [vmem:[%s13832_s30 + $0x8b0] sm:$0xff]  ;;  %v8705_v23 = vmul.f32 -1.442695, %v415_v15 }
 0x244   : > { %v10535_v24 = vpop.eup %10534  ;;  %7556 = vst [vmem:[%s13858_s17 + $0x7d0] sm:$0xff] %v10533_v21  ;;  %10554 = vpow2.f32 %v8689_v13  ;;  %v417_v21 = vld [vmem:[%s13832_s30 + $0x8b8] sm:$0xff]  ;;  %v8706_v26 = vmul.f32 -1.442695, %v416_v18 }
 0x245   : > { %v10537_v27 = vpop.eup %10536  ;;  %7557 = vst [vmem:[%s13858_s17 + $0x7d8] sm:$0xff] %v10535_v24  ;;  %10556 = vpow2.f32 %v8690_v16  ;;  %v418_v24 = vld [vmem:[%s13832_s30 + $0x8c0] sm:$0xff]  ;;  %v8707_v29 = vmul.f32 -1.442695, %v417_v21 }
 0x246   : > { %v10539_v30 = vpop.eup %10538  ;;  %7558 = vst [vmem:[%s13858_s17 + $0x7e0] sm:$0xff] %v10537_v27  ;;  %10558 = vpow2.f32 %v8691_v19  ;;  %v419_v27 = vld [vmem:[%s13832_s30 + $0x8c8] sm:$0xff]  ;;  %v8708_v32 = vmul.f32 -1.442695, %v418_v24 }
 0x247   : > { %v10541_v33 = vpop.eup %10540  ;;  %7559 = vst [vmem:[%s13858_s17 + $0x7e8] sm:$0xff] %v10539_v30  ;;  %10560 = vpow2.f32 %v8692_v22  ;;  %v420_v30 = vld [vmem:[%s13832_s30 + $0x8d0] sm:$0xff]  ;;  %v8709_v35 = vmul.f32 -1.442695, %v419_v27 }
 0x248   : > { %v10543_v36 = vpop.eup %10542  ;;  %7560 = vst [vmem:[%s13858_s17 + $0x7f0] sm:$0xff] %v10541_v33  ;;  %10562 = vpow2.f32 %v8693_v25  ;;  %v421_v33 = vld [vmem:[%s13832_s30 + $0x8d8] sm:$0xff]  ;;  %v8710_v38 = vmul.f32 -1.442695, %v420_v30 }
 0x249   : > { %v10545_v39 = vpop.eup %10544  ;;  %7561 = vst [vmem:[%s13858_s17 + $0x7f8] sm:$0xff] %v10543_v36  ;;  %10564 = vpow2.f32 %v8694_v28  ;;  %v422_v36 = vld [vmem:[%s13832_s30 + $0x8e0] sm:$0xff] }
 0x24a   : > { %v10547_v41 = vpop.eup %10546  ;;  %7562 = vst [vmem:[%s13858_s17 + $0x800] sm:$0xff] %v10545_v39  ;;  %10566 = vpow2.f32 %v8695_v31  ;;  %v423_v39 = vld [vmem:[%s13832_s30 + $0x8e8] sm:$0xff] }
 0x24b   : > { %v10549_v43 = vpop.eup %10548  ;;  %7563 = vst [vmem:[%s13858_s17 + $0x808] sm:$0xff] %v10547_v41  ;;  %10568 = vpow2.f32 %v8696_v34  ;;  %v8711_v41 = vmul.f32 -1.442695, %v421_v33 }
 0x24c   : > { %v10551_v45 = vpop.eup %10550  ;;  %7564 = vst [vmem:[%s13858_s17 + $0x810] sm:$0xff] %v10549_v43  ;;  %10570 = vpow2.f32 %v8697_v37  ;;  %v8712_v43 = vmul.f32 -1.442695, %v422_v36 }
 0x24d   : > { %v10553_v46 = vpop.eup %10552  ;;  %7565 = vst [vmem:[%s13858_s17 + $0x818] sm:$0xff] %v10551_v45  ;;  %10572 = vpow2.f32 %v8698_v40  ;;  %v8713_v45 = vmul.f32 -1.442695, %v423_v39 }
 0x24e   : > { %v10555_v47 = vpop.eup %10554  ;;  %v4494_v48 = vadd.f32 1.0, %v10553_v46  ;;  %10574 = vpow2.f32 %v8699_v42 }
 0x24f   : > { %v10557_v49 = vpop.eup %10556  ;;  %v4495_v50 = vadd.f32 1.0, %v10555_v47  ;;  %10576 = vpow2.f32 %v8700_v44 }
 0x250   : > { %v10559_v51 = vpop.eup %10558  ;;  %10578 = vrcp.f32 %v4494_v48  ;;  %v4496_v52 = vadd.f32 1.0, %v10557_v49 }
 0x251   : > { %v10561_v53 = vpop.eup %10560  ;;  %10580 = vrcp.f32 %v4495_v50  ;;  %v4497_v54 = vadd.f32 1.0, %v10559_v51 }
 0x252   : > { %v10563_v55 = vpop.eup %10562  ;;  %10582 = vrcp.f32 %v4496_v52  ;;  %v4498_v56 = vadd.f32 1.0, %v10561_v53 }
 0x253   : > { %v10565_v57 = vpop.eup %10564  ;;  %10584 = vrcp.f32 %v4497_v54  ;;  %v4499_v58 = vadd.f32 1.0, %v10563_v55 }
 0x254   : > { %v10567_v59 = vpop.eup %10566  ;;  %10586 = vrcp.f32 %v4498_v56  ;;  %v4500_v60 = vadd.f32 1.0, %v10565_v57 }
 0x255   : > { %v10569_v61 = vpop.eup %10568  ;;  %10588 = vrcp.f32 %v4499_v58  ;;  %v4501_v62 = vadd.f32 1.0, %v10567_v59 }
 0x256   : > { %v10571_v63 = vpop.eup %10570  ;;  %10590 = vrcp.f32 %v4500_v60  ;;  %v4502_v0 = vadd.f32 1.0, %v10569_v61 }
 0x257   : > { %v10573_v2 = vpop.eup %10572  ;;  %10592 = vrcp.f32 %v4501_v62  ;;  %v4503_v3 = vadd.f32 1.0, %v10571_v63 }
 0x258   : > { %v10575_v5 = vpop.eup %10574  ;;  %10594 = vrcp.f32 %v4502_v0  ;;  %v4504_v6 = vadd.f32 1.0, %v10573_v2  ;;  %v424_v2 = vld [vmem:[%s13832_s30 + $0x8f0] sm:$0xff] }
 0x259   : > { %v10577_v8 = vpop.eup %10576  ;;  %10596 = vrcp.f32 %v4503_v3  ;;  %v4505_v9 = vadd.f32 1.0, %v10575_v5  ;;  %v425_v5 = vld [vmem:[%s13832_s30 + $0x8f8] sm:$0xff]  ;;  %v8714_v11 = vmul.f32 -1.442695, %v424_v2 }
 0x25a   : > { %v10579_v12 = vpop.eup %10578  ;;  %10598 = vrcp.f32 %v4504_v6  ;;  %v4506_v13 = vadd.f32 1.0, %v10577_v8  ;;  %v426_v8 = vld [vmem:[%s13832_s30 + $0x900] sm:$0xff]  ;;  %v8715_v15 = vmul.f32 -1.442695, %v425_v5 }
 0x25b   : > { %v10581_v16 = vpop.eup %10580  ;;  %7566 = vst [vmem:[%s13858_s17 + $0x820] sm:$0xff] %v10579_v12  ;;  %10600 = vrcp.f32 %v4505_v9  ;;  %v427_v12 = vld [vmem:[%s13832_s30 + $0x908] sm:$0xff]  ;;  %v8716_v18 = vmul.f32 -1.442695, %v426_v8 }
 0x25c   : > { %v10583_v19 = vpop.eup %10582  ;;  %7567 = vst [vmem:[%s13858_s17 + $0x828] sm:$0xff] %v10581_v16  ;;  %10602 = vrcp.f32 %v4506_v13  ;;  %v428_v16 = vld [vmem:[%s13832_s30 + $0x910] sm:$0xff]  ;;  %v8717_v21 = vmul.f32 -1.442695, %v427_v12 }
 0x25d   : > { %v10585_v22 = vpop.eup %10584  ;;  %7568 = vst [vmem:[%s13858_s17 + $0x830] sm:$0xff] %v10583_v19  ;;  %10604 = vpow2.f32 %v8701_v10  ;;  %v429_v19 = vld [vmem:[%s13832_s30 + $0x918] sm:$0xff]  ;;  %v8718_v24 = vmul.f32 -1.442695, %v428_v16 }
 0x25e   : > { %v10587_v25 = vpop.eup %10586  ;;  %7569 = vst [vmem:[%s13858_s17 + $0x838] sm:$0xff] %v10585_v22  ;;  %10606 = vpow2.f32 %v8702_v14  ;;  %v430_v22 = vld [vmem:[%s13832_s30 + $0x920] sm:$0xff]  ;;  %v8719_v27 = vmul.f32 -1.442695, %v429_v19 }
 0x25f   : > { %v10589_v28 = vpop.eup %10588  ;;  %7570 = vst [vmem:[%s13858_s17 + $0x840] sm:$0xff] %v10587_v25  ;;  %10608 = vpow2.f32 %v8703_v17  ;;  %v431_v25 = vld [vmem:[%s13832_s30 + $0x928] sm:$0xff]  ;;  %v8720_v30 = vmul.f32 -1.442695, %v430_v22 }
 0x260   : > { %v10591_v31 = vpop.eup %10590  ;;  %7571 = vst [vmem:[%s13858_s17 + $0x848] sm:$0xff] %v10589_v28  ;;  %10610 = vpow2.f32 %v8704_v20  ;;  %v432_v28 = vld [vmem:[%s13832_s30 + $0x930] sm:$0xff]  ;;  %v8721_v33 = vmul.f32 -1.442695, %v431_v25 }
 0x261   : > { %v10593_v34 = vpop.eup %10592  ;;  %7572 = vst [vmem:[%s13858_s17 + $0x850] sm:$0xff] %v10591_v31  ;;  %10612 = vpow2.f32 %v8705_v23  ;;  %v433_v31 = vld [vmem:[%s13832_s30 + $0x938] sm:$0xff]  ;;  %v8722_v36 = vmul.f32 -1.442695, %v432_v28 }
 0x262   : > { %v10595_v37 = vpop.eup %10594  ;;  %7573 = vst [vmem:[%s13858_s17 + $0x858] sm:$0xff] %v10593_v34  ;;  %10614 = vpow2.f32 %v8706_v26  ;;  %v434_v34 = vld [vmem:[%s13832_s30 + $0x940] sm:$0xff]  ;;  %v8723_v39 = vmul.f32 -1.442695, %v433_v31 }
 0x263   : > { %v10597_v40 = vpop.eup %10596  ;;  %7574 = vst [vmem:[%s13858_s17 + $0x860] sm:$0xff] %v10595_v37  ;;  %10616 = vpow2.f32 %v8707_v29  ;;  %v435_v37 = vld [vmem:[%s13832_s30 + $0x948] sm:$0xff] }
 0x264   : > { %v10599_v42 = vpop.eup %10598  ;;  %7575 = vst [vmem:[%s13858_s17 + $0x868] sm:$0xff] %v10597_v40  ;;  %10618 = vpow2.f32 %v8708_v32  ;;  %v436_v40 = vld [vmem:[%s13832_s30 + $0x950] sm:$0xff] }
 0x265   : > { %v10601_v44 = vpop.eup %10600  ;;  %7576 = vst [vmem:[%s13858_s17 + $0x870] sm:$0xff] %v10599_v42  ;;  %10620 = vpow2.f32 %v8709_v35  ;;  %v8724_v42 = vmul.f32 -1.442695, %v434_v34 }
 0x266   : > { %v10603_v46 = vpop.eup %10602  ;;  %7577 = vst [vmem:[%s13858_s17 + $0x878] sm:$0xff] %v10601_v44  ;;  %10622 = vpow2.f32 %v8710_v38  ;;  %v8725_v44 = vmul.f32 -1.442695, %v435_v37 }
 0x267   : > { %v10605_v47 = vpop.eup %10604  ;;  %7578 = vst [vmem:[%s13858_s17 + $0x880] sm:$0xff] %v10603_v46  ;;  %10624 = vpow2.f32 %v8711_v41  ;;  %v8726_v46 = vmul.f32 -1.442695, %v436_v40 }
 0x268   : > { %v10607_v48 = vpop.eup %10606  ;;  %v4507_v49 = vadd.f32 1.0, %v10605_v47  ;;  %10626 = vpow2.f32 %v8712_v43 }
 0x269   : > { %v10609_v50 = vpop.eup %10608  ;;  %v4508_v51 = vadd.f32 1.0, %v10607_v48  ;;  %10628 = vpow2.f32 %v8713_v45 }
 0x26a   : > { %v10611_v52 = vpop.eup %10610  ;;  %10630 = vrcp.f32 %v4507_v49  ;;  %v4509_v53 = vadd.f32 1.0, %v10609_v50 }
 0x26b   : > { %v10613_v54 = vpop.eup %10612  ;;  %10632 = vrcp.f32 %v4508_v51  ;;  %v4510_v55 = vadd.f32 1.0, %v10611_v52 }
 0x26c   : > { %v10615_v56 = vpop.eup %10614  ;;  %10634 = vrcp.f32 %v4509_v53  ;;  %v4511_v57 = vadd.f32 1.0, %v10613_v54 }
 0x26d   : > { %v10617_v58 = vpop.eup %10616  ;;  %10636 = vrcp.f32 %v4510_v55  ;;  %v4512_v59 = vadd.f32 1.0, %v10615_v56 }
 0x26e   : > { %v10619_v60 = vpop.eup %10618  ;;  %10638 = vrcp.f32 %v4511_v57  ;;  %v4513_v61 = vadd.f32 1.0, %v10617_v58 }
 0x26f   : > { %v10621_v62 = vpop.eup %10620  ;;  %10640 = vrcp.f32 %v4512_v59  ;;  %v4514_v63 = vadd.f32 1.0, %v10619_v60 }
 0x270   : > { %v10623_v0 = vpop.eup %10622  ;;  %10642 = vrcp.f32 %v4513_v61  ;;  %v4515_v1 = vadd.f32 1.0, %v10621_v62 }
 0x271   : > { %v10625_v3 = vpop.eup %10624  ;;  %10644 = vrcp.f32 %v4514_v63  ;;  %v4516_v4 = vadd.f32 1.0, %v10623_v0 }
 0x272   : > { %v10627_v6 = vpop.eup %10626  ;;  %10646 = vrcp.f32 %v4515_v1  ;;  %v4517_v7 = vadd.f32 1.0, %v10625_v3  ;;  %v437_v3 = vld [vmem:[%s13832_s30 + $0x958] sm:$0xff] }
 0x273   : > { %v10629_v9 = vpop.eup %10628  ;;  %10648 = vrcp.f32 %v4516_v4  ;;  %v4518_v10 = vadd.f32 1.0, %v10627_v6  ;;  %v438_v6 = vld [vmem:[%s13832_s30 + $0x960] sm:$0xff]  ;;  %v8727_v12 = vmul.f32 -1.442695, %v437_v3 }
 0x274   : > { %v10631_v13 = vpop.eup %10630  ;;  %10650 = vrcp.f32 %v4517_v7  ;;  %v4519_v14 = vadd.f32 1.0, %v10629_v9  ;;  %v439_v9 = vld [vmem:[%s13832_s30 + $0x968] sm:$0xff]  ;;  %v8728_v16 = vmul.f32 -1.442695, %v438_v6 }
 0x275   : > { %v10633_v17 = vpop.eup %10632  ;;  %7579 = vst [vmem:[%s13858_s17 + $0x888] sm:$0xff] %v10631_v13  ;;  %10652 = vrcp.f32 %v4518_v10  ;;  %v440_v13 = vld [vmem:[%s13832_s30 + $0x970] sm:$0xff]  ;;  %v8729_v19 = vmul.f32 -1.442695, %v439_v9 }
 0x276   : > { %v10635_v20 = vpop.eup %10634  ;;  %7580 = vst [vmem:[%s13858_s17 + $0x890] sm:$0xff] %v10633_v17  ;;  %10654 = vrcp.f32 %v4519_v14  ;;  %v441_v17 = vld [vmem:[%s13832_s30 + $0x978] sm:$0xff]  ;;  %v8730_v22 = vmul.f32 -1.442695, %v440_v13 }
 0x277   : > { %v10637_v23 = vpop.eup %10636  ;;  %7581 = vst [vmem:[%s13858_s17 + $0x898] sm:$0xff] %v10635_v20  ;;  %10656 = vpow2.f32 %v8714_v11  ;;  %v442_v20 = vld [vmem:[%s13832_s30 + $0x980] sm:$0xff]  ;;  %v8731_v25 = vmul.f32 -1.442695, %v441_v17 }
 0x278   : > { %v10639_v26 = vpop.eup %10638  ;;  %7582 = vst [vmem:[%s13858_s17 + $0x8a0] sm:$0xff] %v10637_v23  ;;  %10658 = vpow2.f32 %v8715_v15  ;;  %v443_v23 = vld [vmem:[%s13832_s30 + $0x988] sm:$0xff]  ;;  %v8732_v28 = vmul.f32 -1.442695, %v442_v20 }
 0x279   : > { %v10641_v29 = vpop.eup %10640  ;;  %7583 = vst [vmem:[%s13858_s17 + $0x8a8] sm:$0xff] %v10639_v26  ;;  %10660 = vpow2.f32 %v8716_v18  ;;  %v444_v26 = vld [vmem:[%s13832_s30 + $0x990] sm:$0xff]  ;;  %v8733_v31 = vmul.f32 -1.442695, %v443_v23 }
 0x27a   : > { %v10643_v32 = vpop.eup %10642  ;;  %7584 = vst [vmem:[%s13858_s17 + $0x8b0] sm:$0xff] %v10641_v29  ;;  %10662 = vpow2.f32 %v8717_v21  ;;  %v445_v29 = vld [vmem:[%s13832_s30 + $0x998] sm:$0xff]  ;;  %v8734_v34 = vmul.f32 -1.442695, %v444_v26 }
 0x27b   : > { %v10645_v35 = vpop.eup %10644  ;;  %7585 = vst [vmem:[%s13858_s17 + $0x8b8] sm:$0xff] %v10643_v32  ;;  %10664 = vpow2.f32 %v8718_v24  ;;  %v446_v32 = vld [vmem:[%s13832_s30 + $0x9a0] sm:$0xff]  ;;  %v8735_v37 = vmul.f32 -1.442695, %v445_v29 }
 0x27c   : > { %v10647_v38 = vpop.eup %10646  ;;  %7586 = vst [vmem:[%s13858_s17 + $0x8c0] sm:$0xff] %v10645_v35  ;;  %10666 = vpow2.f32 %v8719_v27  ;;  %v447_v35 = vld [vmem:[%s13832_s30 + $0x9a8] sm:$0xff]  ;;  %v8736_v40 = vmul.f32 -1.442695, %v446_v32 }
 0x27d   : > { %v10649_v41 = vpop.eup %10648  ;;  %7587 = vst [vmem:[%s13858_s17 + $0x8c8] sm:$0xff] %v10647_v38  ;;  %10668 = vpow2.f32 %v8720_v30  ;;  %v448_v38 = vld [vmem:[%s13832_s30 + $0x9b0] sm:$0xff] }
 0x27e   : > { %v10651_v43 = vpop.eup %10650  ;;  %7588 = vst [vmem:[%s13858_s17 + $0x8d0] sm:$0xff] %v10649_v41  ;;  %10670 = vpow2.f32 %v8721_v33  ;;  %v449_v41 = vld [vmem:[%s13832_s30 + $0x9b8] sm:$0xff] }
 0x27f   : > { %v10653_v45 = vpop.eup %10652  ;;  %7589 = vst [vmem:[%s13858_s17 + $0x8d8] sm:$0xff] %v10651_v43  ;;  %10672 = vpow2.f32 %v8722_v36  ;;  %v8737_v43 = vmul.f32 -1.442695, %v447_v35 }
 0x280   : > { %v10655_v47 = vpop.eup %10654  ;;  %7590 = vst [vmem:[%s13858_s17 + $0x8e0] sm:$0xff] %v10653_v45  ;;  %10674 = vpow2.f32 %v8723_v39  ;;  %v8738_v45 = vmul.f32 -1.442695, %v448_v38 }
 0x281   : > { %v10657_v48 = vpop.eup %10656  ;;  %7591 = vst [vmem:[%s13858_s17 + $0x8e8] sm:$0xff] %v10655_v47  ;;  %10676 = vpow2.f32 %v8724_v42  ;;  %v8739_v47 = vmul.f32 -1.442695, %v449_v41 }
 0x282   : > { %v10659_v49 = vpop.eup %10658  ;;  %v4520_v50 = vadd.f32 1.0, %v10657_v48  ;;  %10678 = vpow2.f32 %v8725_v44 }
 0x283   : > { %v10661_v51 = vpop.eup %10660  ;;  %v4521_v52 = vadd.f32 1.0, %v10659_v49  ;;  %10680 = vpow2.f32 %v8726_v46 }
 0x284   : > { %v10663_v53 = vpop.eup %10662  ;;  %10682 = vrcp.f32 %v4520_v50  ;;  %v4522_v54 = vadd.f32 1.0, %v10661_v51 }
 0x285   : > { %v10665_v55 = vpop.eup %10664  ;;  %10684 = vrcp.f32 %v4521_v52  ;;  %v4523_v56 = vadd.f32 1.0, %v10663_v53 }
 0x286   : > { %v10667_v57 = vpop.eup %10666  ;;  %10686 = vrcp.f32 %v4522_v54  ;;  %v4524_v58 = vadd.f32 1.0, %v10665_v55 }
 0x287   : > { %v10669_v59 = vpop.eup %10668  ;;  %10688 = vrcp.f32 %v4523_v56  ;;  %v4525_v60 = vadd.f32 1.0, %v10667_v57 }
 0x288   : > { %v10671_v61 = vpop.eup %10670  ;;  %10690 = vrcp.f32 %v4524_v58  ;;  %v4526_v62 = vadd.f32 1.0, %v10669_v59 }
 0x289   : > { %v10673_v63 = vpop.eup %10672  ;;  %10692 = vrcp.f32 %v4525_v60  ;;  %v4527_v0 = vadd.f32 1.0, %v10671_v61 }
 0x28a   : > { %v10675_v1 = vpop.eup %10674  ;;  %10694 = vrcp.f32 %v4526_v62  ;;  %v4528_v2 = vadd.f32 1.0, %v10673_v63 }
 0x28b   : > { %v10677_v4 = vpop.eup %10676  ;;  %10696 = vrcp.f32 %v4527_v0  ;;  %v4529_v5 = vadd.f32 1.0, %v10675_v1 }
 0x28c   : > { %v10679_v7 = vpop.eup %10678  ;;  %10698 = vrcp.f32 %v4528_v2  ;;  %v4530_v8 = vadd.f32 1.0, %v10677_v4  ;;  %v450_v4 = vld [vmem:[%s13832_s30 + $0x9c0] sm:$0xff] }
 0x28d   : > { %v10681_v10 = vpop.eup %10680  ;;  %10700 = vrcp.f32 %v4529_v5  ;;  %v4531_v11 = vadd.f32 1.0, %v10679_v7  ;;  %v451_v7 = vld [vmem:[%s13832_s30 + $0x9c8] sm:$0xff]  ;;  %v8740_v13 = vmul.f32 -1.442695, %v450_v4 }
 0x28e   : > { %v10683_v14 = vpop.eup %10682  ;;  %10702 = vrcp.f32 %v4530_v8  ;;  %v4532_v15 = vadd.f32 1.0, %v10681_v10  ;;  %v452_v10 = vld [vmem:[%s13832_s30 + $0x9d0] sm:$0xff]  ;;  %v8741_v17 = vmul.f32 -1.442695, %v451_v7 }
 0x28f   : > { %v10685_v18 = vpop.eup %10684  ;;  %7592 = vst [vmem:[%s13858_s17 + $0x8f0] sm:$0xff] %v10683_v14  ;;  %10704 = vrcp.f32 %v4531_v11  ;;  %v453_v14 = vld [vmem:[%s13832_s30 + $0x9d8] sm:$0xff]  ;;  %v8742_v20 = vmul.f32 -1.442695, %v452_v10 }
 0x290   : > { %v10687_v21 = vpop.eup %10686  ;;  %7593 = vst [vmem:[%s13858_s17 + $0x8f8] sm:$0xff] %v10685_v18  ;;  %10706 = vrcp.f32 %v4532_v15  ;;  %v454_v18 = vld [vmem:[%s13832_s30 + $0x9e0] sm:$0xff]  ;;  %v8743_v23 = vmul.f32 -1.442695, %v453_v14 }
 0x291   : > { %v10689_v24 = vpop.eup %10688  ;;  %7594 = vst [vmem:[%s13858_s17 + $0x900] sm:$0xff] %v10687_v21  ;;  %10708 = vpow2.f32 %v8727_v12  ;;  %v455_v21 = vld [vmem:[%s13832_s30 + $0x9e8] sm:$0xff]  ;;  %v8744_v26 = vmul.f32 -1.442695, %v454_v18 }
 0x292   : > { %v10691_v27 = vpop.eup %10690  ;;  %7595 = vst [vmem:[%s13858_s17 + $0x908] sm:$0xff] %v10689_v24  ;;  %10710 = vpow2.f32 %v8728_v16  ;;  %v456_v24 = vld [vmem:[%s13832_s30 + $0x9f0] sm:$0xff]  ;;  %v8745_v29 = vmul.f32 -1.442695, %v455_v21 }
 0x293   : > { %v10693_v30 = vpop.eup %10692  ;;  %7596 = vst [vmem:[%s13858_s17 + $0x910] sm:$0xff] %v10691_v27  ;;  %10712 = vpow2.f32 %v8729_v19  ;;  %v457_v27 = vld [vmem:[%s13832_s30 + $0x9f8] sm:$0xff]  ;;  %v8746_v32 = vmul.f32 -1.442695, %v456_v24 }
 0x294   : > { %v10695_v33 = vpop.eup %10694  ;;  %7597 = vst [vmem:[%s13858_s17 + $0x918] sm:$0xff] %v10693_v30  ;;  %10714 = vpow2.f32 %v8730_v22  ;;  %v458_v30 = vld [vmem:[%s13832_s30 + $0xa00] sm:$0xff]  ;;  %v8747_v35 = vmul.f32 -1.442695, %v457_v27 }
 0x295   : > { %v10697_v36 = vpop.eup %10696  ;;  %7598 = vst [vmem:[%s13858_s17 + $0x920] sm:$0xff] %v10695_v33  ;;  %10716 = vpow2.f32 %v8731_v25  ;;  %v459_v33 = vld [vmem:[%s13832_s30 + $0xa08] sm:$0xff]  ;;  %v8748_v38 = vmul.f32 -1.442695, %v458_v30 }
 0x296   : > { %v10699_v39 = vpop.eup %10698  ;;  %7599 = vst [vmem:[%s13858_s17 + $0x928] sm:$0xff] %v10697_v36  ;;  %10718 = vpow2.f32 %v8732_v28  ;;  %v460_v36 = vld [vmem:[%s13832_s30 + $0xa10] sm:$0xff]  ;;  %v8749_v41 = vmul.f32 -1.442695, %v459_v33 }
 0x297   : > { %v10701_v42 = vpop.eup %10700  ;;  %7600 = vst [vmem:[%s13858_s17 + $0x930] sm:$0xff] %v10699_v39  ;;  %10720 = vpow2.f32 %v8733_v31  ;;  %v461_v39 = vld [vmem:[%s13832_s30 + $0xa18] sm:$0xff] }
 0x298   : > { %v10703_v44 = vpop.eup %10702  ;;  %7601 = vst [vmem:[%s13858_s17 + $0x938] sm:$0xff] %v10701_v42  ;;  %10722 = vpow2.f32 %v8734_v34  ;;  %v462_v42 = vld [vmem:[%s13832_s30 + $0xa20] sm:$0xff] }
 0x299   : > { %v10705_v46 = vpop.eup %10704  ;;  %7602 = vst [vmem:[%s13858_s17 + $0x940] sm:$0xff] %v10703_v44  ;;  %10724 = vpow2.f32 %v8735_v37  ;;  %v8750_v44 = vmul.f32 -1.442695, %v460_v36 }
 0x29a   : > { %v10707_v48 = vpop.eup %10706  ;;  %7603 = vst [vmem:[%s13858_s17 + $0x948] sm:$0xff] %v10705_v46  ;;  %10726 = vpow2.f32 %v8736_v40  ;;  %v8751_v46 = vmul.f32 -1.442695, %v461_v39 }
 0x29b   : > { %v10709_v49 = vpop.eup %10708  ;;  %7604 = vst [vmem:[%s13858_s17 + $0x950] sm:$0xff] %v10707_v48  ;;  %10728 = vpow2.f32 %v8737_v43  ;;  %v8752_v48 = vmul.f32 -1.442695, %v462_v42 }
 0x29c   : > { %v10711_v50 = vpop.eup %10710  ;;  %v4533_v51 = vadd.f32 1.0, %v10709_v49  ;;  %10730 = vpow2.f32 %v8738_v45 }
 0x29d   : > { %v10713_v52 = vpop.eup %10712  ;;  %v4534_v53 = vadd.f32 1.0, %v10711_v50  ;;  %10732 = vpow2.f32 %v8739_v47 }
 0x29e   : > { %v10715_v54 = vpop.eup %10714  ;;  %10734 = vrcp.f32 %v4533_v51  ;;  %v4535_v55 = vadd.f32 1.0, %v10713_v52 }
 0x29f   : > { %v10717_v56 = vpop.eup %10716  ;;  %10736 = vrcp.f32 %v4534_v53  ;;  %v4536_v57 = vadd.f32 1.0, %v10715_v54 }
 0x2a0   : > { %v10719_v58 = vpop.eup %10718  ;;  %10738 = vrcp.f32 %v4535_v55  ;;  %v4537_v59 = vadd.f32 1.0, %v10717_v56 }
 0x2a1   : > { %v10721_v60 = vpop.eup %10720  ;;  %10740 = vrcp.f32 %v4536_v57  ;;  %v4538_v61 = vadd.f32 1.0, %v10719_v58 }
 0x2a2   : > { %v10723_v62 = vpop.eup %10722  ;;  %10742 = vrcp.f32 %v4537_v59  ;;  %v4539_v63 = vadd.f32 1.0, %v10721_v60 }
 0x2a3   : > { %v10725_v0 = vpop.eup %10724  ;;  %10744 = vrcp.f32 %v4538_v61  ;;  %v4540_v1 = vadd.f32 1.0, %v10723_v62 }
 0x2a4   : > { %v10727_v2 = vpop.eup %10726  ;;  %10746 = vrcp.f32 %v4539_v63  ;;  %v4541_v3 = vadd.f32 1.0, %v10725_v0 }
 0x2a5   : > { %v10729_v5 = vpop.eup %10728  ;;  %10748 = vrcp.f32 %v4540_v1  ;;  %v4542_v6 = vadd.f32 1.0, %v10727_v2 }
 0x2a6   : > { %v10731_v8 = vpop.eup %10730  ;;  %10750 = vrcp.f32 %v4541_v3  ;;  %v4543_v9 = vadd.f32 1.0, %v10729_v5  ;;  %v463_v5 = vld [vmem:[%s13832_s30 + $0xa28] sm:$0xff] }
 0x2a7   : > { %v10733_v11 = vpop.eup %10732  ;;  %10752 = vrcp.f32 %v4542_v6  ;;  %v4544_v12 = vadd.f32 1.0, %v10731_v8  ;;  %v464_v8 = vld [vmem:[%s13832_s30 + $0xa30] sm:$0xff]  ;;  %v8753_v14 = vmul.f32 -1.442695, %v463_v5 }
 0x2a8   : > { %v10735_v15 = vpop.eup %10734  ;;  %10754 = vrcp.f32 %v4543_v9  ;;  %v4545_v16 = vadd.f32 1.0, %v10733_v11  ;;  %v465_v11 = vld [vmem:[%s13832_s30 + $0xa38] sm:$0xff]  ;;  %v8754_v18 = vmul.f32 -1.442695, %v464_v8 }
 0x2a9   : > { %v10737_v19 = vpop.eup %10736  ;;  %7605 = vst [vmem:[%s13858_s17 + $0x958] sm:$0xff] %v10735_v15  ;;  %10756 = vrcp.f32 %v4544_v12  ;;  %v466_v15 = vld [vmem:[%s13832_s30 + $0xa40] sm:$0xff]  ;;  %v8755_v21 = vmul.f32 -1.442695, %v465_v11 }
 0x2aa   : > { %v10739_v22 = vpop.eup %10738  ;;  %7606 = vst [vmem:[%s13858_s17 + $0x960] sm:$0xff] %v10737_v19  ;;  %10758 = vrcp.f32 %v4545_v16  ;;  %v467_v19 = vld [vmem:[%s13832_s30 + $0xa48] sm:$0xff]  ;;  %v8756_v24 = vmul.f32 -1.442695, %v466_v15 }
 0x2ab   : > { %v10741_v25 = vpop.eup %10740  ;;  %7607 = vst [vmem:[%s13858_s17 + $0x968] sm:$0xff] %v10739_v22  ;;  %10760 = vpow2.f32 %v8740_v13  ;;  %v468_v22 = vld [vmem:[%s13832_s30 + $0xa50] sm:$0xff]  ;;  %v8757_v27 = vmul.f32 -1.442695, %v467_v19 }
 0x2ac   : > { %v10743_v28 = vpop.eup %10742  ;;  %7608 = vst [vmem:[%s13858_s17 + $0x970] sm:$0xff] %v10741_v25  ;;  %10762 = vpow2.f32 %v8741_v17  ;;  %v469_v25 = vld [vmem:[%s13832_s30 + $0xa58] sm:$0xff]  ;;  %v8758_v30 = vmul.f32 -1.442695, %v468_v22 }
 0x2ad   : > { %v10745_v31 = vpop.eup %10744  ;;  %7609 = vst [vmem:[%s13858_s17 + $0x978] sm:$0xff] %v10743_v28  ;;  %10764 = vpow2.f32 %v8742_v20  ;;  %v470_v28 = vld [vmem:[%s13832_s30 + $0xa60] sm:$0xff]  ;;  %v8759_v33 = vmul.f32 -1.442695, %v469_v25 }
 0x2ae   : > { %v10747_v34 = vpop.eup %10746  ;;  %7610 = vst [vmem:[%s13858_s17 + $0x980] sm:$0xff] %v10745_v31  ;;  %10766 = vpow2.f32 %v8743_v23  ;;  %v471_v31 = vld [vmem:[%s13832_s30 + $0xa68] sm:$0xff]  ;;  %v8760_v36 = vmul.f32 -1.442695, %v470_v28 }
 0x2af   : > { %v10749_v37 = vpop.eup %10748  ;;  %7611 = vst [vmem:[%s13858_s17 + $0x988] sm:$0xff] %v10747_v34  ;;  %10768 = vpow2.f32 %v8744_v26  ;;  %v472_v34 = vld [vmem:[%s13832_s30 + $0xa70] sm:$0xff]  ;;  %v8761_v39 = vmul.f32 -1.442695, %v471_v31 }
 0x2b0   : > { %v10751_v40 = vpop.eup %10750  ;;  %7612 = vst [vmem:[%s13858_s17 + $0x990] sm:$0xff] %v10749_v37  ;;  %10770 = vpow2.f32 %v8745_v29  ;;  %v473_v37 = vld [vmem:[%s13832_s30 + $0xa78] sm:$0xff]  ;;  %v8762_v42 = vmul.f32 -1.442695, %v472_v34 }
 0x2b1   : > { %v10753_v43 = vpop.eup %10752  ;;  %7613 = vst [vmem:[%s13858_s17 + $0x998] sm:$0xff] %v10751_v40  ;;  %10772 = vpow2.f32 %v8746_v32  ;;  %v474_v40 = vld [vmem:[%s13832_s30 + $0xa80] sm:$0xff] }
 0x2b2   : > { %v10755_v45 = vpop.eup %10754  ;;  %7614 = vst [vmem:[%s13858_s17 + $0x9a0] sm:$0xff] %v10753_v43  ;;  %10774 = vpow2.f32 %v8747_v35  ;;  %v475_v43 = vld [vmem:[%s13832_s30 + $0xa88] sm:$0xff] }
 0x2b3   : > { %v10757_v47 = vpop.eup %10756  ;;  %7615 = vst [vmem:[%s13858_s17 + $0x9a8] sm:$0xff] %v10755_v45  ;;  %10776 = vpow2.f32 %v8748_v38  ;;  %v8763_v45 = vmul.f32 -1.442695, %v473_v37 }
 0x2b4   : > { %v10759_v49 = vpop.eup %10758  ;;  %7616 = vst [vmem:[%s13858_s17 + $0x9b0] sm:$0xff] %v10757_v47  ;;  %10778 = vpow2.f32 %v8749_v41  ;;  %v8764_v47 = vmul.f32 -1.442695, %v474_v40 }
 0x2b5   : > { %v10761_v50 = vpop.eup %10760  ;;  %7617 = vst [vmem:[%s13858_s17 + $0x9b8] sm:$0xff] %v10759_v49  ;;  %10780 = vpow2.f32 %v8750_v44  ;;  %v8765_v49 = vmul.f32 -1.442695, %v475_v43 }
 0x2b6   : > { %v10763_v51 = vpop.eup %10762  ;;  %v4546_v52 = vadd.f32 1.0, %v10761_v50  ;;  %10782 = vpow2.f32 %v8751_v46 }
 0x2b7   : > { %v10765_v53 = vpop.eup %10764  ;;  %v4547_v54 = vadd.f32 1.0, %v10763_v51  ;;  %10784 = vpow2.f32 %v8752_v48 }
 0x2b8   : > { %v10767_v55 = vpop.eup %10766  ;;  %10786 = vrcp.f32 %v4546_v52  ;;  %v4548_v56 = vadd.f32 1.0, %v10765_v53 }
 0x2b9   : > { %v10769_v57 = vpop.eup %10768  ;;  %10788 = vrcp.f32 %v4547_v54  ;;  %v4549_v58 = vadd.f32 1.0, %v10767_v55 }
 0x2ba   : > { %v10771_v59 = vpop.eup %10770  ;;  %10790 = vrcp.f32 %v4548_v56  ;;  %v4550_v60 = vadd.f32 1.0, %v10769_v57 }
 0x2bb   : > { %v10773_v61 = vpop.eup %10772  ;;  %10792 = vrcp.f32 %v4549_v58  ;;  %v4551_v62 = vadd.f32 1.0, %v10771_v59 }
 0x2bc   : > { %v10775_v63 = vpop.eup %10774  ;;  %10794 = vrcp.f32 %v4550_v60  ;;  %v4552_v0 = vadd.f32 1.0, %v10773_v61 }
 0x2bd   : > { %v10777_v1 = vpop.eup %10776  ;;  %10796 = vrcp.f32 %v4551_v62  ;;  %v4553_v2 = vadd.f32 1.0, %v10775_v63 }
 0x2be   : > { %v10779_v3 = vpop.eup %10778  ;;  %10798 = vrcp.f32 %v4552_v0  ;;  %v4554_v4 = vadd.f32 1.0, %v10777_v1 }
 0x2bf   : > { %v10781_v6 = vpop.eup %10780  ;;  %10800 = vrcp.f32 %v4553_v2  ;;  %v4555_v7 = vadd.f32 1.0, %v10779_v3 }
 0x2c0   : > { %v10783_v9 = vpop.eup %10782  ;;  %10802 = vrcp.f32 %v4554_v4  ;;  %v4556_v10 = vadd.f32 1.0, %v10781_v6  ;;  %v476_v6 = vld [vmem:[%s13832_s30 + $0xa90] sm:$0xff] }
 0x2c1   : > { %v10785_v12 = vpop.eup %10784  ;;  %10804 = vrcp.f32 %v4555_v7  ;;  %v4557_v13 = vadd.f32 1.0, %v10783_v9  ;;  %v477_v9 = vld [vmem:[%s13832_s30 + $0xa98] sm:$0xff]  ;;  %v8766_v15 = vmul.f32 -1.442695, %v476_v6 }
 0x2c2   : > { %v10787_v16 = vpop.eup %10786  ;;  %10806 = vrcp.f32 %v4556_v10  ;;  %v4558_v17 = vadd.f32 1.0, %v10785_v12  ;;  %v478_v12 = vld [vmem:[%s13832_s30 + $0xaa0] sm:$0xff]  ;;  %v8767_v19 = vmul.f32 -1.442695, %v477_v9 }
 0x2c3   : > { %v10789_v20 = vpop.eup %10788  ;;  %7618 = vst [vmem:[%s13858_s17 + $0x9c0] sm:$0xff] %v10787_v16  ;;  %10808 = vrcp.f32 %v4557_v13  ;;  %v479_v16 = vld [vmem:[%s13832_s30 + $0xaa8] sm:$0xff]  ;;  %v8768_v22 = vmul.f32 -1.442695, %v478_v12 }
 0x2c4   : > { %v10791_v23 = vpop.eup %10790  ;;  %7619 = vst [vmem:[%s13858_s17 + $0x9c8] sm:$0xff] %v10789_v20  ;;  %10810 = vrcp.f32 %v4558_v17  ;;  %v480_v20 = vld [vmem:[%s13832_s30 + $0xab0] sm:$0xff]  ;;  %v8769_v25 = vmul.f32 -1.442695, %v479_v16 }
 0x2c5   : > { %v10793_v26 = vpop.eup %10792  ;;  %7620 = vst [vmem:[%s13858_s17 + $0x9d0] sm:$0xff] %v10791_v23  ;;  %10812 = vpow2.f32 %v8753_v14  ;;  %v481_v23 = vld [vmem:[%s13832_s30 + $0xab8] sm:$0xff]  ;;  %v8770_v28 = vmul.f32 -1.442695, %v480_v20 }
 0x2c6   : > { %v10795_v29 = vpop.eup %10794  ;;  %7621 = vst [vmem:[%s13858_s17 + $0x9d8] sm:$0xff] %v10793_v26  ;;  %10814 = vpow2.f32 %v8754_v18  ;;  %v482_v26 = vld [vmem:[%s13832_s30 + $0xac0] sm:$0xff]  ;;  %v8771_v31 = vmul.f32 -1.442695, %v481_v23 }
 0x2c7   : > { %v10797_v32 = vpop.eup %10796  ;;  %7622 = vst [vmem:[%s13858_s17 + $0x9e0] sm:$0xff] %v10795_v29  ;;  %10816 = vpow2.f32 %v8755_v21  ;;  %v483_v29 = vld [vmem:[%s13832_s30 + $0xac8] sm:$0xff]  ;;  %v8772_v34 = vmul.f32 -1.442695, %v482_v26 }
 0x2c8   : > { %v10799_v35 = vpop.eup %10798  ;;  %7623 = vst [vmem:[%s13858_s17 + $0x9e8] sm:$0xff] %v10797_v32  ;;  %10818 = vpow2.f32 %v8756_v24  ;;  %v484_v32 = vld [vmem:[%s13832_s30 + $0xad0] sm:$0xff]  ;;  %v8773_v37 = vmul.f32 -1.442695, %v483_v29 }
 0x2c9   : > { %v10801_v38 = vpop.eup %10800  ;;  %7624 = vst [vmem:[%s13858_s17 + $0x9f0] sm:$0xff] %v10799_v35  ;;  %10820 = vpow2.f32 %v8757_v27  ;;  %v485_v35 = vld [vmem:[%s13832_s30 + $0xad8] sm:$0xff]  ;;  %v8774_v40 = vmul.f32 -1.442695, %v484_v32 }
 0x2ca   : > { %v10803_v41 = vpop.eup %10802  ;;  %7625 = vst [vmem:[%s13858_s17 + $0x9f8] sm:$0xff] %v10801_v38  ;;  %10822 = vpow2.f32 %v8758_v30  ;;  %v486_v38 = vld [vmem:[%s13832_s30 + $0xae0] sm:$0xff]  ;;  %v8775_v43 = vmul.f32 -1.442695, %v485_v35 }
 0x2cb   : > { %v10805_v44 = vpop.eup %10804  ;;  %7626 = vst [vmem:[%s13858_s17 + $0xa00] sm:$0xff] %v10803_v41  ;;  %10824 = vpow2.f32 %v8759_v33  ;;  %v487_v41 = vld [vmem:[%s13832_s30 + $0xae8] sm:$0xff] }
 0x2cc   : > { %v10807_v46 = vpop.eup %10806  ;;  %7627 = vst [vmem:[%s13858_s17 + $0xa08] sm:$0xff] %v10805_v44  ;;  %10826 = vpow2.f32 %v8760_v36  ;;  %v488_v44 = vld [vmem:[%s13832_s30 + $0xaf0] sm:$0xff] }
 0x2cd   : > { %v10809_v48 = vpop.eup %10808  ;;  %7628 = vst [vmem:[%s13858_s17 + $0xa10] sm:$0xff] %v10807_v46  ;;  %10828 = vpow2.f32 %v8761_v39  ;;  %v8776_v46 = vmul.f32 -1.442695, %v486_v38 }
 0x2ce   : > { %v10811_v50 = vpop.eup %10810  ;;  %7629 = vst [vmem:[%s13858_s17 + $0xa18] sm:$0xff] %v10809_v48  ;;  %10830 = vpow2.f32 %v8762_v42  ;;  %v8777_v48 = vmul.f32 -1.442695, %v487_v41 }
 0x2cf   : > { %v10813_v51 = vpop.eup %10812  ;;  %7630 = vst [vmem:[%s13858_s17 + $0xa20] sm:$0xff] %v10811_v50  ;;  %10832 = vpow2.f32 %v8763_v45  ;;  %v8778_v50 = vmul.f32 -1.442695, %v488_v44 }
 0x2d0   : > { %v10815_v52 = vpop.eup %10814  ;;  %v4559_v53 = vadd.f32 1.0, %v10813_v51  ;;  %10834 = vpow2.f32 %v8764_v47 }
 0x2d1   : > { %v10817_v54 = vpop.eup %10816  ;;  %v4560_v55 = vadd.f32 1.0, %v10815_v52  ;;  %10836 = vpow2.f32 %v8765_v49 }
 0x2d2   : > { %v10819_v56 = vpop.eup %10818  ;;  %10838 = vrcp.f32 %v4559_v53  ;;  %v4561_v57 = vadd.f32 1.0, %v10817_v54 }
 0x2d3   : > { %v10821_v58 = vpop.eup %10820  ;;  %10840 = vrcp.f32 %v4560_v55  ;;  %v4562_v59 = vadd.f32 1.0, %v10819_v56 }
 0x2d4   : > { %v10823_v60 = vpop.eup %10822  ;;  %10842 = vrcp.f32 %v4561_v57  ;;  %v4563_v61 = vadd.f32 1.0, %v10821_v58 }
 0x2d5   : > { %v10825_v62 = vpop.eup %10824  ;;  %10844 = vrcp.f32 %v4562_v59  ;;  %v4564_v63 = vadd.f32 1.0, %v10823_v60 }
 0x2d6   : > { %v10827_v0 = vpop.eup %10826  ;;  %10846 = vrcp.f32 %v4563_v61  ;;  %v4565_v1 = vadd.f32 1.0, %v10825_v62 }
 0x2d7   : > { %v10829_v2 = vpop.eup %10828  ;;  %10848 = vrcp.f32 %v4564_v63  ;;  %v4566_v3 = vadd.f32 1.0, %v10827_v0 }
 0x2d8   : > { %v10831_v4 = vpop.eup %10830  ;;  %10850 = vrcp.f32 %v4565_v1  ;;  %v4567_v5 = vadd.f32 1.0, %v10829_v2 }
 0x2d9   : > { %v10833_v7 = vpop.eup %10832  ;;  %10852 = vrcp.f32 %v4566_v3  ;;  %v4568_v8 = vadd.f32 1.0, %v10831_v4 }
 0x2da   : > { %v10835_v10 = vpop.eup %10834  ;;  %10854 = vrcp.f32 %v4567_v5  ;;  %v4569_v11 = vadd.f32 1.0, %v10833_v7  ;;  %v489_v7 = vld [vmem:[%s13832_s30 + $0xaf8] sm:$0xff] }
 0x2db   : > { %v10837_v13 = vpop.eup %10836  ;;  %10856 = vrcp.f32 %v4568_v8  ;;  %v4570_v14 = vadd.f32 1.0, %v10835_v10  ;;  %v490_v10 = vld [vmem:[%s13832_s30 + $0xb00] sm:$0xff]  ;;  %v8779_v16 = vmul.f32 -1.442695, %v489_v7 }
 0x2dc   : > { %v10839_v17 = vpop.eup %10838  ;;  %10858 = vrcp.f32 %v4569_v11  ;;  %v4571_v18 = vadd.f32 1.0, %v10837_v13  ;;  %v491_v13 = vld [vmem:[%s13832_s30 + $0xb08] sm:$0xff]  ;;  %v8780_v20 = vmul.f32 -1.442695, %v490_v10 }
 0x2dd   : > { %v10841_v21 = vpop.eup %10840  ;;  %7631 = vst [vmem:[%s13858_s17 + $0xa28] sm:$0xff] %v10839_v17  ;;  %10860 = vrcp.f32 %v4570_v14  ;;  %v492_v17 = vld [vmem:[%s13832_s30 + $0xb10] sm:$0xff]  ;;  %v8781_v23 = vmul.f32 -1.442695, %v491_v13 }
 0x2de   : > { %v10843_v24 = vpop.eup %10842  ;;  %7632 = vst [vmem:[%s13858_s17 + $0xa30] sm:$0xff] %v10841_v21  ;;  %10862 = vrcp.f32 %v4571_v18  ;;  %v493_v21 = vld [vmem:[%s13832_s30 + $0xb18] sm:$0xff]  ;;  %v8782_v26 = vmul.f32 -1.442695, %v492_v17 }
 0x2df   : > { %v10845_v27 = vpop.eup %10844  ;;  %7633 = vst [vmem:[%s13858_s17 + $0xa38] sm:$0xff] %v10843_v24  ;;  %10864 = vpow2.f32 %v8766_v15  ;;  %v494_v24 = vld [vmem:[%s13832_s30 + $0xb20] sm:$0xff]  ;;  %v8783_v29 = vmul.f32 -1.442695, %v493_v21 }
 0x2e0   : > { %v10847_v30 = vpop.eup %10846  ;;  %7634 = vst [vmem:[%s13858_s17 + $0xa40] sm:$0xff] %v10845_v27  ;;  %10866 = vpow2.f32 %v8767_v19  ;;  %v495_v27 = vld [vmem:[%s13832_s30 + $0xb28] sm:$0xff]  ;;  %v8784_v32 = vmul.f32 -1.442695, %v494_v24 }
 0x2e1   : > { %v10849_v33 = vpop.eup %10848  ;;  %7635 = vst [vmem:[%s13858_s17 + $0xa48] sm:$0xff] %v10847_v30  ;;  %10868 = vpow2.f32 %v8768_v22  ;;  %v496_v30 = vld [vmem:[%s13832_s30 + $0xb30] sm:$0xff]  ;;  %v8785_v35 = vmul.f32 -1.442695, %v495_v27 }
 0x2e2   : > { %v10851_v36 = vpop.eup %10850  ;;  %7636 = vst [vmem:[%s13858_s17 + $0xa50] sm:$0xff] %v10849_v33  ;;  %10870 = vpow2.f32 %v8769_v25  ;;  %v497_v33 = vld [vmem:[%s13832_s30 + $0xb38] sm:$0xff]  ;;  %v8786_v38 = vmul.f32 -1.442695, %v496_v30 }
 0x2e3   : > { %v10853_v39 = vpop.eup %10852  ;;  %7637 = vst [vmem:[%s13858_s17 + $0xa58] sm:$0xff] %v10851_v36  ;;  %10872 = vpow2.f32 %v8770_v28  ;;  %v498_v36 = vld [vmem:[%s13832_s30 + $0xb40] sm:$0xff]  ;;  %v8787_v41 = vmul.f32 -1.442695, %v497_v33 }
 0x2e4   : > { %v10855_v42 = vpop.eup %10854  ;;  %7638 = vst [vmem:[%s13858_s17 + $0xa60] sm:$0xff] %v10853_v39  ;;  %10874 = vpow2.f32 %v8771_v31  ;;  %v499_v39 = vld [vmem:[%s13832_s30 + $0xb48] sm:$0xff]  ;;  %v8788_v44 = vmul.f32 -1.442695, %v498_v36 }
 0x2e5   : > { %v10857_v45 = vpop.eup %10856  ;;  %7639 = vst [vmem:[%s13858_s17 + $0xa68] sm:$0xff] %v10855_v42  ;;  %10876 = vpow2.f32 %v8772_v34  ;;  %v500_v42 = vld [vmem:[%s13832_s30 + $0xb50] sm:$0xff] }
 0x2e6   : > { %v10859_v47 = vpop.eup %10858  ;;  %7640 = vst [vmem:[%s13858_s17 + $0xa70] sm:$0xff] %v10857_v45  ;;  %10878 = vpow2.f32 %v8773_v37  ;;  %v501_v45 = vld [vmem:[%s13832_s30 + $0xb58] sm:$0xff] }
 0x2e7   : > { %v10861_v49 = vpop.eup %10860  ;;  %7641 = vst [vmem:[%s13858_s17 + $0xa78] sm:$0xff] %v10859_v47  ;;  %10880 = vpow2.f32 %v8774_v40  ;;  %v8789_v47 = vmul.f32 -1.442695, %v499_v39 }
 0x2e8   : > { %v10863_v51 = vpop.eup %10862  ;;  %7642 = vst [vmem:[%s13858_s17 + $0xa80] sm:$0xff] %v10861_v49  ;;  %10882 = vpow2.f32 %v8775_v43  ;;  %v8790_v49 = vmul.f32 -1.442695, %v500_v42 }
 0x2e9   : > { %v10865_v52 = vpop.eup %10864  ;;  %7643 = vst [vmem:[%s13858_s17 + $0xa88] sm:$0xff] %v10863_v51  ;;  %10884 = vpow2.f32 %v8776_v46  ;;  %v8791_v51 = vmul.f32 -1.442695, %v501_v45 }
 0x2ea   : > { %v10867_v53 = vpop.eup %10866  ;;  %v4572_v54 = vadd.f32 1.0, %v10865_v52  ;;  %10886 = vpow2.f32 %v8777_v48 }
 0x2eb   : > { %v10869_v55 = vpop.eup %10868  ;;  %v4573_v56 = vadd.f32 1.0, %v10867_v53  ;;  %10888 = vpow2.f32 %v8778_v50 }
 0x2ec   : > { %v10871_v57 = vpop.eup %10870  ;;  %10890 = vrcp.f32 %v4572_v54  ;;  %v4574_v58 = vadd.f32 1.0, %v10869_v55 }
 0x2ed   : > { %v10873_v59 = vpop.eup %10872  ;;  %10892 = vrcp.f32 %v4573_v56  ;;  %v4575_v60 = vadd.f32 1.0, %v10871_v57 }
 0x2ee   : > { %v10875_v61 = vpop.eup %10874  ;;  %10894 = vrcp.f32 %v4574_v58  ;;  %v4576_v62 = vadd.f32 1.0, %v10873_v59 }
 0x2ef   : > { %v10877_v63 = vpop.eup %10876  ;;  %10896 = vrcp.f32 %v4575_v60  ;;  %v4577_v0 = vadd.f32 1.0, %v10875_v61 }
 0x2f0   : > { %v10879_v1 = vpop.eup %10878  ;;  %10898 = vrcp.f32 %v4576_v62  ;;  %v4578_v2 = vadd.f32 1.0, %v10877_v63 }
 0x2f1   : > { %v10881_v3 = vpop.eup %10880  ;;  %10900 = vrcp.f32 %v4577_v0  ;;  %v4579_v4 = vadd.f32 1.0, %v10879_v1 }
 0x2f2   : > { %v10883_v5 = vpop.eup %10882  ;;  %10902 = vrcp.f32 %v4578_v2  ;;  %v4580_v6 = vadd.f32 1.0, %v10881_v3 }
 0x2f3   : > { %v10885_v8 = vpop.eup %10884  ;;  %10904 = vrcp.f32 %v4579_v4  ;;  %v4581_v9 = vadd.f32 1.0, %v10883_v5 }
 0x2f4   : > { %v10887_v11 = vpop.eup %10886  ;;  %10906 = vrcp.f32 %v4580_v6  ;;  %v4582_v12 = vadd.f32 1.0, %v10885_v8  ;;  %v502_v8 = vld [vmem:[%s13832_s30 + $0xb60] sm:$0xff] }
 0x2f5   : > { %v10889_v14 = vpop.eup %10888  ;;  %10908 = vrcp.f32 %v4581_v9  ;;  %v4583_v15 = vadd.f32 1.0, %v10887_v11  ;;  %v503_v11 = vld [vmem:[%s13832_s30 + $0xb68] sm:$0xff]  ;;  %v8792_v17 = vmul.f32 -1.442695, %v502_v8 }
 0x2f6   : > { %v10891_v18 = vpop.eup %10890  ;;  %10910 = vrcp.f32 %v4582_v12  ;;  %v4584_v19 = vadd.f32 1.0, %v10889_v14  ;;  %v504_v14 = vld [vmem:[%s13832_s30 + $0xb70] sm:$0xff]  ;;  %v8793_v21 = vmul.f32 -1.442695, %v503_v11 }
 0x2f7   : > { %v10893_v22 = vpop.eup %10892  ;;  %7644 = vst [vmem:[%s13858_s17 + $0xa90] sm:$0xff] %v10891_v18  ;;  %10912 = vrcp.f32 %v4583_v15  ;;  %v505_v18 = vld [vmem:[%s13832_s30 + $0xb78] sm:$0xff]  ;;  %v8794_v24 = vmul.f32 -1.442695, %v504_v14 }
 0x2f8   : > { %v10895_v25 = vpop.eup %10894  ;;  %7645 = vst [vmem:[%s13858_s17 + $0xa98] sm:$0xff] %v10893_v22  ;;  %10914 = vrcp.f32 %v4584_v19  ;;  %v506_v22 = vld [vmem:[%s13832_s30 + $0xb80] sm:$0xff]  ;;  %v8795_v27 = vmul.f32 -1.442695, %v505_v18 }
 0x2f9   : > { %v10897_v28 = vpop.eup %10896  ;;  %7646 = vst [vmem:[%s13858_s17 + $0xaa0] sm:$0xff] %v10895_v25  ;;  %10916 = vpow2.f32 %v8779_v16  ;;  %v507_v25 = vld [vmem:[%s13832_s30 + $0xb88] sm:$0xff]  ;;  %v8796_v30 = vmul.f32 -1.442695, %v506_v22 }
 0x2fa   : > { %v10899_v31 = vpop.eup %10898  ;;  %7647 = vst [vmem:[%s13858_s17 + $0xaa8] sm:$0xff] %v10897_v28  ;;  %10918 = vpow2.f32 %v8780_v20  ;;  %v508_v28 = vld [vmem:[%s13832_s30 + $0xb90] sm:$0xff]  ;;  %v8797_v33 = vmul.f32 -1.442695, %v507_v25 }
 0x2fb   : > { %v10901_v34 = vpop.eup %10900  ;;  %7648 = vst [vmem:[%s13858_s17 + $0xab0] sm:$0xff] %v10899_v31  ;;  %10920 = vpow2.f32 %v8781_v23  ;;  %v509_v31 = vld [vmem:[%s13832_s30 + $0xb98] sm:$0xff]  ;;  %v8798_v36 = vmul.f32 -1.442695, %v508_v28 }
 0x2fc   : > { %v10903_v37 = vpop.eup %10902  ;;  %7649 = vst [vmem:[%s13858_s17 + $0xab8] sm:$0xff] %v10901_v34  ;;  %10922 = vpow2.f32 %v8782_v26  ;;  %v510_v34 = vld [vmem:[%s13832_s30 + $0xba0] sm:$0xff]  ;;  %v8799_v39 = vmul.f32 -1.442695, %v509_v31 }
 0x2fd   : > { %v10905_v40 = vpop.eup %10904  ;;  %7650 = vst [vmem:[%s13858_s17 + $0xac0] sm:$0xff] %v10903_v37  ;;  %10924 = vpow2.f32 %v8783_v29  ;;  %v511_v37 = vld [vmem:[%s13832_s30 + $0xba8] sm:$0xff]  ;;  %v8800_v42 = vmul.f32 -1.442695, %v510_v34 }
 0x2fe   : > { %v10907_v43 = vpop.eup %10906  ;;  %7651 = vst [vmem:[%s13858_s17 + $0xac8] sm:$0xff] %v10905_v40  ;;  %10926 = vpow2.f32 %v8784_v32  ;;  %v512_v40 = vld [vmem:[%s13832_s30 + $0xbb0] sm:$0xff]  ;;  %v8801_v45 = vmul.f32 -1.442695, %v511_v37 }
 0x2ff   : > { %v10909_v46 = vpop.eup %10908  ;;  %7652 = vst [vmem:[%s13858_s17 + $0xad0] sm:$0xff] %v10907_v43  ;;  %10928 = vpow2.f32 %v8785_v35  ;;  %v513_v43 = vld [vmem:[%s13832_s30 + $0xbb8] sm:$0xff] }
 0x300   : > { %v10911_v48 = vpop.eup %10910  ;;  %7653 = vst [vmem:[%s13858_s17 + $0xad8] sm:$0xff] %v10909_v46  ;;  %10930 = vpow2.f32 %v8786_v38  ;;  %v514_v46 = vld [vmem:[%s13832_s30 + $0xbc0] sm:$0xff] }
 0x301   : > { %v10913_v50 = vpop.eup %10912  ;;  %7654 = vst [vmem:[%s13858_s17 + $0xae0] sm:$0xff] %v10911_v48  ;;  %10932 = vpow2.f32 %v8787_v41  ;;  %v8802_v48 = vmul.f32 -1.442695, %v512_v40 }
 0x302   : > { %v10915_v52 = vpop.eup %10914  ;;  %7655 = vst [vmem:[%s13858_s17 + $0xae8] sm:$0xff] %v10913_v50  ;;  %10934 = vpow2.f32 %v8788_v44  ;;  %v8803_v50 = vmul.f32 -1.442695, %v513_v43 }
 0x303   : > { %v10917_v53 = vpop.eup %10916  ;;  %7656 = vst [vmem:[%s13858_s17 + $0xaf0] sm:$0xff] %v10915_v52  ;;  %10936 = vpow2.f32 %v8789_v47  ;;  %v8804_v52 = vmul.f32 -1.442695, %v514_v46 }
 0x304   : > { %v10919_v54 = vpop.eup %10918  ;;  %v4585_v55 = vadd.f32 1.0, %v10917_v53  ;;  %10938 = vpow2.f32 %v8790_v49 }
 0x305   : > { %v10921_v56 = vpop.eup %10920  ;;  %v4586_v57 = vadd.f32 1.0, %v10919_v54  ;;  %10940 = vpow2.f32 %v8791_v51 }
 0x306   : > { %v10923_v58 = vpop.eup %10922  ;;  %10942 = vrcp.f32 %v4585_v55  ;;  %v4587_v59 = vadd.f32 1.0, %v10921_v56 }
 0x307   : > { %v10925_v60 = vpop.eup %10924  ;;  %10944 = vrcp.f32 %v4586_v57  ;;  %v4588_v61 = vadd.f32 1.0, %v10923_v58 }
 0x308   : > { %v10927_v62 = vpop.eup %10926  ;;  %10946 = vrcp.f32 %v4587_v59  ;;  %v4589_v63 = vadd.f32 1.0, %v10925_v60 }
 0x309   : > { %v10929_v0 = vpop.eup %10928  ;;  %10948 = vrcp.f32 %v4588_v61  ;;  %v4590_v1 = vadd.f32 1.0, %v10927_v62 }
 0x30a   : > { %v10931_v2 = vpop.eup %10930  ;;  %10950 = vrcp.f32 %v4589_v63  ;;  %v4591_v3 = vadd.f32 1.0, %v10929_v0 }
 0x30b   : > { %v10933_v4 = vpop.eup %10932  ;;  %10952 = vrcp.f32 %v4590_v1  ;;  %v4592_v5 = vadd.f32 1.0, %v10931_v2 }
 0x30c   : > { %v10935_v6 = vpop.eup %10934  ;;  %10954 = vrcp.f32 %v4591_v3  ;;  %v4593_v7 = vadd.f32 1.0, %v10933_v4 }
 0x30d   : > { %v10937_v9 = vpop.eup %10936  ;;  %10956 = vrcp.f32 %v4592_v5  ;;  %v4594_v10 = vadd.f32 1.0, %v10935_v6 }
 0x30e   : > { %v10939_v12 = vpop.eup %10938  ;;  %10958 = vrcp.f32 %v4593_v7  ;;  %v4595_v13 = vadd.f32 1.0, %v10937_v9  ;;  %v515_v9 = vld [vmem:[%s13832_s30 + $0xbc8] sm:$0xff] }
 0x30f   : > { %v10941_v15 = vpop.eup %10940  ;;  %10960 = vrcp.f32 %v4594_v10  ;;  %v4596_v16 = vadd.f32 1.0, %v10939_v12  ;;  %v516_v12 = vld [vmem:[%s13832_s30 + $0xbd0] sm:$0xff]  ;;  %v8805_v18 = vmul.f32 -1.442695, %v515_v9 }
 0x310   : > { %v10943_v19 = vpop.eup %10942  ;;  %10962 = vrcp.f32 %v4595_v13  ;;  %v4597_v20 = vadd.f32 1.0, %v10941_v15  ;;  %v517_v15 = vld [vmem:[%s13832_s30 + $0xbd8] sm:$0xff]  ;;  %v8806_v22 = vmul.f32 -1.442695, %v516_v12 }
 0x311   : > { %v10945_v23 = vpop.eup %10944  ;;  %7657 = vst [vmem:[%s13858_s17 + $0xaf8] sm:$0xff] %v10943_v19  ;;  %10964 = vrcp.f32 %v4596_v16  ;;  %v518_v19 = vld [vmem:[%s13832_s30 + $0xbe0] sm:$0xff]  ;;  %v8807_v25 = vmul.f32 -1.442695, %v517_v15 }
 0x312   : > { %v10947_v26 = vpop.eup %10946  ;;  %7658 = vst [vmem:[%s13858_s17 + $0xb00] sm:$0xff] %v10945_v23  ;;  %10966 = vrcp.f32 %v4597_v20  ;;  %v519_v23 = vld [vmem:[%s13832_s30 + $0xbe8] sm:$0xff]  ;;  %v8808_v28 = vmul.f32 -1.442695, %v518_v19 }
 0x313   : > { %v10949_v29 = vpop.eup %10948  ;;  %7659 = vst [vmem:[%s13858_s17 + $0xb08] sm:$0xff] %v10947_v26  ;;  %10968 = vpow2.f32 %v8792_v17  ;;  %v520_v26 = vld [vmem:[%s13832_s30 + $0xbf0] sm:$0xff]  ;;  %v8809_v31 = vmul.f32 -1.442695, %v519_v23 }
 0x314   : > { %v10951_v32 = vpop.eup %10950  ;;  %7660 = vst [vmem:[%s13858_s17 + $0xb10] sm:$0xff] %v10949_v29  ;;  %10970 = vpow2.f32 %v8793_v21  ;;  %v521_v29 = vld [vmem:[%s13832_s30 + $0xbf8] sm:$0xff]  ;;  %v8810_v34 = vmul.f32 -1.442695, %v520_v26 }
 0x315   : > { %v10953_v35 = vpop.eup %10952  ;;  %7661 = vst [vmem:[%s13858_s17 + $0xb18] sm:$0xff] %v10951_v32  ;;  %10972 = vpow2.f32 %v8794_v24  ;;  %v522_v32 = vld [vmem:[%s13832_s30 + $0xc00] sm:$0xff]  ;;  %v8811_v37 = vmul.f32 -1.442695, %v521_v29 }
 0x316   : > { %v10955_v38 = vpop.eup %10954  ;;  %7662 = vst [vmem:[%s13858_s17 + $0xb20] sm:$0xff] %v10953_v35  ;;  %10974 = vpow2.f32 %v8795_v27  ;;  %v523_v35 = vld [vmem:[%s13832_s30 + $0xc08] sm:$0xff]  ;;  %v8812_v40 = vmul.f32 -1.442695, %v522_v32 }
 0x317   : > { %v10957_v41 = vpop.eup %10956  ;;  %7663 = vst [vmem:[%s13858_s17 + $0xb28] sm:$0xff] %v10955_v38  ;;  %10976 = vpow2.f32 %v8796_v30  ;;  %v524_v38 = vld [vmem:[%s13832_s30 + $0xc10] sm:$0xff]  ;;  %v8813_v43 = vmul.f32 -1.442695, %v523_v35 }
 0x318   : > { %v10959_v44 = vpop.eup %10958  ;;  %7664 = vst [vmem:[%s13858_s17 + $0xb30] sm:$0xff] %v10957_v41  ;;  %10978 = vpow2.f32 %v8797_v33  ;;  %v525_v41 = vld [vmem:[%s13832_s30 + $0xc18] sm:$0xff]  ;;  %v8814_v46 = vmul.f32 -1.442695, %v524_v38 }
 0x319   : > { %v10961_v47 = vpop.eup %10960  ;;  %7665 = vst [vmem:[%s13858_s17 + $0xb38] sm:$0xff] %v10959_v44  ;;  %10980 = vpow2.f32 %v8798_v36  ;;  %v526_v44 = vld [vmem:[%s13832_s30 + $0xc20] sm:$0xff] }
 0x31a   : > { %v10963_v49 = vpop.eup %10962  ;;  %7666 = vst [vmem:[%s13858_s17 + $0xb40] sm:$0xff] %v10961_v47  ;;  %10982 = vpow2.f32 %v8799_v39  ;;  %v527_v47 = vld [vmem:[%s13832_s30 + $0xc28] sm:$0xff] }
 0x31b   : > { %v10965_v51 = vpop.eup %10964  ;;  %7667 = vst [vmem:[%s13858_s17 + $0xb48] sm:$0xff] %v10963_v49  ;;  %10984 = vpow2.f32 %v8800_v42  ;;  %v8815_v49 = vmul.f32 -1.442695, %v525_v41 }
 0x31c   : > { %v10967_v53 = vpop.eup %10966  ;;  %7668 = vst [vmem:[%s13858_s17 + $0xb50] sm:$0xff] %v10965_v51  ;;  %10986 = vpow2.f32 %v8801_v45  ;;  %v8816_v51 = vmul.f32 -1.442695, %v526_v44 }
 0x31d   : > { %v10969_v54 = vpop.eup %10968  ;;  %7669 = vst [vmem:[%s13858_s17 + $0xb58] sm:$0xff] %v10967_v53  ;;  %10988 = vpow2.f32 %v8802_v48  ;;  %v8817_v53 = vmul.f32 -1.442695, %v527_v47 }
 0x31e   : > { %v10971_v55 = vpop.eup %10970  ;;  %v4598_v56 = vadd.f32 1.0, %v10969_v54  ;;  %10990 = vpow2.f32 %v8803_v50 }
 0x31f   : > { %v10973_v57 = vpop.eup %10972  ;;  %v4599_v58 = vadd.f32 1.0, %v10971_v55  ;;  %10992 = vpow2.f32 %v8804_v52 }
 0x320   : > { %v10975_v59 = vpop.eup %10974  ;;  %10994 = vrcp.f32 %v4598_v56  ;;  %v4600_v60 = vadd.f32 1.0, %v10973_v57 }
 0x321   : > { %v10977_v61 = vpop.eup %10976  ;;  %10996 = vrcp.f32 %v4599_v58  ;;  %v4601_v62 = vadd.f32 1.0, %v10975_v59 }
 0x322   : > { %v10979_v63 = vpop.eup %10978  ;;  %10998 = vrcp.f32 %v4600_v60  ;;  %v4602_v0 = vadd.f32 1.0, %v10977_v61 }
 0x323   : > { %v10981_v1 = vpop.eup %10980  ;;  %11000 = vrcp.f32 %v4601_v62  ;;  %v4603_v2 = vadd.f32 1.0, %v10979_v63 }
 0x324   : > { %v10983_v3 = vpop.eup %10982  ;;  %11002 = vrcp.f32 %v4602_v0  ;;  %v4604_v4 = vadd.f32 1.0, %v10981_v1 }
 0x325   : > { %v10985_v5 = vpop.eup %10984  ;;  %11004 = vrcp.f32 %v4603_v2  ;;  %v4605_v6 = vadd.f32 1.0, %v10983_v3 }
 0x326   : > { %v10987_v7 = vpop.eup %10986  ;;  %11006 = vrcp.f32 %v4604_v4  ;;  %v4606_v8 = vadd.f32 1.0, %v10985_v5 }
 0x327   : > { %v10989_v10 = vpop.eup %10988  ;;  %11008 = vrcp.f32 %v4605_v6  ;;  %v4607_v11 = vadd.f32 1.0, %v10987_v7 }
 0x328   : > { %v10991_v13 = vpop.eup %10990  ;;  %11010 = vrcp.f32 %v4606_v8  ;;  %v4608_v14 = vadd.f32 1.0, %v10989_v10  ;;  %v528_v10 = vld [vmem:[%s13832_s30 + $0xc30] sm:$0xff] }
 0x329   : > { %v10993_v16 = vpop.eup %10992  ;;  %11012 = vrcp.f32 %v4607_v11  ;;  %v4609_v17 = vadd.f32 1.0, %v10991_v13  ;;  %v529_v13 = vld [vmem:[%s13832_s30 + $0xc38] sm:$0xff]  ;;  %v8818_v19 = vmul.f32 -1.442695, %v528_v10 }
 0x32a   : > { %v10995_v20 = vpop.eup %10994  ;;  %11014 = vrcp.f32 %v4608_v14  ;;  %v4610_v21 = vadd.f32 1.0, %v10993_v16  ;;  %v530_v16 = vld [vmem:[%s13832_s30 + $0xc40] sm:$0xff]  ;;  %v8819_v23 = vmul.f32 -1.442695, %v529_v13 }
 0x32b   : > { %v10997_v24 = vpop.eup %10996  ;;  %7670 = vst [vmem:[%s13858_s17 + $0xb60] sm:$0xff] %v10995_v20  ;;  %11016 = vrcp.f32 %v4609_v17  ;;  %v531_v20 = vld [vmem:[%s13832_s30 + $0xc48] sm:$0xff]  ;;  %v8820_v26 = vmul.f32 -1.442695, %v530_v16 }
 0x32c   : > { %v10999_v27 = vpop.eup %10998  ;;  %7671 = vst [vmem:[%s13858_s17 + $0xb68] sm:$0xff] %v10997_v24  ;;  %11018 = vrcp.f32 %v4610_v21  ;;  %v532_v24 = vld [vmem:[%s13832_s30 + $0xc50] sm:$0xff]  ;;  %v8821_v29 = vmul.f32 -1.442695, %v531_v20 }
 0x32d   : > { %v11001_v30 = vpop.eup %11000  ;;  %7672 = vst [vmem:[%s13858_s17 + $0xb70] sm:$0xff] %v10999_v27  ;;  %11020 = vpow2.f32 %v8805_v18  ;;  %v533_v27 = vld [vmem:[%s13832_s30 + $0xc58] sm:$0xff]  ;;  %v8822_v32 = vmul.f32 -1.442695, %v532_v24 }
 0x32e   : > { %v11003_v33 = vpop.eup %11002  ;;  %7673 = vst [vmem:[%s13858_s17 + $0xb78] sm:$0xff] %v11001_v30  ;;  %11022 = vpow2.f32 %v8806_v22  ;;  %v534_v30 = vld [vmem:[%s13832_s30 + $0xc60] sm:$0xff]  ;;  %v8823_v35 = vmul.f32 -1.442695, %v533_v27 }
 0x32f   : > { %v11005_v36 = vpop.eup %11004  ;;  %7674 = vst [vmem:[%s13858_s17 + $0xb80] sm:$0xff] %v11003_v33  ;;  %11024 = vpow2.f32 %v8807_v25  ;;  %v535_v33 = vld [vmem:[%s13832_s30 + $0xc68] sm:$0xff]  ;;  %v8824_v38 = vmul.f32 -1.442695, %v534_v30 }
 0x330   : > { %v11007_v39 = vpop.eup %11006  ;;  %7675 = vst [vmem:[%s13858_s17 + $0xb88] sm:$0xff] %v11005_v36  ;;  %11026 = vpow2.f32 %v8808_v28  ;;  %v536_v36 = vld [vmem:[%s13832_s30 + $0xc70] sm:$0xff]  ;;  %v8825_v41 = vmul.f32 -1.442695, %v535_v33 }
 0x331   : > { %v11009_v42 = vpop.eup %11008  ;;  %7676 = vst [vmem:[%s13858_s17 + $0xb90] sm:$0xff] %v11007_v39  ;;  %11028 = vpow2.f32 %v8809_v31  ;;  %v537_v39 = vld [vmem:[%s13832_s30 + $0xc78] sm:$0xff]  ;;  %v8826_v44 = vmul.f32 -1.442695, %v536_v36 }
 0x332   : > { %v11011_v45 = vpop.eup %11010  ;;  %7677 = vst [vmem:[%s13858_s17 + $0xb98] sm:$0xff] %v11009_v42  ;;  %11030 = vpow2.f32 %v8810_v34  ;;  %v538_v42 = vld [vmem:[%s13832_s30 + $0xc80] sm:$0xff]  ;;  %v8827_v47 = vmul.f32 -1.442695, %v537_v39 }
 0x333   : > { %v11013_v48 = vpop.eup %11012  ;;  %7678 = vst [vmem:[%s13858_s17 + $0xba0] sm:$0xff] %v11011_v45  ;;  %11032 = vpow2.f32 %v8811_v37  ;;  %v539_v45 = vld [vmem:[%s13832_s30 + $0xc88] sm:$0xff] }
 0x334   : > { %v11015_v50 = vpop.eup %11014  ;;  %7679 = vst [vmem:[%s13858_s17 + $0xba8] sm:$0xff] %v11013_v48  ;;  %11034 = vpow2.f32 %v8812_v40  ;;  %v540_v48 = vld [vmem:[%s13832_s30 + $0xc90] sm:$0xff] }
 0x335   : > { %v11017_v52 = vpop.eup %11016  ;;  %7680 = vst [vmem:[%s13858_s17 + $0xbb0] sm:$0xff] %v11015_v50  ;;  %11036 = vpow2.f32 %v8813_v43  ;;  %v8828_v50 = vmul.f32 -1.442695, %v538_v42 }
 0x336   : > { %v11019_v54 = vpop.eup %11018  ;;  %7681 = vst [vmem:[%s13858_s17 + $0xbb8] sm:$0xff] %v11017_v52  ;;  %11038 = vpow2.f32 %v8814_v46  ;;  %v8829_v52 = vmul.f32 -1.442695, %v539_v45 }
 0x337   : > { %v11021_v55 = vpop.eup %11020  ;;  %7682 = vst [vmem:[%s13858_s17 + $0xbc0] sm:$0xff] %v11019_v54  ;;  %11040 = vpow2.f32 %v8815_v49  ;;  %v8830_v54 = vmul.f32 -1.442695, %v540_v48 }
 0x338   : > { %v11023_v56 = vpop.eup %11022  ;;  %v4611_v57 = vadd.f32 1.0, %v11021_v55  ;;  %11042 = vpow2.f32 %v8816_v51 }
 0x339   : > { %v11025_v58 = vpop.eup %11024  ;;  %v4612_v59 = vadd.f32 1.0, %v11023_v56  ;;  %11044 = vpow2.f32 %v8817_v53 }
 0x33a   : > { %v11027_v60 = vpop.eup %11026  ;;  %11046 = vrcp.f32 %v4611_v57  ;;  %v4613_v61 = vadd.f32 1.0, %v11025_v58 }
 0x33b   : > { %v11029_v62 = vpop.eup %11028  ;;  %11048 = vrcp.f32 %v4612_v59  ;;  %v4614_v63 = vadd.f32 1.0, %v11027_v60 }
 0x33c   : > { %v11031_v0 = vpop.eup %11030  ;;  %11050 = vrcp.f32 %v4613_v61  ;;  %v4615_v1 = vadd.f32 1.0, %v11029_v62 }
 0x33d   : > { %v11033_v2 = vpop.eup %11032  ;;  %11052 = vrcp.f32 %v4614_v63  ;;  %v4616_v3 = vadd.f32 1.0, %v11031_v0 }
 0x33e   : > { %v11035_v4 = vpop.eup %11034  ;;  %11054 = vrcp.f32 %v4615_v1  ;;  %v4617_v5 = vadd.f32 1.0, %v11033_v2 }
 0x33f   : > { %v11037_v6 = vpop.eup %11036  ;;  %11056 = vrcp.f32 %v4616_v3  ;;  %v4618_v7 = vadd.f32 1.0, %v11035_v4 }
 0x340   : > { %v11039_v8 = vpop.eup %11038  ;;  %11058 = vrcp.f32 %v4617_v5  ;;  %v4619_v9 = vadd.f32 1.0, %v11037_v6 }
 0x341   : > { %v11041_v11 = vpop.eup %11040  ;;  %11060 = vrcp.f32 %v4618_v7  ;;  %v4620_v12 = vadd.f32 1.0, %v11039_v8 }
 0x342   : > { %v11043_v14 = vpop.eup %11042  ;;  %11062 = vrcp.f32 %v4619_v9  ;;  %v4621_v15 = vadd.f32 1.0, %v11041_v11  ;;  %v541_v11 = vld [vmem:[%s13832_s30 + $0xc98] sm:$0xff] }
 0x343   : > { %v11045_v17 = vpop.eup %11044  ;;  %11064 = vrcp.f32 %v4620_v12  ;;  %v4622_v18 = vadd.f32 1.0, %v11043_v14  ;;  %v542_v14 = vld [vmem:[%s13832_s30 + $0xca0] sm:$0xff]  ;;  %v8831_v20 = vmul.f32 -1.442695, %v541_v11 }
 0x344   : > { %v11047_v21 = vpop.eup %11046  ;;  %11066 = vrcp.f32 %v4621_v15  ;;  %v4623_v22 = vadd.f32 1.0, %v11045_v17  ;;  %v543_v17 = vld [vmem:[%s13832_s30 + $0xca8] sm:$0xff]  ;;  %v8832_v24 = vmul.f32 -1.442695, %v542_v14 }
 0x345   : > { %v11049_v25 = vpop.eup %11048  ;;  %7683 = vst [vmem:[%s13858_s17 + $0xbc8] sm:$0xff] %v11047_v21  ;;  %11068 = vrcp.f32 %v4622_v18  ;;  %v544_v21 = vld [vmem:[%s13832_s30 + $0xcb0] sm:$0xff]  ;;  %v8833_v27 = vmul.f32 -1.442695, %v543_v17 }
 0x346   : > { %v11051_v28 = vpop.eup %11050  ;;  %7684 = vst [vmem:[%s13858_s17 + $0xbd0] sm:$0xff] %v11049_v25  ;;  %11070 = vrcp.f32 %v4623_v22  ;;  %v545_v25 = vld [vmem:[%s13832_s30 + $0xcb8] sm:$0xff]  ;;  %v8834_v30 = vmul.f32 -1.442695, %v544_v21 }
 0x347   : > { %v11053_v31 = vpop.eup %11052  ;;  %7685 = vst [vmem:[%s13858_s17 + $0xbd8] sm:$0xff] %v11051_v28  ;;  %11072 = vpow2.f32 %v8818_v19  ;;  %v546_v28 = vld [vmem:[%s13832_s30 + $0xcc0] sm:$0xff]  ;;  %v8835_v33 = vmul.f32 -1.442695, %v545_v25 }
 0x348   : > { %v11055_v34 = vpop.eup %11054  ;;  %7686 = vst [vmem:[%s13858_s17 + $0xbe0] sm:$0xff] %v11053_v31  ;;  %11074 = vpow2.f32 %v8819_v23  ;;  %v547_v31 = vld [vmem:[%s13832_s30 + $0xcc8] sm:$0xff]  ;;  %v8836_v36 = vmul.f32 -1.442695, %v546_v28 }
 0x349   : > { %v11057_v37 = vpop.eup %11056  ;;  %7687 = vst [vmem:[%s13858_s17 + $0xbe8] sm:$0xff] %v11055_v34  ;;  %11076 = vpow2.f32 %v8820_v26  ;;  %v548_v34 = vld [vmem:[%s13832_s30 + $0xcd0] sm:$0xff]  ;;  %v8837_v39 = vmul.f32 -1.442695, %v547_v31 }
 0x34a   : > { %v11059_v40 = vpop.eup %11058  ;;  %7688 = vst [vmem:[%s13858_s17 + $0xbf0] sm:$0xff] %v11057_v37  ;;  %11078 = vpow2.f32 %v8821_v29  ;;  %v549_v37 = vld [vmem:[%s13832_s30 + $0xcd8] sm:$0xff]  ;;  %v8838_v42 = vmul.f32 -1.442695, %v548_v34 }
 0x34b   : > { %v11061_v43 = vpop.eup %11060  ;;  %7689 = vst [vmem:[%s13858_s17 + $0xbf8] sm:$0xff] %v11059_v40  ;;  %11080 = vpow2.f32 %v8822_v32  ;;  %v550_v40 = vld [vmem:[%s13832_s30 + $0xce0] sm:$0xff]  ;;  %v8839_v45 = vmul.f32 -1.442695, %v549_v37 }
 0x34c   : > { %v11063_v46 = vpop.eup %11062  ;;  %7690 = vst [vmem:[%s13858_s17 + $0xc00] sm:$0xff] %v11061_v43  ;;  %11082 = vpow2.f32 %v8823_v35  ;;  %v551_v43 = vld [vmem:[%s13832_s30 + $0xce8] sm:$0xff]  ;;  %v8840_v48 = vmul.f32 -1.442695, %v550_v40 }
 0x34d   : > { %v11065_v49 = vpop.eup %11064  ;;  %7691 = vst [vmem:[%s13858_s17 + $0xc08] sm:$0xff] %v11063_v46  ;;  %11084 = vpow2.f32 %v8824_v38  ;;  %v552_v46 = vld [vmem:[%s13832_s30 + $0xcf0] sm:$0xff] }
 0x34e   : > { %v11067_v51 = vpop.eup %11066  ;;  %7692 = vst [vmem:[%s13858_s17 + $0xc10] sm:$0xff] %v11065_v49  ;;  %11086 = vpow2.f32 %v8825_v41  ;;  %v553_v49 = vld [vmem:[%s13832_s30 + $0xcf8] sm:$0xff] }
 0x34f   : > { %v11069_v53 = vpop.eup %11068  ;;  %7693 = vst [vmem:[%s13858_s17 + $0xc18] sm:$0xff] %v11067_v51  ;;  %11088 = vpow2.f32 %v8826_v44  ;;  %v8841_v51 = vmul.f32 -1.442695, %v551_v43 }
 0x350   : > { %v11071_v55 = vpop.eup %11070  ;;  %7694 = vst [vmem:[%s13858_s17 + $0xc20] sm:$0xff] %v11069_v53  ;;  %11090 = vpow2.f32 %v8827_v47  ;;  %v8842_v53 = vmul.f32 -1.442695, %v552_v46 }
 0x351   : > { %v11073_v56 = vpop.eup %11072  ;;  %7695 = vst [vmem:[%s13858_s17 + $0xc28] sm:$0xff] %v11071_v55  ;;  %11092 = vpow2.f32 %v8828_v50  ;;  %v8843_v55 = vmul.f32 -1.442695, %v553_v49 }
 0x352   : > { %v11075_v57 = vpop.eup %11074  ;;  %v4624_v58 = vadd.f32 1.0, %v11073_v56  ;;  %11094 = vpow2.f32 %v8829_v52 }
 0x353   : > { %v11077_v59 = vpop.eup %11076  ;;  %v4625_v60 = vadd.f32 1.0, %v11075_v57  ;;  %11096 = vpow2.f32 %v8830_v54 }
 0x354   : > { %v11079_v61 = vpop.eup %11078  ;;  %11098 = vrcp.f32 %v4624_v58  ;;  %v4626_v62 = vadd.f32 1.0, %v11077_v59 }
 0x355   : > { %v11081_v63 = vpop.eup %11080  ;;  %11100 = vrcp.f32 %v4625_v60  ;;  %v4627_v0 = vadd.f32 1.0, %v11079_v61 }
 0x356   : > { %v11083_v1 = vpop.eup %11082  ;;  %11102 = vrcp.f32 %v4626_v62  ;;  %v4628_v2 = vadd.f32 1.0, %v11081_v63 }
 0x357   : > { %v11085_v3 = vpop.eup %11084  ;;  %11104 = vrcp.f32 %v4627_v0  ;;  %v4629_v4 = vadd.f32 1.0, %v11083_v1 }
 0x358   : > { %v11087_v5 = vpop.eup %11086  ;;  %11106 = vrcp.f32 %v4628_v2  ;;  %v4630_v6 = vadd.f32 1.0, %v11085_v3 }
 0x359   : > { %v11089_v7 = vpop.eup %11088  ;;  %11108 = vrcp.f32 %v4629_v4  ;;  %v4631_v8 = vadd.f32 1.0, %v11087_v5 }
 0x35a   : > { %v11091_v9 = vpop.eup %11090  ;;  %11110 = vrcp.f32 %v4630_v6  ;;  %v4632_v10 = vadd.f32 1.0, %v11089_v7 }
 0x35b   : > { %v11093_v12 = vpop.eup %11092  ;;  %11112 = vrcp.f32 %v4631_v8  ;;  %v4633_v13 = vadd.f32 1.0, %v11091_v9 }
 0x35c   : > { %v11095_v15 = vpop.eup %11094  ;;  %11114 = vrcp.f32 %v4632_v10  ;;  %v4634_v16 = vadd.f32 1.0, %v11093_v12  ;;  %v554_v12 = vld [vmem:[%s13832_s30 + $0xd00] sm:$0xff] }
 0x35d   : > { %v11097_v18 = vpop.eup %11096  ;;  %11116 = vrcp.f32 %v4633_v13  ;;  %v4635_v19 = vadd.f32 1.0, %v11095_v15  ;;  %v555_v15 = vld [vmem:[%s13832_s30 + $0xd08] sm:$0xff]  ;;  %v8844_v21 = vmul.f32 -1.442695, %v554_v12 }
 0x35e   : > { %v11099_v22 = vpop.eup %11098  ;;  %11118 = vrcp.f32 %v4634_v16  ;;  %v4636_v23 = vadd.f32 1.0, %v11097_v18  ;;  %v556_v18 = vld [vmem:[%s13832_s30 + $0xd10] sm:$0xff]  ;;  %v8845_v25 = vmul.f32 -1.442695, %v555_v15 }
 0x35f   : > { %v11101_v26 = vpop.eup %11100  ;;  %7696 = vst [vmem:[%s13858_s17 + $0xc30] sm:$0xff] %v11099_v22  ;;  %11120 = vrcp.f32 %v4635_v19  ;;  %v557_v22 = vld [vmem:[%s13832_s30 + $0xd18] sm:$0xff]  ;;  %v8846_v28 = vmul.f32 -1.442695, %v556_v18 }
 0x360   : > { %v11103_v29 = vpop.eup %11102  ;;  %7697 = vst [vmem:[%s13858_s17 + $0xc38] sm:$0xff] %v11101_v26  ;;  %11122 = vrcp.f32 %v4636_v23  ;;  %v558_v26 = vld [vmem:[%s13832_s30 + $0xd20] sm:$0xff]  ;;  %v8847_v31 = vmul.f32 -1.442695, %v557_v22 }
 0x361   : > { %v11105_v32 = vpop.eup %11104  ;;  %7698 = vst [vmem:[%s13858_s17 + $0xc40] sm:$0xff] %v11103_v29  ;;  %11124 = vpow2.f32 %v8831_v20  ;;  %v559_v29 = vld [vmem:[%s13832_s30 + $0xd28] sm:$0xff]  ;;  %v8848_v34 = vmul.f32 -1.442695, %v558_v26 }
 0x362   : > { %v11107_v35 = vpop.eup %11106  ;;  %7699 = vst [vmem:[%s13858_s17 + $0xc48] sm:$0xff] %v11105_v32  ;;  %11126 = vpow2.f32 %v8832_v24  ;;  %v560_v32 = vld [vmem:[%s13832_s30 + $0xd30] sm:$0xff]  ;;  %v8849_v37 = vmul.f32 -1.442695, %v559_v29 }
 0x363   : > { %v11109_v38 = vpop.eup %11108  ;;  %7700 = vst [vmem:[%s13858_s17 + $0xc50] sm:$0xff] %v11107_v35  ;;  %11128 = vpow2.f32 %v8833_v27  ;;  %v561_v35 = vld [vmem:[%s13832_s30 + $0xd38] sm:$0xff]  ;;  %v8850_v40 = vmul.f32 -1.442695, %v560_v32 }
 0x364   : > { %v11111_v41 = vpop.eup %11110  ;;  %7701 = vst [vmem:[%s13858_s17 + $0xc58] sm:$0xff] %v11109_v38  ;;  %11130 = vpow2.f32 %v8834_v30  ;;  %v562_v38 = vld [vmem:[%s13832_s30 + $0xd40] sm:$0xff]  ;;  %v8851_v43 = vmul.f32 -1.442695, %v561_v35 }
 0x365   : > { %v11113_v44 = vpop.eup %11112  ;;  %7702 = vst [vmem:[%s13858_s17 + $0xc60] sm:$0xff] %v11111_v41  ;;  %11132 = vpow2.f32 %v8835_v33  ;;  %v563_v41 = vld [vmem:[%s13832_s30 + $0xd48] sm:$0xff]  ;;  %v8852_v46 = vmul.f32 -1.442695, %v562_v38 }
 0x366   : > { %v11115_v47 = vpop.eup %11114  ;;  %7703 = vst [vmem:[%s13858_s17 + $0xc68] sm:$0xff] %v11113_v44  ;;  %11134 = vpow2.f32 %v8836_v36  ;;  %v564_v44 = vld [vmem:[%s13832_s30 + $0xd50] sm:$0xff]  ;;  %v8853_v49 = vmul.f32 -1.442695, %v563_v41 }
 0x367   : > { %v11117_v50 = vpop.eup %11116  ;;  %7704 = vst [vmem:[%s13858_s17 + $0xc70] sm:$0xff] %v11115_v47  ;;  %11136 = vpow2.f32 %v8837_v39  ;;  %v565_v47 = vld [vmem:[%s13832_s30 + $0xd58] sm:$0xff] }
 0x368   : > { %v11119_v52 = vpop.eup %11118  ;;  %7705 = vst [vmem:[%s13858_s17 + $0xc78] sm:$0xff] %v11117_v50  ;;  %11138 = vpow2.f32 %v8838_v42  ;;  %v566_v50 = vld [vmem:[%s13832_s30 + $0xd60] sm:$0xff] }
 0x369   : > { %v11121_v54 = vpop.eup %11120  ;;  %7706 = vst [vmem:[%s13858_s17 + $0xc80] sm:$0xff] %v11119_v52  ;;  %11140 = vpow2.f32 %v8839_v45  ;;  %v8854_v52 = vmul.f32 -1.442695, %v564_v44 }
 0x36a   : > { %v11123_v56 = vpop.eup %11122  ;;  %7707 = vst [vmem:[%s13858_s17 + $0xc88] sm:$0xff] %v11121_v54  ;;  %11142 = vpow2.f32 %v8840_v48  ;;  %v8855_v54 = vmul.f32 -1.442695, %v565_v47 }
 0x36b   : > { %v11125_v57 = vpop.eup %11124  ;;  %7708 = vst [vmem:[%s13858_s17 + $0xc90] sm:$0xff] %v11123_v56  ;;  %11144 = vpow2.f32 %v8841_v51  ;;  %v8856_v56 = vmul.f32 -1.442695, %v566_v50 }
 0x36c   : > { %v11127_v58 = vpop.eup %11126  ;;  %v4637_v59 = vadd.f32 1.0, %v11125_v57  ;;  %11146 = vpow2.f32 %v8842_v53 }
 0x36d   : > { %v11129_v60 = vpop.eup %11128  ;;  %v4638_v61 = vadd.f32 1.0, %v11127_v58  ;;  %11148 = vpow2.f32 %v8843_v55 }
 0x36e   : > { %v11131_v62 = vpop.eup %11130  ;;  %11150 = vrcp.f32 %v4637_v59  ;;  %v4639_v63 = vadd.f32 1.0, %v11129_v60 }
 0x36f   : > { %v11133_v0 = vpop.eup %11132  ;;  %11152 = vrcp.f32 %v4638_v61  ;;  %v4640_v1 = vadd.f32 1.0, %v11131_v62 }
 0x370   : > { %v11135_v2 = vpop.eup %11134  ;;  %11154 = vrcp.f32 %v4639_v63  ;;  %v4641_v3 = vadd.f32 1.0, %v11133_v0 }
 0x371   : > { %v11137_v4 = vpop.eup %11136  ;;  %11156 = vrcp.f32 %v4640_v1  ;;  %v4642_v5 = vadd.f32 1.0, %v11135_v2 }
 0x372   : > { %v11139_v6 = vpop.eup %11138  ;;  %11158 = vrcp.f32 %v4641_v3  ;;  %v4643_v7 = vadd.f32 1.0, %v11137_v4 }
 0x373   : > { %v11141_v8 = vpop.eup %11140  ;;  %11160 = vrcp.f32 %v4642_v5  ;;  %v4644_v9 = vadd.f32 1.0, %v11139_v6 }
 0x374   : > { %v11143_v10 = vpop.eup %11142  ;;  %11162 = vrcp.f32 %v4643_v7  ;;  %v4645_v11 = vadd.f32 1.0, %v11141_v8 }
 0x375   : > { %v11145_v13 = vpop.eup %11144  ;;  %11164 = vrcp.f32 %v4644_v9  ;;  %v4646_v14 = vadd.f32 1.0, %v11143_v10 }
 0x376   : > { %v11147_v16 = vpop.eup %11146  ;;  %11166 = vrcp.f32 %v4645_v11  ;;  %v4647_v17 = vadd.f32 1.0, %v11145_v13  ;;  %v567_v13 = vld [vmem:[%s13832_s30 + $0xd68] sm:$0xff] }
 0x377   : > { %v11149_v19 = vpop.eup %11148  ;;  %11168 = vrcp.f32 %v4646_v14  ;;  %v4648_v20 = vadd.f32 1.0, %v11147_v16  ;;  %v568_v16 = vld [vmem:[%s13832_s30 + $0xd70] sm:$0xff]  ;;  %v8857_v22 = vmul.f32 -1.442695, %v567_v13 }
 0x378   : > { %v11151_v23 = vpop.eup %11150  ;;  %11170 = vrcp.f32 %v4647_v17  ;;  %v4649_v24 = vadd.f32 1.0, %v11149_v19  ;;  %v569_v19 = vld [vmem:[%s13832_s30 + $0xd78] sm:$0xff]  ;;  %v8858_v26 = vmul.f32 -1.442695, %v568_v16 }
 0x379   : > { %v11153_v27 = vpop.eup %11152  ;;  %7709 = vst [vmem:[%s13858_s17 + $0xc98] sm:$0xff] %v11151_v23  ;;  %11172 = vrcp.f32 %v4648_v20  ;;  %v570_v23 = vld [vmem:[%s13832_s30 + $0xd80] sm:$0xff]  ;;  %v8859_v29 = vmul.f32 -1.442695, %v569_v19 }
 0x37a   : > { %v11155_v30 = vpop.eup %11154  ;;  %7710 = vst [vmem:[%s13858_s17 + $0xca0] sm:$0xff] %v11153_v27  ;;  %11174 = vrcp.f32 %v4649_v24  ;;  %v571_v27 = vld [vmem:[%s13832_s30 + $0xd88] sm:$0xff]  ;;  %v8860_v32 = vmul.f32 -1.442695, %v570_v23 }
 0x37b   : > { %v11157_v33 = vpop.eup %11156  ;;  %7711 = vst [vmem:[%s13858_s17 + $0xca8] sm:$0xff] %v11155_v30  ;;  %11176 = vpow2.f32 %v8844_v21  ;;  %v572_v30 = vld [vmem:[%s13832_s30 + $0xd90] sm:$0xff]  ;;  %v8861_v35 = vmul.f32 -1.442695, %v571_v27 }
 0x37c   : > { %v11159_v36 = vpop.eup %11158  ;;  %7712 = vst [vmem:[%s13858_s17 + $0xcb0] sm:$0xff] %v11157_v33  ;;  %11178 = vpow2.f32 %v8845_v25  ;;  %v573_v33 = vld [vmem:[%s13832_s30 + $0xd98] sm:$0xff]  ;;  %v8862_v38 = vmul.f32 -1.442695, %v572_v30 }
 0x37d   : > { %v11161_v39 = vpop.eup %11160  ;;  %7713 = vst [vmem:[%s13858_s17 + $0xcb8] sm:$0xff] %v11159_v36  ;;  %11180 = vpow2.f32 %v8846_v28  ;;  %v574_v36 = vld [vmem:[%s13832_s30 + $0xda0] sm:$0xff]  ;;  %v8863_v41 = vmul.f32 -1.442695, %v573_v33 }
 0x37e   : > { %v11163_v42 = vpop.eup %11162  ;;  %7714 = vst [vmem:[%s13858_s17 + $0xcc0] sm:$0xff] %v11161_v39  ;;  %11182 = vpow2.f32 %v8847_v31  ;;  %v575_v39 = vld [vmem:[%s13832_s30 + $0xda8] sm:$0xff]  ;;  %v8864_v44 = vmul.f32 -1.442695, %v574_v36 }
 0x37f   : > { %v11165_v45 = vpop.eup %11164  ;;  %7715 = vst [vmem:[%s13858_s17 + $0xcc8] sm:$0xff] %v11163_v42  ;;  %11184 = vpow2.f32 %v8848_v34  ;;  %v576_v42 = vld [vmem:[%s13832_s30 + $0xdb0] sm:$0xff]  ;;  %v8865_v47 = vmul.f32 -1.442695, %v575_v39 }
 0x380   : > { %v11167_v48 = vpop.eup %11166  ;;  %7716 = vst [vmem:[%s13858_s17 + $0xcd0] sm:$0xff] %v11165_v45  ;;  %11186 = vpow2.f32 %v8849_v37  ;;  %v577_v45 = vld [vmem:[%s13832_s30 + $0xdb8] sm:$0xff]  ;;  %v8866_v50 = vmul.f32 -1.442695, %v576_v42 }
 0x381   : > { %v11169_v51 = vpop.eup %11168  ;;  %7717 = vst [vmem:[%s13858_s17 + $0xcd8] sm:$0xff] %v11167_v48  ;;  %11188 = vpow2.f32 %v8850_v40  ;;  %v578_v48 = vld [vmem:[%s13832_s30 + $0xdc0] sm:$0xff] }
 0x382   : > { %v11171_v53 = vpop.eup %11170  ;;  %7718 = vst [vmem:[%s13858_s17 + $0xce0] sm:$0xff] %v11169_v51  ;;  %11190 = vpow2.f32 %v8851_v43  ;;  %v579_v51 = vld [vmem:[%s13832_s30 + $0xdc8] sm:$0xff] }
 0x383   : > { %v11173_v55 = vpop.eup %11172  ;;  %7719 = vst [vmem:[%s13858_s17 + $0xce8] sm:$0xff] %v11171_v53  ;;  %11192 = vpow2.f32 %v8852_v46  ;;  %v8867_v53 = vmul.f32 -1.442695, %v577_v45 }
 0x384   : > { %v11175_v57 = vpop.eup %11174  ;;  %7720 = vst [vmem:[%s13858_s17 + $0xcf0] sm:$0xff] %v11173_v55  ;;  %11194 = vpow2.f32 %v8853_v49  ;;  %v8868_v55 = vmul.f32 -1.442695, %v578_v48 }
 0x385   : > { %v11177_v58 = vpop.eup %11176  ;;  %7721 = vst [vmem:[%s13858_s17 + $0xcf8] sm:$0xff] %v11175_v57  ;;  %11196 = vpow2.f32 %v8854_v52  ;;  %v8869_v57 = vmul.f32 -1.442695, %v579_v51 }
 0x386   : > { %v11179_v59 = vpop.eup %11178  ;;  %v4650_v60 = vadd.f32 1.0, %v11177_v58  ;;  %11198 = vpow2.f32 %v8855_v54 }
 0x387   : > { %v11181_v61 = vpop.eup %11180  ;;  %v4651_v62 = vadd.f32 1.0, %v11179_v59  ;;  %11200 = vpow2.f32 %v8856_v56 }
 0x388   : > { %v11183_v63 = vpop.eup %11182  ;;  %11202 = vrcp.f32 %v4650_v60  ;;  %v4652_v0 = vadd.f32 1.0, %v11181_v61 }
 0x389   : > { %v11185_v1 = vpop.eup %11184  ;;  %11204 = vrcp.f32 %v4651_v62  ;;  %v4653_v2 = vadd.f32 1.0, %v11183_v63 }
 0x38a   : > { %v11187_v3 = vpop.eup %11186  ;;  %11206 = vrcp.f32 %v4652_v0  ;;  %v4654_v4 = vadd.f32 1.0, %v11185_v1 }
 0x38b   : > { %v11189_v5 = vpop.eup %11188  ;;  %11208 = vrcp.f32 %v4653_v2  ;;  %v4655_v6 = vadd.f32 1.0, %v11187_v3 }
 0x38c   : > { %v11191_v7 = vpop.eup %11190  ;;  %11210 = vrcp.f32 %v4654_v4  ;;  %v4656_v8 = vadd.f32 1.0, %v11189_v5 }
 0x38d   : > { %v11193_v9 = vpop.eup %11192  ;;  %11212 = vrcp.f32 %v4655_v6  ;;  %v4657_v10 = vadd.f32 1.0, %v11191_v7 }
 0x38e   : > { %v11195_v11 = vpop.eup %11194  ;;  %11214 = vrcp.f32 %v4656_v8  ;;  %v4658_v12 = vadd.f32 1.0, %v11193_v9 }
 0x38f   : > { %v11197_v14 = vpop.eup %11196  ;;  %11216 = vrcp.f32 %v4657_v10  ;;  %v4659_v15 = vadd.f32 1.0, %v11195_v11 }
 0x390   : > { %v11199_v17 = vpop.eup %11198  ;;  %11218 = vrcp.f32 %v4658_v12  ;;  %v4660_v18 = vadd.f32 1.0, %v11197_v14  ;;  %v580_v14 = vld [vmem:[%s13832_s30 + $0xdd0] sm:$0xff] }
 0x391   : > { %v11201_v20 = vpop.eup %11200  ;;  %11220 = vrcp.f32 %v4659_v15  ;;  %v4661_v21 = vadd.f32 1.0, %v11199_v17  ;;  %v581_v17 = vld [vmem:[%s13832_s30 + $0xdd8] sm:$0xff]  ;;  %v8870_v23 = vmul.f32 -1.442695, %v580_v14 }
 0x392   : > { %v11203_v24 = vpop.eup %11202  ;;  %11222 = vrcp.f32 %v4660_v18  ;;  %v4662_v25 = vadd.f32 1.0, %v11201_v20  ;;  %v582_v20 = vld [vmem:[%s13832_s30 + $0xde0] sm:$0xff]  ;;  %v8871_v27 = vmul.f32 -1.442695, %v581_v17 }
 0x393   : > { %v11205_v28 = vpop.eup %11204  ;;  %7722 = vst [vmem:[%s13858_s17 + $0xd00] sm:$0xff] %v11203_v24  ;;  %11224 = vrcp.f32 %v4661_v21  ;;  %v583_v24 = vld [vmem:[%s13832_s30 + $0xde8] sm:$0xff]  ;;  %v8872_v30 = vmul.f32 -1.442695, %v582_v20 }
 0x394   : > { %v11207_v31 = vpop.eup %11206  ;;  %7723 = vst [vmem:[%s13858_s17 + $0xd08] sm:$0xff] %v11205_v28  ;;  %11226 = vrcp.f32 %v4662_v25  ;;  %v584_v28 = vld [vmem:[%s13832_s30 + $0xdf0] sm:$0xff]  ;;  %v8873_v33 = vmul.f32 -1.442695, %v583_v24 }
 0x395   : > { %v11209_v34 = vpop.eup %11208  ;;  %7724 = vst [vmem:[%s13858_s17 + $0xd10] sm:$0xff] %v11207_v31  ;;  %11228 = vpow2.f32 %v8857_v22  ;;  %v585_v31 = vld [vmem:[%s13832_s30 + $0xdf8] sm:$0xff]  ;;  %v8874_v36 = vmul.f32 -1.442695, %v584_v28 }
 0x396   : > { %v11211_v37 = vpop.eup %11210  ;;  %7725 = vst [vmem:[%s13858_s17 + $0xd18] sm:$0xff] %v11209_v34  ;;  %11230 = vpow2.f32 %v8858_v26  ;;  %v586_v34 = vld [vmem:[%s13832_s30 + $0xe00] sm:$0xff]  ;;  %v8875_v39 = vmul.f32 -1.442695, %v585_v31 }
 0x397   : > { %v11213_v40 = vpop.eup %11212  ;;  %7726 = vst [vmem:[%s13858_s17 + $0xd20] sm:$0xff] %v11211_v37  ;;  %11232 = vpow2.f32 %v8859_v29  ;;  %v587_v37 = vld [vmem:[%s13832_s30 + $0xe08] sm:$0xff]  ;;  %v8876_v42 = vmul.f32 -1.442695, %v586_v34 }
 0x398   : > { %v11215_v43 = vpop.eup %11214  ;;  %7727 = vst [vmem:[%s13858_s17 + $0xd28] sm:$0xff] %v11213_v40  ;;  %11234 = vpow2.f32 %v8860_v32  ;;  %v588_v40 = vld [vmem:[%s13832_s30 + $0xe10] sm:$0xff]  ;;  %v8877_v45 = vmul.f32 -1.442695, %v587_v37 }
 0x399   : > { %v11217_v46 = vpop.eup %11216  ;;  %7728 = vst [vmem:[%s13858_s17 + $0xd30] sm:$0xff] %v11215_v43  ;;  %11236 = vpow2.f32 %v8861_v35  ;;  %v589_v43 = vld [vmem:[%s13832_s30 + $0xe18] sm:$0xff]  ;;  %v8878_v48 = vmul.f32 -1.442695, %v588_v40 }
 0x39a   : > { %v11219_v49 = vpop.eup %11218  ;;  %7729 = vst [vmem:[%s13858_s17 + $0xd38] sm:$0xff] %v11217_v46  ;;  %11238 = vpow2.f32 %v8862_v38  ;;  %v590_v46 = vld [vmem:[%s13832_s30 + $0xe20] sm:$0xff]  ;;  %v8879_v51 = vmul.f32 -1.442695, %v589_v43 }
 0x39b   : > { %v11221_v52 = vpop.eup %11220  ;;  %7730 = vst [vmem:[%s13858_s17 + $0xd40] sm:$0xff] %v11219_v49  ;;  %11240 = vpow2.f32 %v8863_v41  ;;  %v591_v49 = vld [vmem:[%s13832_s30 + $0xe28] sm:$0xff] }
 0x39c   : > { %v11223_v54 = vpop.eup %11222  ;;  %7731 = vst [vmem:[%s13858_s17 + $0xd48] sm:$0xff] %v11221_v52  ;;  %11242 = vpow2.f32 %v8864_v44  ;;  %v592_v52 = vld [vmem:[%s13832_s30 + $0xe30] sm:$0xff] }
 0x39d   : > { %v11225_v56 = vpop.eup %11224  ;;  %7732 = vst [vmem:[%s13858_s17 + $0xd50] sm:$0xff] %v11223_v54  ;;  %11244 = vpow2.f32 %v8865_v47  ;;  %v8880_v54 = vmul.f32 -1.442695, %v590_v46 }
 0x39e   : > { %v11227_v58 = vpop.eup %11226  ;;  %7733 = vst [vmem:[%s13858_s17 + $0xd58] sm:$0xff] %v11225_v56  ;;  %11246 = vpow2.f32 %v8866_v50  ;;  %v8881_v56 = vmul.f32 -1.442695, %v591_v49 }
 0x39f   : > { %v11229_v59 = vpop.eup %11228  ;;  %7734 = vst [vmem:[%s13858_s17 + $0xd60] sm:$0xff] %v11227_v58  ;;  %11248 = vpow2.f32 %v8867_v53  ;;  %v8882_v58 = vmul.f32 -1.442695, %v592_v52 }
 0x3a0   : > { %v11231_v60 = vpop.eup %11230  ;;  %v4663_v61 = vadd.f32 1.0, %v11229_v59  ;;  %11250 = vpow2.f32 %v8868_v55 }
 0x3a1   : > { %v11233_v62 = vpop.eup %11232  ;;  %v4664_v63 = vadd.f32 1.0, %v11231_v60  ;;  %11252 = vpow2.f32 %v8869_v57 }
 0x3a2   : > { %v11235_v0 = vpop.eup %11234  ;;  %11254 = vrcp.f32 %v4663_v61  ;;  %v4665_v1 = vadd.f32 1.0, %v11233_v62 }
 0x3a3   : > { %v11237_v2 = vpop.eup %11236  ;;  %11256 = vrcp.f32 %v4664_v63  ;;  %v4666_v3 = vadd.f32 1.0, %v11235_v0 }
 0x3a4   : > { %v11239_v4 = vpop.eup %11238  ;;  %11258 = vrcp.f32 %v4665_v1  ;;  %v4667_v5 = vadd.f32 1.0, %v11237_v2 }
 0x3a5   : > { %v11241_v6 = vpop.eup %11240  ;;  %11260 = vrcp.f32 %v4666_v3  ;;  %v4668_v7 = vadd.f32 1.0, %v11239_v4 }
 0x3a6   : > { %v11243_v8 = vpop.eup %11242  ;;  %11262 = vrcp.f32 %v4667_v5  ;;  %v4669_v9 = vadd.f32 1.0, %v11241_v6 }
 0x3a7   : > { %v11245_v10 = vpop.eup %11244  ;;  %11264 = vrcp.f32 %v4668_v7  ;;  %v4670_v11 = vadd.f32 1.0, %v11243_v8 }
 0x3a8   : > { %v11247_v12 = vpop.eup %11246  ;;  %11266 = vrcp.f32 %v4669_v9  ;;  %v4671_v13 = vadd.f32 1.0, %v11245_v10 }
 0x3a9   : > { %v11249_v15 = vpop.eup %11248  ;;  %11268 = vrcp.f32 %v4670_v11  ;;  %v4672_v16 = vadd.f32 1.0, %v11247_v12 }
 0x3aa   : > { %v11251_v18 = vpop.eup %11250  ;;  %11270 = vrcp.f32 %v4671_v13  ;;  %v4673_v19 = vadd.f32 1.0, %v11249_v15  ;;  %v593_v15 = vld [vmem:[%s13832_s30 + $0xe38] sm:$0xff] }
 0x3ab   : > { %v11253_v21 = vpop.eup %11252  ;;  %11272 = vrcp.f32 %v4672_v16  ;;  %v4674_v22 = vadd.f32 1.0, %v11251_v18  ;;  %v594_v18 = vld [vmem:[%s13832_s30 + $0xe40] sm:$0xff]  ;;  %v8883_v24 = vmul.f32 -1.442695, %v593_v15 }
 0x3ac   : > { %v11255_v25 = vpop.eup %11254  ;;  %11274 = vrcp.f32 %v4673_v19  ;;  %v4675_v26 = vadd.f32 1.0, %v11253_v21  ;;  %v595_v21 = vld [vmem:[%s13832_s30 + $0xe48] sm:$0xff]  ;;  %v8884_v28 = vmul.f32 -1.442695, %v594_v18 }
 0x3ad   : > { %v11257_v29 = vpop.eup %11256  ;;  %7735 = vst [vmem:[%s13858_s17 + $0xd68] sm:$0xff] %v11255_v25  ;;  %11276 = vrcp.f32 %v4674_v22  ;;  %v596_v25 = vld [vmem:[%s13832_s30 + $0xe50] sm:$0xff]  ;;  %v8885_v31 = vmul.f32 -1.442695, %v595_v21 }
 0x3ae   : > { %v11259_v32 = vpop.eup %11258  ;;  %7736 = vst [vmem:[%s13858_s17 + $0xd70] sm:$0xff] %v11257_v29  ;;  %11278 = vrcp.f32 %v4675_v26  ;;  %v597_v29 = vld [vmem:[%s13832_s30 + $0xe58] sm:$0xff]  ;;  %v8886_v34 = vmul.f32 -1.442695, %v596_v25 }
 0x3af   : > { %v11261_v35 = vpop.eup %11260  ;;  %7737 = vst [vmem:[%s13858_s17 + $0xd78] sm:$0xff] %v11259_v32  ;;  %11280 = vpow2.f32 %v8870_v23  ;;  %v598_v32 = vld [vmem:[%s13832_s30 + $0xe60] sm:$0xff]  ;;  %v8887_v37 = vmul.f32 -1.442695, %v597_v29 }
 0x3b0   : > { %v11263_v38 = vpop.eup %11262  ;;  %7738 = vst [vmem:[%s13858_s17 + $0xd80] sm:$0xff] %v11261_v35  ;;  %11282 = vpow2.f32 %v8871_v27  ;;  %v599_v35 = vld [vmem:[%s13832_s30 + $0xe68] sm:$0xff]  ;;  %v8888_v40 = vmul.f32 -1.442695, %v598_v32 }
 0x3b1   : > { %v11265_v41 = vpop.eup %11264  ;;  %7739 = vst [vmem:[%s13858_s17 + $0xd88] sm:$0xff] %v11263_v38  ;;  %11284 = vpow2.f32 %v8872_v30  ;;  %v600_v38 = vld [vmem:[%s13832_s30 + $0xe70] sm:$0xff]  ;;  %v8889_v43 = vmul.f32 -1.442695, %v599_v35 }
 0x3b2   : > { %v11267_v44 = vpop.eup %11266  ;;  %7740 = vst [vmem:[%s13858_s17 + $0xd90] sm:$0xff] %v11265_v41  ;;  %11286 = vpow2.f32 %v8873_v33  ;;  %v601_v41 = vld [vmem:[%s13832_s30 + $0xe78] sm:$0xff]  ;;  %v8890_v46 = vmul.f32 -1.442695, %v600_v38 }
 0x3b3   : > { %v11269_v47 = vpop.eup %11268  ;;  %7741 = vst [vmem:[%s13858_s17 + $0xd98] sm:$0xff] %v11267_v44  ;;  %11288 = vpow2.f32 %v8874_v36  ;;  %v602_v44 = vld [vmem:[%s13832_s30 + $0xe80] sm:$0xff]  ;;  %v8891_v49 = vmul.f32 -1.442695, %v601_v41 }
 0x3b4   : > { %v11271_v50 = vpop.eup %11270  ;;  %7742 = vst [vmem:[%s13858_s17 + $0xda0] sm:$0xff] %v11269_v47  ;;  %11290 = vpow2.f32 %v8875_v39  ;;  %v603_v47 = vld [vmem:[%s13832_s30 + $0xe88] sm:$0xff]  ;;  %v8892_v52 = vmul.f32 -1.442695, %v602_v44 }
 0x3b5   : > { %v11273_v53 = vpop.eup %11272  ;;  %7743 = vst [vmem:[%s13858_s17 + $0xda8] sm:$0xff] %v11271_v50  ;;  %11292 = vpow2.f32 %v8876_v42  ;;  %v604_v50 = vld [vmem:[%s13832_s30 + $0xe90] sm:$0xff] }
 0x3b6   : > { %v11275_v55 = vpop.eup %11274  ;;  %7744 = vst [vmem:[%s13858_s17 + $0xdb0] sm:$0xff] %v11273_v53  ;;  %11294 = vpow2.f32 %v8877_v45  ;;  %v605_v53 = vld [vmem:[%s13832_s30 + $0xe98] sm:$0xff] }
 0x3b7   : > { %v11277_v57 = vpop.eup %11276  ;;  %7745 = vst [vmem:[%s13858_s17 + $0xdb8] sm:$0xff] %v11275_v55  ;;  %11296 = vpow2.f32 %v8878_v48  ;;  %v8893_v55 = vmul.f32 -1.442695, %v603_v47 }
 0x3b8   : > { %v11279_v59 = vpop.eup %11278  ;;  %7746 = vst [vmem:[%s13858_s17 + $0xdc0] sm:$0xff] %v11277_v57  ;;  %11298 = vpow2.f32 %v8879_v51  ;;  %v8894_v57 = vmul.f32 -1.442695, %v604_v50 }
 0x3b9   : > { %v11281_v60 = vpop.eup %11280  ;;  %7747 = vst [vmem:[%s13858_s17 + $0xdc8] sm:$0xff] %v11279_v59  ;;  %11300 = vpow2.f32 %v8880_v54  ;;  %v8895_v59 = vmul.f32 -1.442695, %v605_v53 }
 0x3ba   : > { %v11283_v61 = vpop.eup %11282  ;;  %v4676_v62 = vadd.f32 1.0, %v11281_v60  ;;  %11302 = vpow2.f32 %v8881_v56 }
 0x3bb   : > { %v11285_v63 = vpop.eup %11284  ;;  %v4677_v0 = vadd.f32 1.0, %v11283_v61  ;;  %11304 = vpow2.f32 %v8882_v58 }
 0x3bc   : > { %v11287_v1 = vpop.eup %11286  ;;  %11306 = vrcp.f32 %v4676_v62  ;;  %v4678_v2 = vadd.f32 1.0, %v11285_v63 }
 0x3bd   : > { %v11289_v3 = vpop.eup %11288  ;;  %11308 = vrcp.f32 %v4677_v0  ;;  %v4679_v4 = vadd.f32 1.0, %v11287_v1 }
 0x3be   : > { %v11291_v5 = vpop.eup %11290  ;;  %11310 = vrcp.f32 %v4678_v2  ;;  %v4680_v6 = vadd.f32 1.0, %v11289_v3 }
 0x3bf   : > { %v11293_v7 = vpop.eup %11292  ;;  %11312 = vrcp.f32 %v4679_v4  ;;  %v4681_v8 = vadd.f32 1.0, %v11291_v5 }
 0x3c0   : > { %v11295_v9 = vpop.eup %11294  ;;  %11314 = vrcp.f32 %v4680_v6  ;;  %v4682_v10 = vadd.f32 1.0, %v11293_v7 }
 0x3c1   : > { %v11297_v11 = vpop.eup %11296  ;;  %11316 = vrcp.f32 %v4681_v8  ;;  %v4683_v12 = vadd.f32 1.0, %v11295_v9 }
 0x3c2   : > { %v11299_v13 = vpop.eup %11298  ;;  %11318 = vrcp.f32 %v4682_v10  ;;  %v4684_v14 = vadd.f32 1.0, %v11297_v11 }
 0x3c3   : > { %v11301_v16 = vpop.eup %11300  ;;  %11320 = vrcp.f32 %v4683_v12  ;;  %v4685_v17 = vadd.f32 1.0, %v11299_v13 }
 0x3c4   : > { %v11303_v19 = vpop.eup %11302  ;;  %11322 = vrcp.f32 %v4684_v14  ;;  %v4686_v20 = vadd.f32 1.0, %v11301_v16  ;;  %v606_v16 = vld [vmem:[%s13832_s30 + $0xea0] sm:$0xff] }
 0x3c5   : > { %v11305_v22 = vpop.eup %11304  ;;  %11324 = vrcp.f32 %v4685_v17  ;;  %v4687_v23 = vadd.f32 1.0, %v11303_v19  ;;  %v607_v19 = vld [vmem:[%s13832_s30 + $0xea8] sm:$0xff]  ;;  %v8896_v25 = vmul.f32 -1.442695, %v606_v16 }
 0x3c6   : > { %v11307_v26 = vpop.eup %11306  ;;  %11326 = vrcp.f32 %v4686_v20  ;;  %v4688_v27 = vadd.f32 1.0, %v11305_v22  ;;  %v608_v22 = vld [vmem:[%s13832_s30 + $0xeb0] sm:$0xff]  ;;  %v8897_v29 = vmul.f32 -1.442695, %v607_v19 }
 0x3c7   : > { %v11309_v30 = vpop.eup %11308  ;;  %7748 = vst [vmem:[%s13858_s17 + $0xdd0] sm:$0xff] %v11307_v26  ;;  %11328 = vrcp.f32 %v4687_v23  ;;  %v609_v26 = vld [vmem:[%s13832_s30 + $0xeb8] sm:$0xff]  ;;  %v8898_v32 = vmul.f32 -1.442695, %v608_v22 }
 0x3c8   : > { %v11311_v33 = vpop.eup %11310  ;;  %7749 = vst [vmem:[%s13858_s17 + $0xdd8] sm:$0xff] %v11309_v30  ;;  %11330 = vrcp.f32 %v4688_v27  ;;  %v610_v30 = vld [vmem:[%s13832_s30 + $0xec0] sm:$0xff]  ;;  %v8899_v35 = vmul.f32 -1.442695, %v609_v26 }
 0x3c9   : > { %v11313_v36 = vpop.eup %11312  ;;  %7750 = vst [vmem:[%s13858_s17 + $0xde0] sm:$0xff] %v11311_v33  ;;  %11332 = vpow2.f32 %v8883_v24  ;;  %v611_v33 = vld [vmem:[%s13832_s30 + $0xec8] sm:$0xff]  ;;  %v8900_v38 = vmul.f32 -1.442695, %v610_v30 }
 0x3ca   : > { %v11315_v39 = vpop.eup %11314  ;;  %7751 = vst [vmem:[%s13858_s17 + $0xde8] sm:$0xff] %v11313_v36  ;;  %11334 = vpow2.f32 %v8884_v28  ;;  %v612_v36 = vld [vmem:[%s13832_s30 + $0xed0] sm:$0xff]  ;;  %v8901_v41 = vmul.f32 -1.442695, %v611_v33 }
 0x3cb   : > { %v11317_v42 = vpop.eup %11316  ;;  %7752 = vst [vmem:[%s13858_s17 + $0xdf0] sm:$0xff] %v11315_v39  ;;  %11336 = vpow2.f32 %v8885_v31  ;;  %v613_v39 = vld [vmem:[%s13832_s30 + $0xed8] sm:$0xff]  ;;  %v8902_v44 = vmul.f32 -1.442695, %v612_v36 }
 0x3cc   : > { %v11319_v45 = vpop.eup %11318  ;;  %7753 = vst [vmem:[%s13858_s17 + $0xdf8] sm:$0xff] %v11317_v42  ;;  %11338 = vpow2.f32 %v8886_v34  ;;  %v614_v42 = vld [vmem:[%s13832_s30 + $0xee0] sm:$0xff]  ;;  %v8903_v47 = vmul.f32 -1.442695, %v613_v39 }
 0x3cd   : > { %v11321_v48 = vpop.eup %11320  ;;  %7754 = vst [vmem:[%s13858_s17 + $0xe00] sm:$0xff] %v11319_v45  ;;  %11340 = vpow2.f32 %v8887_v37  ;;  %v615_v45 = vld [vmem:[%s13832_s30 + $0xee8] sm:$0xff]  ;;  %v8904_v50 = vmul.f32 -1.442695, %v614_v42 }
 0x3ce   : > { %v11323_v51 = vpop.eup %11322  ;;  %7755 = vst [vmem:[%s13858_s17 + $0xe08] sm:$0xff] %v11321_v48  ;;  %11342 = vpow2.f32 %v8888_v40  ;;  %v616_v48 = vld [vmem:[%s13832_s30 + $0xef0] sm:$0xff]  ;;  %v8905_v53 = vmul.f32 -1.442695, %v615_v45 }
 0x3cf   : > { %v11325_v54 = vpop.eup %11324  ;;  %7756 = vst [vmem:[%s13858_s17 + $0xe10] sm:$0xff] %v11323_v51  ;;  %11344 = vpow2.f32 %v8889_v43  ;;  %v617_v51 = vld [vmem:[%s13832_s30 + $0xef8] sm:$0xff] }
 0x3d0   : > { %v11327_v56 = vpop.eup %11326  ;;  %7757 = vst [vmem:[%s13858_s17 + $0xe18] sm:$0xff] %v11325_v54  ;;  %11346 = vpow2.f32 %v8890_v46  ;;  %v618_v54 = vld [vmem:[%s13832_s30 + $0xf00] sm:$0xff] }
 0x3d1   : > { %v11329_v58 = vpop.eup %11328  ;;  %7758 = vst [vmem:[%s13858_s17 + $0xe20] sm:$0xff] %v11327_v56  ;;  %11348 = vpow2.f32 %v8891_v49  ;;  %v8906_v56 = vmul.f32 -1.442695, %v616_v48 }
 0x3d2   : > { %v11331_v60 = vpop.eup %11330  ;;  %7759 = vst [vmem:[%s13858_s17 + $0xe28] sm:$0xff] %v11329_v58  ;;  %11350 = vpow2.f32 %v8892_v52  ;;  %v8907_v58 = vmul.f32 -1.442695, %v617_v51 }
 0x3d3   : > { %v11333_v61 = vpop.eup %11332  ;;  %7760 = vst [vmem:[%s13858_s17 + $0xe30] sm:$0xff] %v11331_v60  ;;  %11352 = vpow2.f32 %v8893_v55  ;;  %v8908_v60 = vmul.f32 -1.442695, %v618_v54 }
 0x3d4   : > { %v11335_v62 = vpop.eup %11334  ;;  %v4689_v63 = vadd.f32 1.0, %v11333_v61  ;;  %11354 = vpow2.f32 %v8894_v57 }
 0x3d5   : > { %v11337_v0 = vpop.eup %11336  ;;  %v4690_v1 = vadd.f32 1.0, %v11335_v62  ;;  %11356 = vpow2.f32 %v8895_v59 }
 0x3d6   : > { %v11339_v2 = vpop.eup %11338  ;;  %11358 = vrcp.f32 %v4689_v63  ;;  %v4691_v3 = vadd.f32 1.0, %v11337_v0 }
 0x3d7   : > { %v11341_v4 = vpop.eup %11340  ;;  %11360 = vrcp.f32 %v4690_v1  ;;  %v4692_v5 = vadd.f32 1.0, %v11339_v2 }
 0x3d8   : > { %v11343_v6 = vpop.eup %11342  ;;  %11362 = vrcp.f32 %v4691_v3  ;;  %v4693_v7 = vadd.f32 1.0, %v11341_v4 }
 0x3d9   : > { %v11345_v8 = vpop.eup %11344  ;;  %11364 = vrcp.f32 %v4692_v5  ;;  %v4694_v9 = vadd.f32 1.0, %v11343_v6 }
 0x3da   : > { %v11347_v10 = vpop.eup %11346  ;;  %11366 = vrcp.f32 %v4693_v7  ;;  %v4695_v11 = vadd.f32 1.0, %v11345_v8 }
 0x3db   : > { %v11349_v12 = vpop.eup %11348  ;;  %11368 = vrcp.f32 %v4694_v9  ;;  %v4696_v13 = vadd.f32 1.0, %v11347_v10 }
 0x3dc   : > { %v11351_v14 = vpop.eup %11350  ;;  %11370 = vrcp.f32 %v4695_v11  ;;  %v4697_v15 = vadd.f32 1.0, %v11349_v12 }
 0x3dd   : > { %v11353_v17 = vpop.eup %11352  ;;  %11372 = vrcp.f32 %v4696_v13  ;;  %v4698_v18 = vadd.f32 1.0, %v11351_v14 }
 0x3de   : > { %v11355_v20 = vpop.eup %11354  ;;  %11374 = vrcp.f32 %v4697_v15  ;;  %v4699_v21 = vadd.f32 1.0, %v11353_v17  ;;  %v619_v17 = vld [vmem:[%s13832_s30 + $0xf08] sm:$0xff] }
 0x3df   : > { %v11357_v23 = vpop.eup %11356  ;;  %11376 = vrcp.f32 %v4698_v18  ;;  %v4700_v24 = vadd.f32 1.0, %v11355_v20  ;;  %v620_v20 = vld [vmem:[%s13832_s30 + $0xf10] sm:$0xff]  ;;  %v8909_v26 = vmul.f32 -1.442695, %v619_v17 }
 0x3e0   : > { %v11359_v27 = vpop.eup %11358  ;;  %11378 = vrcp.f32 %v4699_v21  ;;  %v4701_v28 = vadd.f32 1.0, %v11357_v23  ;;  %v621_v23 = vld [vmem:[%s13832_s30 + $0xf18] sm:$0xff]  ;;  %v8910_v30 = vmul.f32 -1.442695, %v620_v20 }
 0x3e1   : > { %v11361_v31 = vpop.eup %11360  ;;  %7761 = vst [vmem:[%s13858_s17 + $0xe38] sm:$0xff] %v11359_v27  ;;  %11380 = vrcp.f32 %v4700_v24  ;;  %v622_v27 = vld [vmem:[%s13832_s30 + $0xf20] sm:$0xff]  ;;  %v8911_v33 = vmul.f32 -1.442695, %v621_v23 }
 0x3e2   : > { %v11363_v34 = vpop.eup %11362  ;;  %7762 = vst [vmem:[%s13858_s17 + $0xe40] sm:$0xff] %v11361_v31  ;;  %11382 = vrcp.f32 %v4701_v28  ;;  %v623_v31 = vld [vmem:[%s13832_s30 + $0xf28] sm:$0xff]  ;;  %v8912_v36 = vmul.f32 -1.442695, %v622_v27 }
 0x3e3   : > { %v11365_v37 = vpop.eup %11364  ;;  %7763 = vst [vmem:[%s13858_s17 + $0xe48] sm:$0xff] %v11363_v34  ;;  %11384 = vpow2.f32 %v8896_v25  ;;  %v624_v34 = vld [vmem:[%s13832_s30 + $0xf30] sm:$0xff]  ;;  %v8913_v39 = vmul.f32 -1.442695, %v623_v31 }
 0x3e4   : > { %v11367_v40 = vpop.eup %11366  ;;  %7764 = vst [vmem:[%s13858_s17 + $0xe50] sm:$0xff] %v11365_v37  ;;  %11386 = vpow2.f32 %v8897_v29  ;;  %v625_v37 = vld [vmem:[%s13832_s30 + $0xf38] sm:$0xff]  ;;  %v8914_v42 = vmul.f32 -1.442695, %v624_v34 }
 0x3e5   : > { %v11369_v43 = vpop.eup %11368  ;;  %7765 = vst [vmem:[%s13858_s17 + $0xe58] sm:$0xff] %v11367_v40  ;;  %11388 = vpow2.f32 %v8898_v32  ;;  %v626_v40 = vld [vmem:[%s13832_s30 + $0xf40] sm:$0xff]  ;;  %v8915_v45 = vmul.f32 -1.442695, %v625_v37 }
 0x3e6   : > { %v11371_v46 = vpop.eup %11370  ;;  %7766 = vst [vmem:[%s13858_s17 + $0xe60] sm:$0xff] %v11369_v43  ;;  %11390 = vpow2.f32 %v8899_v35  ;;  %v627_v43 = vld [vmem:[%s13832_s30 + $0xf48] sm:$0xff]  ;;  %v8916_v48 = vmul.f32 -1.442695, %v626_v40 }
 0x3e7   : > { %v11373_v49 = vpop.eup %11372  ;;  %7767 = vst [vmem:[%s13858_s17 + $0xe68] sm:$0xff] %v11371_v46  ;;  %11392 = vpow2.f32 %v8900_v38  ;;  %v628_v46 = vld [vmem:[%s13832_s30 + $0xf50] sm:$0xff]  ;;  %v8917_v51 = vmul.f32 -1.442695, %v627_v43 }
 0x3e8   : > { %v11375_v52 = vpop.eup %11374  ;;  %7768 = vst [vmem:[%s13858_s17 + $0xe70] sm:$0xff] %v11373_v49  ;;  %11394 = vpow2.f32 %v8901_v41  ;;  %v629_v49 = vld [vmem:[%s13832_s30 + $0xf58] sm:$0xff]  ;;  %v8918_v54 = vmul.f32 -1.442695, %v628_v46 }
 0x3e9   : > { %v11377_v55 = vpop.eup %11376  ;;  %7769 = vst [vmem:[%s13858_s17 + $0xe78] sm:$0xff] %v11375_v52  ;;  %11396 = vpow2.f32 %v8902_v44  ;;  %v630_v52 = vld [vmem:[%s13832_s30 + $0xf60] sm:$0xff] }
 0x3ea   : > { %v11379_v57 = vpop.eup %11378  ;;  %7770 = vst [vmem:[%s13858_s17 + $0xe80] sm:$0xff] %v11377_v55  ;;  %11398 = vpow2.f32 %v8903_v47  ;;  %v631_v55 = vld [vmem:[%s13832_s30 + $0xf68] sm:$0xff] }
 0x3eb   : > { %v11381_v59 = vpop.eup %11380  ;;  %7771 = vst [vmem:[%s13858_s17 + $0xe88] sm:$0xff] %v11379_v57  ;;  %11400 = vpow2.f32 %v8904_v50  ;;  %v8919_v57 = vmul.f32 -1.442695, %v629_v49 }
 0x3ec   : > { %v11383_v61 = vpop.eup %11382  ;;  %7772 = vst [vmem:[%s13858_s17 + $0xe90] sm:$0xff] %v11381_v59  ;;  %11402 = vpow2.f32 %v8905_v53  ;;  %v8920_v59 = vmul.f32 -1.442695, %v630_v52 }
 0x3ed   : > { %v11385_v62 = vpop.eup %11384  ;;  %7773 = vst [vmem:[%s13858_s17 + $0xe98] sm:$0xff] %v11383_v61  ;;  %11404 = vpow2.f32 %v8906_v56  ;;  %v8921_v61 = vmul.f32 -1.442695, %v631_v55 }
 0x3ee   : > { %v11387_v63 = vpop.eup %11386  ;;  %v4702_v0 = vadd.f32 1.0, %v11385_v62  ;;  %11406 = vpow2.f32 %v8907_v58 }
 0x3ef   : > { %v11389_v1 = vpop.eup %11388  ;;  %v4703_v2 = vadd.f32 1.0, %v11387_v63  ;;  %11408 = vpow2.f32 %v8908_v60 }
 0x3f0   : > { %v11391_v3 = vpop.eup %11390  ;;  %11410 = vrcp.f32 %v4702_v0  ;;  %v4704_v4 = vadd.f32 1.0, %v11389_v1 }
 0x3f1   : > { %v11393_v5 = vpop.eup %11392  ;;  %11412 = vrcp.f32 %v4703_v2  ;;  %v4705_v6 = vadd.f32 1.0, %v11391_v3 }
 0x3f2   : > { %v11395_v7 = vpop.eup %11394  ;;  %11414 = vrcp.f32 %v4704_v4  ;;  %v4706_v8 = vadd.f32 1.0, %v11393_v5 }
 0x3f3   : > { %v11397_v9 = vpop.eup %11396  ;;  %11416 = vrcp.f32 %v4705_v6  ;;  %v4707_v10 = vadd.f32 1.0, %v11395_v7 }
 0x3f4   : > { %v11399_v11 = vpop.eup %11398  ;;  %11418 = vrcp.f32 %v4706_v8  ;;  %v4708_v12 = vadd.f32 1.0, %v11397_v9 }
 0x3f5   : > { %v11401_v13 = vpop.eup %11400  ;;  %11420 = vrcp.f32 %v4707_v10  ;;  %v4709_v14 = vadd.f32 1.0, %v11399_v11 }
 0x3f6   : > { %v11403_v15 = vpop.eup %11402  ;;  %11422 = vrcp.f32 %v4708_v12  ;;  %v4710_v16 = vadd.f32 1.0, %v11401_v13 }
 0x3f7   : > { %v11405_v18 = vpop.eup %11404  ;;  %11424 = vrcp.f32 %v4709_v14  ;;  %v4711_v19 = vadd.f32 1.0, %v11403_v15 }
 0x3f8   : > { %v11407_v21 = vpop.eup %11406  ;;  %11426 = vrcp.f32 %v4710_v16  ;;  %v4712_v22 = vadd.f32 1.0, %v11405_v18  ;;  %v632_v18 = vld [vmem:[%s13832_s30 + $0xf70] sm:$0xff] }
 0x3f9   : > { %v11409_v24 = vpop.eup %11408  ;;  %11428 = vrcp.f32 %v4711_v19  ;;  %v4713_v25 = vadd.f32 1.0, %v11407_v21  ;;  %v633_v21 = vld [vmem:[%s13832_s30 + $0xf78] sm:$0xff]  ;;  %v8922_v27 = vmul.f32 -1.442695, %v632_v18 }
 0x3fa   : > { %v11411_v28 = vpop.eup %11410  ;;  %11430 = vrcp.f32 %v4712_v22  ;;  %v4714_v29 = vadd.f32 1.0, %v11409_v24  ;;  %v634_v24 = vld [vmem:[%s13832_s30 + $0xf80] sm:$0xff]  ;;  %v8923_v31 = vmul.f32 -1.442695, %v633_v21 }
 0x3fb   : > { %v11413_v32 = vpop.eup %11412  ;;  %7774 = vst [vmem:[%s13858_s17 + $0xea0] sm:$0xff] %v11411_v28  ;;  %11432 = vrcp.f32 %v4713_v25  ;;  %v635_v28 = vld [vmem:[%s13832_s30 + $0xf88] sm:$0xff]  ;;  %v8924_v34 = vmul.f32 -1.442695, %v634_v24 }
 0x3fc   : > { %v11415_v35 = vpop.eup %11414  ;;  %7775 = vst [vmem:[%s13858_s17 + $0xea8] sm:$0xff] %v11413_v32  ;;  %11434 = vrcp.f32 %v4714_v29  ;;  %v636_v32 = vld [vmem:[%s13832_s30 + $0xf90] sm:$0xff]  ;;  %v8925_v37 = vmul.f32 -1.442695, %v635_v28 }
 0x3fd   : > { %v11417_v38 = vpop.eup %11416  ;;  %7776 = vst [vmem:[%s13858_s17 + $0xeb0] sm:$0xff] %v11415_v35  ;;  %11436 = vpow2.f32 %v8909_v26  ;;  %v637_v35 = vld [vmem:[%s13832_s30 + $0xf98] sm:$0xff]  ;;  %v8926_v40 = vmul.f32 -1.442695, %v636_v32 }
 0x3fe   : > { %v11419_v41 = vpop.eup %11418  ;;  %7777 = vst [vmem:[%s13858_s17 + $0xeb8] sm:$0xff] %v11417_v38  ;;  %11438 = vpow2.f32 %v8910_v30  ;;  %v638_v38 = vld [vmem:[%s13832_s30 + $0xfa0] sm:$0xff]  ;;  %v8927_v43 = vmul.f32 -1.442695, %v637_v35 }
 0x3ff   : > { %v11421_v44 = vpop.eup %11420  ;;  %7778 = vst [vmem:[%s13858_s17 + $0xec0] sm:$0xff] %v11419_v41  ;;  %11440 = vpow2.f32 %v8911_v33  ;;  %v639_v41 = vld [vmem:[%s13832_s30 + $0xfa8] sm:$0xff]  ;;  %v8928_v46 = vmul.f32 -1.442695, %v638_v38 }
 0x400   : > { %v11423_v47 = vpop.eup %11422  ;;  %7779 = vst [vmem:[%s13858_s17 + $0xec8] sm:$0xff] %v11421_v44  ;;  %11442 = vpow2.f32 %v8912_v36  ;;  %v640_v44 = vld [vmem:[%s13832_s30 + $0xfb0] sm:$0xff]  ;;  %v8929_v49 = vmul.f32 -1.442695, %v639_v41 }
 0x401   : > { %v11425_v50 = vpop.eup %11424  ;;  %7780 = vst [vmem:[%s13858_s17 + $0xed0] sm:$0xff] %v11423_v47  ;;  %11444 = vpow2.f32 %v8913_v39  ;;  %v641_v47 = vld [vmem:[%s13832_s30 + $0xfb8] sm:$0xff]  ;;  %v8930_v52 = vmul.f32 -1.442695, %v640_v44 }
 0x402   : > { %v11427_v53 = vpop.eup %11426  ;;  %7781 = vst [vmem:[%s13858_s17 + $0xed8] sm:$0xff] %v11425_v50  ;;  %11446 = vpow2.f32 %v8914_v42  ;;  %v642_v50 = vld [vmem:[%s13832_s30 + $0xfc0] sm:$0xff]  ;;  %v8931_v55 = vmul.f32 -1.442695, %v641_v47 }
 0x403   : > { %v11429_v56 = vpop.eup %11428  ;;  %7782 = vst [vmem:[%s13858_s17 + $0xee0] sm:$0xff] %v11427_v53  ;;  %11448 = vpow2.f32 %v8915_v45  ;;  %v643_v53 = vld [vmem:[%s13832_s30 + $0xfc8] sm:$0xff] }
 0x404   : > { %v11431_v58 = vpop.eup %11430  ;;  %7783 = vst [vmem:[%s13858_s17 + $0xee8] sm:$0xff] %v11429_v56  ;;  %11450 = vpow2.f32 %v8916_v48  ;;  %v644_v56 = vld [vmem:[%s13832_s30 + $0xfd0] sm:$0xff] }
 0x405   : > { %v11433_v60 = vpop.eup %11432  ;;  %7784 = vst [vmem:[%s13858_s17 + $0xef0] sm:$0xff] %v11431_v58  ;;  %11452 = vpow2.f32 %v8917_v51  ;;  %v8932_v58 = vmul.f32 -1.442695, %v642_v50 }
 0x406   : > { %v11435_v62 = vpop.eup %11434  ;;  %7785 = vst [vmem:[%s13858_s17 + $0xef8] sm:$0xff] %v11433_v60  ;;  %11454 = vpow2.f32 %v8918_v54  ;;  %v8933_v60 = vmul.f32 -1.442695, %v643_v53 }
 0x407   : > { %v11437_v63 = vpop.eup %11436  ;;  %7786 = vst [vmem:[%s13858_s17 + $0xf00] sm:$0xff] %v11435_v62  ;;  %11456 = vpow2.f32 %v8919_v57  ;;  %v8934_v62 = vmul.f32 -1.442695, %v644_v56 }
 0x408   : > { %v11439_v0 = vpop.eup %11438  ;;  %v4715_v1 = vadd.f32 1.0, %v11437_v63  ;;  %11458 = vpow2.f32 %v8920_v59 }
 0x409   : > { %v11441_v2 = vpop.eup %11440  ;;  %v4716_v3 = vadd.f32 1.0, %v11439_v0  ;;  %11460 = vpow2.f32 %v8921_v61 }
 0x40a   : > { %v11443_v4 = vpop.eup %11442  ;;  %11462 = vrcp.f32 %v4715_v1  ;;  %v4717_v5 = vadd.f32 1.0, %v11441_v2 }
 0x40b   : > { %v11445_v6 = vpop.eup %11444  ;;  %11464 = vrcp.f32 %v4716_v3  ;;  %v4718_v7 = vadd.f32 1.0, %v11443_v4 }
 0x40c   : > { %v11447_v8 = vpop.eup %11446  ;;  %11466 = vrcp.f32 %v4717_v5  ;;  %v4719_v9 = vadd.f32 1.0, %v11445_v6 }
 0x40d   : > { %v11449_v10 = vpop.eup %11448  ;;  %11468 = vrcp.f32 %v4718_v7  ;;  %v4720_v11 = vadd.f32 1.0, %v11447_v8 }
 0x40e   : > { %v11451_v12 = vpop.eup %11450  ;;  %11470 = vrcp.f32 %v4719_v9  ;;  %v4721_v13 = vadd.f32 1.0, %v11449_v10 }
 0x40f   : > { %v11453_v14 = vpop.eup %11452  ;;  %11472 = vrcp.f32 %v4720_v11  ;;  %v4722_v15 = vadd.f32 1.0, %v11451_v12 }
 0x410   : > { %v11455_v16 = vpop.eup %11454  ;;  %11474 = vrcp.f32 %v4721_v13  ;;  %v4723_v17 = vadd.f32 1.0, %v11453_v14 }
 0x411   : > { %v11457_v19 = vpop.eup %11456  ;;  %11476 = vrcp.f32 %v4722_v15  ;;  %v4724_v20 = vadd.f32 1.0, %v11455_v16 }
 0x412   : > { %v11459_v22 = vpop.eup %11458  ;;  %11478 = vrcp.f32 %v4723_v17  ;;  %v4725_v23 = vadd.f32 1.0, %v11457_v19  ;;  %v645_v19 = vld [vmem:[%s13832_s30 + $0xfd8] sm:$0xff] }
 0x413   : > { %v11461_v25 = vpop.eup %11460  ;;  %11480 = vrcp.f32 %v4724_v20  ;;  %v4726_v26 = vadd.f32 1.0, %v11459_v22  ;;  %v646_v22 = vld [vmem:[%s13832_s30 + $0xfe0] sm:$0xff]  ;;  %v8935_v28 = vmul.f32 -1.442695, %v645_v19 }
 0x414   : > { %v11463_v29 = vpop.eup %11462  ;;  %11482 = vrcp.f32 %v4725_v23  ;;  %v4727_v30 = vadd.f32 1.0, %v11461_v25  ;;  %v647_v25 = vld [vmem:[%s13832_s30 + $0xfe8] sm:$0xff]  ;;  %v8936_v32 = vmul.f32 -1.442695, %v646_v22 }
 0x415   : > { %v11465_v33 = vpop.eup %11464  ;;  %7787 = vst [vmem:[%s13858_s17 + $0xf08] sm:$0xff] %v11463_v29  ;;  %11484 = vrcp.f32 %v4726_v26  ;;  %v648_v29 = vld [vmem:[%s13832_s30 + $0xff0] sm:$0xff]  ;;  %v8937_v35 = vmul.f32 -1.442695, %v647_v25 }
 0x416   : > { %v11467_v36 = vpop.eup %11466  ;;  %7788 = vst [vmem:[%s13858_s17 + $0xf10] sm:$0xff] %v11465_v33  ;;  %11486 = vrcp.f32 %v4727_v30  ;;  %v649_v33 = vld [vmem:[%s13832_s30 + $0xff8] sm:$0xff]  ;;  %v8938_v38 = vmul.f32 -1.442695, %v648_v29 }
 0x417   : > { %v11469_v39 = vpop.eup %11468  ;;  %7789 = vst [vmem:[%s13858_s17 + $0xf18] sm:$0xff] %v11467_v36  ;;  %11488 = vpow2.f32 %v8922_v27  ;;  %v650_v36 = vld [vmem:[%s13832_s30 + $0x1000] sm:$0xff]  ;;  %v8939_v41 = vmul.f32 -1.442695, %v649_v33 }
 0x418   : > { %v11471_v42 = vpop.eup %11470  ;;  %7790 = vst [vmem:[%s13858_s17 + $0xf20] sm:$0xff] %v11469_v39  ;;  %11490 = vpow2.f32 %v8923_v31  ;;  %v651_v39 = vld [vmem:[%s13832_s30 + $0x1008] sm:$0xff]  ;;  %v8940_v44 = vmul.f32 -1.442695, %v650_v36 }
 0x419   : > { %v11473_v45 = vpop.eup %11472  ;;  %7791 = vst [vmem:[%s13858_s17 + $0xf28] sm:$0xff] %v11471_v42  ;;  %11492 = vpow2.f32 %v8924_v34  ;;  %v652_v42 = vld [vmem:[%s13832_s30 + $0x1010] sm:$0xff]  ;;  %v8941_v47 = vmul.f32 -1.442695, %v651_v39 }
 0x41a   : > { %v11475_v48 = vpop.eup %11474  ;;  %7792 = vst [vmem:[%s13858_s17 + $0xf30] sm:$0xff] %v11473_v45  ;;  %11494 = vpow2.f32 %v8925_v37  ;;  %v653_v45 = vld [vmem:[%s13832_s30 + $0x1018] sm:$0xff]  ;;  %v8942_v50 = vmul.f32 -1.442695, %v652_v42 }
 0x41b   : > { %v11477_v51 = vpop.eup %11476  ;;  %7793 = vst [vmem:[%s13858_s17 + $0xf38] sm:$0xff] %v11475_v48  ;;  %11496 = vpow2.f32 %v8926_v40  ;;  %v654_v48 = vld [vmem:[%s13832_s30 + $0x1020] sm:$0xff]  ;;  %v8943_v53 = vmul.f32 -1.442695, %v653_v45 }
 0x41c   : > { %v11479_v54 = vpop.eup %11478  ;;  %7794 = vst [vmem:[%s13858_s17 + $0xf40] sm:$0xff] %v11477_v51  ;;  %11498 = vpow2.f32 %v8927_v43  ;;  %v655_v51 = vld [vmem:[%s13832_s30 + $0x1028] sm:$0xff]  ;;  %v8944_v56 = vmul.f32 -1.442695, %v654_v48 }
 0x41d   : > { %v11481_v57 = vpop.eup %11480  ;;  %7795 = vst [vmem:[%s13858_s17 + $0xf48] sm:$0xff] %v11479_v54  ;;  %11500 = vpow2.f32 %v8928_v46  ;;  %v656_v54 = vld [vmem:[%s13832_s30 + $0x1030] sm:$0xff] }
 0x41e   : > { %v11483_v59 = vpop.eup %11482  ;;  %7796 = vst [vmem:[%s13858_s17 + $0xf50] sm:$0xff] %v11481_v57  ;;  %11502 = vpow2.f32 %v8929_v49  ;;  %v657_v57 = vld [vmem:[%s13832_s30 + $0x1038] sm:$0xff] }
 0x41f   : > { %v11485_v61 = vpop.eup %11484  ;;  %7797 = vst [vmem:[%s13858_s17 + $0xf58] sm:$0xff] %v11483_v59  ;;  %11504 = vpow2.f32 %v8930_v52  ;;  %v8945_v59 = vmul.f32 -1.442695, %v655_v51 }
 0x420   : > { %v11487_v63 = vpop.eup %11486  ;;  %7798 = vst [vmem:[%s13858_s17 + $0xf60] sm:$0xff] %v11485_v61  ;;  %11506 = vpow2.f32 %v8931_v55  ;;  %v8946_v61 = vmul.f32 -1.442695, %v656_v54 }
 0x421   : > { %v11489_v0 = vpop.eup %11488  ;;  %7799 = vst [vmem:[%s13858_s17 + $0xf68] sm:$0xff] %v11487_v63  ;;  %11508 = vpow2.f32 %v8932_v58  ;;  %v8947_v63 = vmul.f32 -1.442695, %v657_v57 }
 0x422   : > { %v11491_v1 = vpop.eup %11490  ;;  %v4728_v2 = vadd.f32 1.0, %v11489_v0  ;;  %11510 = vpow2.f32 %v8933_v60 }
 0x423   : > { %v11493_v3 = vpop.eup %11492  ;;  %v4729_v4 = vadd.f32 1.0, %v11491_v1  ;;  %11512 = vpow2.f32 %v8934_v62 }
 0x424   : > { %v11495_v5 = vpop.eup %11494  ;;  %11514 = vrcp.f32 %v4728_v2  ;;  %v4730_v6 = vadd.f32 1.0, %v11493_v3 }
 0x425   : > { %v11497_v7 = vpop.eup %11496  ;;  %11516 = vrcp.f32 %v4729_v4  ;;  %v4731_v8 = vadd.f32 1.0, %v11495_v5 }
 0x426   : > { %v11499_v9 = vpop.eup %11498  ;;  %11518 = vrcp.f32 %v4730_v6  ;;  %v4732_v10 = vadd.f32 1.0, %v11497_v7 }
 0x427   : > { %v11501_v11 = vpop.eup %11500  ;;  %11520 = vrcp.f32 %v4731_v8  ;;  %v4733_v12 = vadd.f32 1.0, %v11499_v9 }
 0x428   : > { %v11503_v13 = vpop.eup %11502  ;;  %11522 = vrcp.f32 %v4732_v10  ;;  %v4734_v14 = vadd.f32 1.0, %v11501_v11 }
 0x429   : > { %v11505_v15 = vpop.eup %11504  ;;  %11524 = vrcp.f32 %v4733_v12  ;;  %v4735_v16 = vadd.f32 1.0, %v11503_v13 }
 0x42a   : > { %v11507_v17 = vpop.eup %11506  ;;  %11526 = vrcp.f32 %v4734_v14  ;;  %v4736_v18 = vadd.f32 1.0, %v11505_v15 }
 0x42b   : > { %v11509_v20 = vpop.eup %11508  ;;  %11528 = vrcp.f32 %v4735_v16  ;;  %v4737_v21 = vadd.f32 1.0, %v11507_v17 }
 0x42c   : > { %v11511_v23 = vpop.eup %11510  ;;  %11530 = vrcp.f32 %v4736_v18  ;;  %v4738_v24 = vadd.f32 1.0, %v11509_v20  ;;  %v658_v20 = vld [vmem:[%s13832_s30 + $0x1040] sm:$0xff] }
 0x42d   : > { %v11513_v26 = vpop.eup %11512  ;;  %11532 = vrcp.f32 %v4737_v21  ;;  %v4739_v27 = vadd.f32 1.0, %v11511_v23  ;;  %v659_v23 = vld [vmem:[%s13832_s30 + $0x1048] sm:$0xff]  ;;  %v8948_v29 = vmul.f32 -1.442695, %v658_v20 }
 0x42e   : > { %v11515_v30 = vpop.eup %11514  ;;  %11534 = vrcp.f32 %v4738_v24  ;;  %v4740_v31 = vadd.f32 1.0, %v11513_v26  ;;  %v660_v26 = vld [vmem:[%s13832_s30 + $0x1050] sm:$0xff]  ;;  %v8949_v33 = vmul.f32 -1.442695, %v659_v23 }
 0x42f   : > { %v11517_v34 = vpop.eup %11516  ;;  %7800 = vst [vmem:[%s13858_s17 + $0xf70] sm:$0xff] %v11515_v30  ;;  %11536 = vrcp.f32 %v4739_v27  ;;  %v661_v30 = vld [vmem:[%s13832_s30 + $0x1058] sm:$0xff]  ;;  %v8950_v36 = vmul.f32 -1.442695, %v660_v26 }
 0x430   : > { %v11519_v37 = vpop.eup %11518  ;;  %7801 = vst [vmem:[%s13858_s17 + $0xf78] sm:$0xff] %v11517_v34  ;;  %11538 = vrcp.f32 %v4740_v31  ;;  %v662_v34 = vld [vmem:[%s13832_s30 + $0x1060] sm:$0xff]  ;;  %v8951_v39 = vmul.f32 -1.442695, %v661_v30 }
 0x431   : > { %v11521_v40 = vpop.eup %11520  ;;  %7802 = vst [vmem:[%s13858_s17 + $0xf80] sm:$0xff] %v11519_v37  ;;  %11540 = vpow2.f32 %v8935_v28  ;;  %v663_v37 = vld [vmem:[%s13832_s30 + $0x1068] sm:$0xff]  ;;  %v8952_v42 = vmul.f32 -1.442695, %v662_v34 }
 0x432   : > { %v11523_v43 = vpop.eup %11522  ;;  %7803 = vst [vmem:[%s13858_s17 + $0xf88] sm:$0xff] %v11521_v40  ;;  %11542 = vpow2.f32 %v8936_v32  ;;  %v664_v40 = vld [vmem:[%s13832_s30 + $0x1070] sm:$0xff]  ;;  %v8953_v45 = vmul.f32 -1.442695, %v663_v37 }
 0x433   : > { %v11525_v46 = vpop.eup %11524  ;;  %7804 = vst [vmem:[%s13858_s17 + $0xf90] sm:$0xff] %v11523_v43  ;;  %11544 = vpow2.f32 %v8937_v35  ;;  %v665_v43 = vld [vmem:[%s13832_s30 + $0x1078] sm:$0xff]  ;;  %v8954_v48 = vmul.f32 -1.442695, %v664_v40 }
 0x434   : > { %v11527_v49 = vpop.eup %11526  ;;  %7805 = vst [vmem:[%s13858_s17 + $0xf98] sm:$0xff] %v11525_v46  ;;  %11546 = vpow2.f32 %v8938_v38  ;;  %v666_v46 = vld [vmem:[%s13832_s30 + $0x1080] sm:$0xff]  ;;  %v8955_v51 = vmul.f32 -1.442695, %v665_v43 }
 0x435   : > { %v11529_v52 = vpop.eup %11528  ;;  %7806 = vst [vmem:[%s13858_s17 + $0xfa0] sm:$0xff] %v11527_v49  ;;  %11548 = vpow2.f32 %v8939_v41  ;;  %v667_v49 = vld [vmem:[%s13832_s30 + $0x1088] sm:$0xff]  ;;  %v8956_v54 = vmul.f32 -1.442695, %v666_v46 }
 0x436   : > { %v11531_v55 = vpop.eup %11530  ;;  %7807 = vst [vmem:[%s13858_s17 + $0xfa8] sm:$0xff] %v11529_v52  ;;  %11550 = vpow2.f32 %v8940_v44  ;;  %v668_v52 = vld [vmem:[%s13832_s30 + $0x1090] sm:$0xff]  ;;  %v8957_v57 = vmul.f32 -1.442695, %v667_v49 }
 0x437   : > { %v11533_v58 = vpop.eup %11532  ;;  %7808 = vst [vmem:[%s13858_s17 + $0xfb0] sm:$0xff] %v11531_v55  ;;  %11552 = vpow2.f32 %v8941_v47  ;;  %v669_v55 = vld [vmem:[%s13832_s30 + $0x1098] sm:$0xff] }
 0x438   : > { %v11535_v60 = vpop.eup %11534  ;;  %7809 = vst [vmem:[%s13858_s17 + $0xfb8] sm:$0xff] %v11533_v58  ;;  %11554 = vpow2.f32 %v8942_v50  ;;  %v670_v58 = vld [vmem:[%s13832_s30 + $0x10a0] sm:$0xff] }
 0x439   : > { %v11537_v62 = vpop.eup %11536  ;;  %7810 = vst [vmem:[%s13858_s17 + $0xfc0] sm:$0xff] %v11535_v60  ;;  %11556 = vpow2.f32 %v8943_v53  ;;  %v8958_v60 = vmul.f32 -1.442695, %v668_v52 }
 0x43a   : > { %v11539_v0 = vpop.eup %11538  ;;  %7811 = vst [vmem:[%s13858_s17 + $0xfc8] sm:$0xff] %v11537_v62  ;;  %11558 = vpow2.f32 %v8944_v56  ;;  %v8959_v62 = vmul.f32 -1.442695, %v669_v55 }
 0x43b   : > { %v11541_v1 = vpop.eup %11540  ;;  %7812 = vst [vmem:[%s13858_s17 + $0xfd0] sm:$0xff] %v11539_v0  ;;  %11560 = vpow2.f32 %v8945_v59  ;;  %v8960_v0 = vmul.f32 -1.442695, %v670_v58 }
 0x43c   : > { %v11543_v2 = vpop.eup %11542  ;;  %v4741_v3 = vadd.f32 1.0, %v11541_v1  ;;  %11562 = vpow2.f32 %v8946_v61 }
 0x43d   : > { %v11545_v4 = vpop.eup %11544  ;;  %v4742_v5 = vadd.f32 1.0, %v11543_v2  ;;  %11564 = vpow2.f32 %v8947_v63 }
 0x43e   : > { %v11547_v6 = vpop.eup %11546  ;;  %11566 = vrcp.f32 %v4741_v3  ;;  %v4743_v7 = vadd.f32 1.0, %v11545_v4 }
 0x43f   : > { %v11549_v8 = vpop.eup %11548  ;;  %11568 = vrcp.f32 %v4742_v5  ;;  %v4744_v9 = vadd.f32 1.0, %v11547_v6 }
 0x440   : > { %v11551_v10 = vpop.eup %11550  ;;  %11570 = vrcp.f32 %v4743_v7  ;;  %v4745_v11 = vadd.f32 1.0, %v11549_v8 }
 0x441   : > { %v11553_v12 = vpop.eup %11552  ;;  %11572 = vrcp.f32 %v4744_v9  ;;  %v4746_v13 = vadd.f32 1.0, %v11551_v10 }
 0x442   : > { %v11555_v14 = vpop.eup %11554  ;;  %11574 = vrcp.f32 %v4745_v11  ;;  %v4747_v15 = vadd.f32 1.0, %v11553_v12 }
 0x443   : > { %v11557_v16 = vpop.eup %11556  ;;  %11576 = vrcp.f32 %v4746_v13  ;;  %v4748_v17 = vadd.f32 1.0, %v11555_v14 }
 0x444   : > { %v11559_v18 = vpop.eup %11558  ;;  %11578 = vrcp.f32 %v4747_v15  ;;  %v4749_v19 = vadd.f32 1.0, %v11557_v16 }
 0x445   : > { %v11561_v21 = vpop.eup %11560  ;;  %11580 = vrcp.f32 %v4748_v17  ;;  %v4750_v22 = vadd.f32 1.0, %v11559_v18 }
 0x446   : > { %v11563_v24 = vpop.eup %11562  ;;  %11582 = vrcp.f32 %v4749_v19  ;;  %v4751_v25 = vadd.f32 1.0, %v11561_v21  ;;  %v671_v21 = vld [vmem:[%s13832_s30 + $0x10a8] sm:$0xff] }
 0x447   : > { %v11565_v27 = vpop.eup %11564  ;;  %11584 = vrcp.f32 %v4750_v22  ;;  %v4752_v28 = vadd.f32 1.0, %v11563_v24  ;;  %v672_v24 = vld [vmem:[%s13832_s30 + $0x10b0] sm:$0xff]  ;;  %v8961_v30 = vmul.f32 -1.442695, %v671_v21 }
 0x448   : > { %v11567_v31 = vpop.eup %11566  ;;  %11586 = vrcp.f32 %v4751_v25  ;;  %v4753_v32 = vadd.f32 1.0, %v11565_v27  ;;  %v673_v27 = vld [vmem:[%s13832_s30 + $0x10b8] sm:$0xff]  ;;  %v8962_v34 = vmul.f32 -1.442695, %v672_v24 }
 0x449   : > { %v11569_v35 = vpop.eup %11568  ;;  %7813 = vst [vmem:[%s13858_s17 + $0xfd8] sm:$0xff] %v11567_v31  ;;  %11588 = vrcp.f32 %v4752_v28  ;;  %v674_v31 = vld [vmem:[%s13832_s30 + $0x10c0] sm:$0xff]  ;;  %v8963_v37 = vmul.f32 -1.442695, %v673_v27 }
 0x44a   : > { %v11571_v38 = vpop.eup %11570  ;;  %7814 = vst [vmem:[%s13858_s17 + $0xfe0] sm:$0xff] %v11569_v35  ;;  %11590 = vrcp.f32 %v4753_v32  ;;  %v675_v35 = vld [vmem:[%s13832_s30 + $0x10c8] sm:$0xff]  ;;  %v8964_v40 = vmul.f32 -1.442695, %v674_v31 }
 0x44b   : > { %v11573_v41 = vpop.eup %11572  ;;  %7815 = vst [vmem:[%s13858_s17 + $0xfe8] sm:$0xff] %v11571_v38  ;;  %11592 = vpow2.f32 %v8948_v29  ;;  %v676_v38 = vld [vmem:[%s13832_s30 + $0x10d0] sm:$0xff]  ;;  %v8965_v43 = vmul.f32 -1.442695, %v675_v35 }
 0x44c   : > { %v11575_v44 = vpop.eup %11574  ;;  %7816 = vst [vmem:[%s13858_s17 + $0xff0] sm:$0xff] %v11573_v41  ;;  %11594 = vpow2.f32 %v8949_v33  ;;  %v677_v41 = vld [vmem:[%s13832_s30 + $0x10d8] sm:$0xff]  ;;  %v8966_v46 = vmul.f32 -1.442695, %v676_v38 }
 0x44d   : > { %v11577_v47 = vpop.eup %11576  ;;  %7817 = vst [vmem:[%s13858_s17 + $0xff8] sm:$0xff] %v11575_v44  ;;  %11596 = vpow2.f32 %v8950_v36  ;;  %v678_v44 = vld [vmem:[%s13832_s30 + $0x10e0] sm:$0xff]  ;;  %v8967_v49 = vmul.f32 -1.442695, %v677_v41 }
 0x44e   : > { %v11579_v50 = vpop.eup %11578  ;;  %7818 = vst [vmem:[%s13858_s17 + $0x1000] sm:$0xff] %v11577_v47  ;;  %11598 = vpow2.f32 %v8951_v39  ;;  %v679_v47 = vld [vmem:[%s13832_s30 + $0x10e8] sm:$0xff]  ;;  %v8968_v52 = vmul.f32 -1.442695, %v678_v44 }
 0x44f   : > { %v11581_v53 = vpop.eup %11580  ;;  %7819 = vst [vmem:[%s13858_s17 + $0x1008] sm:$0xff] %v11579_v50  ;;  %11600 = vpow2.f32 %v8952_v42  ;;  %v680_v50 = vld [vmem:[%s13832_s30 + $0x10f0] sm:$0xff]  ;;  %v8969_v55 = vmul.f32 -1.442695, %v679_v47 }
 0x450   : > { %v11583_v56 = vpop.eup %11582  ;;  %7820 = vst [vmem:[%s13858_s17 + $0x1010] sm:$0xff] %v11581_v53  ;;  %11602 = vpow2.f32 %v8953_v45  ;;  %v681_v53 = vld [vmem:[%s13832_s30 + $0x10f8] sm:$0xff]  ;;  %v8970_v58 = vmul.f32 -1.442695, %v680_v50 }
 0x451   : > { %v11585_v59 = vpop.eup %11584  ;;  %7821 = vst [vmem:[%s13858_s17 + $0x1018] sm:$0xff] %v11583_v56  ;;  %11604 = vpow2.f32 %v8954_v48  ;;  %v682_v56 = vld [vmem:[%s13832_s30 + $0x1100] sm:$0xff] }
 0x452   : > { %v11587_v61 = vpop.eup %11586  ;;  %7822 = vst [vmem:[%s13858_s17 + $0x1020] sm:$0xff] %v11585_v59  ;;  %11606 = vpow2.f32 %v8955_v51  ;;  %v683_v59 = vld [vmem:[%s13832_s30 + $0x1108] sm:$0xff] }
 0x453   : > { %v11589_v63 = vpop.eup %11588  ;;  %7823 = vst [vmem:[%s13858_s17 + $0x1028] sm:$0xff] %v11587_v61  ;;  %11608 = vpow2.f32 %v8956_v54  ;;  %v8971_v61 = vmul.f32 -1.442695, %v681_v53 }
 0x454   : > { %v11591_v1 = vpop.eup %11590  ;;  %7824 = vst [vmem:[%s13858_s17 + $0x1030] sm:$0xff] %v11589_v63  ;;  %11610 = vpow2.f32 %v8957_v57  ;;  %v8972_v63 = vmul.f32 -1.442695, %v682_v56 }
 0x455   : > { %v11593_v2 = vpop.eup %11592  ;;  %7825 = vst [vmem:[%s13858_s17 + $0x1038] sm:$0xff] %v11591_v1  ;;  %11612 = vpow2.f32 %v8958_v60  ;;  %v8973_v1 = vmul.f32 -1.442695, %v683_v59 }
 0x456   : > { %v11595_v3 = vpop.eup %11594  ;;  %v4754_v4 = vadd.f32 1.0, %v11593_v2  ;;  %11614 = vpow2.f32 %v8959_v62 }
 0x457   : > { %v11597_v5 = vpop.eup %11596  ;;  %v4755_v6 = vadd.f32 1.0, %v11595_v3  ;;  %11616 = vpow2.f32 %v8960_v0 }
 0x458   : > { %v11599_v7 = vpop.eup %11598  ;;  %11618 = vrcp.f32 %v4754_v4  ;;  %v4756_v8 = vadd.f32 1.0, %v11597_v5 }
 0x459   : > { %v11601_v9 = vpop.eup %11600  ;;  %11620 = vrcp.f32 %v4755_v6  ;;  %v4757_v10 = vadd.f32 1.0, %v11599_v7 }
 0x45a   : > { %v11603_v11 = vpop.eup %11602  ;;  %11622 = vrcp.f32 %v4756_v8  ;;  %v4758_v12 = vadd.f32 1.0, %v11601_v9 }
 0x45b   : > { %v11605_v13 = vpop.eup %11604  ;;  %11624 = vrcp.f32 %v4757_v10  ;;  %v4759_v14 = vadd.f32 1.0, %v11603_v11 }
 0x45c   : > { %v11607_v15 = vpop.eup %11606  ;;  %11626 = vrcp.f32 %v4758_v12  ;;  %v4760_v16 = vadd.f32 1.0, %v11605_v13 }
 0x45d   : > { %v11609_v17 = vpop.eup %11608  ;;  %11628 = vrcp.f32 %v4759_v14  ;;  %v4761_v18 = vadd.f32 1.0, %v11607_v15 }
 0x45e   : > { %v11611_v19 = vpop.eup %11610  ;;  %11630 = vrcp.f32 %v4760_v16  ;;  %v4762_v20 = vadd.f32 1.0, %v11609_v17 }
 0x45f   : > { %v11613_v22 = vpop.eup %11612  ;;  %11632 = vrcp.f32 %v4761_v18  ;;  %v4763_v23 = vadd.f32 1.0, %v11611_v19 }
 0x460   : > { %v11615_v25 = vpop.eup %11614  ;;  %11634 = vrcp.f32 %v4762_v20  ;;  %v4764_v26 = vadd.f32 1.0, %v11613_v22  ;;  %v684_v22 = vld [vmem:[%s13832_s30 + $0x1110] sm:$0xff] }
 0x461   : > { %v11617_v28 = vpop.eup %11616  ;;  %11636 = vrcp.f32 %v4763_v23  ;;  %v4765_v29 = vadd.f32 1.0, %v11615_v25  ;;  %v685_v25 = vld [vmem:[%s13832_s30 + $0x1118] sm:$0xff]  ;;  %v8974_v31 = vmul.f32 -1.442695, %v684_v22 }
 0x462   : > { %v11619_v32 = vpop.eup %11618  ;;  %11638 = vrcp.f32 %v4764_v26  ;;  %v4766_v33 = vadd.f32 1.0, %v11617_v28  ;;  %v686_v28 = vld [vmem:[%s13832_s30 + $0x1120] sm:$0xff]  ;;  %v8975_v35 = vmul.f32 -1.442695, %v685_v25 }
 0x463   : > { %v11621_v36 = vpop.eup %11620  ;;  %7826 = vst [vmem:[%s13858_s17 + $0x1040] sm:$0xff] %v11619_v32  ;;  %11640 = vrcp.f32 %v4765_v29  ;;  %v687_v32 = vld [vmem:[%s13832_s30 + $0x1128] sm:$0xff]  ;;  %v8976_v38 = vmul.f32 -1.442695, %v686_v28 }
 0x464   : > { %v11623_v39 = vpop.eup %11622  ;;  %7827 = vst [vmem:[%s13858_s17 + $0x1048] sm:$0xff] %v11621_v36  ;;  %11642 = vrcp.f32 %v4766_v33  ;;  %v688_v36 = vld [vmem:[%s13832_s30 + $0x1130] sm:$0xff]  ;;  %v8977_v41 = vmul.f32 -1.442695, %v687_v32 }
 0x465   : > { %v11625_v42 = vpop.eup %11624  ;;  %7828 = vst [vmem:[%s13858_s17 + $0x1050] sm:$0xff] %v11623_v39  ;;  %11644 = vpow2.f32 %v8961_v30  ;;  %v689_v39 = vld [vmem:[%s13832_s30 + $0x1138] sm:$0xff]  ;;  %v8978_v44 = vmul.f32 -1.442695, %v688_v36 }
 0x466   : > { %v11627_v45 = vpop.eup %11626  ;;  %7829 = vst [vmem:[%s13858_s17 + $0x1058] sm:$0xff] %v11625_v42  ;;  %11646 = vpow2.f32 %v8962_v34  ;;  %v690_v42 = vld [vmem:[%s13832_s30 + $0x1140] sm:$0xff]  ;;  %v8979_v47 = vmul.f32 -1.442695, %v689_v39 }
 0x467   : > { %v11629_v48 = vpop.eup %11628  ;;  %7830 = vst [vmem:[%s13858_s17 + $0x1060] sm:$0xff] %v11627_v45  ;;  %11648 = vpow2.f32 %v8963_v37  ;;  %v691_v45 = vld [vmem:[%s13832_s30 + $0x1148] sm:$0xff]  ;;  %v8980_v50 = vmul.f32 -1.442695, %v690_v42 }
 0x468   : > { %v11631_v51 = vpop.eup %11630  ;;  %7831 = vst [vmem:[%s13858_s17 + $0x1068] sm:$0xff] %v11629_v48  ;;  %11650 = vpow2.f32 %v8964_v40  ;;  %v692_v48 = vld [vmem:[%s13832_s30 + $0x1150] sm:$0xff]  ;;  %v8981_v53 = vmul.f32 -1.442695, %v691_v45 }
 0x469   : > { %v11633_v54 = vpop.eup %11632  ;;  %7832 = vst [vmem:[%s13858_s17 + $0x1070] sm:$0xff] %v11631_v51  ;;  %11652 = vpow2.f32 %v8965_v43  ;;  %v693_v51 = vld [vmem:[%s13832_s30 + $0x1158] sm:$0xff]  ;;  %v8982_v56 = vmul.f32 -1.442695, %v692_v48 }
 0x46a   : > { %v11635_v57 = vpop.eup %11634  ;;  %7833 = vst [vmem:[%s13858_s17 + $0x1078] sm:$0xff] %v11633_v54  ;;  %11654 = vpow2.f32 %v8966_v46  ;;  %v694_v54 = vld [vmem:[%s13832_s30 + $0x1160] sm:$0xff]  ;;  %v8983_v59 = vmul.f32 -1.442695, %v693_v51 }
 0x46b   : > { %v11637_v60 = vpop.eup %11636  ;;  %7834 = vst [vmem:[%s13858_s17 + $0x1080] sm:$0xff] %v11635_v57  ;;  %11656 = vpow2.f32 %v8967_v49  ;;  %v695_v57 = vld [vmem:[%s13832_s30 + $0x1168] sm:$0xff] }
 0x46c   : > { %v11639_v62 = vpop.eup %11638  ;;  %7835 = vst [vmem:[%s13858_s17 + $0x1088] sm:$0xff] %v11637_v60  ;;  %11658 = vpow2.f32 %v8968_v52  ;;  %v696_v60 = vld [vmem:[%s13832_s30 + $0x1170] sm:$0xff] }
 0x46d   : > { %v11641_v0 = vpop.eup %11640  ;;  %7836 = vst [vmem:[%s13858_s17 + $0x1090] sm:$0xff] %v11639_v62  ;;  %11660 = vpow2.f32 %v8969_v55  ;;  %v8984_v62 = vmul.f32 -1.442695, %v694_v54 }
 0x46e   : > { %v11643_v2 = vpop.eup %11642  ;;  %7837 = vst [vmem:[%s13858_s17 + $0x1098] sm:$0xff] %v11641_v0  ;;  %11662 = vpow2.f32 %v8970_v58  ;;  %v8985_v0 = vmul.f32 -1.442695, %v695_v57 }
 0x46f   : > { %v11645_v3 = vpop.eup %11644  ;;  %7838 = vst [vmem:[%s13858_s17 + $0x10a0] sm:$0xff] %v11643_v2  ;;  %11664 = vpow2.f32 %v8971_v61  ;;  %v8986_v2 = vmul.f32 -1.442695, %v696_v60 }
 0x470   : > { %v11647_v4 = vpop.eup %11646  ;;  %v4767_v5 = vadd.f32 1.0, %v11645_v3  ;;  %11666 = vpow2.f32 %v8972_v63 }
 0x471   : > { %v11649_v6 = vpop.eup %11648  ;;  %v4768_v7 = vadd.f32 1.0, %v11647_v4  ;;  %11668 = vpow2.f32 %v8973_v1 }
 0x472   : > { %v11651_v8 = vpop.eup %11650  ;;  %11670 = vrcp.f32 %v4767_v5  ;;  %v4769_v9 = vadd.f32 1.0, %v11649_v6 }
 0x473   : > { %v11653_v10 = vpop.eup %11652  ;;  %11672 = vrcp.f32 %v4768_v7  ;;  %v4770_v11 = vadd.f32 1.0, %v11651_v8 }
 0x474   : > { %v11655_v12 = vpop.eup %11654  ;;  %11674 = vrcp.f32 %v4769_v9  ;;  %v4771_v13 = vadd.f32 1.0, %v11653_v10 }
 0x475   : > { %v11657_v14 = vpop.eup %11656  ;;  %11676 = vrcp.f32 %v4770_v11  ;;  %v4772_v15 = vadd.f32 1.0, %v11655_v12 }
 0x476   : > { %v11659_v16 = vpop.eup %11658  ;;  %11678 = vrcp.f32 %v4771_v13  ;;  %v4773_v17 = vadd.f32 1.0, %v11657_v14 }
 0x477   : > { %v11661_v18 = vpop.eup %11660  ;;  %11680 = vrcp.f32 %v4772_v15  ;;  %v4774_v19 = vadd.f32 1.0, %v11659_v16 }
 0x478   : > { %v11663_v20 = vpop.eup %11662  ;;  %11682 = vrcp.f32 %v4773_v17  ;;  %v4775_v21 = vadd.f32 1.0, %v11661_v18 }
 0x479   : > { %v11665_v23 = vpop.eup %11664  ;;  %11684 = vrcp.f32 %v4774_v19  ;;  %v4776_v24 = vadd.f32 1.0, %v11663_v20 }
 0x47a   : > { %v11667_v26 = vpop.eup %11666  ;;  %11686 = vrcp.f32 %v4775_v21  ;;  %v4777_v27 = vadd.f32 1.0, %v11665_v23  ;;  %v697_v23 = vld [vmem:[%s13832_s30 + $0x1178] sm:$0xff] }
 0x47b   : > { %v11669_v29 = vpop.eup %11668  ;;  %11688 = vrcp.f32 %v4776_v24  ;;  %v4778_v30 = vadd.f32 1.0, %v11667_v26  ;;  %v698_v26 = vld [vmem:[%s13832_s30 + $0x1180] sm:$0xff]  ;;  %v8987_v32 = vmul.f32 -1.442695, %v697_v23 }
 0x47c   : > { %v11671_v33 = vpop.eup %11670  ;;  %11690 = vrcp.f32 %v4777_v27  ;;  %v4779_v34 = vadd.f32 1.0, %v11669_v29  ;;  %v699_v29 = vld [vmem:[%s13832_s30 + $0x1188] sm:$0xff]  ;;  %v8988_v36 = vmul.f32 -1.442695, %v698_v26 }
 0x47d   : > { %v11673_v37 = vpop.eup %11672  ;;  %7839 = vst [vmem:[%s13858_s17 + $0x10a8] sm:$0xff] %v11671_v33  ;;  %11692 = vrcp.f32 %v4778_v30  ;;  %v700_v33 = vld [vmem:[%s13832_s30 + $0x1190] sm:$0xff]  ;;  %v8989_v39 = vmul.f32 -1.442695, %v699_v29 }
 0x47e   : > { %v11675_v40 = vpop.eup %11674  ;;  %7840 = vst [vmem:[%s13858_s17 + $0x10b0] sm:$0xff] %v11673_v37  ;;  %11694 = vrcp.f32 %v4779_v34  ;;  %v701_v37 = vld [vmem:[%s13832_s30 + $0x1198] sm:$0xff]  ;;  %v8990_v42 = vmul.f32 -1.442695, %v700_v33 }
 0x47f   : > { %v11677_v43 = vpop.eup %11676  ;;  %7841 = vst [vmem:[%s13858_s17 + $0x10b8] sm:$0xff] %v11675_v40  ;;  %11696 = vpow2.f32 %v8974_v31  ;;  %v702_v40 = vld [vmem:[%s13832_s30 + $0x11a0] sm:$0xff]  ;;  %v8991_v45 = vmul.f32 -1.442695, %v701_v37 }
 0x480   : > { %v11679_v46 = vpop.eup %11678  ;;  %7842 = vst [vmem:[%s13858_s17 + $0x10c0] sm:$0xff] %v11677_v43  ;;  %11698 = vpow2.f32 %v8975_v35  ;;  %v703_v43 = vld [vmem:[%s13832_s30 + $0x11a8] sm:$0xff]  ;;  %v8992_v48 = vmul.f32 -1.442695, %v702_v40 }
 0x481   : > { %v11681_v49 = vpop.eup %11680  ;;  %7843 = vst [vmem:[%s13858_s17 + $0x10c8] sm:$0xff] %v11679_v46  ;;  %11700 = vpow2.f32 %v8976_v38  ;;  %v704_v46 = vld [vmem:[%s13832_s30 + $0x11b0] sm:$0xff]  ;;  %v8993_v51 = vmul.f32 -1.442695, %v703_v43 }
 0x482   : > { %v11683_v52 = vpop.eup %11682  ;;  %7844 = vst [vmem:[%s13858_s17 + $0x10d0] sm:$0xff] %v11681_v49  ;;  %11702 = vpow2.f32 %v8977_v41  ;;  %v705_v49 = vld [vmem:[%s13832_s30 + $0x11b8] sm:$0xff]  ;;  %v8994_v54 = vmul.f32 -1.442695, %v704_v46 }
 0x483   : > { %v11685_v55 = vpop.eup %11684  ;;  %7845 = vst [vmem:[%s13858_s17 + $0x10d8] sm:$0xff] %v11683_v52  ;;  %11704 = vpow2.f32 %v8978_v44  ;;  %v706_v52 = vld [vmem:[%s13832_s30 + $0x11c0] sm:$0xff]  ;;  %v8995_v57 = vmul.f32 -1.442695, %v705_v49 }
 0x484   : > { %v11687_v58 = vpop.eup %11686  ;;  %7846 = vst [vmem:[%s13858_s17 + $0x10e0] sm:$0xff] %v11685_v55  ;;  %11706 = vpow2.f32 %v8979_v47  ;;  %v707_v55 = vld [vmem:[%s13832_s30 + $0x11c8] sm:$0xff]  ;;  %v8996_v60 = vmul.f32 -1.442695, %v706_v52 }
 0x485   : > { %v11689_v61 = vpop.eup %11688  ;;  %7847 = vst [vmem:[%s13858_s17 + $0x10e8] sm:$0xff] %v11687_v58  ;;  %11708 = vpow2.f32 %v8980_v50  ;;  %v708_v58 = vld [vmem:[%s13832_s30 + $0x11d0] sm:$0xff] }
 0x486   : > { %v11691_v63 = vpop.eup %11690  ;;  %7848 = vst [vmem:[%s13858_s17 + $0x10f0] sm:$0xff] %v11689_v61  ;;  %11710 = vpow2.f32 %v8981_v53  ;;  %v709_v61 = vld [vmem:[%s13832_s30 + $0x11d8] sm:$0xff] }
 0x487   : > { %v11693_v1 = vpop.eup %11692  ;;  %7849 = vst [vmem:[%s13858_s17 + $0x10f8] sm:$0xff] %v11691_v63  ;;  %11712 = vpow2.f32 %v8982_v56  ;;  %v8997_v63 = vmul.f32 -1.442695, %v707_v55 }
 0x488   : > { %v11695_v3 = vpop.eup %11694  ;;  %7850 = vst [vmem:[%s13858_s17 + $0x1100] sm:$0xff] %v11693_v1  ;;  %11714 = vpow2.f32 %v8983_v59  ;;  %v8998_v1 = vmul.f32 -1.442695, %v708_v58 }
 0x489   : > { %v11697_v4 = vpop.eup %11696  ;;  %7851 = vst [vmem:[%s13858_s17 + $0x1108] sm:$0xff] %v11695_v3  ;;  %11716 = vpow2.f32 %v8984_v62  ;;  %v8999_v3 = vmul.f32 -1.442695, %v709_v61 }
 0x48a   : > { %v11699_v5 = vpop.eup %11698  ;;  %v4780_v6 = vadd.f32 1.0, %v11697_v4  ;;  %11718 = vpow2.f32 %v8985_v0 }
 0x48b   : > { %v11701_v7 = vpop.eup %11700  ;;  %v4781_v8 = vadd.f32 1.0, %v11699_v5  ;;  %11720 = vpow2.f32 %v8986_v2 }
 0x48c   : > { %v11703_v9 = vpop.eup %11702  ;;  %11722 = vrcp.f32 %v4780_v6  ;;  %v4782_v10 = vadd.f32 1.0, %v11701_v7 }
 0x48d   : > { %v11705_v11 = vpop.eup %11704  ;;  %11724 = vrcp.f32 %v4781_v8  ;;  %v4783_v12 = vadd.f32 1.0, %v11703_v9 }
 0x48e   : > { %v11707_v13 = vpop.eup %11706  ;;  %11726 = vrcp.f32 %v4782_v10  ;;  %v4784_v14 = vadd.f32 1.0, %v11705_v11 }
 0x48f   : > { %v11709_v15 = vpop.eup %11708  ;;  %11728 = vrcp.f32 %v4783_v12  ;;  %v4785_v16 = vadd.f32 1.0, %v11707_v13 }
 0x490   : > { %v11711_v17 = vpop.eup %11710  ;;  %11730 = vrcp.f32 %v4784_v14  ;;  %v4786_v18 = vadd.f32 1.0, %v11709_v15 }
 0x491   : > { %v11713_v19 = vpop.eup %11712  ;;  %11732 = vrcp.f32 %v4785_v16  ;;  %v4787_v20 = vadd.f32 1.0, %v11711_v17 }
 0x492   : > { %v11715_v21 = vpop.eup %11714  ;;  %11734 = vrcp.f32 %v4786_v18  ;;  %v4788_v22 = vadd.f32 1.0, %v11713_v19 }
 0x493   : > { %v11717_v24 = vpop.eup %11716  ;;  %11736 = vrcp.f32 %v4787_v20  ;;  %v4789_v25 = vadd.f32 1.0, %v11715_v21 }
 0x494   : > { %v11719_v27 = vpop.eup %11718  ;;  %11738 = vrcp.f32 %v4788_v22  ;;  %v4790_v28 = vadd.f32 1.0, %v11717_v24  ;;  %v710_v24 = vld [vmem:[%s13832_s30 + $0x11e0] sm:$0xff] }
 0x495   : > { %v11721_v30 = vpop.eup %11720  ;;  %11740 = vrcp.f32 %v4789_v25  ;;  %v4791_v31 = vadd.f32 1.0, %v11719_v27  ;;  %v711_v27 = vld [vmem:[%s13832_s30 + $0x11e8] sm:$0xff]  ;;  %v9000_v33 = vmul.f32 -1.442695, %v710_v24 }
 0x496   : > { %v11723_v34 = vpop.eup %11722  ;;  %11742 = vrcp.f32 %v4790_v28  ;;  %v4792_v35 = vadd.f32 1.0, %v11721_v30  ;;  %v712_v30 = vld [vmem:[%s13832_s30 + $0x11f0] sm:$0xff]  ;;  %v9001_v37 = vmul.f32 -1.442695, %v711_v27 }
 0x497   : > { %v11725_v38 = vpop.eup %11724  ;;  %7852 = vst [vmem:[%s13858_s17 + $0x1110] sm:$0xff] %v11723_v34  ;;  %11744 = vrcp.f32 %v4791_v31  ;;  %v713_v34 = vld [vmem:[%s13832_s30 + $0x11f8] sm:$0xff]  ;;  %v9002_v40 = vmul.f32 -1.442695, %v712_v30 }
 0x498   : > { %v11727_v41 = vpop.eup %11726  ;;  %7853 = vst [vmem:[%s13858_s17 + $0x1118] sm:$0xff] %v11725_v38  ;;  %11746 = vrcp.f32 %v4792_v35  ;;  %v714_v38 = vld [vmem:[%s13832_s30 + $0x1200] sm:$0xff]  ;;  %v9003_v43 = vmul.f32 -1.442695, %v713_v34 }
 0x499   : > { %v11729_v44 = vpop.eup %11728  ;;  %7854 = vst [vmem:[%s13858_s17 + $0x1120] sm:$0xff] %v11727_v41  ;;  %11748 = vpow2.f32 %v8987_v32  ;;  %v715_v41 = vld [vmem:[%s13832_s30 + $0x1208] sm:$0xff]  ;;  %v9004_v46 = vmul.f32 -1.442695, %v714_v38 }
 0x49a   : > { %v11731_v47 = vpop.eup %11730  ;;  %7855 = vst [vmem:[%s13858_s17 + $0x1128] sm:$0xff] %v11729_v44  ;;  %11750 = vpow2.f32 %v8988_v36  ;;  %v716_v44 = vld [vmem:[%s13832_s30 + $0x1210] sm:$0xff]  ;;  %v9005_v49 = vmul.f32 -1.442695, %v715_v41 }
 0x49b   : > { %v11733_v50 = vpop.eup %11732  ;;  %7856 = vst [vmem:[%s13858_s17 + $0x1130] sm:$0xff] %v11731_v47  ;;  %11752 = vpow2.f32 %v8989_v39  ;;  %v717_v47 = vld [vmem:[%s13832_s30 + $0x1218] sm:$0xff]  ;;  %v9006_v52 = vmul.f32 -1.442695, %v716_v44 }
 0x49c   : > { %v11735_v53 = vpop.eup %11734  ;;  %7857 = vst [vmem:[%s13858_s17 + $0x1138] sm:$0xff] %v11733_v50  ;;  %11754 = vpow2.f32 %v8990_v42  ;;  %v718_v50 = vld [vmem:[%s13832_s30 + $0x1220] sm:$0xff]  ;;  %v9007_v55 = vmul.f32 -1.442695, %v717_v47 }
 0x49d   : > { %v11737_v56 = vpop.eup %11736  ;;  %7858 = vst [vmem:[%s13858_s17 + $0x1140] sm:$0xff] %v11735_v53  ;;  %11756 = vpow2.f32 %v8991_v45  ;;  %v719_v53 = vld [vmem:[%s13832_s30 + $0x1228] sm:$0xff]  ;;  %v9008_v58 = vmul.f32 -1.442695, %v718_v50 }
 0x49e   : > { %v11739_v59 = vpop.eup %11738  ;;  %7859 = vst [vmem:[%s13858_s17 + $0x1148] sm:$0xff] %v11737_v56  ;;  %11758 = vpow2.f32 %v8992_v48  ;;  %v720_v56 = vld [vmem:[%s13832_s30 + $0x1230] sm:$0xff]  ;;  %v9009_v61 = vmul.f32 -1.442695, %v719_v53 }
 0x49f   : > { %v11741_v62 = vpop.eup %11740  ;;  %7860 = vst [vmem:[%s13858_s17 + $0x1150] sm:$0xff] %v11739_v59  ;;  %11760 = vpow2.f32 %v8993_v51  ;;  %v721_v59 = vld [vmem:[%s13832_s30 + $0x1238] sm:$0xff] }
 0x4a0   : > { %v11743_v0 = vpop.eup %11742  ;;  %7861 = vst [vmem:[%s13858_s17 + $0x1158] sm:$0xff] %v11741_v62  ;;  %11762 = vpow2.f32 %v8994_v54  ;;  %v722_v62 = vld [vmem:[%s13832_s30 + $0x1240] sm:$0xff] }
 0x4a1   : > { %v11745_v2 = vpop.eup %11744  ;;  %7862 = vst [vmem:[%s13858_s17 + $0x1160] sm:$0xff] %v11743_v0  ;;  %11764 = vpow2.f32 %v8995_v57  ;;  %v9010_v0 = vmul.f32 -1.442695, %v720_v56 }
 0x4a2   : > { %v11747_v4 = vpop.eup %11746  ;;  %7863 = vst [vmem:[%s13858_s17 + $0x1168] sm:$0xff] %v11745_v2  ;;  %11766 = vpow2.f32 %v8996_v60  ;;  %v9011_v2 = vmul.f32 -1.442695, %v721_v59 }
 0x4a3   : > { %v11749_v5 = vpop.eup %11748  ;;  %7864 = vst [vmem:[%s13858_s17 + $0x1170] sm:$0xff] %v11747_v4  ;;  %11768 = vpow2.f32 %v8997_v63  ;;  %v9012_v4 = vmul.f32 -1.442695, %v722_v62 }
 0x4a4   : > { %v11751_v6 = vpop.eup %11750  ;;  %v4793_v7 = vadd.f32 1.0, %v11749_v5  ;;  %11770 = vpow2.f32 %v8998_v1 }
 0x4a5   : > { %v11753_v8 = vpop.eup %11752  ;;  %v4794_v9 = vadd.f32 1.0, %v11751_v6  ;;  %11772 = vpow2.f32 %v8999_v3 }
 0x4a6   : > { %v11755_v10 = vpop.eup %11754  ;;  %11774 = vrcp.f32 %v4793_v7  ;;  %v4795_v11 = vadd.f32 1.0, %v11753_v8 }
 0x4a7   : > { %v11757_v12 = vpop.eup %11756  ;;  %11776 = vrcp.f32 %v4794_v9  ;;  %v4796_v13 = vadd.f32 1.0, %v11755_v10 }
 0x4a8   : > { %v11759_v14 = vpop.eup %11758  ;;  %11778 = vrcp.f32 %v4795_v11  ;;  %v4797_v15 = vadd.f32 1.0, %v11757_v12 }
 0x4a9   : > { %v11761_v16 = vpop.eup %11760  ;;  %11780 = vrcp.f32 %v4796_v13  ;;  %v4798_v17 = vadd.f32 1.0, %v11759_v14 }
 0x4aa   : > { %v11763_v18 = vpop.eup %11762  ;;  %11782 = vrcp.f32 %v4797_v15  ;;  %v4799_v19 = vadd.f32 1.0, %v11761_v16 }
 0x4ab   : > { %v11765_v20 = vpop.eup %11764  ;;  %11784 = vrcp.f32 %v4798_v17  ;;  %v4800_v21 = vadd.f32 1.0, %v11763_v18 }
 0x4ac   : > { %v11767_v22 = vpop.eup %11766  ;;  %11786 = vrcp.f32 %v4799_v19  ;;  %v4801_v23 = vadd.f32 1.0, %v11765_v20 }
 0x4ad   : > { %v11769_v25 = vpop.eup %11768  ;;  %11788 = vrcp.f32 %v4800_v21  ;;  %v4802_v26 = vadd.f32 1.0, %v11767_v22 }
 0x4ae   : > { %v11771_v28 = vpop.eup %11770  ;;  %11790 = vrcp.f32 %v4801_v23  ;;  %v4803_v29 = vadd.f32 1.0, %v11769_v25  ;;  %v723_v25 = vld [vmem:[%s13832_s30 + $0x1248] sm:$0xff] }
 0x4af   : > { %v11773_v31 = vpop.eup %11772  ;;  %11792 = vrcp.f32 %v4802_v26  ;;  %v4804_v32 = vadd.f32 1.0, %v11771_v28  ;;  %v724_v28 = vld [vmem:[%s13832_s30 + $0x1250] sm:$0xff]  ;;  %v9013_v34 = vmul.f32 -1.442695, %v723_v25 }
 0x4b0   : > { %v11775_v35 = vpop.eup %11774  ;;  %11794 = vrcp.f32 %v4803_v29  ;;  %v4805_v36 = vadd.f32 1.0, %v11773_v31  ;;  %v725_v31 = vld [vmem:[%s13832_s30 + $0x1258] sm:$0xff]  ;;  %v9014_v38 = vmul.f32 -1.442695, %v724_v28 }
 0x4b1   : > { %v11777_v39 = vpop.eup %11776  ;;  %7865 = vst [vmem:[%s13858_s17 + $0x1178] sm:$0xff] %v11775_v35  ;;  %11796 = vrcp.f32 %v4804_v32  ;;  %v726_v35 = vld [vmem:[%s13832_s30 + $0x1260] sm:$0xff]  ;;  %v9015_v41 = vmul.f32 -1.442695, %v725_v31 }
 0x4b2   : > { %v11779_v42 = vpop.eup %11778  ;;  %7866 = vst [vmem:[%s13858_s17 + $0x1180] sm:$0xff] %v11777_v39  ;;  %11798 = vrcp.f32 %v4805_v36  ;;  %v727_v39 = vld [vmem:[%s13832_s30 + $0x1268] sm:$0xff]  ;;  %v9016_v44 = vmul.f32 -1.442695, %v726_v35 }
 0x4b3   : > { %v11781_v45 = vpop.eup %11780  ;;  %7867 = vst [vmem:[%s13858_s17 + $0x1188] sm:$0xff] %v11779_v42  ;;  %11800 = vpow2.f32 %v9000_v33  ;;  %v728_v42 = vld [vmem:[%s13832_s30 + $0x1270] sm:$0xff]  ;;  %v9017_v47 = vmul.f32 -1.442695, %v727_v39 }
 0x4b4   : > { %v11783_v48 = vpop.eup %11782  ;;  %7868 = vst [vmem:[%s13858_s17 + $0x1190] sm:$0xff] %v11781_v45  ;;  %11802 = vpow2.f32 %v9001_v37  ;;  %v729_v45 = vld [vmem:[%s13832_s30 + $0x1278] sm:$0xff]  ;;  %v9018_v50 = vmul.f32 -1.442695, %v728_v42 }
 0x4b5   : > { %v11785_v51 = vpop.eup %11784  ;;  %7869 = vst [vmem:[%s13858_s17 + $0x1198] sm:$0xff] %v11783_v48  ;;  %11804 = vpow2.f32 %v9002_v40  ;;  %v730_v48 = vld [vmem:[%s13832_s30 + $0x1280] sm:$0xff]  ;;  %v9019_v53 = vmul.f32 -1.442695, %v729_v45 }
 0x4b6   : > { %v11787_v54 = vpop.eup %11786  ;;  %7870 = vst [vmem:[%s13858_s17 + $0x11a0] sm:$0xff] %v11785_v51  ;;  %11806 = vpow2.f32 %v9003_v43  ;;  %v731_v51 = vld [vmem:[%s13832_s30 + $0x1288] sm:$0xff]  ;;  %v9020_v56 = vmul.f32 -1.442695, %v730_v48 }
 0x4b7   : > { %v11789_v57 = vpop.eup %11788  ;;  %7871 = vst [vmem:[%s13858_s17 + $0x11a8] sm:$0xff] %v11787_v54  ;;  %11808 = vpow2.f32 %v9004_v46  ;;  %v732_v54 = vld [vmem:[%s13832_s30 + $0x1290] sm:$0xff]  ;;  %v9021_v59 = vmul.f32 -1.442695, %v731_v51 }
 0x4b8   : > { %v11791_v60 = vpop.eup %11790  ;;  %7872 = vst [vmem:[%s13858_s17 + $0x11b0] sm:$0xff] %v11789_v57  ;;  %11810 = vpow2.f32 %v9005_v49  ;;  %v733_v57 = vld [vmem:[%s13832_s30 + $0x1298] sm:$0xff]  ;;  %v9022_v62 = vmul.f32 -1.442695, %v732_v54 }
 0x4b9   : > { %v11793_v63 = vpop.eup %11792  ;;  %7873 = vst [vmem:[%s13858_s17 + $0x11b8] sm:$0xff] %v11791_v60  ;;  %11812 = vpow2.f32 %v9006_v52  ;;  %v734_v60 = vld [vmem:[%s13832_s30 + $0x12a0] sm:$0xff] }
 0x4ba   : > { %v11795_v1 = vpop.eup %11794  ;;  %7874 = vst [vmem:[%s13858_s17 + $0x11c0] sm:$0xff] %v11793_v63  ;;  %11814 = vpow2.f32 %v9007_v55  ;;  %v735_v63 = vld [vmem:[%s13832_s30 + $0x12a8] sm:$0xff] }
 0x4bb   : > { %v11797_v3 = vpop.eup %11796  ;;  %7875 = vst [vmem:[%s13858_s17 + $0x11c8] sm:$0xff] %v11795_v1  ;;  %11816 = vpow2.f32 %v9008_v58  ;;  %v9023_v1 = vmul.f32 -1.442695, %v733_v57 }
 0x4bc   : > { %v11799_v5 = vpop.eup %11798  ;;  %7876 = vst [vmem:[%s13858_s17 + $0x11d0] sm:$0xff] %v11797_v3  ;;  %11818 = vpow2.f32 %v9009_v61  ;;  %v9024_v3 = vmul.f32 -1.442695, %v734_v60 }
 0x4bd   : > { %v11801_v6 = vpop.eup %11800  ;;  %7877 = vst [vmem:[%s13858_s17 + $0x11d8] sm:$0xff] %v11799_v5  ;;  %11820 = vpow2.f32 %v9010_v0  ;;  %v9025_v5 = vmul.f32 -1.442695, %v735_v63 }
 0x4be   : > { %v11803_v7 = vpop.eup %11802  ;;  %v4806_v8 = vadd.f32 1.0, %v11801_v6  ;;  %11822 = vpow2.f32 %v9011_v2 }
 0x4bf   : > { %v11805_v9 = vpop.eup %11804  ;;  %v4807_v10 = vadd.f32 1.0, %v11803_v7  ;;  %11824 = vpow2.f32 %v9012_v4 }
 0x4c0   : > { %v11807_v11 = vpop.eup %11806  ;;  %11826 = vrcp.f32 %v4806_v8  ;;  %v4808_v12 = vadd.f32 1.0, %v11805_v9 }
 0x4c1   : > { %v11809_v13 = vpop.eup %11808  ;;  %11828 = vrcp.f32 %v4807_v10  ;;  %v4809_v14 = vadd.f32 1.0, %v11807_v11 }
 0x4c2   : > { %v11811_v15 = vpop.eup %11810  ;;  %11830 = vrcp.f32 %v4808_v12  ;;  %v4810_v16 = vadd.f32 1.0, %v11809_v13 }
 0x4c3   : > { %v11813_v17 = vpop.eup %11812  ;;  %11832 = vrcp.f32 %v4809_v14  ;;  %v4811_v18 = vadd.f32 1.0, %v11811_v15 }
 0x4c4   : > { %v11815_v19 = vpop.eup %11814  ;;  %11834 = vrcp.f32 %v4810_v16  ;;  %v4812_v20 = vadd.f32 1.0, %v11813_v17 }
 0x4c5   : > { %v11817_v21 = vpop.eup %11816  ;;  %11836 = vrcp.f32 %v4811_v18  ;;  %v4813_v22 = vadd.f32 1.0, %v11815_v19 }
 0x4c6   : > { %v11819_v23 = vpop.eup %11818  ;;  %11838 = vrcp.f32 %v4812_v20  ;;  %v4814_v24 = vadd.f32 1.0, %v11817_v21 }
 0x4c7   : > { %v11821_v26 = vpop.eup %11820  ;;  %11840 = vrcp.f32 %v4813_v22  ;;  %v4815_v27 = vadd.f32 1.0, %v11819_v23 }
 0x4c8   : > { %v11823_v29 = vpop.eup %11822  ;;  %11842 = vrcp.f32 %v4814_v24  ;;  %v4816_v30 = vadd.f32 1.0, %v11821_v26  ;;  %v736_v26 = vld [vmem:[%s13832_s30 + $0x12b0] sm:$0xff] }
 0x4c9   : > { %v11825_v32 = vpop.eup %11824  ;;  %11844 = vrcp.f32 %v4815_v27  ;;  %v4817_v33 = vadd.f32 1.0, %v11823_v29  ;;  %v737_v29 = vld [vmem:[%s13832_s30 + $0x12b8] sm:$0xff]  ;;  %v9026_v35 = vmul.f32 -1.442695, %v736_v26 }
 0x4ca   : > { %v11827_v36 = vpop.eup %11826  ;;  %11846 = vrcp.f32 %v4816_v30  ;;  %v4818_v37 = vadd.f32 1.0, %v11825_v32  ;;  %v738_v32 = vld [vmem:[%s13832_s30 + $0x12c0] sm:$0xff]  ;;  %v9027_v39 = vmul.f32 -1.442695, %v737_v29 }
 0x4cb   : > { %v11829_v40 = vpop.eup %11828  ;;  %7878 = vst [vmem:[%s13858_s17 + $0x11e0] sm:$0xff] %v11827_v36  ;;  %11848 = vrcp.f32 %v4817_v33  ;;  %v739_v36 = vld [vmem:[%s13832_s30 + $0x12c8] sm:$0xff]  ;;  %v9028_v42 = vmul.f32 -1.442695, %v738_v32 }
 0x4cc   : > { %v11831_v43 = vpop.eup %11830  ;;  %7879 = vst [vmem:[%s13858_s17 + $0x11e8] sm:$0xff] %v11829_v40  ;;  %11850 = vrcp.f32 %v4818_v37  ;;  %v740_v40 = vld [vmem:[%s13832_s30 + $0x12d0] sm:$0xff]  ;;  %v9029_v45 = vmul.f32 -1.442695, %v739_v36 }
 0x4cd   : > { %v11833_v46 = vpop.eup %11832  ;;  %7880 = vst [vmem:[%s13858_s17 + $0x11f0] sm:$0xff] %v11831_v43  ;;  %11852 = vpow2.f32 %v9013_v34  ;;  %v741_v43 = vld [vmem:[%s13832_s30 + $0x12d8] sm:$0xff]  ;;  %v9030_v48 = vmul.f32 -1.442695, %v740_v40 }
 0x4ce   : > { %v11835_v49 = vpop.eup %11834  ;;  %7881 = vst [vmem:[%s13858_s17 + $0x11f8] sm:$0xff] %v11833_v46  ;;  %11854 = vpow2.f32 %v9014_v38  ;;  %v742_v46 = vld [vmem:[%s13832_s30 + $0x12e0] sm:$0xff]  ;;  %v9031_v51 = vmul.f32 -1.442695, %v741_v43 }
 0x4cf   : > { %v11837_v52 = vpop.eup %11836  ;;  %7882 = vst [vmem:[%s13858_s17 + $0x1200] sm:$0xff] %v11835_v49  ;;  %11856 = vpow2.f32 %v9015_v41  ;;  %v743_v49 = vld [vmem:[%s13832_s30 + $0x12e8] sm:$0xff]  ;;  %v9032_v54 = vmul.f32 -1.442695, %v742_v46 }
 0x4d0   : > { %v11839_v55 = vpop.eup %11838  ;;  %7883 = vst [vmem:[%s13858_s17 + $0x1208] sm:$0xff] %v11837_v52  ;;  %11858 = vpow2.f32 %v9016_v44  ;;  %v744_v52 = vld [vmem:[%s13832_s30 + $0x12f0] sm:$0xff]  ;;  %v9033_v57 = vmul.f32 -1.442695, %v743_v49 }
 0x4d1   : > { %v11841_v58 = vpop.eup %11840  ;;  %7884 = vst [vmem:[%s13858_s17 + $0x1210] sm:$0xff] %v11839_v55  ;;  %11860 = vpow2.f32 %v9017_v47  ;;  %v745_v55 = vld [vmem:[%s13832_s30 + $0x12f8] sm:$0xff]  ;;  %v9034_v60 = vmul.f32 -1.442695, %v744_v52 }
 0x4d2   : > { %v11843_v61 = vpop.eup %11842  ;;  %7885 = vst [vmem:[%s13858_s17 + $0x1218] sm:$0xff] %v11841_v58  ;;  %11862 = vpow2.f32 %v9018_v50  ;;  %v746_v58 = vld [vmem:[%s13832_s30 + $0x1300] sm:$0xff]  ;;  %v9035_v63 = vmul.f32 -1.442695, %v745_v55 }
 0x4d3   : > { %v11845_v0 = vpop.eup %11844  ;;  %7886 = vst [vmem:[%s13858_s17 + $0x1220] sm:$0xff] %v11843_v61  ;;  %11864 = vpow2.f32 %v9019_v53  ;;  %v747_v61 = vld [vmem:[%s13832_s30 + $0x1308] sm:$0xff] }
 0x4d4   : > { %v11847_v2 = vpop.eup %11846  ;;  %7887 = vst [vmem:[%s13858_s17 + $0x1228] sm:$0xff] %v11845_v0  ;;  %11866 = vpow2.f32 %v9020_v56  ;;  %v748_v0 = vld [vmem:[%s13832_s30 + $0x1310] sm:$0xff] }
 0x4d5   : > { %v11849_v4 = vpop.eup %11848  ;;  %7888 = vst [vmem:[%s13858_s17 + $0x1230] sm:$0xff] %v11847_v2  ;;  %11868 = vpow2.f32 %v9021_v59  ;;  %v9036_v2 = vmul.f32 -1.442695, %v746_v58 }
 0x4d6   : > { %v11851_v6 = vpop.eup %11850  ;;  %7889 = vst [vmem:[%s13858_s17 + $0x1238] sm:$0xff] %v11849_v4  ;;  %11870 = vpow2.f32 %v9022_v62  ;;  %v9037_v4 = vmul.f32 -1.442695, %v747_v61 }
 0x4d7   : > { %v11853_v7 = vpop.eup %11852  ;;  %7890 = vst [vmem:[%s13858_s17 + $0x1240] sm:$0xff] %v11851_v6  ;;  %11872 = vpow2.f32 %v9023_v1  ;;  %v9038_v6 = vmul.f32 -1.442695, %v748_v0 }
 0x4d8   : > { %v11855_v8 = vpop.eup %11854  ;;  %v4819_v9 = vadd.f32 1.0, %v11853_v7  ;;  %11874 = vpow2.f32 %v9024_v3 }
 0x4d9   : > { %v11857_v10 = vpop.eup %11856  ;;  %v4820_v11 = vadd.f32 1.0, %v11855_v8  ;;  %11876 = vpow2.f32 %v9025_v5 }
 0x4da   : > { %v11859_v12 = vpop.eup %11858  ;;  %11878 = vrcp.f32 %v4819_v9  ;;  %v4821_v13 = vadd.f32 1.0, %v11857_v10 }
 0x4db   : > { %v11861_v14 = vpop.eup %11860  ;;  %11880 = vrcp.f32 %v4820_v11  ;;  %v4822_v15 = vadd.f32 1.0, %v11859_v12 }
 0x4dc   : > { %v11863_v16 = vpop.eup %11862  ;;  %11882 = vrcp.f32 %v4821_v13  ;;  %v4823_v17 = vadd.f32 1.0, %v11861_v14 }
 0x4dd   : > { %v11865_v18 = vpop.eup %11864  ;;  %11884 = vrcp.f32 %v4822_v15  ;;  %v4824_v19 = vadd.f32 1.0, %v11863_v16 }
 0x4de   : > { %v11867_v20 = vpop.eup %11866  ;;  %11886 = vrcp.f32 %v4823_v17  ;;  %v4825_v21 = vadd.f32 1.0, %v11865_v18 }
 0x4df   : > { %v11869_v22 = vpop.eup %11868  ;;  %11888 = vrcp.f32 %v4824_v19  ;;  %v4826_v23 = vadd.f32 1.0, %v11867_v20 }
 0x4e0   : > { %v11871_v24 = vpop.eup %11870  ;;  %11890 = vrcp.f32 %v4825_v21  ;;  %v4827_v25 = vadd.f32 1.0, %v11869_v22 }
 0x4e1   : > { %v11873_v27 = vpop.eup %11872  ;;  %11892 = vrcp.f32 %v4826_v23  ;;  %v4828_v28 = vadd.f32 1.0, %v11871_v24 }
 0x4e2   : > { %v11875_v30 = vpop.eup %11874  ;;  %11894 = vrcp.f32 %v4827_v25  ;;  %v4829_v31 = vadd.f32 1.0, %v11873_v27  ;;  %v749_v27 = vld [vmem:[%s13832_s30 + $0x1318] sm:$0xff] }
 0x4e3   : > { %v11877_v33 = vpop.eup %11876  ;;  %11896 = vrcp.f32 %v4828_v28  ;;  %v4830_v34 = vadd.f32 1.0, %v11875_v30  ;;  %v750_v30 = vld [vmem:[%s13832_s30 + $0x1320] sm:$0xff]  ;;  %v9039_v36 = vmul.f32 -1.442695, %v749_v27 }
 0x4e4   : > { %v11879_v37 = vpop.eup %11878  ;;  %11898 = vrcp.f32 %v4829_v31  ;;  %v4831_v38 = vadd.f32 1.0, %v11877_v33  ;;  %v751_v33 = vld [vmem:[%s13832_s30 + $0x1328] sm:$0xff]  ;;  %v9040_v40 = vmul.f32 -1.442695, %v750_v30 }
 0x4e5   : > { %v11881_v41 = vpop.eup %11880  ;;  %7891 = vst [vmem:[%s13858_s17 + $0x1248] sm:$0xff] %v11879_v37  ;;  %11900 = vrcp.f32 %v4830_v34  ;;  %v752_v37 = vld [vmem:[%s13832_s30 + $0x1330] sm:$0xff]  ;;  %v9041_v43 = vmul.f32 -1.442695, %v751_v33 }
 0x4e6   : > { %v11883_v44 = vpop.eup %11882  ;;  %7892 = vst [vmem:[%s13858_s17 + $0x1250] sm:$0xff] %v11881_v41  ;;  %11902 = vrcp.f32 %v4831_v38  ;;  %v753_v41 = vld [vmem:[%s13832_s30 + $0x1338] sm:$0xff]  ;;  %v9042_v46 = vmul.f32 -1.442695, %v752_v37 }
 0x4e7   : > { %v11885_v47 = vpop.eup %11884  ;;  %7893 = vst [vmem:[%s13858_s17 + $0x1258] sm:$0xff] %v11883_v44  ;;  %11904 = vpow2.f32 %v9026_v35  ;;  %v754_v44 = vld [vmem:[%s13832_s30 + $0x1340] sm:$0xff]  ;;  %v9043_v49 = vmul.f32 -1.442695, %v753_v41 }
 0x4e8   : > { %v11887_v50 = vpop.eup %11886  ;;  %7894 = vst [vmem:[%s13858_s17 + $0x1260] sm:$0xff] %v11885_v47  ;;  %11906 = vpow2.f32 %v9027_v39  ;;  %v755_v47 = vld [vmem:[%s13832_s30 + $0x1348] sm:$0xff]  ;;  %v9044_v52 = vmul.f32 -1.442695, %v754_v44 }
 0x4e9   : > { %v11889_v53 = vpop.eup %11888  ;;  %7895 = vst [vmem:[%s13858_s17 + $0x1268] sm:$0xff] %v11887_v50  ;;  %11908 = vpow2.f32 %v9028_v42  ;;  %v756_v50 = vld [vmem:[%s13832_s30 + $0x1350] sm:$0xff]  ;;  %v9045_v55 = vmul.f32 -1.442695, %v755_v47 }
 0x4ea   : > { %v11891_v56 = vpop.eup %11890  ;;  %7896 = vst [vmem:[%s13858_s17 + $0x1270] sm:$0xff] %v11889_v53  ;;  %11910 = vpow2.f32 %v9029_v45  ;;  %v757_v53 = vld [vmem:[%s13832_s30 + $0x1358] sm:$0xff]  ;;  %v9046_v58 = vmul.f32 -1.442695, %v756_v50 }
 0x4eb   : > { %v11893_v59 = vpop.eup %11892  ;;  %7897 = vst [vmem:[%s13858_s17 + $0x1278] sm:$0xff] %v11891_v56  ;;  %11912 = vpow2.f32 %v9030_v48  ;;  %v758_v56 = vld [vmem:[%s13832_s30 + $0x1360] sm:$0xff]  ;;  %v9047_v61 = vmul.f32 -1.442695, %v757_v53 }
 0x4ec   : > { %v11895_v62 = vpop.eup %11894  ;;  %7898 = vst [vmem:[%s13858_s17 + $0x1280] sm:$0xff] %v11893_v59  ;;  %11914 = vpow2.f32 %v9031_v51  ;;  %v759_v59 = vld [vmem:[%s13832_s30 + $0x1368] sm:$0xff]  ;;  %v9048_v0 = vmul.f32 -1.442695, %v758_v56 }
 0x4ed   : > { %v11897_v1 = vpop.eup %11896  ;;  %7899 = vst [vmem:[%s13858_s17 + $0x1288] sm:$0xff] %v11895_v62  ;;  %11916 = vpow2.f32 %v9032_v54  ;;  %v760_v62 = vld [vmem:[%s13832_s30 + $0x1370] sm:$0xff] }
 0x4ee   : > { %v11899_v3 = vpop.eup %11898  ;;  %7900 = vst [vmem:[%s13858_s17 + $0x1290] sm:$0xff] %v11897_v1  ;;  %11918 = vpow2.f32 %v9033_v57  ;;  %v761_v1 = vld [vmem:[%s13832_s30 + $0x1378] sm:$0xff] }
 0x4ef   : > { %v11901_v5 = vpop.eup %11900  ;;  %7901 = vst [vmem:[%s13858_s17 + $0x1298] sm:$0xff] %v11899_v3  ;;  %11920 = vpow2.f32 %v9034_v60  ;;  %v9049_v3 = vmul.f32 -1.442695, %v759_v59 }
 0x4f0   : > { %v11903_v7 = vpop.eup %11902  ;;  %7902 = vst [vmem:[%s13858_s17 + $0x12a0] sm:$0xff] %v11901_v5  ;;  %11922 = vpow2.f32 %v9035_v63  ;;  %v9050_v5 = vmul.f32 -1.442695, %v760_v62 }
 0x4f1   : > { %v11905_v8 = vpop.eup %11904  ;;  %7903 = vst [vmem:[%s13858_s17 + $0x12a8] sm:$0xff] %v11903_v7  ;;  %11924 = vpow2.f32 %v9036_v2  ;;  %v9051_v7 = vmul.f32 -1.442695, %v761_v1 }
 0x4f2   : > { %v11907_v9 = vpop.eup %11906  ;;  %v4832_v10 = vadd.f32 1.0, %v11905_v8  ;;  %11926 = vpow2.f32 %v9037_v4 }
 0x4f3   : > { %v11909_v11 = vpop.eup %11908  ;;  %v4833_v12 = vadd.f32 1.0, %v11907_v9  ;;  %11928 = vpow2.f32 %v9038_v6 }
 0x4f4   : > { %v11911_v13 = vpop.eup %11910  ;;  %11930 = vrcp.f32 %v4832_v10  ;;  %v4834_v14 = vadd.f32 1.0, %v11909_v11 }
 0x4f5   : > { %v11913_v15 = vpop.eup %11912  ;;  %11932 = vrcp.f32 %v4833_v12  ;;  %v4835_v16 = vadd.f32 1.0, %v11911_v13 }
 0x4f6   : > { %v11915_v17 = vpop.eup %11914  ;;  %11934 = vrcp.f32 %v4834_v14  ;;  %v4836_v18 = vadd.f32 1.0, %v11913_v15 }
 0x4f7   : > { %v11917_v19 = vpop.eup %11916  ;;  %11936 = vrcp.f32 %v4835_v16  ;;  %v4837_v20 = vadd.f32 1.0, %v11915_v17 }
 0x4f8   : > { %v11919_v21 = vpop.eup %11918  ;;  %11938 = vrcp.f32 %v4836_v18  ;;  %v4838_v22 = vadd.f32 1.0, %v11917_v19 }
 0x4f9   : > { %v11921_v23 = vpop.eup %11920  ;;  %11940 = vrcp.f32 %v4837_v20  ;;  %v4839_v24 = vadd.f32 1.0, %v11919_v21 }
 0x4fa   : > { %v11923_v25 = vpop.eup %11922  ;;  %11942 = vrcp.f32 %v4838_v22  ;;  %v4840_v26 = vadd.f32 1.0, %v11921_v23 }
 0x4fb   : > { %v11925_v28 = vpop.eup %11924  ;;  %11944 = vrcp.f32 %v4839_v24  ;;  %v4841_v29 = vadd.f32 1.0, %v11923_v25 }
 0x4fc   : > { %v11927_v31 = vpop.eup %11926  ;;  %11946 = vrcp.f32 %v4840_v26  ;;  %v4842_v32 = vadd.f32 1.0, %v11925_v28  ;;  %v762_v28 = vld [vmem:[%s13832_s30 + $0x1380] sm:$0xff] }
 0x4fd   : > { %v11929_v34 = vpop.eup %11928  ;;  %11948 = vrcp.f32 %v4841_v29  ;;  %v4843_v35 = vadd.f32 1.0, %v11927_v31  ;;  %v763_v31 = vld [vmem:[%s13832_s30 + $0x1388] sm:$0xff]  ;;  %v9052_v37 = vmul.f32 -1.442695, %v762_v28 }
 0x4fe   : > { %v11931_v38 = vpop.eup %11930  ;;  %11950 = vrcp.f32 %v4842_v32  ;;  %v4844_v39 = vadd.f32 1.0, %v11929_v34  ;;  %v764_v34 = vld [vmem:[%s13832_s30 + $0x1390] sm:$0xff]  ;;  %v9053_v41 = vmul.f32 -1.442695, %v763_v31 }
 0x4ff   : > { %v11933_v42 = vpop.eup %11932  ;;  %7904 = vst [vmem:[%s13858_s17 + $0x12b0] sm:$0xff] %v11931_v38  ;;  %11952 = vrcp.f32 %v4843_v35  ;;  %v765_v38 = vld [vmem:[%s13832_s30 + $0x1398] sm:$0xff]  ;;  %v9054_v44 = vmul.f32 -1.442695, %v764_v34 }
 0x500   : > { %v11935_v45 = vpop.eup %11934  ;;  %7905 = vst [vmem:[%s13858_s17 + $0x12b8] sm:$0xff] %v11933_v42  ;;  %11954 = vrcp.f32 %v4844_v39  ;;  %v766_v42 = vld [vmem:[%s13832_s30 + $0x13a0] sm:$0xff]  ;;  %v9055_v47 = vmul.f32 -1.442695, %v765_v38 }
 0x501   : > { %v11937_v48 = vpop.eup %11936  ;;  %7906 = vst [vmem:[%s13858_s17 + $0x12c0] sm:$0xff] %v11935_v45  ;;  %11956 = vpow2.f32 %v9039_v36  ;;  %v767_v45 = vld [vmem:[%s13832_s30 + $0x13a8] sm:$0xff]  ;;  %v9056_v50 = vmul.f32 -1.442695, %v766_v42 }
 0x502   : > { %v11939_v51 = vpop.eup %11938  ;;  %7907 = vst [vmem:[%s13858_s17 + $0x12c8] sm:$0xff] %v11937_v48  ;;  %11958 = vpow2.f32 %v9040_v40  ;;  %v768_v48 = vld [vmem:[%s13832_s30 + $0x13b0] sm:$0xff]  ;;  %v9057_v53 = vmul.f32 -1.442695, %v767_v45 }
 0x503   : > { %v11941_v54 = vpop.eup %11940  ;;  %7908 = vst [vmem:[%s13858_s17 + $0x12d0] sm:$0xff] %v11939_v51  ;;  %11960 = vpow2.f32 %v9041_v43  ;;  %v769_v51 = vld [vmem:[%s13832_s30 + $0x13b8] sm:$0xff]  ;;  %v9058_v56 = vmul.f32 -1.442695, %v768_v48 }
 0x504   : > { %v11943_v57 = vpop.eup %11942  ;;  %7909 = vst [vmem:[%s13858_s17 + $0x12d8] sm:$0xff] %v11941_v54  ;;  %11962 = vpow2.f32 %v9042_v46  ;;  %v770_v54 = vld [vmem:[%s13832_s30 + $0x13c0] sm:$0xff]  ;;  %v9059_v59 = vmul.f32 -1.442695, %v769_v51 }
 0x505   : > { %v11945_v60 = vpop.eup %11944  ;;  %7910 = vst [vmem:[%s13858_s17 + $0x12e0] sm:$0xff] %v11943_v57  ;;  %11964 = vpow2.f32 %v9043_v49  ;;  %v771_v57 = vld [vmem:[%s13832_s30 + $0x13c8] sm:$0xff]  ;;  %v9060_v62 = vmul.f32 -1.442695, %v770_v54 }
 0x506   : > { %v11947_v63 = vpop.eup %11946  ;;  %7911 = vst [vmem:[%s13858_s17 + $0x12e8] sm:$0xff] %v11945_v60  ;;  %11966 = vpow2.f32 %v9044_v52  ;;  %v772_v60 = vld [vmem:[%s13832_s30 + $0x13d0] sm:$0xff]  ;;  %v9061_v1 = vmul.f32 -1.442695, %v771_v57 }
 0x507   : > { %v11949_v2 = vpop.eup %11948  ;;  %7912 = vst [vmem:[%s13858_s17 + $0x12f0] sm:$0xff] %v11947_v63  ;;  %11968 = vpow2.f32 %v9045_v55  ;;  %v773_v63 = vld [vmem:[%s13832_s30 + $0x13d8] sm:$0xff] }
 0x508   : > { %v11951_v4 = vpop.eup %11950  ;;  %7913 = vst [vmem:[%s13858_s17 + $0x12f8] sm:$0xff] %v11949_v2  ;;  %11970 = vpow2.f32 %v9046_v58  ;;  %v774_v2 = vld [vmem:[%s13832_s30 + $0x13e0] sm:$0xff] }
 0x509   : > { %v11953_v6 = vpop.eup %11952  ;;  %7914 = vst [vmem:[%s13858_s17 + $0x1300] sm:$0xff] %v11951_v4  ;;  %11972 = vpow2.f32 %v9047_v61  ;;  %v9062_v4 = vmul.f32 -1.442695, %v772_v60 }
 0x50a   : > { %v11955_v8 = vpop.eup %11954  ;;  %7915 = vst [vmem:[%s13858_s17 + $0x1308] sm:$0xff] %v11953_v6  ;;  %11974 = vpow2.f32 %v9048_v0  ;;  %v9063_v6 = vmul.f32 -1.442695, %v773_v63 }
 0x50b   : > { %v11957_v9 = vpop.eup %11956  ;;  %7916 = vst [vmem:[%s13858_s17 + $0x1310] sm:$0xff] %v11955_v8  ;;  %11976 = vpow2.f32 %v9049_v3  ;;  %v9064_v8 = vmul.f32 -1.442695, %v774_v2 }
 0x50c   : > { %v11959_v10 = vpop.eup %11958  ;;  %v4845_v11 = vadd.f32 1.0, %v11957_v9  ;;  %11978 = vpow2.f32 %v9050_v5 }
 0x50d   : > { %v11961_v12 = vpop.eup %11960  ;;  %v4846_v13 = vadd.f32 1.0, %v11959_v10  ;;  %11980 = vpow2.f32 %v9051_v7 }
 0x50e   : > { %v11963_v14 = vpop.eup %11962  ;;  %11982 = vrcp.f32 %v4845_v11  ;;  %v4847_v15 = vadd.f32 1.0, %v11961_v12 }
 0x50f   : > { %v11965_v16 = vpop.eup %11964  ;;  %11984 = vrcp.f32 %v4846_v13  ;;  %v4848_v17 = vadd.f32 1.0, %v11963_v14 }
 0x510   : > { %v11967_v18 = vpop.eup %11966  ;;  %11986 = vrcp.f32 %v4847_v15  ;;  %v4849_v19 = vadd.f32 1.0, %v11965_v16 }
 0x511   : > { %v11969_v20 = vpop.eup %11968  ;;  %11988 = vrcp.f32 %v4848_v17  ;;  %v4850_v21 = vadd.f32 1.0, %v11967_v18 }
 0x512   : > { %v11971_v22 = vpop.eup %11970  ;;  %11990 = vrcp.f32 %v4849_v19  ;;  %v4851_v23 = vadd.f32 1.0, %v11969_v20 }
 0x513   : > { %v11973_v24 = vpop.eup %11972  ;;  %11992 = vrcp.f32 %v4850_v21  ;;  %v4852_v25 = vadd.f32 1.0, %v11971_v22 }
 0x514   : > { %v11975_v26 = vpop.eup %11974  ;;  %11994 = vrcp.f32 %v4851_v23  ;;  %v4853_v27 = vadd.f32 1.0, %v11973_v24 }
 0x515   : > { %v11977_v29 = vpop.eup %11976  ;;  %11996 = vrcp.f32 %v4852_v25  ;;  %v4854_v30 = vadd.f32 1.0, %v11975_v26 }
 0x516   : > { %v11979_v32 = vpop.eup %11978  ;;  %11998 = vrcp.f32 %v4853_v27  ;;  %v4855_v33 = vadd.f32 1.0, %v11977_v29  ;;  %v775_v29 = vld [vmem:[%s13832_s30 + $0x13e8] sm:$0xff] }
 0x517   : > { %v11981_v35 = vpop.eup %11980  ;;  %12000 = vrcp.f32 %v4854_v30  ;;  %v4856_v36 = vadd.f32 1.0, %v11979_v32  ;;  %v776_v32 = vld [vmem:[%s13832_s30 + $0x13f0] sm:$0xff]  ;;  %v9065_v38 = vmul.f32 -1.442695, %v775_v29 }
 0x518   : > { %v11983_v39 = vpop.eup %11982  ;;  %12002 = vrcp.f32 %v4855_v33  ;;  %v4857_v40 = vadd.f32 1.0, %v11981_v35  ;;  %v777_v35 = vld [vmem:[%s13832_s30 + $0x13f8] sm:$0xff]  ;;  %v9066_v42 = vmul.f32 -1.442695, %v776_v32 }
 0x519   : > { %v11985_v43 = vpop.eup %11984  ;;  %7917 = vst [vmem:[%s13858_s17 + $0x1318] sm:$0xff] %v11983_v39  ;;  %12004 = vrcp.f32 %v4856_v36  ;;  %v778_v39 = vld [vmem:[%s13832_s30 + $0x1400] sm:$0xff]  ;;  %v9067_v45 = vmul.f32 -1.442695, %v777_v35 }
 0x51a   : > { %v11987_v46 = vpop.eup %11986  ;;  %7918 = vst [vmem:[%s13858_s17 + $0x1320] sm:$0xff] %v11985_v43  ;;  %12006 = vrcp.f32 %v4857_v40  ;;  %v779_v43 = vld [vmem:[%s13832_s30 + $0x1408] sm:$0xff]  ;;  %v9068_v48 = vmul.f32 -1.442695, %v778_v39 }
 0x51b   : > { %v11989_v49 = vpop.eup %11988  ;;  %7919 = vst [vmem:[%s13858_s17 + $0x1328] sm:$0xff] %v11987_v46  ;;  %12008 = vpow2.f32 %v9052_v37  ;;  %v780_v46 = vld [vmem:[%s13832_s30 + $0x1410] sm:$0xff]  ;;  %v9069_v51 = vmul.f32 -1.442695, %v779_v43 }
 0x51c   : > { %v11991_v52 = vpop.eup %11990  ;;  %7920 = vst [vmem:[%s13858_s17 + $0x1330] sm:$0xff] %v11989_v49  ;;  %12010 = vpow2.f32 %v9053_v41  ;;  %v781_v49 = vld [vmem:[%s13832_s30 + $0x1418] sm:$0xff]  ;;  %v9070_v54 = vmul.f32 -1.442695, %v780_v46 }
 0x51d   : > { %v11993_v55 = vpop.eup %11992  ;;  %7921 = vst [vmem:[%s13858_s17 + $0x1338] sm:$0xff] %v11991_v52  ;;  %12012 = vpow2.f32 %v9054_v44  ;;  %v782_v52 = vld [vmem:[%s13832_s30 + $0x1420] sm:$0xff]  ;;  %v9071_v57 = vmul.f32 -1.442695, %v781_v49 }
 0x51e   : > { %v11995_v58 = vpop.eup %11994  ;;  %7922 = vst [vmem:[%s13858_s17 + $0x1340] sm:$0xff] %v11993_v55  ;;  %12014 = vpow2.f32 %v9055_v47  ;;  %v783_v55 = vld [vmem:[%s13832_s30 + $0x1428] sm:$0xff]  ;;  %v9072_v60 = vmul.f32 -1.442695, %v782_v52 }
 0x51f   : > { %v11997_v61 = vpop.eup %11996  ;;  %7923 = vst [vmem:[%s13858_s17 + $0x1348] sm:$0xff] %v11995_v58  ;;  %12016 = vpow2.f32 %v9056_v50  ;;  %v784_v58 = vld [vmem:[%s13832_s30 + $0x1430] sm:$0xff]  ;;  %v9073_v63 = vmul.f32 -1.442695, %v783_v55 }
 0x520   : > { %v11999_v0 = vpop.eup %11998  ;;  %7924 = vst [vmem:[%s13858_s17 + $0x1350] sm:$0xff] %v11997_v61  ;;  %12018 = vpow2.f32 %v9057_v53  ;;  %v785_v61 = vld [vmem:[%s13832_s30 + $0x1438] sm:$0xff]  ;;  %v9074_v2 = vmul.f32 -1.442695, %v784_v58 }
 0x521   : > { %v12001_v3 = vpop.eup %12000  ;;  %7925 = vst [vmem:[%s13858_s17 + $0x1358] sm:$0xff] %v11999_v0  ;;  %12020 = vpow2.f32 %v9058_v56  ;;  %v786_v0 = vld [vmem:[%s13832_s30 + $0x1440] sm:$0xff] }
 0x522   : > { %v12003_v5 = vpop.eup %12002  ;;  %7926 = vst [vmem:[%s13858_s17 + $0x1360] sm:$0xff] %v12001_v3  ;;  %12022 = vpow2.f32 %v9059_v59  ;;  %v787_v3 = vld [vmem:[%s13832_s30 + $0x1448] sm:$0xff] }
 0x523   : > { %v12005_v7 = vpop.eup %12004  ;;  %7927 = vst [vmem:[%s13858_s17 + $0x1368] sm:$0xff] %v12003_v5  ;;  %12024 = vpow2.f32 %v9060_v62  ;;  %v9075_v5 = vmul.f32 -1.442695, %v785_v61 }
 0x524   : > { %v12007_v9 = vpop.eup %12006  ;;  %7928 = vst [vmem:[%s13858_s17 + $0x1370] sm:$0xff] %v12005_v7  ;;  %12026 = vpow2.f32 %v9061_v1  ;;  %v9076_v7 = vmul.f32 -1.442695, %v786_v0 }
 0x525   : > { %v12009_v10 = vpop.eup %12008  ;;  %7929 = vst [vmem:[%s13858_s17 + $0x1378] sm:$0xff] %v12007_v9  ;;  %12028 = vpow2.f32 %v9062_v4  ;;  %v9077_v9 = vmul.f32 -1.442695, %v787_v3 }
 0x526   : > { %v12011_v11 = vpop.eup %12010  ;;  %v4858_v12 = vadd.f32 1.0, %v12009_v10  ;;  %12030 = vpow2.f32 %v9063_v6 }
 0x527   : > { %v12013_v13 = vpop.eup %12012  ;;  %v4859_v14 = vadd.f32 1.0, %v12011_v11  ;;  %12032 = vpow2.f32 %v9064_v8 }
 0x528   : > { %v12015_v15 = vpop.eup %12014  ;;  %12034 = vrcp.f32 %v4858_v12  ;;  %v4860_v16 = vadd.f32 1.0, %v12013_v13 }
 0x529   : > { %v12017_v17 = vpop.eup %12016  ;;  %12036 = vrcp.f32 %v4859_v14  ;;  %v4861_v18 = vadd.f32 1.0, %v12015_v15 }
 0x52a   : > { %v12019_v19 = vpop.eup %12018  ;;  %12038 = vrcp.f32 %v4860_v16  ;;  %v4862_v20 = vadd.f32 1.0, %v12017_v17 }
 0x52b   : > { %v12021_v21 = vpop.eup %12020  ;;  %12040 = vrcp.f32 %v4861_v18  ;;  %v4863_v22 = vadd.f32 1.0, %v12019_v19 }
 0x52c   : > { %v12023_v23 = vpop.eup %12022  ;;  %12042 = vrcp.f32 %v4862_v20  ;;  %v4864_v24 = vadd.f32 1.0, %v12021_v21 }
 0x52d   : > { %v12025_v25 = vpop.eup %12024  ;;  %12044 = vrcp.f32 %v4863_v22  ;;  %v4865_v26 = vadd.f32 1.0, %v12023_v23 }
 0x52e   : > { %v12027_v27 = vpop.eup %12026  ;;  %12046 = vrcp.f32 %v4864_v24  ;;  %v4866_v28 = vadd.f32 1.0, %v12025_v25 }
 0x52f   : > { %v12029_v30 = vpop.eup %12028  ;;  %12048 = vrcp.f32 %v4865_v26  ;;  %v4867_v31 = vadd.f32 1.0, %v12027_v27 }
 0x530   : > { %v12031_v33 = vpop.eup %12030  ;;  %12050 = vrcp.f32 %v4866_v28  ;;  %v4868_v34 = vadd.f32 1.0, %v12029_v30  ;;  %v788_v30 = vld [vmem:[%s13832_s30 + $0x1450] sm:$0xff] }
 0x531   : > { %v12033_v36 = vpop.eup %12032  ;;  %12052 = vrcp.f32 %v4867_v31  ;;  %v4869_v37 = vadd.f32 1.0, %v12031_v33  ;;  %v789_v33 = vld [vmem:[%s13832_s30 + $0x1458] sm:$0xff]  ;;  %v9078_v39 = vmul.f32 -1.442695, %v788_v30 }
 0x532   : > { %v12035_v40 = vpop.eup %12034  ;;  %12054 = vrcp.f32 %v4868_v34  ;;  %v4870_v41 = vadd.f32 1.0, %v12033_v36  ;;  %v790_v36 = vld [vmem:[%s13832_s30 + $0x1460] sm:$0xff]  ;;  %v9079_v43 = vmul.f32 -1.442695, %v789_v33 }
 0x533   : > { %v12037_v44 = vpop.eup %12036  ;;  %7930 = vst [vmem:[%s13858_s17 + $0x1380] sm:$0xff] %v12035_v40  ;;  %12056 = vrcp.f32 %v4869_v37  ;;  %v791_v40 = vld [vmem:[%s13832_s30 + $0x1468] sm:$0xff]  ;;  %v9080_v46 = vmul.f32 -1.442695, %v790_v36 }
 0x534   : > { %v12039_v47 = vpop.eup %12038  ;;  %7931 = vst [vmem:[%s13858_s17 + $0x1388] sm:$0xff] %v12037_v44  ;;  %12058 = vrcp.f32 %v4870_v41  ;;  %v792_v44 = vld [vmem:[%s13832_s30 + $0x1470] sm:$0xff]  ;;  %v9081_v49 = vmul.f32 -1.442695, %v791_v40 }
 0x535   : > { %v12041_v50 = vpop.eup %12040  ;;  %7932 = vst [vmem:[%s13858_s17 + $0x1390] sm:$0xff] %v12039_v47  ;;  %12060 = vpow2.f32 %v9065_v38  ;;  %v793_v47 = vld [vmem:[%s13832_s30 + $0x1478] sm:$0xff]  ;;  %v9082_v52 = vmul.f32 -1.442695, %v792_v44 }
 0x536   : > { %v12043_v53 = vpop.eup %12042  ;;  %7933 = vst [vmem:[%s13858_s17 + $0x1398] sm:$0xff] %v12041_v50  ;;  %12062 = vpow2.f32 %v9066_v42  ;;  %v794_v50 = vld [vmem:[%s13832_s30 + $0x1480] sm:$0xff]  ;;  %v9083_v55 = vmul.f32 -1.442695, %v793_v47 }
 0x537   : > { %v12045_v56 = vpop.eup %12044  ;;  %7934 = vst [vmem:[%s13858_s17 + $0x13a0] sm:$0xff] %v12043_v53  ;;  %12064 = vpow2.f32 %v9067_v45  ;;  %v795_v53 = vld [vmem:[%s13832_s30 + $0x1488] sm:$0xff]  ;;  %v9084_v58 = vmul.f32 -1.442695, %v794_v50 }
 0x538   : > { %v12047_v59 = vpop.eup %12046  ;;  %7935 = vst [vmem:[%s13858_s17 + $0x13a8] sm:$0xff] %v12045_v56  ;;  %12066 = vpow2.f32 %v9068_v48  ;;  %v796_v56 = vld [vmem:[%s13832_s30 + $0x1490] sm:$0xff]  ;;  %v9085_v61 = vmul.f32 -1.442695, %v795_v53 }
 0x539   : > { %v12049_v62 = vpop.eup %12048  ;;  %7936 = vst [vmem:[%s13858_s17 + $0x13b0] sm:$0xff] %v12047_v59  ;;  %12068 = vpow2.f32 %v9069_v51  ;;  %v797_v59 = vld [vmem:[%s13832_s30 + $0x1498] sm:$0xff]  ;;  %v9086_v0 = vmul.f32 -1.442695, %v796_v56 }
 0x53a   : > { %v12051_v1 = vpop.eup %12050  ;;  %7937 = vst [vmem:[%s13858_s17 + $0x13b8] sm:$0xff] %v12049_v62  ;;  %12070 = vpow2.f32 %v9070_v54  ;;  %v798_v62 = vld [vmem:[%s13832_s30 + $0x14a0] sm:$0xff]  ;;  %v9087_v3 = vmul.f32 -1.442695, %v797_v59 }
 0x53b   : > { %v12053_v4 = vpop.eup %12052  ;;  %7938 = vst [vmem:[%s13858_s17 + $0x13c0] sm:$0xff] %v12051_v1  ;;  %12072 = vpow2.f32 %v9071_v57  ;;  %v799_v1 = vld [vmem:[%s13832_s30 + $0x14a8] sm:$0xff] }
 0x53c   : > { %v12055_v6 = vpop.eup %12054  ;;  %7939 = vst [vmem:[%s13858_s17 + $0x13c8] sm:$0xff] %v12053_v4  ;;  %12074 = vpow2.f32 %v9072_v60  ;;  %v800_v4 = vld [vmem:[%s13832_s30 + $0x14b0] sm:$0xff] }
 0x53d   : > { %v12057_v8 = vpop.eup %12056  ;;  %7940 = vst [vmem:[%s13858_s17 + $0x13d0] sm:$0xff] %v12055_v6  ;;  %12076 = vpow2.f32 %v9073_v63  ;;  %v9088_v6 = vmul.f32 -1.442695, %v798_v62 }
 0x53e   : > { %v12059_v10 = vpop.eup %12058  ;;  %7941 = vst [vmem:[%s13858_s17 + $0x13d8] sm:$0xff] %v12057_v8  ;;  %12078 = vpow2.f32 %v9074_v2  ;;  %v9089_v8 = vmul.f32 -1.442695, %v799_v1 }
 0x53f   : > { %v12061_v11 = vpop.eup %12060  ;;  %7942 = vst [vmem:[%s13858_s17 + $0x13e0] sm:$0xff] %v12059_v10  ;;  %12080 = vpow2.f32 %v9075_v5  ;;  %v9090_v10 = vmul.f32 -1.442695, %v800_v4 }
 0x540   : > { %v12063_v12 = vpop.eup %12062  ;;  %v4871_v13 = vadd.f32 1.0, %v12061_v11  ;;  %12082 = vpow2.f32 %v9076_v7 }
 0x541   : > { %v12065_v14 = vpop.eup %12064  ;;  %v4872_v15 = vadd.f32 1.0, %v12063_v12  ;;  %12084 = vpow2.f32 %v9077_v9 }
 0x542   : > { %v12067_v16 = vpop.eup %12066  ;;  %12086 = vrcp.f32 %v4871_v13  ;;  %v4873_v17 = vadd.f32 1.0, %v12065_v14 }
 0x543   : > { %v12069_v18 = vpop.eup %12068  ;;  %12088 = vrcp.f32 %v4872_v15  ;;  %v4874_v19 = vadd.f32 1.0, %v12067_v16 }
 0x544   : > { %v12071_v20 = vpop.eup %12070  ;;  %12090 = vrcp.f32 %v4873_v17  ;;  %v4875_v21 = vadd.f32 1.0, %v12069_v18 }
 0x545   : > { %v12073_v22 = vpop.eup %12072  ;;  %12092 = vrcp.f32 %v4874_v19  ;;  %v4876_v23 = vadd.f32 1.0, %v12071_v20 }
 0x546   : > { %v12075_v24 = vpop.eup %12074  ;;  %12094 = vrcp.f32 %v4875_v21  ;;  %v4877_v25 = vadd.f32 1.0, %v12073_v22 }
 0x547   : > { %v12077_v26 = vpop.eup %12076  ;;  %12096 = vrcp.f32 %v4876_v23  ;;  %v4878_v27 = vadd.f32 1.0, %v12075_v24 }
 0x548   : > { %v12079_v28 = vpop.eup %12078  ;;  %12098 = vrcp.f32 %v4877_v25  ;;  %v4879_v29 = vadd.f32 1.0, %v12077_v26 }
 0x549   : > { %v12081_v31 = vpop.eup %12080  ;;  %12100 = vrcp.f32 %v4878_v27  ;;  %v4880_v32 = vadd.f32 1.0, %v12079_v28 }
 0x54a   : > { %v12083_v34 = vpop.eup %12082  ;;  %12102 = vrcp.f32 %v4879_v29  ;;  %v4881_v35 = vadd.f32 1.0, %v12081_v31  ;;  %v801_v31 = vld [vmem:[%s13832_s30 + $0x14b8] sm:$0xff] }
 0x54b   : > { %v12085_v37 = vpop.eup %12084  ;;  %12104 = vrcp.f32 %v4880_v32  ;;  %v4882_v38 = vadd.f32 1.0, %v12083_v34  ;;  %v802_v34 = vld [vmem:[%s13832_s30 + $0x14c0] sm:$0xff]  ;;  %v9091_v40 = vmul.f32 -1.442695, %v801_v31 }
 0x54c   : > { %v12087_v41 = vpop.eup %12086  ;;  %12106 = vrcp.f32 %v4881_v35  ;;  %v4883_v42 = vadd.f32 1.0, %v12085_v37  ;;  %v803_v37 = vld [vmem:[%s13832_s30 + $0x14c8] sm:$0xff]  ;;  %v9092_v44 = vmul.f32 -1.442695, %v802_v34 }
 0x54d   : > { %v12089_v45 = vpop.eup %12088  ;;  %7943 = vst [vmem:[%s13858_s17 + $0x13e8] sm:$0xff] %v12087_v41  ;;  %12108 = vrcp.f32 %v4882_v38  ;;  %v804_v41 = vld [vmem:[%s13832_s30 + $0x14d0] sm:$0xff]  ;;  %v9093_v47 = vmul.f32 -1.442695, %v803_v37 }
 0x54e   : > { %v12091_v48 = vpop.eup %12090  ;;  %7944 = vst [vmem:[%s13858_s17 + $0x13f0] sm:$0xff] %v12089_v45  ;;  %12110 = vrcp.f32 %v4883_v42  ;;  %v805_v45 = vld [vmem:[%s13832_s30 + $0x14d8] sm:$0xff]  ;;  %v9094_v50 = vmul.f32 -1.442695, %v804_v41 }
 0x54f   : > { %v12093_v51 = vpop.eup %12092  ;;  %7945 = vst [vmem:[%s13858_s17 + $0x13f8] sm:$0xff] %v12091_v48  ;;  %12112 = vpow2.f32 %v9078_v39  ;;  %v806_v48 = vld [vmem:[%s13832_s30 + $0x14e0] sm:$0xff]  ;;  %v9095_v53 = vmul.f32 -1.442695, %v805_v45 }
 0x550   : > { %v12095_v54 = vpop.eup %12094  ;;  %7946 = vst [vmem:[%s13858_s17 + $0x1400] sm:$0xff] %v12093_v51  ;;  %12114 = vpow2.f32 %v9079_v43  ;;  %v807_v51 = vld [vmem:[%s13832_s30 + $0x14e8] sm:$0xff]  ;;  %v9096_v56 = vmul.f32 -1.442695, %v806_v48 }
 0x551   : > { %v12097_v57 = vpop.eup %12096  ;;  %7947 = vst [vmem:[%s13858_s17 + $0x1408] sm:$0xff] %v12095_v54  ;;  %12116 = vpow2.f32 %v9080_v46  ;;  %v808_v54 = vld [vmem:[%s13832_s30 + $0x14f0] sm:$0xff]  ;;  %v9097_v59 = vmul.f32 -1.442695, %v807_v51 }
 0x552   : > { %v12099_v60 = vpop.eup %12098  ;;  %7948 = vst [vmem:[%s13858_s17 + $0x1410] sm:$0xff] %v12097_v57  ;;  %12118 = vpow2.f32 %v9081_v49  ;;  %v809_v57 = vld [vmem:[%s13832_s30 + $0x14f8] sm:$0xff]  ;;  %v9098_v62 = vmul.f32 -1.442695, %v808_v54 }
 0x553   : > { %v12101_v63 = vpop.eup %12100  ;;  %7949 = vst [vmem:[%s13858_s17 + $0x1418] sm:$0xff] %v12099_v60  ;;  %12120 = vpow2.f32 %v9082_v52  ;;  %v810_v60 = vld [vmem:[%s13832_s30 + $0x1500] sm:$0xff]  ;;  %v9099_v1 = vmul.f32 -1.442695, %v809_v57 }
 0x554   : > { %v12103_v2 = vpop.eup %12102  ;;  %7950 = vst [vmem:[%s13858_s17 + $0x1420] sm:$0xff] %v12101_v63  ;;  %12122 = vpow2.f32 %v9083_v55  ;;  %v811_v63 = vld [vmem:[%s13832_s30 + $0x1508] sm:$0xff]  ;;  %v9100_v4 = vmul.f32 -1.442695, %v810_v60 }
 0x555   : > { %v12105_v5 = vpop.eup %12104  ;;  %7951 = vst [vmem:[%s13858_s17 + $0x1428] sm:$0xff] %v12103_v2  ;;  %12124 = vpow2.f32 %v9084_v58  ;;  %v812_v2 = vld [vmem:[%s13832_s30 + $0x1510] sm:$0xff] }
 0x556   : > { %v12107_v7 = vpop.eup %12106  ;;  %7952 = vst [vmem:[%s13858_s17 + $0x1430] sm:$0xff] %v12105_v5  ;;  %12126 = vpow2.f32 %v9085_v61  ;;  %v813_v5 = vld [vmem:[%s13832_s30 + $0x1518] sm:$0xff] }
 0x557   : > { %v12109_v9 = vpop.eup %12108  ;;  %7953 = vst [vmem:[%s13858_s17 + $0x1438] sm:$0xff] %v12107_v7  ;;  %12128 = vpow2.f32 %v9086_v0  ;;  %v9101_v7 = vmul.f32 -1.442695, %v811_v63 }
 0x558   : > { %v12111_v11 = vpop.eup %12110  ;;  %7954 = vst [vmem:[%s13858_s17 + $0x1440] sm:$0xff] %v12109_v9  ;;  %12130 = vpow2.f32 %v9087_v3  ;;  %v9102_v9 = vmul.f32 -1.442695, %v812_v2 }
 0x559   : > { %v12113_v12 = vpop.eup %12112  ;;  %7955 = vst [vmem:[%s13858_s17 + $0x1448] sm:$0xff] %v12111_v11  ;;  %12132 = vpow2.f32 %v9088_v6  ;;  %v9103_v11 = vmul.f32 -1.442695, %v813_v5 }
 0x55a   : > { %v12115_v13 = vpop.eup %12114  ;;  %v4884_v14 = vadd.f32 1.0, %v12113_v12  ;;  %12134 = vpow2.f32 %v9089_v8 }
 0x55b   : > { %v12117_v15 = vpop.eup %12116  ;;  %v4885_v16 = vadd.f32 1.0, %v12115_v13  ;;  %12136 = vpow2.f32 %v9090_v10 }
 0x55c   : > { %v12119_v17 = vpop.eup %12118  ;;  %12138 = vrcp.f32 %v4884_v14  ;;  %v4886_v18 = vadd.f32 1.0, %v12117_v15 }
 0x55d   : > { %v12121_v19 = vpop.eup %12120  ;;  %12140 = vrcp.f32 %v4885_v16  ;;  %v4887_v20 = vadd.f32 1.0, %v12119_v17 }
 0x55e   : > { %v12123_v21 = vpop.eup %12122  ;;  %12142 = vrcp.f32 %v4886_v18  ;;  %v4888_v22 = vadd.f32 1.0, %v12121_v19 }
 0x55f   : > { %v12125_v23 = vpop.eup %12124  ;;  %12144 = vrcp.f32 %v4887_v20  ;;  %v4889_v24 = vadd.f32 1.0, %v12123_v21 }
 0x560   : > { %v12127_v25 = vpop.eup %12126  ;;  %12146 = vrcp.f32 %v4888_v22  ;;  %v4890_v26 = vadd.f32 1.0, %v12125_v23 }
 0x561   : > { %v12129_v27 = vpop.eup %12128  ;;  %12148 = vrcp.f32 %v4889_v24  ;;  %v4891_v28 = vadd.f32 1.0, %v12127_v25 }
 0x562   : > { %v12131_v29 = vpop.eup %12130  ;;  %12150 = vrcp.f32 %v4890_v26  ;;  %v4892_v30 = vadd.f32 1.0, %v12129_v27 }
 0x563   : > { %v12133_v32 = vpop.eup %12132  ;;  %12152 = vrcp.f32 %v4891_v28  ;;  %v4893_v33 = vadd.f32 1.0, %v12131_v29 }
 0x564   : > { %v12135_v35 = vpop.eup %12134  ;;  %12154 = vrcp.f32 %v4892_v30  ;;  %v4894_v36 = vadd.f32 1.0, %v12133_v32  ;;  %v814_v32 = vld [vmem:[%s13832_s30 + $0x1520] sm:$0xff] }
 0x565   : > { %v12137_v38 = vpop.eup %12136  ;;  %12156 = vrcp.f32 %v4893_v33  ;;  %v4895_v39 = vadd.f32 1.0, %v12135_v35  ;;  %v815_v35 = vld [vmem:[%s13832_s30 + $0x1528] sm:$0xff]  ;;  %v9104_v41 = vmul.f32 -1.442695, %v814_v32 }
 0x566   : > { %v12139_v42 = vpop.eup %12138  ;;  %12158 = vrcp.f32 %v4894_v36  ;;  %v4896_v43 = vadd.f32 1.0, %v12137_v38  ;;  %v816_v38 = vld [vmem:[%s13832_s30 + $0x1530] sm:$0xff]  ;;  %v9105_v45 = vmul.f32 -1.442695, %v815_v35 }
 0x567   : > { %v12141_v46 = vpop.eup %12140  ;;  %7956 = vst [vmem:[%s13858_s17 + $0x1450] sm:$0xff] %v12139_v42  ;;  %12160 = vrcp.f32 %v4895_v39  ;;  %v817_v42 = vld [vmem:[%s13832_s30 + $0x1538] sm:$0xff]  ;;  %v9106_v48 = vmul.f32 -1.442695, %v816_v38 }
 0x568   : > { %v12143_v49 = vpop.eup %12142  ;;  %7957 = vst [vmem:[%s13858_s17 + $0x1458] sm:$0xff] %v12141_v46  ;;  %12162 = vrcp.f32 %v4896_v43  ;;  %v818_v46 = vld [vmem:[%s13832_s30 + $0x1540] sm:$0xff]  ;;  %v9107_v51 = vmul.f32 -1.442695, %v817_v42 }
 0x569   : > { %v12145_v52 = vpop.eup %12144  ;;  %7958 = vst [vmem:[%s13858_s17 + $0x1460] sm:$0xff] %v12143_v49  ;;  %12164 = vpow2.f32 %v9091_v40  ;;  %v819_v49 = vld [vmem:[%s13832_s30 + $0x1548] sm:$0xff]  ;;  %v9108_v54 = vmul.f32 -1.442695, %v818_v46 }
 0x56a   : > { %v12147_v55 = vpop.eup %12146  ;;  %7959 = vst [vmem:[%s13858_s17 + $0x1468] sm:$0xff] %v12145_v52  ;;  %12166 = vpow2.f32 %v9092_v44  ;;  %v820_v52 = vld [vmem:[%s13832_s30 + $0x1550] sm:$0xff]  ;;  %v9109_v57 = vmul.f32 -1.442695, %v819_v49 }
 0x56b   : > { %v12149_v58 = vpop.eup %12148  ;;  %7960 = vst [vmem:[%s13858_s17 + $0x1470] sm:$0xff] %v12147_v55  ;;  %12168 = vpow2.f32 %v9093_v47  ;;  %v821_v55 = vld [vmem:[%s13832_s30 + $0x1558] sm:$0xff]  ;;  %v9110_v60 = vmul.f32 -1.442695, %v820_v52 }
 0x56c   : > { %v12151_v61 = vpop.eup %12150  ;;  %7961 = vst [vmem:[%s13858_s17 + $0x1478] sm:$0xff] %v12149_v58  ;;  %12170 = vpow2.f32 %v9094_v50  ;;  %v822_v58 = vld [vmem:[%s13832_s30 + $0x1560] sm:$0xff]  ;;  %v9111_v63 = vmul.f32 -1.442695, %v821_v55 }
 0x56d   : > { %v12153_v0 = vpop.eup %12152  ;;  %7962 = vst [vmem:[%s13858_s17 + $0x1480] sm:$0xff] %v12151_v61  ;;  %12172 = vpow2.f32 %v9095_v53  ;;  %v823_v61 = vld [vmem:[%s13832_s30 + $0x1568] sm:$0xff]  ;;  %v9112_v2 = vmul.f32 -1.442695, %v822_v58 }
 0x56e   : > { %v12155_v3 = vpop.eup %12154  ;;  %7963 = vst [vmem:[%s13858_s17 + $0x1488] sm:$0xff] %v12153_v0  ;;  %12174 = vpow2.f32 %v9096_v56  ;;  %v824_v0 = vld [vmem:[%s13832_s30 + $0x1570] sm:$0xff]  ;;  %v9113_v5 = vmul.f32 -1.442695, %v823_v61 }
 0x56f   : > { %v12157_v6 = vpop.eup %12156  ;;  %7964 = vst [vmem:[%s13858_s17 + $0x1490] sm:$0xff] %v12155_v3  ;;  %12176 = vpow2.f32 %v9097_v59  ;;  %v825_v3 = vld [vmem:[%s13832_s30 + $0x1578] sm:$0xff] }
 0x570   : > { %v12159_v8 = vpop.eup %12158  ;;  %7965 = vst [vmem:[%s13858_s17 + $0x1498] sm:$0xff] %v12157_v6  ;;  %12178 = vpow2.f32 %v9098_v62  ;;  %v826_v6 = vld [vmem:[%s13832_s30 + $0x1580] sm:$0xff] }
 0x571   : > { %v12161_v10 = vpop.eup %12160  ;;  %7966 = vst [vmem:[%s13858_s17 + $0x14a0] sm:$0xff] %v12159_v8  ;;  %12180 = vpow2.f32 %v9099_v1  ;;  %v9114_v8 = vmul.f32 -1.442695, %v824_v0 }
 0x572   : > { %v12163_v12 = vpop.eup %12162  ;;  %7967 = vst [vmem:[%s13858_s17 + $0x14a8] sm:$0xff] %v12161_v10  ;;  %12182 = vpow2.f32 %v9100_v4  ;;  %v9115_v10 = vmul.f32 -1.442695, %v825_v3 }
 0x573   : > { %v12165_v13 = vpop.eup %12164  ;;  %7968 = vst [vmem:[%s13858_s17 + $0x14b0] sm:$0xff] %v12163_v12  ;;  %12184 = vpow2.f32 %v9101_v7  ;;  %v9116_v12 = vmul.f32 -1.442695, %v826_v6 }
 0x574   : > { %v12167_v14 = vpop.eup %12166  ;;  %v4897_v15 = vadd.f32 1.0, %v12165_v13  ;;  %12186 = vpow2.f32 %v9102_v9 }
 0x575   : > { %v12169_v16 = vpop.eup %12168  ;;  %v4898_v17 = vadd.f32 1.0, %v12167_v14  ;;  %12188 = vpow2.f32 %v9103_v11 }
 0x576   : > { %v12171_v18 = vpop.eup %12170  ;;  %12190 = vrcp.f32 %v4897_v15  ;;  %v4899_v19 = vadd.f32 1.0, %v12169_v16 }
 0x577   : > { %v12173_v20 = vpop.eup %12172  ;;  %12192 = vrcp.f32 %v4898_v17  ;;  %v4900_v21 = vadd.f32 1.0, %v12171_v18 }
 0x578   : > { %v12175_v22 = vpop.eup %12174  ;;  %12194 = vrcp.f32 %v4899_v19  ;;  %v4901_v23 = vadd.f32 1.0, %v12173_v20 }
 0x579   : > { %v12177_v24 = vpop.eup %12176  ;;  %12196 = vrcp.f32 %v4900_v21  ;;  %v4902_v25 = vadd.f32 1.0, %v12175_v22 }
 0x57a   : > { %v12179_v26 = vpop.eup %12178  ;;  %12198 = vrcp.f32 %v4901_v23  ;;  %v4903_v27 = vadd.f32 1.0, %v12177_v24 }
 0x57b   : > { %v12181_v28 = vpop.eup %12180  ;;  %12200 = vrcp.f32 %v4902_v25  ;;  %v4904_v29 = vadd.f32 1.0, %v12179_v26 }
 0x57c   : > { %v12183_v30 = vpop.eup %12182  ;;  %12202 = vrcp.f32 %v4903_v27  ;;  %v4905_v31 = vadd.f32 1.0, %v12181_v28 }
 0x57d   : > { %v12185_v33 = vpop.eup %12184  ;;  %12204 = vrcp.f32 %v4904_v29  ;;  %v4906_v34 = vadd.f32 1.0, %v12183_v30 }
 0x57e   : > { %v12187_v36 = vpop.eup %12186  ;;  %12206 = vrcp.f32 %v4905_v31  ;;  %v4907_v37 = vadd.f32 1.0, %v12185_v33  ;;  %v827_v33 = vld [vmem:[%s13832_s30 + $0x1588] sm:$0xff] }
 0x57f   : > { %v12189_v39 = vpop.eup %12188  ;;  %12208 = vrcp.f32 %v4906_v34  ;;  %v4908_v40 = vadd.f32 1.0, %v12187_v36  ;;  %v828_v36 = vld [vmem:[%s13832_s30 + $0x1590] sm:$0xff]  ;;  %v9117_v42 = vmul.f32 -1.442695, %v827_v33 }
 0x580   : > { %v12191_v43 = vpop.eup %12190  ;;  %12210 = vrcp.f32 %v4907_v37  ;;  %v4909_v44 = vadd.f32 1.0, %v12189_v39  ;;  %v829_v39 = vld [vmem:[%s13832_s30 + $0x1598] sm:$0xff]  ;;  %v9118_v46 = vmul.f32 -1.442695, %v828_v36 }
 0x581   : > { %v12193_v47 = vpop.eup %12192  ;;  %7969 = vst [vmem:[%s13858_s17 + $0x14b8] sm:$0xff] %v12191_v43  ;;  %12212 = vrcp.f32 %v4908_v40  ;;  %v830_v43 = vld [vmem:[%s13832_s30 + $0x15a0] sm:$0xff]  ;;  %v9119_v49 = vmul.f32 -1.442695, %v829_v39 }
 0x582   : > { %v12195_v50 = vpop.eup %12194  ;;  %7970 = vst [vmem:[%s13858_s17 + $0x14c0] sm:$0xff] %v12193_v47  ;;  %12214 = vrcp.f32 %v4909_v44  ;;  %v831_v47 = vld [vmem:[%s13832_s30 + $0x15a8] sm:$0xff]  ;;  %v9120_v52 = vmul.f32 -1.442695, %v830_v43 }
 0x583   : > { %v12197_v53 = vpop.eup %12196  ;;  %7971 = vst [vmem:[%s13858_s17 + $0x14c8] sm:$0xff] %v12195_v50  ;;  %12216 = vpow2.f32 %v9104_v41  ;;  %v832_v50 = vld [vmem:[%s13832_s30 + $0x15b0] sm:$0xff]  ;;  %v9121_v55 = vmul.f32 -1.442695, %v831_v47 }
 0x584   : > { %v12199_v56 = vpop.eup %12198  ;;  %7972 = vst [vmem:[%s13858_s17 + $0x14d0] sm:$0xff] %v12197_v53  ;;  %12218 = vpow2.f32 %v9105_v45  ;;  %v833_v53 = vld [vmem:[%s13832_s30 + $0x15b8] sm:$0xff]  ;;  %v9122_v58 = vmul.f32 -1.442695, %v832_v50 }
 0x585   : > { %v12201_v59 = vpop.eup %12200  ;;  %7973 = vst [vmem:[%s13858_s17 + $0x14d8] sm:$0xff] %v12199_v56  ;;  %12220 = vpow2.f32 %v9106_v48  ;;  %v834_v56 = vld [vmem:[%s13832_s30 + $0x15c0] sm:$0xff]  ;;  %v9123_v61 = vmul.f32 -1.442695, %v833_v53 }
 0x586   : > { %v12203_v62 = vpop.eup %12202  ;;  %7974 = vst [vmem:[%s13858_s17 + $0x14e0] sm:$0xff] %v12201_v59  ;;  %12222 = vpow2.f32 %v9107_v51  ;;  %v835_v59 = vld [vmem:[%s13832_s30 + $0x15c8] sm:$0xff]  ;;  %v9124_v0 = vmul.f32 -1.442695, %v834_v56 }
 0x587   : > { %v12205_v1 = vpop.eup %12204  ;;  %7975 = vst [vmem:[%s13858_s17 + $0x14e8] sm:$0xff] %v12203_v62  ;;  %12224 = vpow2.f32 %v9108_v54  ;;  %v836_v62 = vld [vmem:[%s13832_s30 + $0x15d0] sm:$0xff]  ;;  %v9125_v3 = vmul.f32 -1.442695, %v835_v59 }
 0x588   : > { %v12207_v4 = vpop.eup %12206  ;;  %7976 = vst [vmem:[%s13858_s17 + $0x14f0] sm:$0xff] %v12205_v1  ;;  %12226 = vpow2.f32 %v9109_v57  ;;  %v837_v1 = vld [vmem:[%s13832_s30 + $0x15d8] sm:$0xff]  ;;  %v9126_v6 = vmul.f32 -1.442695, %v836_v62 }
 0x589   : > { %v12209_v7 = vpop.eup %12208  ;;  %7977 = vst [vmem:[%s13858_s17 + $0x14f8] sm:$0xff] %v12207_v4  ;;  %12228 = vpow2.f32 %v9110_v60  ;;  %v838_v4 = vld [vmem:[%s13832_s30 + $0x15e0] sm:$0xff] }
 0x58a   : > { %v12211_v9 = vpop.eup %12210  ;;  %7978 = vst [vmem:[%s13858_s17 + $0x1500] sm:$0xff] %v12209_v7  ;;  %12230 = vpow2.f32 %v9111_v63  ;;  %v839_v7 = vld [vmem:[%s13832_s30 + $0x15e8] sm:$0xff] }
 0x58b   : > { %v12213_v11 = vpop.eup %12212  ;;  %7979 = vst [vmem:[%s13858_s17 + $0x1508] sm:$0xff] %v12211_v9  ;;  %12232 = vpow2.f32 %v9112_v2  ;;  %v9127_v9 = vmul.f32 -1.442695, %v837_v1 }
 0x58c   : > { %v12215_v13 = vpop.eup %12214  ;;  %7980 = vst [vmem:[%s13858_s17 + $0x1510] sm:$0xff] %v12213_v11  ;;  %12234 = vpow2.f32 %v9113_v5  ;;  %v9128_v11 = vmul.f32 -1.442695, %v838_v4 }
 0x58d   : > { %v12217_v14 = vpop.eup %12216  ;;  %7981 = vst [vmem:[%s13858_s17 + $0x1518] sm:$0xff] %v12215_v13  ;;  %12236 = vpow2.f32 %v9114_v8  ;;  %v9129_v13 = vmul.f32 -1.442695, %v839_v7 }
 0x58e   : > { %v12219_v15 = vpop.eup %12218  ;;  %v4910_v16 = vadd.f32 1.0, %v12217_v14  ;;  %12238 = vpow2.f32 %v9115_v10 }
 0x58f   : > { %v12221_v17 = vpop.eup %12220  ;;  %v4911_v18 = vadd.f32 1.0, %v12219_v15  ;;  %12240 = vpow2.f32 %v9116_v12 }
 0x590   : > { %v12223_v19 = vpop.eup %12222  ;;  %12242 = vrcp.f32 %v4910_v16  ;;  %v4912_v20 = vadd.f32 1.0, %v12221_v17 }
 0x591   : > { %v12225_v21 = vpop.eup %12224  ;;  %12244 = vrcp.f32 %v4911_v18  ;;  %v4913_v22 = vadd.f32 1.0, %v12223_v19 }
 0x592   : > { %v12227_v23 = vpop.eup %12226  ;;  %12246 = vrcp.f32 %v4912_v20  ;;  %v4914_v24 = vadd.f32 1.0, %v12225_v21 }
 0x593   : > { %v12229_v25 = vpop.eup %12228  ;;  %12248 = vrcp.f32 %v4913_v22  ;;  %v4915_v26 = vadd.f32 1.0, %v12227_v23 }
 0x594   : > { %v12231_v27 = vpop.eup %12230  ;;  %12250 = vrcp.f32 %v4914_v24  ;;  %v4916_v28 = vadd.f32 1.0, %v12229_v25 }
 0x595   : > { %v12233_v29 = vpop.eup %12232  ;;  %12252 = vrcp.f32 %v4915_v26  ;;  %v4917_v30 = vadd.f32 1.0, %v12231_v27 }
 0x596   : > { %v12235_v31 = vpop.eup %12234  ;;  %12254 = vrcp.f32 %v4916_v28  ;;  %v4918_v32 = vadd.f32 1.0, %v12233_v29 }
 0x597   : > { %v12237_v34 = vpop.eup %12236  ;;  %12256 = vrcp.f32 %v4917_v30  ;;  %v4919_v35 = vadd.f32 1.0, %v12235_v31 }
 0x598   : > { %v12239_v37 = vpop.eup %12238  ;;  %12258 = vrcp.f32 %v4918_v32  ;;  %v4920_v38 = vadd.f32 1.0, %v12237_v34  ;;  %v840_v34 = vld [vmem:[%s13832_s30 + $0x15f0] sm:$0xff] }
 0x599   : > { %v12241_v40 = vpop.eup %12240  ;;  %12260 = vrcp.f32 %v4919_v35  ;;  %v4921_v41 = vadd.f32 1.0, %v12239_v37  ;;  %v841_v37 = vld [vmem:[%s13832_s30 + $0x15f8] sm:$0xff]  ;;  %v9130_v43 = vmul.f32 -1.442695, %v840_v34 }
 0x59a   : > { %v12243_v44 = vpop.eup %12242  ;;  %12262 = vrcp.f32 %v4920_v38  ;;  %v4922_v45 = vadd.f32 1.0, %v12241_v40  ;;  %v842_v40 = vld [vmem:[%s13832_s30 + $0x1600] sm:$0xff]  ;;  %v9131_v47 = vmul.f32 -1.442695, %v841_v37 }
 0x59b   : > { %v12245_v48 = vpop.eup %12244  ;;  %7982 = vst [vmem:[%s13858_s17 + $0x1520] sm:$0xff] %v12243_v44  ;;  %12264 = vrcp.f32 %v4921_v41  ;;  %v843_v44 = vld [vmem:[%s13832_s30 + $0x1608] sm:$0xff]  ;;  %v9132_v50 = vmul.f32 -1.442695, %v842_v40 }
 0x59c   : > { %v12247_v51 = vpop.eup %12246  ;;  %7983 = vst [vmem:[%s13858_s17 + $0x1528] sm:$0xff] %v12245_v48  ;;  %12266 = vrcp.f32 %v4922_v45  ;;  %v844_v48 = vld [vmem:[%s13832_s30 + $0x1610] sm:$0xff]  ;;  %v9133_v53 = vmul.f32 -1.442695, %v843_v44 }
 0x59d   : > { %v12249_v54 = vpop.eup %12248  ;;  %7984 = vst [vmem:[%s13858_s17 + $0x1530] sm:$0xff] %v12247_v51  ;;  %12268 = vpow2.f32 %v9117_v42  ;;  %v845_v51 = vld [vmem:[%s13832_s30 + $0x1618] sm:$0xff]  ;;  %v9134_v56 = vmul.f32 -1.442695, %v844_v48 }
 0x59e   : > { %v12251_v57 = vpop.eup %12250  ;;  %7985 = vst [vmem:[%s13858_s17 + $0x1538] sm:$0xff] %v12249_v54  ;;  %12270 = vpow2.f32 %v9118_v46  ;;  %v846_v54 = vld [vmem:[%s13832_s30 + $0x1620] sm:$0xff]  ;;  %v9135_v59 = vmul.f32 -1.442695, %v845_v51 }
 0x59f   : > { %v12253_v60 = vpop.eup %12252  ;;  %7986 = vst [vmem:[%s13858_s17 + $0x1540] sm:$0xff] %v12251_v57  ;;  %12272 = vpow2.f32 %v9119_v49  ;;  %v847_v57 = vld [vmem:[%s13832_s30 + $0x1628] sm:$0xff]  ;;  %v9136_v62 = vmul.f32 -1.442695, %v846_v54 }
 0x5a0   : > { %v12255_v63 = vpop.eup %12254  ;;  %7987 = vst [vmem:[%s13858_s17 + $0x1548] sm:$0xff] %v12253_v60  ;;  %12274 = vpow2.f32 %v9120_v52  ;;  %v848_v60 = vld [vmem:[%s13832_s30 + $0x1630] sm:$0xff]  ;;  %v9137_v1 = vmul.f32 -1.442695, %v847_v57 }
 0x5a1   : > { %v12257_v2 = vpop.eup %12256  ;;  %7988 = vst [vmem:[%s13858_s17 + $0x1550] sm:$0xff] %v12255_v63  ;;  %12276 = vpow2.f32 %v9121_v55  ;;  %v849_v63 = vld [vmem:[%s13832_s30 + $0x1638] sm:$0xff]  ;;  %v9138_v4 = vmul.f32 -1.442695, %v848_v60 }
 0x5a2   : > { %v12259_v5 = vpop.eup %12258  ;;  %7989 = vst [vmem:[%s13858_s17 + $0x1558] sm:$0xff] %v12257_v2  ;;  %12278 = vpow2.f32 %v9122_v58  ;;  %v850_v2 = vld [vmem:[%s13832_s30 + $0x1640] sm:$0xff]  ;;  %v9139_v7 = vmul.f32 -1.442695, %v849_v63 }
 0x5a3   : > { %v12261_v8 = vpop.eup %12260  ;;  %7990 = vst [vmem:[%s13858_s17 + $0x1560] sm:$0xff] %v12259_v5  ;;  %12280 = vpow2.f32 %v9123_v61  ;;  %v851_v5 = vld [vmem:[%s13832_s30 + $0x1648] sm:$0xff] }
 0x5a4   : > { %v12263_v10 = vpop.eup %12262  ;;  %7991 = vst [vmem:[%s13858_s17 + $0x1568] sm:$0xff] %v12261_v8  ;;  %12282 = vpow2.f32 %v9124_v0  ;;  %v852_v8 = vld [vmem:[%s13832_s30 + $0x1650] sm:$0xff] }
 0x5a5   : > { %v12265_v12 = vpop.eup %12264  ;;  %7992 = vst [vmem:[%s13858_s17 + $0x1570] sm:$0xff] %v12263_v10  ;;  %12284 = vpow2.f32 %v9125_v3  ;;  %v9140_v10 = vmul.f32 -1.442695, %v850_v2 }
 0x5a6   : > { %v12267_v14 = vpop.eup %12266  ;;  %7993 = vst [vmem:[%s13858_s17 + $0x1578] sm:$0xff] %v12265_v12  ;;  %12286 = vpow2.f32 %v9126_v6  ;;  %v9141_v12 = vmul.f32 -1.442695, %v851_v5 }
 0x5a7   : > { %v12269_v15 = vpop.eup %12268  ;;  %7994 = vst [vmem:[%s13858_s17 + $0x1580] sm:$0xff] %v12267_v14  ;;  %12288 = vpow2.f32 %v9127_v9  ;;  %v9142_v14 = vmul.f32 -1.442695, %v852_v8 }
 0x5a8   : > { %v12271_v16 = vpop.eup %12270  ;;  %v4923_v17 = vadd.f32 1.0, %v12269_v15  ;;  %12290 = vpow2.f32 %v9128_v11 }
 0x5a9   : > { %v12273_v18 = vpop.eup %12272  ;;  %v4924_v19 = vadd.f32 1.0, %v12271_v16  ;;  %12292 = vpow2.f32 %v9129_v13 }
 0x5aa   : > { %v12275_v20 = vpop.eup %12274  ;;  %12294 = vrcp.f32 %v4923_v17  ;;  %v4925_v21 = vadd.f32 1.0, %v12273_v18 }
 0x5ab   : > { %v12277_v22 = vpop.eup %12276  ;;  %12296 = vrcp.f32 %v4924_v19  ;;  %v4926_v23 = vadd.f32 1.0, %v12275_v20 }
 0x5ac   : > { %v12279_v24 = vpop.eup %12278  ;;  %12298 = vrcp.f32 %v4925_v21  ;;  %v4927_v25 = vadd.f32 1.0, %v12277_v22 }
 0x5ad   : > { %v12281_v26 = vpop.eup %12280  ;;  %12300 = vrcp.f32 %v4926_v23  ;;  %v4928_v27 = vadd.f32 1.0, %v12279_v24 }
 0x5ae   : > { %v12283_v28 = vpop.eup %12282  ;;  %12302 = vrcp.f32 %v4927_v25  ;;  %v4929_v29 = vadd.f32 1.0, %v12281_v26 }
 0x5af   : > { %v12285_v30 = vpop.eup %12284  ;;  %12304 = vrcp.f32 %v4928_v27  ;;  %v4930_v31 = vadd.f32 1.0, %v12283_v28 }
 0x5b0   : > { %v12287_v32 = vpop.eup %12286  ;;  %12306 = vrcp.f32 %v4929_v29  ;;  %v4931_v33 = vadd.f32 1.0, %v12285_v30 }
 0x5b1   : > { %v12289_v35 = vpop.eup %12288  ;;  %12308 = vrcp.f32 %v4930_v31  ;;  %v4932_v36 = vadd.f32 1.0, %v12287_v32 }
 0x5b2   : > { %v12291_v38 = vpop.eup %12290  ;;  %12310 = vrcp.f32 %v4931_v33  ;;  %v4933_v39 = vadd.f32 1.0, %v12289_v35  ;;  %v853_v35 = vld [vmem:[%s13832_s30 + $0x1658] sm:$0xff] }
 0x5b3   : > { %v12293_v41 = vpop.eup %12292  ;;  %12312 = vrcp.f32 %v4932_v36  ;;  %v4934_v42 = vadd.f32 1.0, %v12291_v38  ;;  %v854_v38 = vld [vmem:[%s13832_s30 + $0x1660] sm:$0xff]  ;;  %v9143_v44 = vmul.f32 -1.442695, %v853_v35 }
 0x5b4   : > { %v12295_v45 = vpop.eup %12294  ;;  %12314 = vrcp.f32 %v4933_v39  ;;  %v4935_v46 = vadd.f32 1.0, %v12293_v41  ;;  %v855_v41 = vld [vmem:[%s13832_s30 + $0x1668] sm:$0xff]  ;;  %v9144_v48 = vmul.f32 -1.442695, %v854_v38 }
 0x5b5   : > { %v12297_v49 = vpop.eup %12296  ;;  %7995 = vst [vmem:[%s13858_s17 + $0x1588] sm:$0xff] %v12295_v45  ;;  %12316 = vrcp.f32 %v4934_v42  ;;  %v856_v45 = vld [vmem:[%s13832_s30 + $0x1670] sm:$0xff]  ;;  %v9145_v51 = vmul.f32 -1.442695, %v855_v41 }
 0x5b6   : > { %v12299_v52 = vpop.eup %12298  ;;  %7996 = vst [vmem:[%s13858_s17 + $0x1590] sm:$0xff] %v12297_v49  ;;  %12318 = vrcp.f32 %v4935_v46  ;;  %v857_v49 = vld [vmem:[%s13832_s30 + $0x1678] sm:$0xff]  ;;  %v9146_v54 = vmul.f32 -1.442695, %v856_v45 }
 0x5b7   : > { %v12301_v55 = vpop.eup %12300  ;;  %7997 = vst [vmem:[%s13858_s17 + $0x1598] sm:$0xff] %v12299_v52  ;;  %12320 = vpow2.f32 %v9130_v43  ;;  %v858_v52 = vld [vmem:[%s13832_s30 + $0x1680] sm:$0xff]  ;;  %v9147_v57 = vmul.f32 -1.442695, %v857_v49 }
 0x5b8   : > { %v12303_v58 = vpop.eup %12302  ;;  %7998 = vst [vmem:[%s13858_s17 + $0x15a0] sm:$0xff] %v12301_v55  ;;  %12322 = vpow2.f32 %v9131_v47  ;;  %v859_v55 = vld [vmem:[%s13832_s30 + $0x1688] sm:$0xff]  ;;  %v9148_v60 = vmul.f32 -1.442695, %v858_v52 }
 0x5b9   : > { %v12305_v61 = vpop.eup %12304  ;;  %7999 = vst [vmem:[%s13858_s17 + $0x15a8] sm:$0xff] %v12303_v58  ;;  %12324 = vpow2.f32 %v9132_v50  ;;  %v860_v58 = vld [vmem:[%s13832_s30 + $0x1690] sm:$0xff]  ;;  %v9149_v63 = vmul.f32 -1.442695, %v859_v55 }
 0x5ba   : > { %v12307_v0 = vpop.eup %12306  ;;  %8000 = vst [vmem:[%s13858_s17 + $0x15b0] sm:$0xff] %v12305_v61  ;;  %12326 = vpow2.f32 %v9133_v53  ;;  %v861_v61 = vld [vmem:[%s13832_s30 + $0x1698] sm:$0xff]  ;;  %v9150_v2 = vmul.f32 -1.442695, %v860_v58 }
 0x5bb   : > { %v12309_v3 = vpop.eup %12308  ;;  %8001 = vst [vmem:[%s13858_s17 + $0x15b8] sm:$0xff] %v12307_v0  ;;  %12328 = vpow2.f32 %v9134_v56  ;;  %v862_v0 = vld [vmem:[%s13832_s30 + $0x16a0] sm:$0xff]  ;;  %v9151_v5 = vmul.f32 -1.442695, %v861_v61 }
 0x5bc   : > { %v12311_v6 = vpop.eup %12310  ;;  %8002 = vst [vmem:[%s13858_s17 + $0x15c0] sm:$0xff] %v12309_v3  ;;  %12330 = vpow2.f32 %v9135_v59  ;;  %v863_v3 = vld [vmem:[%s13832_s30 + $0x16a8] sm:$0xff]  ;;  %v9152_v8 = vmul.f32 -1.442695, %v862_v0 }
 0x5bd   : > { %v12313_v9 = vpop.eup %12312  ;;  %8003 = vst [vmem:[%s13858_s17 + $0x15c8] sm:$0xff] %v12311_v6  ;;  %12332 = vpow2.f32 %v9136_v62  ;;  %v864_v6 = vld [vmem:[%s13832_s30 + $0x16b0] sm:$0xff] }
 0x5be   : > { %v12315_v11 = vpop.eup %12314  ;;  %8004 = vst [vmem:[%s13858_s17 + $0x15d0] sm:$0xff] %v12313_v9  ;;  %12334 = vpow2.f32 %v9137_v1  ;;  %v865_v9 = vld [vmem:[%s13832_s30 + $0x16b8] sm:$0xff] }
 0x5bf   : > { %v12317_v13 = vpop.eup %12316  ;;  %8005 = vst [vmem:[%s13858_s17 + $0x15d8] sm:$0xff] %v12315_v11  ;;  %12336 = vpow2.f32 %v9138_v4  ;;  %v9153_v11 = vmul.f32 -1.442695, %v863_v3 }
 0x5c0   : > { %v12319_v15 = vpop.eup %12318  ;;  %8006 = vst [vmem:[%s13858_s17 + $0x15e0] sm:$0xff] %v12317_v13  ;;  %12338 = vpow2.f32 %v9139_v7  ;;  %v9154_v13 = vmul.f32 -1.442695, %v864_v6 }
 0x5c1   : > { %v12321_v16 = vpop.eup %12320  ;;  %8007 = vst [vmem:[%s13858_s17 + $0x15e8] sm:$0xff] %v12319_v15  ;;  %12340 = vpow2.f32 %v9140_v10  ;;  %v9155_v15 = vmul.f32 -1.442695, %v865_v9 }
 0x5c2   : > { %v12323_v17 = vpop.eup %12322  ;;  %v4936_v18 = vadd.f32 1.0, %v12321_v16  ;;  %12342 = vpow2.f32 %v9141_v12 }
 0x5c3   : > { %v12325_v19 = vpop.eup %12324  ;;  %v4937_v20 = vadd.f32 1.0, %v12323_v17  ;;  %12344 = vpow2.f32 %v9142_v14 }
 0x5c4   : > { %v12327_v21 = vpop.eup %12326  ;;  %12346 = vrcp.f32 %v4936_v18  ;;  %v4938_v22 = vadd.f32 1.0, %v12325_v19 }
 0x5c5   : > { %v12329_v23 = vpop.eup %12328  ;;  %12348 = vrcp.f32 %v4937_v20  ;;  %v4939_v24 = vadd.f32 1.0, %v12327_v21 }
 0x5c6   : > { %v12331_v25 = vpop.eup %12330  ;;  %12350 = vrcp.f32 %v4938_v22  ;;  %v4940_v26 = vadd.f32 1.0, %v12329_v23 }
 0x5c7   : > { %v12333_v27 = vpop.eup %12332  ;;  %12352 = vrcp.f32 %v4939_v24  ;;  %v4941_v28 = vadd.f32 1.0, %v12331_v25 }
 0x5c8   : > { %v12335_v29 = vpop.eup %12334  ;;  %12354 = vrcp.f32 %v4940_v26  ;;  %v4942_v30 = vadd.f32 1.0, %v12333_v27 }
 0x5c9   : > { %v12337_v31 = vpop.eup %12336  ;;  %12356 = vrcp.f32 %v4941_v28  ;;  %v4943_v32 = vadd.f32 1.0, %v12335_v29 }
 0x5ca   : > { %v12339_v33 = vpop.eup %12338  ;;  %12358 = vrcp.f32 %v4942_v30  ;;  %v4944_v34 = vadd.f32 1.0, %v12337_v31 }
 0x5cb   : > { %v12341_v36 = vpop.eup %12340  ;;  %12360 = vrcp.f32 %v4943_v32  ;;  %v4945_v37 = vadd.f32 1.0, %v12339_v33 }
 0x5cc   : > { %v12343_v39 = vpop.eup %12342  ;;  %12362 = vrcp.f32 %v4944_v34  ;;  %v4946_v40 = vadd.f32 1.0, %v12341_v36  ;;  %v866_v36 = vld [vmem:[%s13832_s30 + $0x16c0] sm:$0xff] }
 0x5cd   : > { %v12345_v42 = vpop.eup %12344  ;;  %12364 = vrcp.f32 %v4945_v37  ;;  %v4947_v43 = vadd.f32 1.0, %v12343_v39  ;;  %v867_v39 = vld [vmem:[%s13832_s30 + $0x16c8] sm:$0xff]  ;;  %v9156_v45 = vmul.f32 -1.442695, %v866_v36 }
 0x5ce   : > { %v12347_v46 = vpop.eup %12346  ;;  %12366 = vrcp.f32 %v4946_v40  ;;  %v4948_v47 = vadd.f32 1.0, %v12345_v42  ;;  %v868_v42 = vld [vmem:[%s13832_s30 + $0x16d0] sm:$0xff]  ;;  %v9157_v49 = vmul.f32 -1.442695, %v867_v39 }
 0x5cf   : > { %v12349_v50 = vpop.eup %12348  ;;  %8008 = vst [vmem:[%s13858_s17 + $0x15f0] sm:$0xff] %v12347_v46  ;;  %12368 = vrcp.f32 %v4947_v43  ;;  %v869_v46 = vld [vmem:[%s13832_s30 + $0x16d8] sm:$0xff]  ;;  %v9158_v52 = vmul.f32 -1.442695, %v868_v42 }
 0x5d0   : > { %v12351_v53 = vpop.eup %12350  ;;  %8009 = vst [vmem:[%s13858_s17 + $0x15f8] sm:$0xff] %v12349_v50  ;;  %12370 = vrcp.f32 %v4948_v47  ;;  %v870_v50 = vld [vmem:[%s13832_s30 + $0x16e0] sm:$0xff]  ;;  %v9159_v55 = vmul.f32 -1.442695, %v869_v46 }
 0x5d1   : > { %v12353_v56 = vpop.eup %12352  ;;  %8010 = vst [vmem:[%s13858_s17 + $0x1600] sm:$0xff] %v12351_v53  ;;  %12372 = vpow2.f32 %v9143_v44  ;;  %v871_v53 = vld [vmem:[%s13832_s30 + $0x16e8] sm:$0xff]  ;;  %v9160_v58 = vmul.f32 -1.442695, %v870_v50 }
 0x5d2   : > { %v12355_v59 = vpop.eup %12354  ;;  %8011 = vst [vmem:[%s13858_s17 + $0x1608] sm:$0xff] %v12353_v56  ;;  %12374 = vpow2.f32 %v9144_v48  ;;  %v872_v56 = vld [vmem:[%s13832_s30 + $0x16f0] sm:$0xff]  ;;  %v9161_v61 = vmul.f32 -1.442695, %v871_v53 }
 0x5d3   : > { %v12357_v62 = vpop.eup %12356  ;;  %8012 = vst [vmem:[%s13858_s17 + $0x1610] sm:$0xff] %v12355_v59  ;;  %12376 = vpow2.f32 %v9145_v51  ;;  %v873_v59 = vld [vmem:[%s13832_s30 + $0x16f8] sm:$0xff]  ;;  %v9162_v0 = vmul.f32 -1.442695, %v872_v56 }
 0x5d4   : > { %v12359_v1 = vpop.eup %12358  ;;  %8013 = vst [vmem:[%s13858_s17 + $0x1618] sm:$0xff] %v12357_v62  ;;  %12378 = vpow2.f32 %v9146_v54  ;;  %v874_v62 = vld [vmem:[%s13832_s30 + $0x1700] sm:$0xff]  ;;  %v9163_v3 = vmul.f32 -1.442695, %v873_v59 }
 0x5d5   : > { %v12361_v4 = vpop.eup %12360  ;;  %8014 = vst [vmem:[%s13858_s17 + $0x1620] sm:$0xff] %v12359_v1  ;;  %12380 = vpow2.f32 %v9147_v57  ;;  %v875_v1 = vld [vmem:[%s13832_s30 + $0x1708] sm:$0xff]  ;;  %v9164_v6 = vmul.f32 -1.442695, %v874_v62 }
 0x5d6   : > { %v12363_v7 = vpop.eup %12362  ;;  %8015 = vst [vmem:[%s13858_s17 + $0x1628] sm:$0xff] %v12361_v4  ;;  %12382 = vpow2.f32 %v9148_v60  ;;  %v876_v4 = vld [vmem:[%s13832_s30 + $0x1710] sm:$0xff]  ;;  %v9165_v9 = vmul.f32 -1.442695, %v875_v1 }
 0x5d7   : > { %v12365_v10 = vpop.eup %12364  ;;  %8016 = vst [vmem:[%s13858_s17 + $0x1630] sm:$0xff] %v12363_v7  ;;  %12384 = vpow2.f32 %v9149_v63  ;;  %v877_v7 = vld [vmem:[%s13832_s30 + $0x1718] sm:$0xff] }
 0x5d8   : > { %v12367_v12 = vpop.eup %12366  ;;  %8017 = vst [vmem:[%s13858_s17 + $0x1638] sm:$0xff] %v12365_v10  ;;  %12386 = vpow2.f32 %v9150_v2  ;;  %v878_v10 = vld [vmem:[%s13832_s30 + $0x1720] sm:$0xff] }
 0x5d9   : > { %v12369_v14 = vpop.eup %12368  ;;  %8018 = vst [vmem:[%s13858_s17 + $0x1640] sm:$0xff] %v12367_v12  ;;  %12388 = vpow2.f32 %v9151_v5  ;;  %v9166_v12 = vmul.f32 -1.442695, %v876_v4 }
 0x5da   : > { %v12371_v16 = vpop.eup %12370  ;;  %8019 = vst [vmem:[%s13858_s17 + $0x1648] sm:$0xff] %v12369_v14  ;;  %12390 = vpow2.f32 %v9152_v8  ;;  %v9167_v14 = vmul.f32 -1.442695, %v877_v7 }
 0x5db   : > { %v12373_v17 = vpop.eup %12372  ;;  %8020 = vst [vmem:[%s13858_s17 + $0x1650] sm:$0xff] %v12371_v16  ;;  %12392 = vpow2.f32 %v9153_v11  ;;  %v9168_v16 = vmul.f32 -1.442695, %v878_v10 }
 0x5dc   : > { %v12375_v18 = vpop.eup %12374  ;;  %v4949_v19 = vadd.f32 1.0, %v12373_v17  ;;  %12394 = vpow2.f32 %v9154_v13 }
 0x5dd   : > { %v12377_v20 = vpop.eup %12376  ;;  %v4950_v21 = vadd.f32 1.0, %v12375_v18  ;;  %12396 = vpow2.f32 %v9155_v15 }
 0x5de   : > { %v12379_v22 = vpop.eup %12378  ;;  %12398 = vrcp.f32 %v4949_v19  ;;  %v4951_v23 = vadd.f32 1.0, %v12377_v20 }
 0x5df   : > { %v12381_v24 = vpop.eup %12380  ;;  %12400 = vrcp.f32 %v4950_v21  ;;  %v4952_v25 = vadd.f32 1.0, %v12379_v22 }
 0x5e0   : > { %v12383_v26 = vpop.eup %12382  ;;  %12402 = vrcp.f32 %v4951_v23  ;;  %v4953_v27 = vadd.f32 1.0, %v12381_v24 }
 0x5e1   : > { %v12385_v28 = vpop.eup %12384  ;;  %12404 = vrcp.f32 %v4952_v25  ;;  %v4954_v29 = vadd.f32 1.0, %v12383_v26 }
 0x5e2   : > { %v12387_v30 = vpop.eup %12386  ;;  %12406 = vrcp.f32 %v4953_v27  ;;  %v4955_v31 = vadd.f32 1.0, %v12385_v28 }
 0x5e3   : > { %v12389_v32 = vpop.eup %12388  ;;  %12408 = vrcp.f32 %v4954_v29  ;;  %v4956_v33 = vadd.f32 1.0, %v12387_v30 }
 0x5e4   : > { %v12391_v34 = vpop.eup %12390  ;;  %12410 = vrcp.f32 %v4955_v31  ;;  %v4957_v35 = vadd.f32 1.0, %v12389_v32 }
 0x5e5   : > { %v12393_v37 = vpop.eup %12392  ;;  %12412 = vrcp.f32 %v4956_v33  ;;  %v4958_v38 = vadd.f32 1.0, %v12391_v34 }
 0x5e6   : > { %v12395_v40 = vpop.eup %12394  ;;  %12414 = vrcp.f32 %v4957_v35  ;;  %v4959_v41 = vadd.f32 1.0, %v12393_v37  ;;  %v879_v37 = vld [vmem:[%s13832_s30 + $0x1728] sm:$0xff] }
 0x5e7   : > { %v12397_v43 = vpop.eup %12396  ;;  %12416 = vrcp.f32 %v4958_v38  ;;  %v4960_v44 = vadd.f32 1.0, %v12395_v40  ;;  %v880_v40 = vld [vmem:[%s13832_s30 + $0x1730] sm:$0xff]  ;;  %v9169_v46 = vmul.f32 -1.442695, %v879_v37 }
 0x5e8   : > { %v12399_v47 = vpop.eup %12398  ;;  %12418 = vrcp.f32 %v4959_v41  ;;  %v4961_v48 = vadd.f32 1.0, %v12397_v43  ;;  %v881_v43 = vld [vmem:[%s13832_s30 + $0x1738] sm:$0xff]  ;;  %v9170_v50 = vmul.f32 -1.442695, %v880_v40 }
 0x5e9   : > { %v12401_v51 = vpop.eup %12400  ;;  %8021 = vst [vmem:[%s13858_s17 + $0x1658] sm:$0xff] %v12399_v47  ;;  %12420 = vrcp.f32 %v4960_v44  ;;  %v882_v47 = vld [vmem:[%s13832_s30 + $0x1740] sm:$0xff]  ;;  %v9171_v53 = vmul.f32 -1.442695, %v881_v43 }
 0x5ea   : > { %v12403_v54 = vpop.eup %12402  ;;  %8022 = vst [vmem:[%s13858_s17 + $0x1660] sm:$0xff] %v12401_v51  ;;  %12422 = vrcp.f32 %v4961_v48  ;;  %v883_v51 = vld [vmem:[%s13832_s30 + $0x1748] sm:$0xff]  ;;  %v9172_v56 = vmul.f32 -1.442695, %v882_v47 }
 0x5eb   : > { %v12405_v57 = vpop.eup %12404  ;;  %8023 = vst [vmem:[%s13858_s17 + $0x1668] sm:$0xff] %v12403_v54  ;;  %12424 = vpow2.f32 %v9156_v45  ;;  %v884_v54 = vld [vmem:[%s13832_s30 + $0x1750] sm:$0xff]  ;;  %v9173_v59 = vmul.f32 -1.442695, %v883_v51 }
 0x5ec   : > { %v12407_v60 = vpop.eup %12406  ;;  %8024 = vst [vmem:[%s13858_s17 + $0x1670] sm:$0xff] %v12405_v57  ;;  %12426 = vpow2.f32 %v9157_v49  ;;  %v885_v57 = vld [vmem:[%s13832_s30 + $0x1758] sm:$0xff]  ;;  %v9174_v62 = vmul.f32 -1.442695, %v884_v54 }
 0x5ed   : > { %v12409_v63 = vpop.eup %12408  ;;  %8025 = vst [vmem:[%s13858_s17 + $0x1678] sm:$0xff] %v12407_v60  ;;  %12428 = vpow2.f32 %v9158_v52  ;;  %v886_v60 = vld [vmem:[%s13832_s30 + $0x1760] sm:$0xff]  ;;  %v9175_v1 = vmul.f32 -1.442695, %v885_v57 }
 0x5ee   : > { %v12411_v2 = vpop.eup %12410  ;;  %8026 = vst [vmem:[%s13858_s17 + $0x1680] sm:$0xff] %v12409_v63  ;;  %12430 = vpow2.f32 %v9159_v55  ;;  %v887_v63 = vld [vmem:[%s13832_s30 + $0x1768] sm:$0xff]  ;;  %v9176_v4 = vmul.f32 -1.442695, %v886_v60 }
 0x5ef   : > { %v12413_v5 = vpop.eup %12412  ;;  %8027 = vst [vmem:[%s13858_s17 + $0x1688] sm:$0xff] %v12411_v2  ;;  %12432 = vpow2.f32 %v9160_v58  ;;  %v888_v2 = vld [vmem:[%s13832_s30 + $0x1770] sm:$0xff]  ;;  %v9177_v7 = vmul.f32 -1.442695, %v887_v63 }
 0x5f0   : > { %v12415_v8 = vpop.eup %12414  ;;  %8028 = vst [vmem:[%s13858_s17 + $0x1690] sm:$0xff] %v12413_v5  ;;  %12434 = vpow2.f32 %v9161_v61  ;;  %v889_v5 = vld [vmem:[%s13832_s30 + $0x1778] sm:$0xff]  ;;  %v9178_v10 = vmul.f32 -1.442695, %v888_v2 }
 0x5f1   : > { %v12417_v11 = vpop.eup %12416  ;;  %8029 = vst [vmem:[%s13858_s17 + $0x1698] sm:$0xff] %v12415_v8  ;;  %12436 = vpow2.f32 %v9162_v0  ;;  %v890_v8 = vld [vmem:[%s13832_s30 + $0x1780] sm:$0xff] }
 0x5f2   : > { %v12419_v13 = vpop.eup %12418  ;;  %8030 = vst [vmem:[%s13858_s17 + $0x16a0] sm:$0xff] %v12417_v11  ;;  %12438 = vpow2.f32 %v9163_v3  ;;  %v891_v11 = vld [vmem:[%s13832_s30 + $0x1788] sm:$0xff] }
 0x5f3   : > { %v12421_v15 = vpop.eup %12420  ;;  %8031 = vst [vmem:[%s13858_s17 + $0x16a8] sm:$0xff] %v12419_v13  ;;  %12440 = vpow2.f32 %v9164_v6  ;;  %v9179_v13 = vmul.f32 -1.442695, %v889_v5 }
 0x5f4   : > { %v12423_v17 = vpop.eup %12422  ;;  %8032 = vst [vmem:[%s13858_s17 + $0x16b0] sm:$0xff] %v12421_v15  ;;  %12442 = vpow2.f32 %v9165_v9  ;;  %v9180_v15 = vmul.f32 -1.442695, %v890_v8 }
 0x5f5   : > { %v12425_v18 = vpop.eup %12424  ;;  %8033 = vst [vmem:[%s13858_s17 + $0x16b8] sm:$0xff] %v12423_v17  ;;  %12444 = vpow2.f32 %v9166_v12  ;;  %v9181_v17 = vmul.f32 -1.442695, %v891_v11 }
 0x5f6   : > { %v12427_v19 = vpop.eup %12426  ;;  %v4962_v20 = vadd.f32 1.0, %v12425_v18  ;;  %12446 = vpow2.f32 %v9167_v14 }
 0x5f7   : > { %v12429_v21 = vpop.eup %12428  ;;  %v4963_v22 = vadd.f32 1.0, %v12427_v19  ;;  %12448 = vpow2.f32 %v9168_v16 }
 0x5f8   : > { %v12431_v23 = vpop.eup %12430  ;;  %12450 = vrcp.f32 %v4962_v20  ;;  %v4964_v24 = vadd.f32 1.0, %v12429_v21 }
 0x5f9   : > { %v12433_v25 = vpop.eup %12432  ;;  %12452 = vrcp.f32 %v4963_v22  ;;  %v4965_v26 = vadd.f32 1.0, %v12431_v23 }
 0x5fa   : > { %v12435_v27 = vpop.eup %12434  ;;  %12454 = vrcp.f32 %v4964_v24  ;;  %v4966_v28 = vadd.f32 1.0, %v12433_v25 }
 0x5fb   : > { %v12437_v29 = vpop.eup %12436  ;;  %12456 = vrcp.f32 %v4965_v26  ;;  %v4967_v30 = vadd.f32 1.0, %v12435_v27 }
 0x5fc   : > { %v12439_v31 = vpop.eup %12438  ;;  %12458 = vrcp.f32 %v4966_v28  ;;  %v4968_v32 = vadd.f32 1.0, %v12437_v29 }
 0x5fd   : > { %v12441_v33 = vpop.eup %12440  ;;  %12460 = vrcp.f32 %v4967_v30  ;;  %v4969_v34 = vadd.f32 1.0, %v12439_v31 }
 0x5fe   : > { %v12443_v35 = vpop.eup %12442  ;;  %12462 = vrcp.f32 %v4968_v32  ;;  %v4970_v36 = vadd.f32 1.0, %v12441_v33 }
 0x5ff   : > { %v12445_v38 = vpop.eup %12444  ;;  %12464 = vrcp.f32 %v4969_v34  ;;  %v4971_v39 = vadd.f32 1.0, %v12443_v35 }
 0x600   : > { %v12447_v41 = vpop.eup %12446  ;;  %12466 = vrcp.f32 %v4970_v36  ;;  %v4972_v42 = vadd.f32 1.0, %v12445_v38  ;;  %v892_v38 = vld [vmem:[%s13832_s30 + $0x1790] sm:$0xff] }
 0x601   : > { %v12449_v44 = vpop.eup %12448  ;;  %12468 = vrcp.f32 %v4971_v39  ;;  %v4973_v45 = vadd.f32 1.0, %v12447_v41  ;;  %v893_v41 = vld [vmem:[%s13832_s30 + $0x1798] sm:$0xff]  ;;  %v9182_v47 = vmul.f32 -1.442695, %v892_v38 }
 0x602   : > { %v12451_v48 = vpop.eup %12450  ;;  %12470 = vrcp.f32 %v4972_v42  ;;  %v4974_v49 = vadd.f32 1.0, %v12449_v44  ;;  %v894_v44 = vld [vmem:[%s13832_s30 + $0x17a0] sm:$0xff]  ;;  %v9183_v51 = vmul.f32 -1.442695, %v893_v41 }
 0x603   : > { %v12453_v52 = vpop.eup %12452  ;;  %8034 = vst [vmem:[%s13858_s17 + $0x16c0] sm:$0xff] %v12451_v48  ;;  %12472 = vrcp.f32 %v4973_v45  ;;  %v895_v48 = vld [vmem:[%s13832_s30 + $0x17a8] sm:$0xff]  ;;  %v9184_v54 = vmul.f32 -1.442695, %v894_v44 }
 0x604   : > { %v12455_v55 = vpop.eup %12454  ;;  %8035 = vst [vmem:[%s13858_s17 + $0x16c8] sm:$0xff] %v12453_v52  ;;  %12474 = vrcp.f32 %v4974_v49  ;;  %v896_v52 = vld [vmem:[%s13832_s30 + $0x17b0] sm:$0xff]  ;;  %v9185_v57 = vmul.f32 -1.442695, %v895_v48 }
 0x605   : > { %v12457_v58 = vpop.eup %12456  ;;  %8036 = vst [vmem:[%s13858_s17 + $0x16d0] sm:$0xff] %v12455_v55  ;;  %12476 = vpow2.f32 %v9169_v46  ;;  %v897_v55 = vld [vmem:[%s13832_s30 + $0x17b8] sm:$0xff]  ;;  %v9186_v60 = vmul.f32 -1.442695, %v896_v52 }
 0x606   : > { %v12459_v61 = vpop.eup %12458  ;;  %8037 = vst [vmem:[%s13858_s17 + $0x16d8] sm:$0xff] %v12457_v58  ;;  %12478 = vpow2.f32 %v9170_v50  ;;  %v898_v58 = vld [vmem:[%s13832_s30 + $0x17c0] sm:$0xff]  ;;  %v9187_v63 = vmul.f32 -1.442695, %v897_v55 }
 0x607   : > { %v12461_v0 = vpop.eup %12460  ;;  %8038 = vst [vmem:[%s13858_s17 + $0x16e0] sm:$0xff] %v12459_v61  ;;  %12480 = vpow2.f32 %v9171_v53  ;;  %v899_v61 = vld [vmem:[%s13832_s30 + $0x17c8] sm:$0xff]  ;;  %v9188_v2 = vmul.f32 -1.442695, %v898_v58 }
 0x608   : > { %v12463_v3 = vpop.eup %12462  ;;  %8039 = vst [vmem:[%s13858_s17 + $0x16e8] sm:$0xff] %v12461_v0  ;;  %12482 = vpow2.f32 %v9172_v56  ;;  %v900_v0 = vld [vmem:[%s13832_s30 + $0x17d0] sm:$0xff]  ;;  %v9189_v5 = vmul.f32 -1.442695, %v899_v61 }
 0x609   : > { %v12465_v6 = vpop.eup %12464  ;;  %8040 = vst [vmem:[%s13858_s17 + $0x16f0] sm:$0xff] %v12463_v3  ;;  %12484 = vpow2.f32 %v9173_v59  ;;  %v901_v3 = vld [vmem:[%s13832_s30 + $0x17d8] sm:$0xff]  ;;  %v9190_v8 = vmul.f32 -1.442695, %v900_v0 }
 0x60a   : > { %v12467_v9 = vpop.eup %12466  ;;  %8041 = vst [vmem:[%s13858_s17 + $0x16f8] sm:$0xff] %v12465_v6  ;;  %12486 = vpow2.f32 %v9174_v62  ;;  %v902_v6 = vld [vmem:[%s13832_s30 + $0x17e0] sm:$0xff]  ;;  %v9191_v11 = vmul.f32 -1.442695, %v901_v3 }
 0x60b   : > { %v12469_v12 = vpop.eup %12468  ;;  %8042 = vst [vmem:[%s13858_s17 + $0x1700] sm:$0xff] %v12467_v9  ;;  %12488 = vpow2.f32 %v9175_v1  ;;  %v903_v9 = vld [vmem:[%s13832_s30 + $0x17e8] sm:$0xff] }
 0x60c   : > { %v12471_v14 = vpop.eup %12470  ;;  %8043 = vst [vmem:[%s13858_s17 + $0x1708] sm:$0xff] %v12469_v12  ;;  %12490 = vpow2.f32 %v9176_v4  ;;  %v904_v12 = vld [vmem:[%s13832_s30 + $0x17f0] sm:$0xff] }
 0x60d   : > { %v12473_v16 = vpop.eup %12472  ;;  %8044 = vst [vmem:[%s13858_s17 + $0x1710] sm:$0xff] %v12471_v14  ;;  %12492 = vpow2.f32 %v9177_v7  ;;  %v9192_v14 = vmul.f32 -1.442695, %v902_v6 }
 0x60e   : > { %v12475_v18 = vpop.eup %12474  ;;  %8045 = vst [vmem:[%s13858_s17 + $0x1718] sm:$0xff] %v12473_v16  ;;  %12494 = vpow2.f32 %v9178_v10  ;;  %v9193_v16 = vmul.f32 -1.442695, %v903_v9 }
 0x60f   : > { %v12477_v19 = vpop.eup %12476  ;;  %8046 = vst [vmem:[%s13858_s17 + $0x1720] sm:$0xff] %v12475_v18  ;;  %12496 = vpow2.f32 %v9179_v13  ;;  %v9194_v18 = vmul.f32 -1.442695, %v904_v12 }
 0x610   : > { %v12479_v20 = vpop.eup %12478  ;;  %v4975_v21 = vadd.f32 1.0, %v12477_v19  ;;  %12498 = vpow2.f32 %v9180_v15 }
 0x611   : > { %v12481_v22 = vpop.eup %12480  ;;  %v4976_v23 = vadd.f32 1.0, %v12479_v20  ;;  %12500 = vpow2.f32 %v9181_v17 }
 0x612   : > { %v12483_v24 = vpop.eup %12482  ;;  %12502 = vrcp.f32 %v4975_v21  ;;  %v4977_v25 = vadd.f32 1.0, %v12481_v22 }
 0x613   : > { %v12485_v26 = vpop.eup %12484  ;;  %12504 = vrcp.f32 %v4976_v23  ;;  %v4978_v27 = vadd.f32 1.0, %v12483_v24 }
 0x614   : > { %v12487_v28 = vpop.eup %12486  ;;  %12506 = vrcp.f32 %v4977_v25  ;;  %v4979_v29 = vadd.f32 1.0, %v12485_v26 }
 0x615   : > { %v12489_v30 = vpop.eup %12488  ;;  %12508 = vrcp.f32 %v4978_v27  ;;  %v4980_v31 = vadd.f32 1.0, %v12487_v28 }
 0x616   : > { %v12491_v32 = vpop.eup %12490  ;;  %12510 = vrcp.f32 %v4979_v29  ;;  %v4981_v33 = vadd.f32 1.0, %v12489_v30 }
 0x617   : > { %v12493_v34 = vpop.eup %12492  ;;  %12512 = vrcp.f32 %v4980_v31  ;;  %v4982_v35 = vadd.f32 1.0, %v12491_v32 }
 0x618   : > { %v12495_v36 = vpop.eup %12494  ;;  %12514 = vrcp.f32 %v4981_v33  ;;  %v4983_v37 = vadd.f32 1.0, %v12493_v34 }
 0x619   : > { %v12497_v39 = vpop.eup %12496  ;;  %12516 = vrcp.f32 %v4982_v35  ;;  %v4984_v40 = vadd.f32 1.0, %v12495_v36 }
 0x61a   : > { %v12499_v42 = vpop.eup %12498  ;;  %12518 = vrcp.f32 %v4983_v37  ;;  %v4985_v43 = vadd.f32 1.0, %v12497_v39  ;;  %v905_v39 = vld [vmem:[%s13832_s30 + $0x17f8] sm:$0xff] }
 0x61b   : > { %v12501_v45 = vpop.eup %12500  ;;  %12520 = vrcp.f32 %v4984_v40  ;;  %v4986_v46 = vadd.f32 1.0, %v12499_v42  ;;  %v906_v42 = vld [vmem:[%s13832_s30 + $0x1800] sm:$0xff]  ;;  %v9195_v48 = vmul.f32 -1.442695, %v905_v39 }
 0x61c   : > { %v12503_v49 = vpop.eup %12502  ;;  %12522 = vrcp.f32 %v4985_v43  ;;  %v4987_v50 = vadd.f32 1.0, %v12501_v45  ;;  %v907_v45 = vld [vmem:[%s13832_s30 + $0x1808] sm:$0xff]  ;;  %v9196_v52 = vmul.f32 -1.442695, %v906_v42 }
 0x61d   : > { %v12505_v53 = vpop.eup %12504  ;;  %8047 = vst [vmem:[%s13858_s17 + $0x1728] sm:$0xff] %v12503_v49  ;;  %12524 = vrcp.f32 %v4986_v46  ;;  %v908_v49 = vld [vmem:[%s13832_s30 + $0x1810] sm:$0xff]  ;;  %v9197_v55 = vmul.f32 -1.442695, %v907_v45 }
 0x61e   : > { %v12507_v56 = vpop.eup %12506  ;;  %8048 = vst [vmem:[%s13858_s17 + $0x1730] sm:$0xff] %v12505_v53  ;;  %12526 = vrcp.f32 %v4987_v50  ;;  %v909_v53 = vld [vmem:[%s13832_s30 + $0x1818] sm:$0xff]  ;;  %v9198_v58 = vmul.f32 -1.442695, %v908_v49 }
 0x61f   : > { %v12509_v59 = vpop.eup %12508  ;;  %8049 = vst [vmem:[%s13858_s17 + $0x1738] sm:$0xff] %v12507_v56  ;;  %12528 = vpow2.f32 %v9182_v47  ;;  %v910_v56 = vld [vmem:[%s13832_s30 + $0x1820] sm:$0xff]  ;;  %v9199_v61 = vmul.f32 -1.442695, %v909_v53 }
 0x620   : > { %v12511_v62 = vpop.eup %12510  ;;  %8050 = vst [vmem:[%s13858_s17 + $0x1740] sm:$0xff] %v12509_v59  ;;  %12530 = vpow2.f32 %v9183_v51  ;;  %v911_v59 = vld [vmem:[%s13832_s30 + $0x1828] sm:$0xff]  ;;  %v9200_v0 = vmul.f32 -1.442695, %v910_v56 }
 0x621   : > { %v12513_v1 = vpop.eup %12512  ;;  %8051 = vst [vmem:[%s13858_s17 + $0x1748] sm:$0xff] %v12511_v62  ;;  %12532 = vpow2.f32 %v9184_v54  ;;  %v912_v62 = vld [vmem:[%s13832_s30 + $0x1830] sm:$0xff]  ;;  %v9201_v3 = vmul.f32 -1.442695, %v911_v59 }
 0x622   : > { %v12515_v4 = vpop.eup %12514  ;;  %8052 = vst [vmem:[%s13858_s17 + $0x1750] sm:$0xff] %v12513_v1  ;;  %12534 = vpow2.f32 %v9185_v57  ;;  %v913_v1 = vld [vmem:[%s13832_s30 + $0x1838] sm:$0xff]  ;;  %v9202_v6 = vmul.f32 -1.442695, %v912_v62 }
 0x623   : > { %v12517_v7 = vpop.eup %12516  ;;  %8053 = vst [vmem:[%s13858_s17 + $0x1758] sm:$0xff] %v12515_v4  ;;  %12536 = vpow2.f32 %v9186_v60  ;;  %v914_v4 = vld [vmem:[%s13832_s30 + $0x1840] sm:$0xff]  ;;  %v9203_v9 = vmul.f32 -1.442695, %v913_v1 }
 0x624   : > { %v12519_v10 = vpop.eup %12518  ;;  %8054 = vst [vmem:[%s13858_s17 + $0x1760] sm:$0xff] %v12517_v7  ;;  %12538 = vpow2.f32 %v9187_v63  ;;  %v915_v7 = vld [vmem:[%s13832_s30 + $0x1848] sm:$0xff]  ;;  %v9204_v12 = vmul.f32 -1.442695, %v914_v4 }
 0x625   : > { %v12521_v13 = vpop.eup %12520  ;;  %8055 = vst [vmem:[%s13858_s17 + $0x1768] sm:$0xff] %v12519_v10  ;;  %12540 = vpow2.f32 %v9188_v2  ;;  %v916_v10 = vld [vmem:[%s13832_s30 + $0x1850] sm:$0xff] }
 0x626   : > { %v12523_v15 = vpop.eup %12522  ;;  %8056 = vst [vmem:[%s13858_s17 + $0x1770] sm:$0xff] %v12521_v13  ;;  %12542 = vpow2.f32 %v9189_v5  ;;  %v917_v13 = vld [vmem:[%s13832_s30 + $0x1858] sm:$0xff] }
 0x627   : > { %v12525_v17 = vpop.eup %12524  ;;  %8057 = vst [vmem:[%s13858_s17 + $0x1778] sm:$0xff] %v12523_v15  ;;  %12544 = vpow2.f32 %v9190_v8  ;;  %v9205_v15 = vmul.f32 -1.442695, %v915_v7 }
 0x628   : > { %v12527_v19 = vpop.eup %12526  ;;  %8058 = vst [vmem:[%s13858_s17 + $0x1780] sm:$0xff] %v12525_v17  ;;  %12546 = vpow2.f32 %v9191_v11  ;;  %v9206_v17 = vmul.f32 -1.442695, %v916_v10 }
 0x629   : > { %v12529_v20 = vpop.eup %12528  ;;  %8059 = vst [vmem:[%s13858_s17 + $0x1788] sm:$0xff] %v12527_v19  ;;  %12548 = vpow2.f32 %v9192_v14  ;;  %v9207_v19 = vmul.f32 -1.442695, %v917_v13 }
 0x62a   : > { %v12531_v21 = vpop.eup %12530  ;;  %v4988_v22 = vadd.f32 1.0, %v12529_v20  ;;  %12550 = vpow2.f32 %v9193_v16 }
 0x62b   : > { %v12533_v23 = vpop.eup %12532  ;;  %v4989_v24 = vadd.f32 1.0, %v12531_v21  ;;  %12552 = vpow2.f32 %v9194_v18 }
 0x62c   : > { %v12535_v25 = vpop.eup %12534  ;;  %12554 = vrcp.f32 %v4988_v22  ;;  %v4990_v26 = vadd.f32 1.0, %v12533_v23 }
 0x62d   : > { %v12537_v27 = vpop.eup %12536  ;;  %12556 = vrcp.f32 %v4989_v24  ;;  %v4991_v28 = vadd.f32 1.0, %v12535_v25 }
 0x62e   : > { %v12539_v29 = vpop.eup %12538  ;;  %12558 = vrcp.f32 %v4990_v26  ;;  %v4992_v30 = vadd.f32 1.0, %v12537_v27 }
 0x62f   : > { %v12541_v31 = vpop.eup %12540  ;;  %12560 = vrcp.f32 %v4991_v28  ;;  %v4993_v32 = vadd.f32 1.0, %v12539_v29 }
 0x630   : > { %v12543_v33 = vpop.eup %12542  ;;  %12562 = vrcp.f32 %v4992_v30  ;;  %v4994_v34 = vadd.f32 1.0, %v12541_v31 }
 0x631   : > { %v12545_v35 = vpop.eup %12544  ;;  %12564 = vrcp.f32 %v4993_v32  ;;  %v4995_v36 = vadd.f32 1.0, %v12543_v33 }
 0x632   : > { %v12547_v37 = vpop.eup %12546  ;;  %12566 = vrcp.f32 %v4994_v34  ;;  %v4996_v38 = vadd.f32 1.0, %v12545_v35 }
 0x633   : > { %v12549_v40 = vpop.eup %12548  ;;  %12568 = vrcp.f32 %v4995_v36  ;;  %v4997_v41 = vadd.f32 1.0, %v12547_v37 }
 0x634   : > { %v12551_v43 = vpop.eup %12550  ;;  %12570 = vrcp.f32 %v4996_v38  ;;  %v4998_v44 = vadd.f32 1.0, %v12549_v40  ;;  %v918_v40 = vld [vmem:[%s13832_s30 + $0x1860] sm:$0xff] }
 0x635   : > { %v12553_v46 = vpop.eup %12552  ;;  %12572 = vrcp.f32 %v4997_v41  ;;  %v4999_v47 = vadd.f32 1.0, %v12551_v43  ;;  %v919_v43 = vld [vmem:[%s13832_s30 + $0x1868] sm:$0xff]  ;;  %v9208_v49 = vmul.f32 -1.442695, %v918_v40 }
 0x636   : > { %v12555_v50 = vpop.eup %12554  ;;  %12574 = vrcp.f32 %v4998_v44  ;;  %v5000_v51 = vadd.f32 1.0, %v12553_v46  ;;  %v920_v46 = vld [vmem:[%s13832_s30 + $0x1870] sm:$0xff]  ;;  %v9209_v53 = vmul.f32 -1.442695, %v919_v43 }
 0x637   : > { %v12557_v54 = vpop.eup %12556  ;;  %8060 = vst [vmem:[%s13858_s17 + $0x1790] sm:$0xff] %v12555_v50  ;;  %12576 = vrcp.f32 %v4999_v47  ;;  %v921_v50 = vld [vmem:[%s13832_s30 + $0x1878] sm:$0xff]  ;;  %v9210_v56 = vmul.f32 -1.442695, %v920_v46 }
 0x638   : > { %v12559_v57 = vpop.eup %12558  ;;  %8061 = vst [vmem:[%s13858_s17 + $0x1798] sm:$0xff] %v12557_v54  ;;  %12578 = vrcp.f32 %v5000_v51  ;;  %v922_v54 = vld [vmem:[%s13832_s30 + $0x1880] sm:$0xff]  ;;  %v9211_v59 = vmul.f32 -1.442695, %v921_v50 }
 0x639   : > { %v12561_v60 = vpop.eup %12560  ;;  %8062 = vst [vmem:[%s13858_s17 + $0x17a0] sm:$0xff] %v12559_v57  ;;  %12580 = vpow2.f32 %v9195_v48  ;;  %v923_v57 = vld [vmem:[%s13832_s30 + $0x1888] sm:$0xff]  ;;  %v9212_v62 = vmul.f32 -1.442695, %v922_v54 }
 0x63a   : > { %v12563_v63 = vpop.eup %12562  ;;  %8063 = vst [vmem:[%s13858_s17 + $0x17a8] sm:$0xff] %v12561_v60  ;;  %12582 = vpow2.f32 %v9196_v52  ;;  %v924_v60 = vld [vmem:[%s13832_s30 + $0x1890] sm:$0xff]  ;;  %v9213_v1 = vmul.f32 -1.442695, %v923_v57 }
 0x63b   : > { %v12565_v2 = vpop.eup %12564  ;;  %8064 = vst [vmem:[%s13858_s17 + $0x17b0] sm:$0xff] %v12563_v63  ;;  %12584 = vpow2.f32 %v9197_v55  ;;  %v925_v63 = vld [vmem:[%s13832_s30 + $0x1898] sm:$0xff]  ;;  %v9214_v4 = vmul.f32 -1.442695, %v924_v60 }
 0x63c   : > { %v12567_v5 = vpop.eup %12566  ;;  %8065 = vst [vmem:[%s13858_s17 + $0x17b8] sm:$0xff] %v12565_v2  ;;  %12586 = vpow2.f32 %v9198_v58  ;;  %v926_v2 = vld [vmem:[%s13832_s30 + $0x18a0] sm:$0xff]  ;;  %v9215_v7 = vmul.f32 -1.442695, %v925_v63 }
 0x63d   : > { %v12569_v8 = vpop.eup %12568  ;;  %8066 = vst [vmem:[%s13858_s17 + $0x17c0] sm:$0xff] %v12567_v5  ;;  %12588 = vpow2.f32 %v9199_v61  ;;  %v927_v5 = vld [vmem:[%s13832_s30 + $0x18a8] sm:$0xff]  ;;  %v9216_v10 = vmul.f32 -1.442695, %v926_v2 }
 0x63e   : > { %v12571_v11 = vpop.eup %12570  ;;  %8067 = vst [vmem:[%s13858_s17 + $0x17c8] sm:$0xff] %v12569_v8  ;;  %12590 = vpow2.f32 %v9200_v0  ;;  %v928_v8 = vld [vmem:[%s13832_s30 + $0x18b0] sm:$0xff]  ;;  %v9217_v13 = vmul.f32 -1.442695, %v927_v5 }
 0x63f   : > { %v12573_v14 = vpop.eup %12572  ;;  %8068 = vst [vmem:[%s13858_s17 + $0x17d0] sm:$0xff] %v12571_v11  ;;  %12592 = vpow2.f32 %v9201_v3  ;;  %v929_v11 = vld [vmem:[%s13832_s30 + $0x18b8] sm:$0xff] }
 0x640   : > { %v12575_v16 = vpop.eup %12574  ;;  %8069 = vst [vmem:[%s13858_s17 + $0x17d8] sm:$0xff] %v12573_v14  ;;  %12594 = vpow2.f32 %v9202_v6  ;;  %v930_v14 = vld [vmem:[%s13832_s30 + $0x18c0] sm:$0xff] }
 0x641   : > { %v12577_v18 = vpop.eup %12576  ;;  %8070 = vst [vmem:[%s13858_s17 + $0x17e0] sm:$0xff] %v12575_v16  ;;  %12596 = vpow2.f32 %v9203_v9  ;;  %v9218_v16 = vmul.f32 -1.442695, %v928_v8 }
 0x642   : > { %v12579_v20 = vpop.eup %12578  ;;  %8071 = vst [vmem:[%s13858_s17 + $0x17e8] sm:$0xff] %v12577_v18  ;;  %12598 = vpow2.f32 %v9204_v12  ;;  %v9219_v18 = vmul.f32 -1.442695, %v929_v11 }
 0x643   : > { %v12581_v21 = vpop.eup %12580  ;;  %8072 = vst [vmem:[%s13858_s17 + $0x17f0] sm:$0xff] %v12579_v20  ;;  %12600 = vpow2.f32 %v9205_v15  ;;  %v9220_v20 = vmul.f32 -1.442695, %v930_v14 }
 0x644   : > { %v12583_v22 = vpop.eup %12582  ;;  %v5001_v23 = vadd.f32 1.0, %v12581_v21  ;;  %12602 = vpow2.f32 %v9206_v17 }
 0x645   : > { %v12585_v24 = vpop.eup %12584  ;;  %v5002_v25 = vadd.f32 1.0, %v12583_v22  ;;  %12604 = vpow2.f32 %v9207_v19 }
 0x646   : > { %v12587_v26 = vpop.eup %12586  ;;  %12606 = vrcp.f32 %v5001_v23  ;;  %v5003_v27 = vadd.f32 1.0, %v12585_v24 }
 0x647   : > { %v12589_v28 = vpop.eup %12588  ;;  %12608 = vrcp.f32 %v5002_v25  ;;  %v5004_v29 = vadd.f32 1.0, %v12587_v26 }
 0x648   : > { %v12591_v30 = vpop.eup %12590  ;;  %12610 = vrcp.f32 %v5003_v27  ;;  %v5005_v31 = vadd.f32 1.0, %v12589_v28 }
 0x649   : > { %v12593_v32 = vpop.eup %12592  ;;  %12612 = vrcp.f32 %v5004_v29  ;;  %v5006_v33 = vadd.f32 1.0, %v12591_v30 }
 0x64a   : > { %v12595_v34 = vpop.eup %12594  ;;  %12614 = vrcp.f32 %v5005_v31  ;;  %v5007_v35 = vadd.f32 1.0, %v12593_v32 }
 0x64b   : > { %v12597_v36 = vpop.eup %12596  ;;  %12616 = vrcp.f32 %v5006_v33  ;;  %v5008_v37 = vadd.f32 1.0, %v12595_v34 }
 0x64c   : > { %v12599_v38 = vpop.eup %12598  ;;  %12618 = vrcp.f32 %v5007_v35  ;;  %v5009_v39 = vadd.f32 1.0, %v12597_v36 }
 0x64d   : > { %v12601_v41 = vpop.eup %12600  ;;  %12620 = vrcp.f32 %v5008_v37  ;;  %v5010_v42 = vadd.f32 1.0, %v12599_v38 }
 0x64e   : > { %v12603_v44 = vpop.eup %12602  ;;  %12622 = vrcp.f32 %v5009_v39  ;;  %v5011_v45 = vadd.f32 1.0, %v12601_v41  ;;  %v931_v41 = vld [vmem:[%s13832_s30 + $0x18c8] sm:$0xff] }
 0x64f   : > { %v12605_v47 = vpop.eup %12604  ;;  %12624 = vrcp.f32 %v5010_v42  ;;  %v5012_v48 = vadd.f32 1.0, %v12603_v44  ;;  %v932_v44 = vld [vmem:[%s13832_s30 + $0x18d0] sm:$0xff]  ;;  %v9221_v50 = vmul.f32 -1.442695, %v931_v41 }
 0x650   : > { %v12607_v51 = vpop.eup %12606  ;;  %12626 = vrcp.f32 %v5011_v45  ;;  %v5013_v52 = vadd.f32 1.0, %v12605_v47  ;;  %v933_v47 = vld [vmem:[%s13832_s30 + $0x18d8] sm:$0xff]  ;;  %v9222_v54 = vmul.f32 -1.442695, %v932_v44 }
 0x651   : > { %v12609_v55 = vpop.eup %12608  ;;  %8073 = vst [vmem:[%s13858_s17 + $0x17f8] sm:$0xff] %v12607_v51  ;;  %12628 = vrcp.f32 %v5012_v48  ;;  %v934_v51 = vld [vmem:[%s13832_s30 + $0x18e0] sm:$0xff]  ;;  %v9223_v57 = vmul.f32 -1.442695, %v933_v47 }
 0x652   : > { %v12611_v58 = vpop.eup %12610  ;;  %8074 = vst [vmem:[%s13858_s17 + $0x1800] sm:$0xff] %v12609_v55  ;;  %12630 = vrcp.f32 %v5013_v52  ;;  %v935_v55 = vld [vmem:[%s13832_s30 + $0x18e8] sm:$0xff]  ;;  %v9224_v60 = vmul.f32 -1.442695, %v934_v51 }
 0x653   : > { %v12613_v61 = vpop.eup %12612  ;;  %8075 = vst [vmem:[%s13858_s17 + $0x1808] sm:$0xff] %v12611_v58  ;;  %12632 = vpow2.f32 %v9208_v49  ;;  %v936_v58 = vld [vmem:[%s13832_s30 + $0x18f0] sm:$0xff]  ;;  %v9225_v63 = vmul.f32 -1.442695, %v935_v55 }
 0x654   : > { %v12615_v0 = vpop.eup %12614  ;;  %8076 = vst [vmem:[%s13858_s17 + $0x1810] sm:$0xff] %v12613_v61  ;;  %12634 = vpow2.f32 %v9209_v53  ;;  %v937_v61 = vld [vmem:[%s13832_s30 + $0x18f8] sm:$0xff]  ;;  %v9226_v2 = vmul.f32 -1.442695, %v936_v58 }
 0x655   : > { %v12617_v3 = vpop.eup %12616  ;;  %8077 = vst [vmem:[%s13858_s17 + $0x1818] sm:$0xff] %v12615_v0  ;;  %12636 = vpow2.f32 %v9210_v56  ;;  %v938_v0 = vld [vmem:[%s13832_s30 + $0x1900] sm:$0xff]  ;;  %v9227_v5 = vmul.f32 -1.442695, %v937_v61 }
 0x656   : > { %v12619_v6 = vpop.eup %12618  ;;  %8078 = vst [vmem:[%s13858_s17 + $0x1820] sm:$0xff] %v12617_v3  ;;  %12638 = vpow2.f32 %v9211_v59  ;;  %v939_v3 = vld [vmem:[%s13832_s30 + $0x1908] sm:$0xff]  ;;  %v9228_v8 = vmul.f32 -1.442695, %v938_v0 }
 0x657   : > { %v12621_v9 = vpop.eup %12620  ;;  %8079 = vst [vmem:[%s13858_s17 + $0x1828] sm:$0xff] %v12619_v6  ;;  %12640 = vpow2.f32 %v9212_v62  ;;  %v940_v6 = vld [vmem:[%s13832_s30 + $0x1910] sm:$0xff]  ;;  %v9229_v11 = vmul.f32 -1.442695, %v939_v3 }
 0x658   : > { %v12623_v12 = vpop.eup %12622  ;;  %8080 = vst [vmem:[%s13858_s17 + $0x1830] sm:$0xff] %v12621_v9  ;;  %12642 = vpow2.f32 %v9213_v1  ;;  %v941_v9 = vld [vmem:[%s13832_s30 + $0x1918] sm:$0xff]  ;;  %v9230_v14 = vmul.f32 -1.442695, %v940_v6 }
 0x659   : > { %v12625_v15 = vpop.eup %12624  ;;  %8081 = vst [vmem:[%s13858_s17 + $0x1838] sm:$0xff] %v12623_v12  ;;  %12644 = vpow2.f32 %v9214_v4  ;;  %v942_v12 = vld [vmem:[%s13832_s30 + $0x1920] sm:$0xff] }
 0x65a   : > { %v12627_v17 = vpop.eup %12626  ;;  %8082 = vst [vmem:[%s13858_s17 + $0x1840] sm:$0xff] %v12625_v15  ;;  %12646 = vpow2.f32 %v9215_v7  ;;  %v943_v15 = vld [vmem:[%s13832_s30 + $0x1928] sm:$0xff] }
 0x65b   : > { %v12629_v19 = vpop.eup %12628  ;;  %8083 = vst [vmem:[%s13858_s17 + $0x1848] sm:$0xff] %v12627_v17  ;;  %12648 = vpow2.f32 %v9216_v10  ;;  %v9231_v17 = vmul.f32 -1.442695, %v941_v9 }
 0x65c   : > { %v12631_v21 = vpop.eup %12630  ;;  %8084 = vst [vmem:[%s13858_s17 + $0x1850] sm:$0xff] %v12629_v19  ;;  %12650 = vpow2.f32 %v9217_v13  ;;  %v9232_v19 = vmul.f32 -1.442695, %v942_v12 }
 0x65d   : > { %v12633_v22 = vpop.eup %12632  ;;  %8085 = vst [vmem:[%s13858_s17 + $0x1858] sm:$0xff] %v12631_v21  ;;  %12652 = vpow2.f32 %v9218_v16  ;;  %v9233_v21 = vmul.f32 -1.442695, %v943_v15 }
 0x65e   : > { %v12635_v23 = vpop.eup %12634  ;;  %v5014_v24 = vadd.f32 1.0, %v12633_v22  ;;  %12654 = vpow2.f32 %v9219_v18 }
 0x65f   : > { %v12637_v25 = vpop.eup %12636  ;;  %v5015_v26 = vadd.f32 1.0, %v12635_v23  ;;  %12656 = vpow2.f32 %v9220_v20 }
 0x660   : > { %v12639_v27 = vpop.eup %12638  ;;  %12658 = vrcp.f32 %v5014_v24  ;;  %v5016_v28 = vadd.f32 1.0, %v12637_v25 }
 0x661   : > { %v12641_v29 = vpop.eup %12640  ;;  %12660 = vrcp.f32 %v5015_v26  ;;  %v5017_v30 = vadd.f32 1.0, %v12639_v27 }
 0x662   : > { %v12643_v31 = vpop.eup %12642  ;;  %12662 = vrcp.f32 %v5016_v28  ;;  %v5018_v32 = vadd.f32 1.0, %v12641_v29 }
 0x663   : > { %v12645_v33 = vpop.eup %12644  ;;  %12664 = vrcp.f32 %v5017_v30  ;;  %v5019_v34 = vadd.f32 1.0, %v12643_v31 }
 0x664   : > { %v12647_v35 = vpop.eup %12646  ;;  %12666 = vrcp.f32 %v5018_v32  ;;  %v5020_v36 = vadd.f32 1.0, %v12645_v33 }
 0x665   : > { %v12649_v37 = vpop.eup %12648  ;;  %12668 = vrcp.f32 %v5019_v34  ;;  %v5021_v38 = vadd.f32 1.0, %v12647_v35 }
 0x666   : > { %v12651_v39 = vpop.eup %12650  ;;  %12670 = vrcp.f32 %v5020_v36  ;;  %v5022_v40 = vadd.f32 1.0, %v12649_v37 }
 0x667   : > { %v12653_v42 = vpop.eup %12652  ;;  %12672 = vrcp.f32 %v5021_v38  ;;  %v5023_v43 = vadd.f32 1.0, %v12651_v39 }
 0x668   : > { %v12655_v45 = vpop.eup %12654  ;;  %12674 = vrcp.f32 %v5022_v40  ;;  %v5024_v46 = vadd.f32 1.0, %v12653_v42  ;;  %v944_v42 = vld [vmem:[%s13832_s30 + $0x1930] sm:$0xff] }
 0x669   : > { %v12657_v48 = vpop.eup %12656  ;;  %12676 = vrcp.f32 %v5023_v43  ;;  %v5025_v49 = vadd.f32 1.0, %v12655_v45  ;;  %v945_v45 = vld [vmem:[%s13832_s30 + $0x1938] sm:$0xff]  ;;  %v9234_v51 = vmul.f32 -1.442695, %v944_v42 }
 0x66a   : > { %v12659_v52 = vpop.eup %12658  ;;  %12678 = vrcp.f32 %v5024_v46  ;;  %v5026_v53 = vadd.f32 1.0, %v12657_v48  ;;  %v946_v48 = vld [vmem:[%s13832_s30 + $0x1940] sm:$0xff]  ;;  %v9235_v55 = vmul.f32 -1.442695, %v945_v45 }
 0x66b   : > { %v12661_v56 = vpop.eup %12660  ;;  %8086 = vst [vmem:[%s13858_s17 + $0x1860] sm:$0xff] %v12659_v52  ;;  %12680 = vrcp.f32 %v5025_v49  ;;  %v947_v52 = vld [vmem:[%s13832_s30 + $0x1948] sm:$0xff]  ;;  %v9236_v58 = vmul.f32 -1.442695, %v946_v48 }
 0x66c   : > { %v12663_v59 = vpop.eup %12662  ;;  %8087 = vst [vmem:[%s13858_s17 + $0x1868] sm:$0xff] %v12661_v56  ;;  %12682 = vrcp.f32 %v5026_v53  ;;  %v948_v56 = vld [vmem:[%s13832_s30 + $0x1950] sm:$0xff]  ;;  %v9237_v61 = vmul.f32 -1.442695, %v947_v52 }
 0x66d   : > { %v12665_v62 = vpop.eup %12664  ;;  %8088 = vst [vmem:[%s13858_s17 + $0x1870] sm:$0xff] %v12663_v59  ;;  %12684 = vpow2.f32 %v9221_v50  ;;  %v949_v59 = vld [vmem:[%s13832_s30 + $0x1958] sm:$0xff]  ;;  %v9238_v0 = vmul.f32 -1.442695, %v948_v56 }
 0x66e   : > { %v12667_v1 = vpop.eup %12666  ;;  %8089 = vst [vmem:[%s13858_s17 + $0x1878] sm:$0xff] %v12665_v62  ;;  %12686 = vpow2.f32 %v9222_v54  ;;  %v950_v62 = vld [vmem:[%s13832_s30 + $0x1960] sm:$0xff]  ;;  %v9239_v3 = vmul.f32 -1.442695, %v949_v59 }
 0x66f   : > { %v12669_v4 = vpop.eup %12668  ;;  %8090 = vst [vmem:[%s13858_s17 + $0x1880] sm:$0xff] %v12667_v1  ;;  %12688 = vpow2.f32 %v9223_v57  ;;  %v951_v1 = vld [vmem:[%s13832_s30 + $0x1968] sm:$0xff]  ;;  %v9240_v6 = vmul.f32 -1.442695, %v950_v62 }
 0x670   : > { %v12671_v7 = vpop.eup %12670  ;;  %8091 = vst [vmem:[%s13858_s17 + $0x1888] sm:$0xff] %v12669_v4  ;;  %12690 = vpow2.f32 %v9224_v60  ;;  %v952_v4 = vld [vmem:[%s13832_s30 + $0x1970] sm:$0xff]  ;;  %v9241_v9 = vmul.f32 -1.442695, %v951_v1 }
 0x671   : > { %v12673_v10 = vpop.eup %12672  ;;  %8092 = vst [vmem:[%s13858_s17 + $0x1890] sm:$0xff] %v12671_v7  ;;  %12692 = vpow2.f32 %v9225_v63  ;;  %v953_v7 = vld [vmem:[%s13832_s30 + $0x1978] sm:$0xff]  ;;  %v9242_v12 = vmul.f32 -1.442695, %v952_v4 }
 0x672   : > { %v12675_v13 = vpop.eup %12674  ;;  %8093 = vst [vmem:[%s13858_s17 + $0x1898] sm:$0xff] %v12673_v10  ;;  %12694 = vpow2.f32 %v9226_v2  ;;  %v954_v10 = vld [vmem:[%s13832_s30 + $0x1980] sm:$0xff]  ;;  %v9243_v15 = vmul.f32 -1.442695, %v953_v7 }
 0x673   : > { %v12677_v16 = vpop.eup %12676  ;;  %8094 = vst [vmem:[%s13858_s17 + $0x18a0] sm:$0xff] %v12675_v13  ;;  %12696 = vpow2.f32 %v9227_v5  ;;  %v955_v13 = vld [vmem:[%s13832_s30 + $0x1988] sm:$0xff] }
 0x674   : > { %v12679_v18 = vpop.eup %12678  ;;  %8095 = vst [vmem:[%s13858_s17 + $0x18a8] sm:$0xff] %v12677_v16  ;;  %12698 = vpow2.f32 %v9228_v8  ;;  %v956_v16 = vld [vmem:[%s13832_s30 + $0x1990] sm:$0xff] }
 0x675   : > { %v12681_v20 = vpop.eup %12680  ;;  %8096 = vst [vmem:[%s13858_s17 + $0x18b0] sm:$0xff] %v12679_v18  ;;  %12700 = vpow2.f32 %v9229_v11  ;;  %v9244_v18 = vmul.f32 -1.442695, %v954_v10 }
 0x676   : > { %v12683_v22 = vpop.eup %12682  ;;  %8097 = vst [vmem:[%s13858_s17 + $0x18b8] sm:$0xff] %v12681_v20  ;;  %12702 = vpow2.f32 %v9230_v14  ;;  %v9245_v20 = vmul.f32 -1.442695, %v955_v13 }
 0x677   : > { %v12685_v23 = vpop.eup %12684  ;;  %8098 = vst [vmem:[%s13858_s17 + $0x18c0] sm:$0xff] %v12683_v22  ;;  %12704 = vpow2.f32 %v9231_v17  ;;  %v9246_v22 = vmul.f32 -1.442695, %v956_v16 }
 0x678   : > { %v12687_v24 = vpop.eup %12686  ;;  %v5027_v25 = vadd.f32 1.0, %v12685_v23  ;;  %12706 = vpow2.f32 %v9232_v19 }
 0x679   : > { %v12689_v26 = vpop.eup %12688  ;;  %v5028_v27 = vadd.f32 1.0, %v12687_v24  ;;  %12708 = vpow2.f32 %v9233_v21 }
 0x67a   : > { %v12691_v28 = vpop.eup %12690  ;;  %12710 = vrcp.f32 %v5027_v25  ;;  %v5029_v29 = vadd.f32 1.0, %v12689_v26 }
 0x67b   : > { %v12693_v30 = vpop.eup %12692  ;;  %12712 = vrcp.f32 %v5028_v27  ;;  %v5030_v31 = vadd.f32 1.0, %v12691_v28 }
 0x67c   : > { %v12695_v32 = vpop.eup %12694  ;;  %12714 = vrcp.f32 %v5029_v29  ;;  %v5031_v33 = vadd.f32 1.0, %v12693_v30 }
 0x67d   : > { %v12697_v34 = vpop.eup %12696  ;;  %12716 = vrcp.f32 %v5030_v31  ;;  %v5032_v35 = vadd.f32 1.0, %v12695_v32 }
 0x67e   : > { %v12699_v36 = vpop.eup %12698  ;;  %12718 = vrcp.f32 %v5031_v33  ;;  %v5033_v37 = vadd.f32 1.0, %v12697_v34 }
 0x67f   : > { %v12701_v38 = vpop.eup %12700  ;;  %12720 = vrcp.f32 %v5032_v35  ;;  %v5034_v39 = vadd.f32 1.0, %v12699_v36 }
 0x680   : > { %v12703_v40 = vpop.eup %12702  ;;  %12722 = vrcp.f32 %v5033_v37  ;;  %v5035_v41 = vadd.f32 1.0, %v12701_v38 }
 0x681   : > { %v12705_v43 = vpop.eup %12704  ;;  %12724 = vrcp.f32 %v5034_v39  ;;  %v5036_v44 = vadd.f32 1.0, %v12703_v40 }
 0x682   : > { %v12707_v46 = vpop.eup %12706  ;;  %12726 = vrcp.f32 %v5035_v41  ;;  %v5037_v47 = vadd.f32 1.0, %v12705_v43  ;;  %v957_v43 = vld [vmem:[%s13832_s30 + $0x1998] sm:$0xff] }
 0x683   : > { %v12709_v49 = vpop.eup %12708  ;;  %12728 = vrcp.f32 %v5036_v44  ;;  %v5038_v50 = vadd.f32 1.0, %v12707_v46  ;;  %v958_v46 = vld [vmem:[%s13832_s30 + $0x19a0] sm:$0xff]  ;;  %v9247_v52 = vmul.f32 -1.442695, %v957_v43 }
 0x684   : > { %v12711_v53 = vpop.eup %12710  ;;  %12730 = vrcp.f32 %v5037_v47  ;;  %v5039_v54 = vadd.f32 1.0, %v12709_v49  ;;  %v959_v49 = vld [vmem:[%s13832_s30 + $0x19a8] sm:$0xff]  ;;  %v9248_v56 = vmul.f32 -1.442695, %v958_v46 }
 0x685   : > { %v12713_v57 = vpop.eup %12712  ;;  %8099 = vst [vmem:[%s13858_s17 + $0x18c8] sm:$0xff] %v12711_v53  ;;  %12732 = vrcp.f32 %v5038_v50  ;;  %v960_v53 = vld [vmem:[%s13832_s30 + $0x19b0] sm:$0xff]  ;;  %v9249_v59 = vmul.f32 -1.442695, %v959_v49 }
 0x686   : > { %v12715_v60 = vpop.eup %12714  ;;  %8100 = vst [vmem:[%s13858_s17 + $0x18d0] sm:$0xff] %v12713_v57  ;;  %12734 = vrcp.f32 %v5039_v54  ;;  %v961_v57 = vld [vmem:[%s13832_s30 + $0x19b8] sm:$0xff]  ;;  %v9250_v62 = vmul.f32 -1.442695, %v960_v53 }
 0x687   : > { %v12717_v63 = vpop.eup %12716  ;;  %8101 = vst [vmem:[%s13858_s17 + $0x18d8] sm:$0xff] %v12715_v60  ;;  %12736 = vpow2.f32 %v9234_v51  ;;  %v962_v60 = vld [vmem:[%s13832_s30 + $0x19c0] sm:$0xff]  ;;  %v9251_v1 = vmul.f32 -1.442695, %v961_v57 }
 0x688   : > { %v12719_v2 = vpop.eup %12718  ;;  %8102 = vst [vmem:[%s13858_s17 + $0x18e0] sm:$0xff] %v12717_v63  ;;  %12738 = vpow2.f32 %v9235_v55  ;;  %v963_v63 = vld [vmem:[%s13832_s30 + $0x19c8] sm:$0xff]  ;;  %v9252_v4 = vmul.f32 -1.442695, %v962_v60 }
 0x689   : > { %v12721_v5 = vpop.eup %12720  ;;  %8103 = vst [vmem:[%s13858_s17 + $0x18e8] sm:$0xff] %v12719_v2  ;;  %12740 = vpow2.f32 %v9236_v58  ;;  %v964_v2 = vld [vmem:[%s13832_s30 + $0x19d0] sm:$0xff]  ;;  %v9253_v7 = vmul.f32 -1.442695, %v963_v63 }
 0x68a   : > { %v12723_v8 = vpop.eup %12722  ;;  %8104 = vst [vmem:[%s13858_s17 + $0x18f0] sm:$0xff] %v12721_v5  ;;  %12742 = vpow2.f32 %v9237_v61  ;;  %v965_v5 = vld [vmem:[%s13832_s30 + $0x19d8] sm:$0xff]  ;;  %v9254_v10 = vmul.f32 -1.442695, %v964_v2 }
 0x68b   : > { %v12725_v11 = vpop.eup %12724  ;;  %8105 = vst [vmem:[%s13858_s17 + $0x18f8] sm:$0xff] %v12723_v8  ;;  %12744 = vpow2.f32 %v9238_v0  ;;  %v966_v8 = vld [vmem:[%s13832_s30 + $0x19e0] sm:$0xff]  ;;  %v9255_v13 = vmul.f32 -1.442695, %v965_v5 }
 0x68c   : > { %v12727_v14 = vpop.eup %12726  ;;  %8106 = vst [vmem:[%s13858_s17 + $0x1900] sm:$0xff] %v12725_v11  ;;  %12746 = vpow2.f32 %v9239_v3  ;;  %v967_v11 = vld [vmem:[%s13832_s30 + $0x19e8] sm:$0xff]  ;;  %v9256_v16 = vmul.f32 -1.442695, %v966_v8 }
 0x68d   : > { %v12729_v17 = vpop.eup %12728  ;;  %8107 = vst [vmem:[%s13858_s17 + $0x1908] sm:$0xff] %v12727_v14  ;;  %12748 = vpow2.f32 %v9240_v6  ;;  %v968_v14 = vld [vmem:[%s13832_s30 + $0x19f0] sm:$0xff] }
 0x68e   : > { %v12731_v19 = vpop.eup %12730  ;;  %8108 = vst [vmem:[%s13858_s17 + $0x1910] sm:$0xff] %v12729_v17  ;;  %12750 = vpow2.f32 %v9241_v9  ;;  %v969_v17 = vld [vmem:[%s13832_s30 + $0x19f8] sm:$0xff] }
 0x68f   : > { %v12733_v21 = vpop.eup %12732  ;;  %8109 = vst [vmem:[%s13858_s17 + $0x1918] sm:$0xff] %v12731_v19  ;;  %12752 = vpow2.f32 %v9242_v12  ;;  %v9257_v19 = vmul.f32 -1.442695, %v967_v11 }
 0x690   : > { %v12735_v23 = vpop.eup %12734  ;;  %8110 = vst [vmem:[%s13858_s17 + $0x1920] sm:$0xff] %v12733_v21  ;;  %12754 = vpow2.f32 %v9243_v15  ;;  %v9258_v21 = vmul.f32 -1.442695, %v968_v14 }
 0x691   : > { %v12737_v24 = vpop.eup %12736  ;;  %8111 = vst [vmem:[%s13858_s17 + $0x1928] sm:$0xff] %v12735_v23  ;;  %12756 = vpow2.f32 %v9244_v18  ;;  %v9259_v23 = vmul.f32 -1.442695, %v969_v17 }
 0x692   : > { %v12739_v25 = vpop.eup %12738  ;;  %v5040_v26 = vadd.f32 1.0, %v12737_v24  ;;  %12758 = vpow2.f32 %v9245_v20 }
 0x693   : > { %v12741_v27 = vpop.eup %12740  ;;  %v5041_v28 = vadd.f32 1.0, %v12739_v25  ;;  %12760 = vpow2.f32 %v9246_v22 }
 0x694   : > { %v12743_v29 = vpop.eup %12742  ;;  %12762 = vrcp.f32 %v5040_v26  ;;  %v5042_v30 = vadd.f32 1.0, %v12741_v27 }
 0x695   : > { %v12745_v31 = vpop.eup %12744  ;;  %12764 = vrcp.f32 %v5041_v28  ;;  %v5043_v32 = vadd.f32 1.0, %v12743_v29 }
 0x696   : > { %v12747_v33 = vpop.eup %12746  ;;  %12766 = vrcp.f32 %v5042_v30  ;;  %v5044_v34 = vadd.f32 1.0, %v12745_v31 }
 0x697   : > { %v12749_v35 = vpop.eup %12748  ;;  %12768 = vrcp.f32 %v5043_v32  ;;  %v5045_v36 = vadd.f32 1.0, %v12747_v33 }
 0x698   : > { %v12751_v37 = vpop.eup %12750  ;;  %12770 = vrcp.f32 %v5044_v34  ;;  %v5046_v38 = vadd.f32 1.0, %v12749_v35 }
 0x699   : > { %v12753_v39 = vpop.eup %12752  ;;  %12772 = vrcp.f32 %v5045_v36  ;;  %v5047_v40 = vadd.f32 1.0, %v12751_v37 }
 0x69a   : > { %v12755_v41 = vpop.eup %12754  ;;  %12774 = vrcp.f32 %v5046_v38  ;;  %v5048_v42 = vadd.f32 1.0, %v12753_v39 }
 0x69b   : > { %v12757_v44 = vpop.eup %12756  ;;  %12776 = vrcp.f32 %v5047_v40  ;;  %v5049_v45 = vadd.f32 1.0, %v12755_v41 }
 0x69c   : > { %v12759_v47 = vpop.eup %12758  ;;  %12778 = vrcp.f32 %v5048_v42  ;;  %v5050_v48 = vadd.f32 1.0, %v12757_v44  ;;  %v970_v44 = vld [vmem:[%s13832_s30 + $0x1a00] sm:$0xff] }
 0x69d   : > { %v12761_v50 = vpop.eup %12760  ;;  %12780 = vrcp.f32 %v5049_v45  ;;  %v5051_v51 = vadd.f32 1.0, %v12759_v47  ;;  %v971_v47 = vld [vmem:[%s13832_s30 + $0x1a08] sm:$0xff]  ;;  %v9260_v53 = vmul.f32 -1.442695, %v970_v44 }
 0x69e   : > { %v12763_v54 = vpop.eup %12762  ;;  %12782 = vrcp.f32 %v5050_v48  ;;  %v5052_v55 = vadd.f32 1.0, %v12761_v50  ;;  %v972_v50 = vld [vmem:[%s13832_s30 + $0x1a10] sm:$0xff]  ;;  %v9261_v57 = vmul.f32 -1.442695, %v971_v47 }
 0x69f   : > { %v12765_v58 = vpop.eup %12764  ;;  %8112 = vst [vmem:[%s13858_s17 + $0x1930] sm:$0xff] %v12763_v54  ;;  %12784 = vrcp.f32 %v5051_v51  ;;  %v973_v54 = vld [vmem:[%s13832_s30 + $0x1a18] sm:$0xff]  ;;  %v9262_v60 = vmul.f32 -1.442695, %v972_v50 }
 0x6a0   : > { %v12767_v61 = vpop.eup %12766  ;;  %8113 = vst [vmem:[%s13858_s17 + $0x1938] sm:$0xff] %v12765_v58  ;;  %12786 = vrcp.f32 %v5052_v55  ;;  %v974_v58 = vld [vmem:[%s13832_s30 + $0x1a20] sm:$0xff]  ;;  %v9263_v63 = vmul.f32 -1.442695, %v973_v54 }
 0x6a1   : > { %v12769_v0 = vpop.eup %12768  ;;  %8114 = vst [vmem:[%s13858_s17 + $0x1940] sm:$0xff] %v12767_v61  ;;  %12788 = vpow2.f32 %v9247_v52  ;;  %v975_v61 = vld [vmem:[%s13832_s30 + $0x1a28] sm:$0xff]  ;;  %v9264_v2 = vmul.f32 -1.442695, %v974_v58 }
 0x6a2   : > { %v12771_v3 = vpop.eup %12770  ;;  %8115 = vst [vmem:[%s13858_s17 + $0x1948] sm:$0xff] %v12769_v0  ;;  %12790 = vpow2.f32 %v9248_v56  ;;  %v976_v0 = vld [vmem:[%s13832_s30 + $0x1a30] sm:$0xff]  ;;  %v9265_v5 = vmul.f32 -1.442695, %v975_v61 }
 0x6a3   : > { %v12773_v6 = vpop.eup %12772  ;;  %8116 = vst [vmem:[%s13858_s17 + $0x1950] sm:$0xff] %v12771_v3  ;;  %12792 = vpow2.f32 %v9249_v59  ;;  %v977_v3 = vld [vmem:[%s13832_s30 + $0x1a38] sm:$0xff]  ;;  %v9266_v8 = vmul.f32 -1.442695, %v976_v0 }
 0x6a4   : > { %v12775_v9 = vpop.eup %12774  ;;  %8117 = vst [vmem:[%s13858_s17 + $0x1958] sm:$0xff] %v12773_v6  ;;  %12794 = vpow2.f32 %v9250_v62  ;;  %v978_v6 = vld [vmem:[%s13832_s30 + $0x1a40] sm:$0xff]  ;;  %v9267_v11 = vmul.f32 -1.442695, %v977_v3 }
 0x6a5   : > { %v12777_v12 = vpop.eup %12776  ;;  %8118 = vst [vmem:[%s13858_s17 + $0x1960] sm:$0xff] %v12775_v9  ;;  %12796 = vpow2.f32 %v9251_v1  ;;  %v979_v9 = vld [vmem:[%s13832_s30 + $0x1a48] sm:$0xff]  ;;  %v9268_v14 = vmul.f32 -1.442695, %v978_v6 }
 0x6a6   : > { %v12779_v15 = vpop.eup %12778  ;;  %8119 = vst [vmem:[%s13858_s17 + $0x1968] sm:$0xff] %v12777_v12  ;;  %12798 = vpow2.f32 %v9252_v4  ;;  %v980_v12 = vld [vmem:[%s13832_s30 + $0x1a50] sm:$0xff]  ;;  %v9269_v17 = vmul.f32 -1.442695, %v979_v9 }
 0x6a7   : > { %v12781_v18 = vpop.eup %12780  ;;  %8120 = vst [vmem:[%s13858_s17 + $0x1970] sm:$0xff] %v12779_v15  ;;  %12800 = vpow2.f32 %v9253_v7  ;;  %v981_v15 = vld [vmem:[%s13832_s30 + $0x1a58] sm:$0xff] }
 0x6a8   : > { %v12783_v20 = vpop.eup %12782  ;;  %8121 = vst [vmem:[%s13858_s17 + $0x1978] sm:$0xff] %v12781_v18  ;;  %12802 = vpow2.f32 %v9254_v10  ;;  %v982_v18 = vld [vmem:[%s13832_s30 + $0x1a60] sm:$0xff] }
 0x6a9   : > { %v12785_v22 = vpop.eup %12784  ;;  %8122 = vst [vmem:[%s13858_s17 + $0x1980] sm:$0xff] %v12783_v20  ;;  %12804 = vpow2.f32 %v9255_v13  ;;  %v9270_v20 = vmul.f32 -1.442695, %v980_v12 }
 0x6aa   : > { %v12787_v24 = vpop.eup %12786  ;;  %8123 = vst [vmem:[%s13858_s17 + $0x1988] sm:$0xff] %v12785_v22  ;;  %12806 = vpow2.f32 %v9256_v16  ;;  %v9271_v22 = vmul.f32 -1.442695, %v981_v15 }
 0x6ab   : > { %v12789_v25 = vpop.eup %12788  ;;  %8124 = vst [vmem:[%s13858_s17 + $0x1990] sm:$0xff] %v12787_v24  ;;  %12808 = vpow2.f32 %v9257_v19  ;;  %v9272_v24 = vmul.f32 -1.442695, %v982_v18 }
 0x6ac   : > { %v12791_v26 = vpop.eup %12790  ;;  %v5053_v27 = vadd.f32 1.0, %v12789_v25  ;;  %12810 = vpow2.f32 %v9258_v21 }
 0x6ad   : > { %v12793_v28 = vpop.eup %12792  ;;  %v5054_v29 = vadd.f32 1.0, %v12791_v26  ;;  %12812 = vpow2.f32 %v9259_v23 }
 0x6ae   : > { %v12795_v30 = vpop.eup %12794  ;;  %12814 = vrcp.f32 %v5053_v27  ;;  %v5055_v31 = vadd.f32 1.0, %v12793_v28 }
 0x6af   : > { %v12797_v32 = vpop.eup %12796  ;;  %12816 = vrcp.f32 %v5054_v29  ;;  %v5056_v33 = vadd.f32 1.0, %v12795_v30 }
 0x6b0   : > { %v12799_v34 = vpop.eup %12798  ;;  %12818 = vrcp.f32 %v5055_v31  ;;  %v5057_v35 = vadd.f32 1.0, %v12797_v32 }
 0x6b1   : > { %v12801_v36 = vpop.eup %12800  ;;  %12820 = vrcp.f32 %v5056_v33  ;;  %v5058_v37 = vadd.f32 1.0, %v12799_v34 }
 0x6b2   : > { %v12803_v38 = vpop.eup %12802  ;;  %12822 = vrcp.f32 %v5057_v35  ;;  %v5059_v39 = vadd.f32 1.0, %v12801_v36 }
 0x6b3   : > { %v12805_v40 = vpop.eup %12804  ;;  %12824 = vrcp.f32 %v5058_v37  ;;  %v5060_v41 = vadd.f32 1.0, %v12803_v38 }
 0x6b4   : > { %v12807_v42 = vpop.eup %12806  ;;  %12826 = vrcp.f32 %v5059_v39  ;;  %v5061_v43 = vadd.f32 1.0, %v12805_v40 }
 0x6b5   : > { %v12809_v45 = vpop.eup %12808  ;;  %12828 = vrcp.f32 %v5060_v41  ;;  %v5062_v46 = vadd.f32 1.0, %v12807_v42 }
 0x6b6   : > { %v12811_v48 = vpop.eup %12810  ;;  %12830 = vrcp.f32 %v5061_v43  ;;  %v5063_v49 = vadd.f32 1.0, %v12809_v45  ;;  %v983_v45 = vld [vmem:[%s13832_s30 + $0x1a68] sm:$0xff] }
 0x6b7   : > { %v12813_v51 = vpop.eup %12812  ;;  %12832 = vrcp.f32 %v5062_v46  ;;  %v5064_v52 = vadd.f32 1.0, %v12811_v48  ;;  %v984_v48 = vld [vmem:[%s13832_s30 + $0x1a70] sm:$0xff]  ;;  %v9273_v54 = vmul.f32 -1.442695, %v983_v45 }
 0x6b8   : > { %v12815_v55 = vpop.eup %12814  ;;  %12834 = vrcp.f32 %v5063_v49  ;;  %v5065_v56 = vadd.f32 1.0, %v12813_v51  ;;  %v985_v51 = vld [vmem:[%s13832_s30 + $0x1a78] sm:$0xff]  ;;  %v9274_v58 = vmul.f32 -1.442695, %v984_v48 }
 0x6b9   : > { %v12817_v59 = vpop.eup %12816  ;;  %8125 = vst [vmem:[%s13858_s17 + $0x1998] sm:$0xff] %v12815_v55  ;;  %12836 = vrcp.f32 %v5064_v52  ;;  %v986_v55 = vld [vmem:[%s13832_s30 + $0x1a80] sm:$0xff]  ;;  %v9275_v61 = vmul.f32 -1.442695, %v985_v51 }
 0x6ba   : > { %v12819_v62 = vpop.eup %12818  ;;  %8126 = vst [vmem:[%s13858_s17 + $0x19a0] sm:$0xff] %v12817_v59  ;;  %12838 = vrcp.f32 %v5065_v56  ;;  %v987_v59 = vld [vmem:[%s13832_s30 + $0x1a88] sm:$0xff]  ;;  %v9276_v0 = vmul.f32 -1.442695, %v986_v55 }
 0x6bb   : > { %v12821_v1 = vpop.eup %12820  ;;  %8127 = vst [vmem:[%s13858_s17 + $0x19a8] sm:$0xff] %v12819_v62  ;;  %12840 = vpow2.f32 %v9260_v53  ;;  %v988_v62 = vld [vmem:[%s13832_s30 + $0x1a90] sm:$0xff]  ;;  %v9277_v3 = vmul.f32 -1.442695, %v987_v59 }
 0x6bc   : > { %v12823_v4 = vpop.eup %12822  ;;  %8128 = vst [vmem:[%s13858_s17 + $0x19b0] sm:$0xff] %v12821_v1  ;;  %12842 = vpow2.f32 %v9261_v57  ;;  %v989_v1 = vld [vmem:[%s13832_s30 + $0x1a98] sm:$0xff]  ;;  %v9278_v6 = vmul.f32 -1.442695, %v988_v62 }
 0x6bd   : > { %v12825_v7 = vpop.eup %12824  ;;  %8129 = vst [vmem:[%s13858_s17 + $0x19b8] sm:$0xff] %v12823_v4  ;;  %12844 = vpow2.f32 %v9262_v60  ;;  %v990_v4 = vld [vmem:[%s13832_s30 + $0x1aa0] sm:$0xff]  ;;  %v9279_v9 = vmul.f32 -1.442695, %v989_v1 }
 0x6be   : > { %v12827_v10 = vpop.eup %12826  ;;  %8130 = vst [vmem:[%s13858_s17 + $0x19c0] sm:$0xff] %v12825_v7  ;;  %12846 = vpow2.f32 %v9263_v63  ;;  %v991_v7 = vld [vmem:[%s13832_s30 + $0x1aa8] sm:$0xff]  ;;  %v9280_v12 = vmul.f32 -1.442695, %v990_v4 }
 0x6bf   : > { %v12829_v13 = vpop.eup %12828  ;;  %8131 = vst [vmem:[%s13858_s17 + $0x19c8] sm:$0xff] %v12827_v10  ;;  %12848 = vpow2.f32 %v9264_v2  ;;  %v992_v10 = vld [vmem:[%s13832_s30 + $0x1ab0] sm:$0xff]  ;;  %v9281_v15 = vmul.f32 -1.442695, %v991_v7 }
 0x6c0   : > { %v12831_v16 = vpop.eup %12830  ;;  %8132 = vst [vmem:[%s13858_s17 + $0x19d0] sm:$0xff] %v12829_v13  ;;  %12850 = vpow2.f32 %v9265_v5  ;;  %v993_v13 = vld [vmem:[%s13832_s30 + $0x1ab8] sm:$0xff]  ;;  %v9282_v18 = vmul.f32 -1.442695, %v992_v10 }
 0x6c1   : > { %v12833_v19 = vpop.eup %12832  ;;  %8133 = vst [vmem:[%s13858_s17 + $0x19d8] sm:$0xff] %v12831_v16  ;;  %12852 = vpow2.f32 %v9266_v8  ;;  %v994_v16 = vld [vmem:[%s13832_s30 + $0x1ac0] sm:$0xff] }
 0x6c2   : > { %v12835_v21 = vpop.eup %12834  ;;  %8134 = vst [vmem:[%s13858_s17 + $0x19e0] sm:$0xff] %v12833_v19  ;;  %12854 = vpow2.f32 %v9267_v11  ;;  %v995_v19 = vld [vmem:[%s13832_s30 + $0x1ac8] sm:$0xff] }
 0x6c3   : > { %v12837_v23 = vpop.eup %12836  ;;  %8135 = vst [vmem:[%s13858_s17 + $0x19e8] sm:$0xff] %v12835_v21  ;;  %12856 = vpow2.f32 %v9268_v14  ;;  %v9283_v21 = vmul.f32 -1.442695, %v993_v13 }
 0x6c4   : > { %v12839_v25 = vpop.eup %12838  ;;  %8136 = vst [vmem:[%s13858_s17 + $0x19f0] sm:$0xff] %v12837_v23  ;;  %12858 = vpow2.f32 %v9269_v17  ;;  %v9284_v23 = vmul.f32 -1.442695, %v994_v16 }
 0x6c5   : > { %v12841_v26 = vpop.eup %12840  ;;  %8137 = vst [vmem:[%s13858_s17 + $0x19f8] sm:$0xff] %v12839_v25  ;;  %12860 = vpow2.f32 %v9270_v20  ;;  %v9285_v25 = vmul.f32 -1.442695, %v995_v19 }
 0x6c6   : > { %v12843_v27 = vpop.eup %12842  ;;  %v5066_v28 = vadd.f32 1.0, %v12841_v26  ;;  %12862 = vpow2.f32 %v9271_v22 }
 0x6c7   : > { %v12845_v29 = vpop.eup %12844  ;;  %v5067_v30 = vadd.f32 1.0, %v12843_v27  ;;  %12864 = vpow2.f32 %v9272_v24 }
 0x6c8   : > { %v12847_v31 = vpop.eup %12846  ;;  %12866 = vrcp.f32 %v5066_v28  ;;  %v5068_v32 = vadd.f32 1.0, %v12845_v29 }
 0x6c9   : > { %v12849_v33 = vpop.eup %12848  ;;  %12868 = vrcp.f32 %v5067_v30  ;;  %v5069_v34 = vadd.f32 1.0, %v12847_v31 }
 0x6ca   : > { %v12851_v35 = vpop.eup %12850  ;;  %12870 = vrcp.f32 %v5068_v32  ;;  %v5070_v36 = vadd.f32 1.0, %v12849_v33 }
 0x6cb   : > { %v12853_v37 = vpop.eup %12852  ;;  %12872 = vrcp.f32 %v5069_v34  ;;  %v5071_v38 = vadd.f32 1.0, %v12851_v35 }
 0x6cc   : > { %v12855_v39 = vpop.eup %12854  ;;  %12874 = vrcp.f32 %v5070_v36  ;;  %v5072_v40 = vadd.f32 1.0, %v12853_v37 }
 0x6cd   : > { %v12857_v41 = vpop.eup %12856  ;;  %12876 = vrcp.f32 %v5071_v38  ;;  %v5073_v42 = vadd.f32 1.0, %v12855_v39 }
 0x6ce   : > { %v12859_v43 = vpop.eup %12858  ;;  %12878 = vrcp.f32 %v5072_v40  ;;  %v5074_v44 = vadd.f32 1.0, %v12857_v41 }
 0x6cf   : > { %v12861_v46 = vpop.eup %12860  ;;  %12880 = vrcp.f32 %v5073_v42  ;;  %v5075_v47 = vadd.f32 1.0, %v12859_v43 }
 0x6d0   : > { %v12863_v49 = vpop.eup %12862  ;;  %12882 = vrcp.f32 %v5074_v44  ;;  %v5076_v50 = vadd.f32 1.0, %v12861_v46  ;;  %v996_v46 = vld [vmem:[%s13832_s30 + $0x1ad0] sm:$0xff] }
 0x6d1   : > { %v12865_v52 = vpop.eup %12864  ;;  %12884 = vrcp.f32 %v5075_v47  ;;  %v5077_v53 = vadd.f32 1.0, %v12863_v49  ;;  %v997_v49 = vld [vmem:[%s13832_s30 + $0x1ad8] sm:$0xff]  ;;  %v9286_v55 = vmul.f32 -1.442695, %v996_v46 }
 0x6d2   : > { %v12867_v56 = vpop.eup %12866  ;;  %12886 = vrcp.f32 %v5076_v50  ;;  %v5078_v57 = vadd.f32 1.0, %v12865_v52  ;;  %v998_v52 = vld [vmem:[%s13832_s30 + $0x1ae0] sm:$0xff]  ;;  %v9287_v59 = vmul.f32 -1.442695, %v997_v49 }
 0x6d3   : > { %v12869_v60 = vpop.eup %12868  ;;  %8138 = vst [vmem:[%s13858_s17 + $0x1a00] sm:$0xff] %v12867_v56  ;;  %12888 = vrcp.f32 %v5077_v53  ;;  %v999_v56 = vld [vmem:[%s13832_s30 + $0x1ae8] sm:$0xff]  ;;  %v9288_v62 = vmul.f32 -1.442695, %v998_v52 }
 0x6d4   : > { %v12871_v63 = vpop.eup %12870  ;;  %8139 = vst [vmem:[%s13858_s17 + $0x1a08] sm:$0xff] %v12869_v60  ;;  %12890 = vrcp.f32 %v5078_v57  ;;  %v1000_v60 = vld [vmem:[%s13832_s30 + $0x1af0] sm:$0xff]  ;;  %v9289_v1 = vmul.f32 -1.442695, %v999_v56 }
 0x6d5   : > { %v12873_v2 = vpop.eup %12872  ;;  %8140 = vst [vmem:[%s13858_s17 + $0x1a10] sm:$0xff] %v12871_v63  ;;  %12892 = vpow2.f32 %v9273_v54  ;;  %v1001_v63 = vld [vmem:[%s13832_s30 + $0x1af8] sm:$0xff]  ;;  %v9290_v4 = vmul.f32 -1.442695, %v1000_v60 }
 0x6d6   : > { %v12875_v5 = vpop.eup %12874  ;;  %8141 = vst [vmem:[%s13858_s17 + $0x1a18] sm:$0xff] %v12873_v2  ;;  %12894 = vpow2.f32 %v9274_v58  ;;  %v1002_v2 = vld [vmem:[%s13832_s30 + $0x1b00] sm:$0xff]  ;;  %v9291_v7 = vmul.f32 -1.442695, %v1001_v63 }
 0x6d7   : > { %v12877_v8 = vpop.eup %12876  ;;  %8142 = vst [vmem:[%s13858_s17 + $0x1a20] sm:$0xff] %v12875_v5  ;;  %12896 = vpow2.f32 %v9275_v61  ;;  %v1003_v5 = vld [vmem:[%s13832_s30 + $0x1b08] sm:$0xff]  ;;  %v9292_v10 = vmul.f32 -1.442695, %v1002_v2 }
 0x6d8   : > { %v12879_v11 = vpop.eup %12878  ;;  %8143 = vst [vmem:[%s13858_s17 + $0x1a28] sm:$0xff] %v12877_v8  ;;  %12898 = vpow2.f32 %v9276_v0  ;;  %v1004_v8 = vld [vmem:[%s13832_s30 + $0x1b10] sm:$0xff]  ;;  %v9293_v13 = vmul.f32 -1.442695, %v1003_v5 }
 0x6d9   : > { %v12881_v14 = vpop.eup %12880  ;;  %8144 = vst [vmem:[%s13858_s17 + $0x1a30] sm:$0xff] %v12879_v11  ;;  %12900 = vpow2.f32 %v9277_v3  ;;  %v1005_v11 = vld [vmem:[%s13832_s30 + $0x1b18] sm:$0xff]  ;;  %v9294_v16 = vmul.f32 -1.442695, %v1004_v8 }
 0x6da   : > { %v12883_v17 = vpop.eup %12882  ;;  %8145 = vst [vmem:[%s13858_s17 + $0x1a38] sm:$0xff] %v12881_v14  ;;  %12902 = vpow2.f32 %v9278_v6  ;;  %v1006_v14 = vld [vmem:[%s13832_s30 + $0x1b20] sm:$0xff]  ;;  %v9295_v19 = vmul.f32 -1.442695, %v1005_v11 }
 0x6db   : > { %v12885_v20 = vpop.eup %12884  ;;  %8146 = vst [vmem:[%s13858_s17 + $0x1a40] sm:$0xff] %v12883_v17  ;;  %12904 = vpow2.f32 %v9279_v9  ;;  %v1007_v17 = vld [vmem:[%s13832_s30 + $0x1b28] sm:$0xff] }
 0x6dc   : > { %v12887_v22 = vpop.eup %12886  ;;  %8147 = vst [vmem:[%s13858_s17 + $0x1a48] sm:$0xff] %v12885_v20  ;;  %12906 = vpow2.f32 %v9280_v12  ;;  %v1008_v20 = vld [vmem:[%s13832_s30 + $0x1b30] sm:$0xff] }
 0x6dd   : > { %v12889_v24 = vpop.eup %12888  ;;  %8148 = vst [vmem:[%s13858_s17 + $0x1a50] sm:$0xff] %v12887_v22  ;;  %12908 = vpow2.f32 %v9281_v15  ;;  %v9296_v22 = vmul.f32 -1.442695, %v1006_v14 }
 0x6de   : > { %v12891_v26 = vpop.eup %12890  ;;  %8149 = vst [vmem:[%s13858_s17 + $0x1a58] sm:$0xff] %v12889_v24  ;;  %12910 = vpow2.f32 %v9282_v18  ;;  %v9297_v24 = vmul.f32 -1.442695, %v1007_v17 }
 0x6df   : > { %v12893_v27 = vpop.eup %12892  ;;  %8150 = vst [vmem:[%s13858_s17 + $0x1a60] sm:$0xff] %v12891_v26  ;;  %12912 = vpow2.f32 %v9283_v21  ;;  %v9298_v26 = vmul.f32 -1.442695, %v1008_v20 }
 0x6e0   : > { %v12895_v28 = vpop.eup %12894  ;;  %v5079_v29 = vadd.f32 1.0, %v12893_v27  ;;  %12914 = vpow2.f32 %v9284_v23 }
 0x6e1   : > { %v12897_v30 = vpop.eup %12896  ;;  %v5080_v31 = vadd.f32 1.0, %v12895_v28  ;;  %12916 = vpow2.f32 %v9285_v25 }
 0x6e2   : > { %v12899_v32 = vpop.eup %12898  ;;  %12918 = vrcp.f32 %v5079_v29  ;;  %v5081_v33 = vadd.f32 1.0, %v12897_v30 }
 0x6e3   : > { %v12901_v34 = vpop.eup %12900  ;;  %12920 = vrcp.f32 %v5080_v31  ;;  %v5082_v35 = vadd.f32 1.0, %v12899_v32 }
 0x6e4   : > { %v12903_v36 = vpop.eup %12902  ;;  %12922 = vrcp.f32 %v5081_v33  ;;  %v5083_v37 = vadd.f32 1.0, %v12901_v34 }
 0x6e5   : > { %v12905_v38 = vpop.eup %12904  ;;  %12924 = vrcp.f32 %v5082_v35  ;;  %v5084_v39 = vadd.f32 1.0, %v12903_v36 }
 0x6e6   : > { %v12907_v40 = vpop.eup %12906  ;;  %12926 = vrcp.f32 %v5083_v37  ;;  %v5085_v41 = vadd.f32 1.0, %v12905_v38 }
 0x6e7   : > { %v12909_v42 = vpop.eup %12908  ;;  %12928 = vrcp.f32 %v5084_v39  ;;  %v5086_v43 = vadd.f32 1.0, %v12907_v40 }
 0x6e8   : > { %v12911_v44 = vpop.eup %12910  ;;  %12930 = vrcp.f32 %v5085_v41  ;;  %v5087_v45 = vadd.f32 1.0, %v12909_v42 }
 0x6e9   : > { %v12913_v47 = vpop.eup %12912  ;;  %12932 = vrcp.f32 %v5086_v43  ;;  %v5088_v48 = vadd.f32 1.0, %v12911_v44 }
 0x6ea   : > { %v12915_v50 = vpop.eup %12914  ;;  %12934 = vrcp.f32 %v5087_v45  ;;  %v5089_v51 = vadd.f32 1.0, %v12913_v47  ;;  %v1009_v47 = vld [vmem:[%s13832_s30 + $0x1b38] sm:$0xff] }
 0x6eb   : > { %v12917_v53 = vpop.eup %12916  ;;  %12936 = vrcp.f32 %v5088_v48  ;;  %v5090_v54 = vadd.f32 1.0, %v12915_v50  ;;  %v1010_v50 = vld [vmem:[%s13832_s30 + $0x1b40] sm:$0xff]  ;;  %v9299_v56 = vmul.f32 -1.442695, %v1009_v47 }
 0x6ec   : > { %v12919_v57 = vpop.eup %12918  ;;  %12938 = vrcp.f32 %v5089_v51  ;;  %v5091_v58 = vadd.f32 1.0, %v12917_v53  ;;  %v1011_v53 = vld [vmem:[%s13832_s30 + $0x1b48] sm:$0xff]  ;;  %v9300_v60 = vmul.f32 -1.442695, %v1010_v50 }
 0x6ed   : > { %v12921_v61 = vpop.eup %12920  ;;  %8151 = vst [vmem:[%s13858_s17 + $0x1a68] sm:$0xff] %v12919_v57  ;;  %12940 = vrcp.f32 %v5090_v54  ;;  %v1012_v57 = vld [vmem:[%s13832_s30 + $0x1b50] sm:$0xff]  ;;  %v9301_v63 = vmul.f32 -1.442695, %v1011_v53 }
 0x6ee   : > { %v12923_v0 = vpop.eup %12922  ;;  %8152 = vst [vmem:[%s13858_s17 + $0x1a70] sm:$0xff] %v12921_v61  ;;  %12942 = vrcp.f32 %v5091_v58  ;;  %v1013_v61 = vld [vmem:[%s13832_s30 + $0x1b58] sm:$0xff]  ;;  %v9302_v2 = vmul.f32 -1.442695, %v1012_v57 }
 0x6ef   : > { %v12925_v3 = vpop.eup %12924  ;;  %8153 = vst [vmem:[%s13858_s17 + $0x1a78] sm:$0xff] %v12923_v0  ;;  %12944 = vpow2.f32 %v9286_v55  ;;  %v1014_v0 = vld [vmem:[%s13832_s30 + $0x1b60] sm:$0xff]  ;;  %v9303_v5 = vmul.f32 -1.442695, %v1013_v61 }
 0x6f0   : > { %v12927_v6 = vpop.eup %12926  ;;  %8154 = vst [vmem:[%s13858_s17 + $0x1a80] sm:$0xff] %v12925_v3  ;;  %12946 = vpow2.f32 %v9287_v59  ;;  %v1015_v3 = vld [vmem:[%s13832_s30 + $0x1b68] sm:$0xff]  ;;  %v9304_v8 = vmul.f32 -1.442695, %v1014_v0 }
 0x6f1   : > { %v12929_v9 = vpop.eup %12928  ;;  %8155 = vst [vmem:[%s13858_s17 + $0x1a88] sm:$0xff] %v12927_v6  ;;  %12948 = vpow2.f32 %v9288_v62  ;;  %v1016_v6 = vld [vmem:[%s13832_s30 + $0x1b70] sm:$0xff]  ;;  %v9305_v11 = vmul.f32 -1.442695, %v1015_v3 }
 0x6f2   : > { %v12931_v12 = vpop.eup %12930  ;;  %8156 = vst [vmem:[%s13858_s17 + $0x1a90] sm:$0xff] %v12929_v9  ;;  %12950 = vpow2.f32 %v9289_v1  ;;  %v1017_v9 = vld [vmem:[%s13832_s30 + $0x1b78] sm:$0xff]  ;;  %v9306_v14 = vmul.f32 -1.442695, %v1016_v6 }
 0x6f3   : > { %v12933_v15 = vpop.eup %12932  ;;  %8157 = vst [vmem:[%s13858_s17 + $0x1a98] sm:$0xff] %v12931_v12  ;;  %12952 = vpow2.f32 %v9290_v4  ;;  %v1018_v12 = vld [vmem:[%s13832_s30 + $0x1b80] sm:$0xff]  ;;  %v9307_v17 = vmul.f32 -1.442695, %v1017_v9 }
 0x6f4   : > { %v12935_v18 = vpop.eup %12934  ;;  %8158 = vst [vmem:[%s13858_s17 + $0x1aa0] sm:$0xff] %v12933_v15  ;;  %12954 = vpow2.f32 %v9291_v7  ;;  %v1019_v15 = vld [vmem:[%s13832_s30 + $0x1b88] sm:$0xff]  ;;  %v9308_v20 = vmul.f32 -1.442695, %v1018_v12 }
 0x6f5   : > { %v12937_v21 = vpop.eup %12936  ;;  %8159 = vst [vmem:[%s13858_s17 + $0x1aa8] sm:$0xff] %v12935_v18  ;;  %12956 = vpow2.f32 %v9292_v10  ;;  %v1020_v18 = vld [vmem:[%s13832_s30 + $0x1b90] sm:$0xff] }
 0x6f6   : > { %v12939_v23 = vpop.eup %12938  ;;  %8160 = vst [vmem:[%s13858_s17 + $0x1ab0] sm:$0xff] %v12937_v21  ;;  %12958 = vpow2.f32 %v9293_v13  ;;  %v1021_v21 = vld [vmem:[%s13832_s30 + $0x1b98] sm:$0xff] }
 0x6f7   : > { %v12941_v25 = vpop.eup %12940  ;;  %8161 = vst [vmem:[%s13858_s17 + $0x1ab8] sm:$0xff] %v12939_v23  ;;  %12960 = vpow2.f32 %v9294_v16  ;;  %v9309_v23 = vmul.f32 -1.442695, %v1019_v15 }
 0x6f8   : > { %v12943_v27 = vpop.eup %12942  ;;  %8162 = vst [vmem:[%s13858_s17 + $0x1ac0] sm:$0xff] %v12941_v25  ;;  %12962 = vpow2.f32 %v9295_v19  ;;  %v9310_v25 = vmul.f32 -1.442695, %v1020_v18 }
 0x6f9   : > { %v12945_v28 = vpop.eup %12944  ;;  %8163 = vst [vmem:[%s13858_s17 + $0x1ac8] sm:$0xff] %v12943_v27  ;;  %12964 = vpow2.f32 %v9296_v22  ;;  %v9311_v27 = vmul.f32 -1.442695, %v1021_v21 }
 0x6fa   : > { %v12947_v29 = vpop.eup %12946  ;;  %v5092_v30 = vadd.f32 1.0, %v12945_v28  ;;  %12966 = vpow2.f32 %v9297_v24 }
 0x6fb   : > { %v12949_v31 = vpop.eup %12948  ;;  %v5093_v32 = vadd.f32 1.0, %v12947_v29  ;;  %12968 = vpow2.f32 %v9298_v26 }
 0x6fc   : > { %v12951_v33 = vpop.eup %12950  ;;  %12970 = vrcp.f32 %v5092_v30  ;;  %v5094_v34 = vadd.f32 1.0, %v12949_v31 }
 0x6fd   : > { %v12953_v35 = vpop.eup %12952  ;;  %12972 = vrcp.f32 %v5093_v32  ;;  %v5095_v36 = vadd.f32 1.0, %v12951_v33 }
 0x6fe   : > { %v12955_v37 = vpop.eup %12954  ;;  %12974 = vrcp.f32 %v5094_v34  ;;  %v5096_v38 = vadd.f32 1.0, %v12953_v35 }
 0x6ff   : > { %v12957_v39 = vpop.eup %12956  ;;  %12976 = vrcp.f32 %v5095_v36  ;;  %v5097_v40 = vadd.f32 1.0, %v12955_v37 }
 0x700   : > { %v12959_v41 = vpop.eup %12958  ;;  %12978 = vrcp.f32 %v5096_v38  ;;  %v5098_v42 = vadd.f32 1.0, %v12957_v39 }
 0x701   : > { %v12961_v43 = vpop.eup %12960  ;;  %12980 = vrcp.f32 %v5097_v40  ;;  %v5099_v44 = vadd.f32 1.0, %v12959_v41 }
 0x702   : > { %v12963_v45 = vpop.eup %12962  ;;  %12982 = vrcp.f32 %v5098_v42  ;;  %v5100_v46 = vadd.f32 1.0, %v12961_v43 }
 0x703   : > { %v12965_v48 = vpop.eup %12964  ;;  %12984 = vrcp.f32 %v5099_v44  ;;  %v5101_v49 = vadd.f32 1.0, %v12963_v45 }
 0x704   : > { %v12967_v51 = vpop.eup %12966  ;;  %12986 = vrcp.f32 %v5100_v46  ;;  %v5102_v52 = vadd.f32 1.0, %v12965_v48  ;;  %v1022_v48 = vld [vmem:[%s13832_s30 + $0x1ba0] sm:$0xff] }
 0x705   : > { %v12969_v54 = vpop.eup %12968  ;;  %12988 = vrcp.f32 %v5101_v49  ;;  %v5103_v55 = vadd.f32 1.0, %v12967_v51  ;;  %v1023_v51 = vld [vmem:[%s13832_s30 + $0x1ba8] sm:$0xff]  ;;  %v9312_v57 = vmul.f32 -1.442695, %v1022_v48 }
 0x706   : > { %v12971_v58 = vpop.eup %12970  ;;  %12990 = vrcp.f32 %v5102_v52  ;;  %v5104_v59 = vadd.f32 1.0, %v12969_v54  ;;  %v1024_v54 = vld [vmem:[%s13832_s30 + $0x1bb0] sm:$0xff]  ;;  %v9313_v61 = vmul.f32 -1.442695, %v1023_v51 }
 0x707   : > { %v12973_v62 = vpop.eup %12972  ;;  %8164 = vst [vmem:[%s13858_s17 + $0x1ad0] sm:$0xff] %v12971_v58  ;;  %12992 = vrcp.f32 %v5103_v55  ;;  %v1025_v58 = vld [vmem:[%s13832_s30 + $0x1bb8] sm:$0xff]  ;;  %v9314_v0 = vmul.f32 -1.442695, %v1024_v54 }
 0x708   : > { %v12975_v1 = vpop.eup %12974  ;;  %8165 = vst [vmem:[%s13858_s17 + $0x1ad8] sm:$0xff] %v12973_v62  ;;  %12994 = vrcp.f32 %v5104_v59  ;;  %v1026_v62 = vld [vmem:[%s13832_s30 + $0x1bc0] sm:$0xff]  ;;  %v9315_v3 = vmul.f32 -1.442695, %v1025_v58 }
 0x709   : > { %v12977_v4 = vpop.eup %12976  ;;  %8166 = vst [vmem:[%s13858_s17 + $0x1ae0] sm:$0xff] %v12975_v1  ;;  %12996 = vpow2.f32 %v9299_v56  ;;  %v1027_v1 = vld [vmem:[%s13832_s30 + $0x1bc8] sm:$0xff]  ;;  %v9316_v6 = vmul.f32 -1.442695, %v1026_v62 }
 0x70a   : > { %v12979_v7 = vpop.eup %12978  ;;  %8167 = vst [vmem:[%s13858_s17 + $0x1ae8] sm:$0xff] %v12977_v4  ;;  %12998 = vpow2.f32 %v9300_v60  ;;  %v1028_v4 = vld [vmem:[%s13832_s30 + $0x1bd0] sm:$0xff]  ;;  %v9317_v9 = vmul.f32 -1.442695, %v1027_v1 }
 0x70b   : > { %v12981_v10 = vpop.eup %12980  ;;  %8168 = vst [vmem:[%s13858_s17 + $0x1af0] sm:$0xff] %v12979_v7  ;;  %13000 = vpow2.f32 %v9301_v63  ;;  %v1029_v7 = vld [vmem:[%s13832_s30 + $0x1bd8] sm:$0xff]  ;;  %v9318_v12 = vmul.f32 -1.442695, %v1028_v4 }
 0x70c   : > { %v12983_v13 = vpop.eup %12982  ;;  %8169 = vst [vmem:[%s13858_s17 + $0x1af8] sm:$0xff] %v12981_v10  ;;  %13002 = vpow2.f32 %v9302_v2  ;;  %v1030_v10 = vld [vmem:[%s13832_s30 + $0x1be0] sm:$0xff]  ;;  %v9319_v15 = vmul.f32 -1.442695, %v1029_v7 }
 0x70d   : > { %v12985_v16 = vpop.eup %12984  ;;  %8170 = vst [vmem:[%s13858_s17 + $0x1b00] sm:$0xff] %v12983_v13  ;;  %13004 = vpow2.f32 %v9303_v5  ;;  %v1031_v13 = vld [vmem:[%s13832_s30 + $0x1be8] sm:$0xff]  ;;  %v9320_v18 = vmul.f32 -1.442695, %v1030_v10 }
 0x70e   : > { %v12987_v19 = vpop.eup %12986  ;;  %8171 = vst [vmem:[%s13858_s17 + $0x1b08] sm:$0xff] %v12985_v16  ;;  %13006 = vpow2.f32 %v9304_v8  ;;  %v1032_v16 = vld [vmem:[%s13832_s30 + $0x1bf0] sm:$0xff]  ;;  %v9321_v21 = vmul.f32 -1.442695, %v1031_v13 }
 0x70f   : > { %v12989_v22 = vpop.eup %12988  ;;  %8172 = vst [vmem:[%s13858_s17 + $0x1b10] sm:$0xff] %v12987_v19  ;;  %13008 = vpow2.f32 %v9305_v11  ;;  %v1033_v19 = vld [vmem:[%s13832_s30 + $0x1bf8] sm:$0xff] }
 0x710   : > { %v12991_v24 = vpop.eup %12990  ;;  %8173 = vst [vmem:[%s13858_s17 + $0x1b18] sm:$0xff] %v12989_v22  ;;  %13010 = vpow2.f32 %v9306_v14  ;;  %v1034_v22 = vld [vmem:[%s13832_s30 + $0x1c00] sm:$0xff] }
 0x711   : > { %v12993_v26 = vpop.eup %12992  ;;  %8174 = vst [vmem:[%s13858_s17 + $0x1b20] sm:$0xff] %v12991_v24  ;;  %13012 = vpow2.f32 %v9307_v17  ;;  %v9322_v24 = vmul.f32 -1.442695, %v1032_v16 }
 0x712   : > { %v12995_v28 = vpop.eup %12994  ;;  %8175 = vst [vmem:[%s13858_s17 + $0x1b28] sm:$0xff] %v12993_v26  ;;  %13014 = vpow2.f32 %v9308_v20  ;;  %v9323_v26 = vmul.f32 -1.442695, %v1033_v19 }
 0x713   : > { %v12997_v29 = vpop.eup %12996  ;;  %8176 = vst [vmem:[%s13858_s17 + $0x1b30] sm:$0xff] %v12995_v28  ;;  %13016 = vpow2.f32 %v9309_v23  ;;  %v9324_v28 = vmul.f32 -1.442695, %v1034_v22 }
 0x714   : > { %v12999_v30 = vpop.eup %12998  ;;  %v5105_v31 = vadd.f32 1.0, %v12997_v29  ;;  %13018 = vpow2.f32 %v9310_v25 }
 0x715   : > { %v13001_v32 = vpop.eup %13000  ;;  %v5106_v33 = vadd.f32 1.0, %v12999_v30  ;;  %13020 = vpow2.f32 %v9311_v27 }
 0x716   : > { %v13003_v34 = vpop.eup %13002  ;;  %13022 = vrcp.f32 %v5105_v31  ;;  %v5107_v35 = vadd.f32 1.0, %v13001_v32 }
 0x717   : > { %v13005_v36 = vpop.eup %13004  ;;  %13024 = vrcp.f32 %v5106_v33  ;;  %v5108_v37 = vadd.f32 1.0, %v13003_v34 }
 0x718   : > { %v13007_v38 = vpop.eup %13006  ;;  %13026 = vrcp.f32 %v5107_v35  ;;  %v5109_v39 = vadd.f32 1.0, %v13005_v36 }
 0x719   : > { %v13009_v40 = vpop.eup %13008  ;;  %13028 = vrcp.f32 %v5108_v37  ;;  %v5110_v41 = vadd.f32 1.0, %v13007_v38 }
 0x71a   : > { %v13011_v42 = vpop.eup %13010  ;;  %13030 = vrcp.f32 %v5109_v39  ;;  %v5111_v43 = vadd.f32 1.0, %v13009_v40 }
 0x71b   : > { %v13013_v44 = vpop.eup %13012  ;;  %13032 = vrcp.f32 %v5110_v41  ;;  %v5112_v45 = vadd.f32 1.0, %v13011_v42 }
 0x71c   : > { %v13015_v46 = vpop.eup %13014  ;;  %13034 = vrcp.f32 %v5111_v43  ;;  %v5113_v47 = vadd.f32 1.0, %v13013_v44 }
 0x71d   : > { %v13017_v49 = vpop.eup %13016  ;;  %13036 = vrcp.f32 %v5112_v45  ;;  %v5114_v50 = vadd.f32 1.0, %v13015_v46 }
 0x71e   : > { %v13019_v52 = vpop.eup %13018  ;;  %13038 = vrcp.f32 %v5113_v47  ;;  %v5115_v53 = vadd.f32 1.0, %v13017_v49  ;;  %v1035_v49 = vld [vmem:[%s13832_s30 + $0x1c08] sm:$0xff] }
 0x71f   : > { %v13021_v55 = vpop.eup %13020  ;;  %13040 = vrcp.f32 %v5114_v50  ;;  %v5116_v56 = vadd.f32 1.0, %v13019_v52  ;;  %v1036_v52 = vld [vmem:[%s13832_s30 + $0x1c10] sm:$0xff]  ;;  %v9325_v58 = vmul.f32 -1.442695, %v1035_v49 }
 0x720   : > { %v13023_v59 = vpop.eup %13022  ;;  %13042 = vrcp.f32 %v5115_v53  ;;  %v5117_v60 = vadd.f32 1.0, %v13021_v55  ;;  %v1037_v55 = vld [vmem:[%s13832_s30 + $0x1c18] sm:$0xff]  ;;  %v9326_v62 = vmul.f32 -1.442695, %v1036_v52 }
 0x721   : > { %v13025_v63 = vpop.eup %13024  ;;  %8177 = vst [vmem:[%s13858_s17 + $0x1b38] sm:$0xff] %v13023_v59  ;;  %13044 = vrcp.f32 %v5116_v56  ;;  %v1038_v59 = vld [vmem:[%s13832_s30 + $0x1c20] sm:$0xff]  ;;  %v9327_v1 = vmul.f32 -1.442695, %v1037_v55 }
 0x722   : > { %v13027_v2 = vpop.eup %13026  ;;  %8178 = vst [vmem:[%s13858_s17 + $0x1b40] sm:$0xff] %v13025_v63  ;;  %13046 = vrcp.f32 %v5117_v60  ;;  %v1039_v63 = vld [vmem:[%s13832_s30 + $0x1c28] sm:$0xff]  ;;  %v9328_v4 = vmul.f32 -1.442695, %v1038_v59 }
 0x723   : > { %v13029_v5 = vpop.eup %13028  ;;  %8179 = vst [vmem:[%s13858_s17 + $0x1b48] sm:$0xff] %v13027_v2  ;;  %13048 = vpow2.f32 %v9312_v57  ;;  %v1040_v2 = vld [vmem:[%s13832_s30 + $0x1c30] sm:$0xff]  ;;  %v9329_v7 = vmul.f32 -1.442695, %v1039_v63 }
 0x724   : > { %v13031_v8 = vpop.eup %13030  ;;  %8180 = vst [vmem:[%s13858_s17 + $0x1b50] sm:$0xff] %v13029_v5  ;;  %13050 = vpow2.f32 %v9313_v61  ;;  %v1041_v5 = vld [vmem:[%s13832_s30 + $0x1c38] sm:$0xff]  ;;  %v9330_v10 = vmul.f32 -1.442695, %v1040_v2 }
 0x725   : > { %v13033_v11 = vpop.eup %13032  ;;  %8181 = vst [vmem:[%s13858_s17 + $0x1b58] sm:$0xff] %v13031_v8  ;;  %13052 = vpow2.f32 %v9314_v0  ;;  %v1042_v8 = vld [vmem:[%s13832_s30 + $0x1c40] sm:$0xff]  ;;  %v9331_v13 = vmul.f32 -1.442695, %v1041_v5 }
 0x726   : > { %v13035_v14 = vpop.eup %13034  ;;  %8182 = vst [vmem:[%s13858_s17 + $0x1b60] sm:$0xff] %v13033_v11  ;;  %13054 = vpow2.f32 %v9315_v3  ;;  %v1043_v11 = vld [vmem:[%s13832_s30 + $0x1c48] sm:$0xff]  ;;  %v9332_v16 = vmul.f32 -1.442695, %v1042_v8 }
 0x727   : > { %v13037_v17 = vpop.eup %13036  ;;  %8183 = vst [vmem:[%s13858_s17 + $0x1b68] sm:$0xff] %v13035_v14  ;;  %13056 = vpow2.f32 %v9316_v6  ;;  %v1044_v14 = vld [vmem:[%s13832_s30 + $0x1c50] sm:$0xff]  ;;  %v9333_v19 = vmul.f32 -1.442695, %v1043_v11 }
 0x728   : > { %v13039_v20 = vpop.eup %13038  ;;  %8184 = vst [vmem:[%s13858_s17 + $0x1b70] sm:$0xff] %v13037_v17  ;;  %13058 = vpow2.f32 %v9317_v9  ;;  %v1045_v17 = vld [vmem:[%s13832_s30 + $0x1c58] sm:$0xff]  ;;  %v9334_v22 = vmul.f32 -1.442695, %v1044_v14 }
 0x729   : > { %v13041_v23 = vpop.eup %13040  ;;  %8185 = vst [vmem:[%s13858_s17 + $0x1b78] sm:$0xff] %v13039_v20  ;;  %13060 = vpow2.f32 %v9318_v12  ;;  %v1046_v20 = vld [vmem:[%s13832_s30 + $0x1c60] sm:$0xff] }
 0x72a   : > { %v13043_v25 = vpop.eup %13042  ;;  %8186 = vst [vmem:[%s13858_s17 + $0x1b80] sm:$0xff] %v13041_v23  ;;  %13062 = vpow2.f32 %v9319_v15  ;;  %v1047_v23 = vld [vmem:[%s13832_s30 + $0x1c68] sm:$0xff] }
 0x72b   : > { %v13045_v27 = vpop.eup %13044  ;;  %8187 = vst [vmem:[%s13858_s17 + $0x1b88] sm:$0xff] %v13043_v25  ;;  %13064 = vpow2.f32 %v9320_v18  ;;  %v9335_v25 = vmul.f32 -1.442695, %v1045_v17 }
 0x72c   : > { %v13047_v29 = vpop.eup %13046  ;;  %8188 = vst [vmem:[%s13858_s17 + $0x1b90] sm:$0xff] %v13045_v27  ;;  %13066 = vpow2.f32 %v9321_v21  ;;  %v9336_v27 = vmul.f32 -1.442695, %v1046_v20 }
 0x72d   : > { %v13049_v30 = vpop.eup %13048  ;;  %8189 = vst [vmem:[%s13858_s17 + $0x1b98] sm:$0xff] %v13047_v29  ;;  %13068 = vpow2.f32 %v9322_v24  ;;  %v9337_v29 = vmul.f32 -1.442695, %v1047_v23 }
 0x72e   : > { %v13051_v31 = vpop.eup %13050  ;;  %v5118_v32 = vadd.f32 1.0, %v13049_v30  ;;  %13070 = vpow2.f32 %v9323_v26 }
 0x72f   : > { %v13053_v33 = vpop.eup %13052  ;;  %v5119_v34 = vadd.f32 1.0, %v13051_v31  ;;  %13072 = vpow2.f32 %v9324_v28 }
 0x730   : > { %v13055_v35 = vpop.eup %13054  ;;  %13074 = vrcp.f32 %v5118_v32  ;;  %v5120_v36 = vadd.f32 1.0, %v13053_v33 }
 0x731   : > { %v13057_v37 = vpop.eup %13056  ;;  %13076 = vrcp.f32 %v5119_v34  ;;  %v5121_v38 = vadd.f32 1.0, %v13055_v35 }
 0x732   : > { %v13059_v39 = vpop.eup %13058  ;;  %13078 = vrcp.f32 %v5120_v36  ;;  %v5122_v40 = vadd.f32 1.0, %v13057_v37 }
 0x733   : > { %v13061_v41 = vpop.eup %13060  ;;  %13080 = vrcp.f32 %v5121_v38  ;;  %v5123_v42 = vadd.f32 1.0, %v13059_v39 }
 0x734   : > { %v13063_v43 = vpop.eup %13062  ;;  %13082 = vrcp.f32 %v5122_v40  ;;  %v5124_v44 = vadd.f32 1.0, %v13061_v41 }
 0x735   : > { %v13065_v45 = vpop.eup %13064  ;;  %13084 = vrcp.f32 %v5123_v42  ;;  %v5125_v46 = vadd.f32 1.0, %v13063_v43 }
 0x736   : > { %v13067_v47 = vpop.eup %13066  ;;  %13086 = vrcp.f32 %v5124_v44  ;;  %v5126_v48 = vadd.f32 1.0, %v13065_v45 }
 0x737   : > { %v13069_v50 = vpop.eup %13068  ;;  %13088 = vrcp.f32 %v5125_v46  ;;  %v5127_v51 = vadd.f32 1.0, %v13067_v47 }
 0x738   : > { %v13071_v53 = vpop.eup %13070  ;;  %13090 = vrcp.f32 %v5126_v48  ;;  %v5128_v54 = vadd.f32 1.0, %v13069_v50  ;;  %v1048_v50 = vld [vmem:[%s13832_s30 + $0x1c70] sm:$0xff] }
 0x739   : > { %v13073_v56 = vpop.eup %13072  ;;  %13092 = vrcp.f32 %v5127_v51  ;;  %v5129_v57 = vadd.f32 1.0, %v13071_v53  ;;  %v1049_v53 = vld [vmem:[%s13832_s30 + $0x1c78] sm:$0xff]  ;;  %v9338_v59 = vmul.f32 -1.442695, %v1048_v50 }
 0x73a   : > { %v13075_v60 = vpop.eup %13074  ;;  %13094 = vrcp.f32 %v5128_v54  ;;  %v5130_v61 = vadd.f32 1.0, %v13073_v56  ;;  %v1050_v56 = vld [vmem:[%s13832_s30 + $0x1c80] sm:$0xff]  ;;  %v9339_v63 = vmul.f32 -1.442695, %v1049_v53 }
 0x73b   : > { %v13077_v0 = vpop.eup %13076  ;;  %8190 = vst [vmem:[%s13858_s17 + $0x1ba0] sm:$0xff] %v13075_v60  ;;  %13096 = vrcp.f32 %v5129_v57  ;;  %v1051_v60 = vld [vmem:[%s13832_s30 + $0x1c88] sm:$0xff]  ;;  %v9340_v2 = vmul.f32 -1.442695, %v1050_v56 }
 0x73c   : > { %v13079_v3 = vpop.eup %13078  ;;  %8191 = vst [vmem:[%s13858_s17 + $0x1ba8] sm:$0xff] %v13077_v0  ;;  %13098 = vrcp.f32 %v5130_v61  ;;  %v1052_v0 = vld [vmem:[%s13832_s30 + $0x1c90] sm:$0xff]  ;;  %v9341_v5 = vmul.f32 -1.442695, %v1051_v60 }
 0x73d   : > { %v13081_v6 = vpop.eup %13080  ;;  %8192 = vst [vmem:[%s13858_s17 + $0x1bb0] sm:$0xff] %v13079_v3  ;;  %13100 = vpow2.f32 %v9325_v58  ;;  %v1053_v3 = vld [vmem:[%s13832_s30 + $0x1c98] sm:$0xff]  ;;  %v9342_v8 = vmul.f32 -1.442695, %v1052_v0 }
 0x73e   : > { %v13083_v9 = vpop.eup %13082  ;;  %8193 = vst [vmem:[%s13858_s17 + $0x1bb8] sm:$0xff] %v13081_v6  ;;  %13102 = vpow2.f32 %v9326_v62  ;;  %v1054_v6 = vld [vmem:[%s13832_s30 + $0x1ca0] sm:$0xff]  ;;  %v9343_v11 = vmul.f32 -1.442695, %v1053_v3 }
 0x73f   : > { %v13085_v12 = vpop.eup %13084  ;;  %8194 = vst [vmem:[%s13858_s17 + $0x1bc0] sm:$0xff] %v13083_v9  ;;  %13104 = vpow2.f32 %v9327_v1  ;;  %v1055_v9 = vld [vmem:[%s13832_s30 + $0x1ca8] sm:$0xff]  ;;  %v9344_v14 = vmul.f32 -1.442695, %v1054_v6 }
 0x740   : > { %v13087_v15 = vpop.eup %13086  ;;  %8195 = vst [vmem:[%s13858_s17 + $0x1bc8] sm:$0xff] %v13085_v12  ;;  %13106 = vpow2.f32 %v9328_v4  ;;  %v1056_v12 = vld [vmem:[%s13832_s30 + $0x1cb0] sm:$0xff]  ;;  %v9345_v17 = vmul.f32 -1.442695, %v1055_v9 }
 0x741   : > { %v13089_v18 = vpop.eup %13088  ;;  %8196 = vst [vmem:[%s13858_s17 + $0x1bd0] sm:$0xff] %v13087_v15  ;;  %13108 = vpow2.f32 %v9329_v7  ;;  %v1057_v15 = vld [vmem:[%s13832_s30 + $0x1cb8] sm:$0xff]  ;;  %v9346_v20 = vmul.f32 -1.442695, %v1056_v12 }
 0x742   : > { %v13091_v21 = vpop.eup %13090  ;;  %8197 = vst [vmem:[%s13858_s17 + $0x1bd8] sm:$0xff] %v13089_v18  ;;  %13110 = vpow2.f32 %v9330_v10  ;;  %v1058_v18 = vld [vmem:[%s13832_s30 + $0x1cc0] sm:$0xff]  ;;  %v9347_v23 = vmul.f32 -1.442695, %v1057_v15 }
 0x743   : > { %v13093_v24 = vpop.eup %13092  ;;  %8198 = vst [vmem:[%s13858_s17 + $0x1be0] sm:$0xff] %v13091_v21  ;;  %13112 = vpow2.f32 %v9331_v13  ;;  %v1059_v21 = vld [vmem:[%s13832_s30 + $0x1cc8] sm:$0xff] }
 0x744   : > { %v13095_v26 = vpop.eup %13094  ;;  %8199 = vst [vmem:[%s13858_s17 + $0x1be8] sm:$0xff] %v13093_v24  ;;  %13114 = vpow2.f32 %v9332_v16  ;;  %v1060_v24 = vld [vmem:[%s13832_s30 + $0x1cd0] sm:$0xff] }
 0x745   : > { %v13097_v28 = vpop.eup %13096  ;;  %8200 = vst [vmem:[%s13858_s17 + $0x1bf0] sm:$0xff] %v13095_v26  ;;  %13116 = vpow2.f32 %v9333_v19  ;;  %v9348_v26 = vmul.f32 -1.442695, %v1058_v18 }
 0x746   : > { %v13099_v30 = vpop.eup %13098  ;;  %8201 = vst [vmem:[%s13858_s17 + $0x1bf8] sm:$0xff] %v13097_v28  ;;  %13118 = vpow2.f32 %v9334_v22  ;;  %v9349_v28 = vmul.f32 -1.442695, %v1059_v21 }
 0x747   : > { %v13101_v31 = vpop.eup %13100  ;;  %8202 = vst [vmem:[%s13858_s17 + $0x1c00] sm:$0xff] %v13099_v30  ;;  %13120 = vpow2.f32 %v9335_v25  ;;  %v9350_v30 = vmul.f32 -1.442695, %v1060_v24 }
 0x748   : > { %v13103_v32 = vpop.eup %13102  ;;  %v5131_v33 = vadd.f32 1.0, %v13101_v31  ;;  %13122 = vpow2.f32 %v9336_v27 }
 0x749   : > { %v13105_v34 = vpop.eup %13104  ;;  %v5132_v35 = vadd.f32 1.0, %v13103_v32  ;;  %13124 = vpow2.f32 %v9337_v29 }
 0x74a   : > { %v13107_v36 = vpop.eup %13106  ;;  %13126 = vrcp.f32 %v5131_v33  ;;  %v5133_v37 = vadd.f32 1.0, %v13105_v34 }
 0x74b   : > { %v13109_v38 = vpop.eup %13108  ;;  %13128 = vrcp.f32 %v5132_v35  ;;  %v5134_v39 = vadd.f32 1.0, %v13107_v36 }
 0x74c   : > { %v13111_v40 = vpop.eup %13110  ;;  %13130 = vrcp.f32 %v5133_v37  ;;  %v5135_v41 = vadd.f32 1.0, %v13109_v38 }
 0x74d   : > { %v13113_v42 = vpop.eup %13112  ;;  %13132 = vrcp.f32 %v5134_v39  ;;  %v5136_v43 = vadd.f32 1.0, %v13111_v40 }
 0x74e   : > { %v13115_v44 = vpop.eup %13114  ;;  %13134 = vrcp.f32 %v5135_v41  ;;  %v5137_v45 = vadd.f32 1.0, %v13113_v42 }
 0x74f   : > { %v13117_v46 = vpop.eup %13116  ;;  %13136 = vrcp.f32 %v5136_v43  ;;  %v5138_v47 = vadd.f32 1.0, %v13115_v44 }
 0x750   : > { %v13119_v48 = vpop.eup %13118  ;;  %13138 = vrcp.f32 %v5137_v45  ;;  %v5139_v49 = vadd.f32 1.0, %v13117_v46 }
 0x751   : > { %v13121_v51 = vpop.eup %13120  ;;  %13140 = vrcp.f32 %v5138_v47  ;;  %v5140_v52 = vadd.f32 1.0, %v13119_v48 }
 0x752   : > { %v13123_v54 = vpop.eup %13122  ;;  %13142 = vrcp.f32 %v5139_v49  ;;  %v5141_v55 = vadd.f32 1.0, %v13121_v51  ;;  %v1061_v51 = vld [vmem:[%s13832_s30 + $0x1cd8] sm:$0xff] }
 0x753   : > { %v13125_v57 = vpop.eup %13124  ;;  %13144 = vrcp.f32 %v5140_v52  ;;  %v5142_v58 = vadd.f32 1.0, %v13123_v54  ;;  %v1062_v54 = vld [vmem:[%s13832_s30 + $0x1ce0] sm:$0xff]  ;;  %v9351_v60 = vmul.f32 -1.442695, %v1061_v51 }
 0x754   : > { %v13127_v61 = vpop.eup %13126  ;;  %13146 = vrcp.f32 %v5141_v55  ;;  %v5143_v62 = vadd.f32 1.0, %v13125_v57  ;;  %v1063_v57 = vld [vmem:[%s13832_s30 + $0x1ce8] sm:$0xff]  ;;  %v9352_v0 = vmul.f32 -1.442695, %v1062_v54 }
 0x755   : > { %v13129_v1 = vpop.eup %13128  ;;  %8203 = vst [vmem:[%s13858_s17 + $0x1c08] sm:$0xff] %v13127_v61  ;;  %13148 = vrcp.f32 %v5142_v58  ;;  %v1064_v61 = vld [vmem:[%s13832_s30 + $0x1cf0] sm:$0xff]  ;;  %v9353_v3 = vmul.f32 -1.442695, %v1063_v57 }
 0x756   : > { %v13131_v4 = vpop.eup %13130  ;;  %8204 = vst [vmem:[%s13858_s17 + $0x1c10] sm:$0xff] %v13129_v1  ;;  %13150 = vrcp.f32 %v5143_v62  ;;  %v1065_v1 = vld [vmem:[%s13832_s30 + $0x1cf8] sm:$0xff]  ;;  %v9354_v6 = vmul.f32 -1.442695, %v1064_v61 }
 0x757   : > { %v13133_v7 = vpop.eup %13132  ;;  %8205 = vst [vmem:[%s13858_s17 + $0x1c18] sm:$0xff] %v13131_v4  ;;  %13152 = vpow2.f32 %v9338_v59  ;;  %v1066_v4 = vld [vmem:[%s13832_s30 + $0x1d00] sm:$0xff]  ;;  %v9355_v9 = vmul.f32 -1.442695, %v1065_v1 }
 0x758   : > { %v13135_v10 = vpop.eup %13134  ;;  %8206 = vst [vmem:[%s13858_s17 + $0x1c20] sm:$0xff] %v13133_v7  ;;  %13154 = vpow2.f32 %v9339_v63  ;;  %v1067_v7 = vld [vmem:[%s13832_s30 + $0x1d08] sm:$0xff]  ;;  %v9356_v12 = vmul.f32 -1.442695, %v1066_v4 }
 0x759   : > { %v13137_v13 = vpop.eup %13136  ;;  %8207 = vst [vmem:[%s13858_s17 + $0x1c28] sm:$0xff] %v13135_v10  ;;  %13156 = vpow2.f32 %v9340_v2  ;;  %v1068_v10 = vld [vmem:[%s13832_s30 + $0x1d10] sm:$0xff]  ;;  %v9357_v15 = vmul.f32 -1.442695, %v1067_v7 }
 0x75a   : > { %v13139_v16 = vpop.eup %13138  ;;  %8208 = vst [vmem:[%s13858_s17 + $0x1c30] sm:$0xff] %v13137_v13  ;;  %13158 = vpow2.f32 %v9341_v5  ;;  %v1069_v13 = vld [vmem:[%s13832_s30 + $0x1d18] sm:$0xff]  ;;  %v9358_v18 = vmul.f32 -1.442695, %v1068_v10 }
 0x75b   : > { %v13141_v19 = vpop.eup %13140  ;;  %8209 = vst [vmem:[%s13858_s17 + $0x1c38] sm:$0xff] %v13139_v16  ;;  %13160 = vpow2.f32 %v9342_v8  ;;  %v1070_v16 = vld [vmem:[%s13832_s30 + $0x1d20] sm:$0xff]  ;;  %v9359_v21 = vmul.f32 -1.442695, %v1069_v13 }
 0x75c   : > { %v13143_v22 = vpop.eup %13142  ;;  %8210 = vst [vmem:[%s13858_s17 + $0x1c40] sm:$0xff] %v13141_v19  ;;  %13162 = vpow2.f32 %v9343_v11  ;;  %v1071_v19 = vld [vmem:[%s13832_s30 + $0x1d28] sm:$0xff]  ;;  %v9360_v24 = vmul.f32 -1.442695, %v1070_v16 }
 0x75d   : > { %v13145_v25 = vpop.eup %13144  ;;  %8211 = vst [vmem:[%s13858_s17 + $0x1c48] sm:$0xff] %v13143_v22  ;;  %13164 = vpow2.f32 %v9344_v14  ;;  %v1072_v22 = vld [vmem:[%s13832_s30 + $0x1d30] sm:$0xff] }
 0x75e   : > { %v13147_v27 = vpop.eup %13146  ;;  %8212 = vst [vmem:[%s13858_s17 + $0x1c50] sm:$0xff] %v13145_v25  ;;  %13166 = vpow2.f32 %v9345_v17  ;;  %v1073_v25 = vld [vmem:[%s13832_s30 + $0x1d38] sm:$0xff] }
 0x75f   : > { %v13149_v29 = vpop.eup %13148  ;;  %8213 = vst [vmem:[%s13858_s17 + $0x1c58] sm:$0xff] %v13147_v27  ;;  %13168 = vpow2.f32 %v9346_v20  ;;  %v9361_v27 = vmul.f32 -1.442695, %v1071_v19 }
 0x760   : > { %v13151_v31 = vpop.eup %13150  ;;  %8214 = vst [vmem:[%s13858_s17 + $0x1c60] sm:$0xff] %v13149_v29  ;;  %13170 = vpow2.f32 %v9347_v23  ;;  %v9362_v29 = vmul.f32 -1.442695, %v1072_v22 }
 0x761   : > { %v13153_v32 = vpop.eup %13152  ;;  %8215 = vst [vmem:[%s13858_s17 + $0x1c68] sm:$0xff] %v13151_v31  ;;  %13172 = vpow2.f32 %v9348_v26  ;;  %v9363_v31 = vmul.f32 -1.442695, %v1073_v25 }
 0x762   : > { %v13155_v33 = vpop.eup %13154  ;;  %v5144_v34 = vadd.f32 1.0, %v13153_v32  ;;  %13174 = vpow2.f32 %v9349_v28 }
 0x763   : > { %v13157_v35 = vpop.eup %13156  ;;  %v5145_v36 = vadd.f32 1.0, %v13155_v33  ;;  %13176 = vpow2.f32 %v9350_v30 }
 0x764   : > { %v13159_v37 = vpop.eup %13158  ;;  %13178 = vrcp.f32 %v5144_v34  ;;  %v5146_v38 = vadd.f32 1.0, %v13157_v35 }
 0x765   : > { %v13161_v39 = vpop.eup %13160  ;;  %13180 = vrcp.f32 %v5145_v36  ;;  %v5147_v40 = vadd.f32 1.0, %v13159_v37 }
 0x766   : > { %v13163_v41 = vpop.eup %13162  ;;  %13182 = vrcp.f32 %v5146_v38  ;;  %v5148_v42 = vadd.f32 1.0, %v13161_v39 }
 0x767   : > { %v13165_v43 = vpop.eup %13164  ;;  %13184 = vrcp.f32 %v5147_v40  ;;  %v5149_v44 = vadd.f32 1.0, %v13163_v41 }
 0x768   : > { %v13167_v45 = vpop.eup %13166  ;;  %13186 = vrcp.f32 %v5148_v42  ;;  %v5150_v46 = vadd.f32 1.0, %v13165_v43 }
 0x769   : > { %v13169_v47 = vpop.eup %13168  ;;  %13188 = vrcp.f32 %v5149_v44  ;;  %v5151_v48 = vadd.f32 1.0, %v13167_v45 }
 0x76a   : > { %v13171_v49 = vpop.eup %13170  ;;  %13190 = vrcp.f32 %v5150_v46  ;;  %v5152_v50 = vadd.f32 1.0, %v13169_v47 }
 0x76b   : > { %v13173_v52 = vpop.eup %13172  ;;  %13192 = vrcp.f32 %v5151_v48  ;;  %v5153_v53 = vadd.f32 1.0, %v13171_v49 }
 0x76c   : > { %v13175_v55 = vpop.eup %13174  ;;  %13194 = vrcp.f32 %v5152_v50  ;;  %v5154_v56 = vadd.f32 1.0, %v13173_v52  ;;  %v1074_v52 = vld [vmem:[%s13832_s30 + $0x1d40] sm:$0xff] }
 0x76d   : > { %v13177_v58 = vpop.eup %13176  ;;  %13196 = vrcp.f32 %v5153_v53  ;;  %v5155_v59 = vadd.f32 1.0, %v13175_v55  ;;  %v1075_v55 = vld [vmem:[%s13832_s30 + $0x1d48] sm:$0xff]  ;;  %v9364_v61 = vmul.f32 -1.442695, %v1074_v52 }
 0x76e   : > { %v13179_v62 = vpop.eup %13178  ;;  %13198 = vrcp.f32 %v5154_v56  ;;  %v5156_v63 = vadd.f32 1.0, %v13177_v58  ;;  %v1076_v58 = vld [vmem:[%s13832_s30 + $0x1d50] sm:$0xff]  ;;  %v9365_v1 = vmul.f32 -1.442695, %v1075_v55 }
 0x76f   : > { %v13181_v2 = vpop.eup %13180  ;;  %8216 = vst [vmem:[%s13858_s17 + $0x1c70] sm:$0xff] %v13179_v62  ;;  %13200 = vrcp.f32 %v5155_v59  ;;  %v1077_v62 = vld [vmem:[%s13832_s30 + $0x1d58] sm:$0xff]  ;;  %v9366_v4 = vmul.f32 -1.442695, %v1076_v58 }
 0x770   : > { %v13183_v5 = vpop.eup %13182  ;;  %8217 = vst [vmem:[%s13858_s17 + $0x1c78] sm:$0xff] %v13181_v2  ;;  %13202 = vrcp.f32 %v5156_v63  ;;  %v1078_v2 = vld [vmem:[%s13832_s30 + $0x1d60] sm:$0xff]  ;;  %v9367_v7 = vmul.f32 -1.442695, %v1077_v62 }
 0x771   : > { %v13185_v8 = vpop.eup %13184  ;;  %8218 = vst [vmem:[%s13858_s17 + $0x1c80] sm:$0xff] %v13183_v5  ;;  %13204 = vpow2.f32 %v9351_v60  ;;  %v1079_v5 = vld [vmem:[%s13832_s30 + $0x1d68] sm:$0xff]  ;;  %v9368_v10 = vmul.f32 -1.442695, %v1078_v2 }
 0x772   : > { %v13187_v11 = vpop.eup %13186  ;;  %8219 = vst [vmem:[%s13858_s17 + $0x1c88] sm:$0xff] %v13185_v8  ;;  %13206 = vpow2.f32 %v9352_v0  ;;  %v1080_v8 = vld [vmem:[%s13832_s30 + $0x1d70] sm:$0xff]  ;;  %v9369_v13 = vmul.f32 -1.442695, %v1079_v5 }
 0x773   : > { %v13189_v14 = vpop.eup %13188  ;;  %8220 = vst [vmem:[%s13858_s17 + $0x1c90] sm:$0xff] %v13187_v11  ;;  %13208 = vpow2.f32 %v9353_v3  ;;  %v1081_v11 = vld [vmem:[%s13832_s30 + $0x1d78] sm:$0xff]  ;;  %v9370_v16 = vmul.f32 -1.442695, %v1080_v8 }
 0x774   : > { %v13191_v17 = vpop.eup %13190  ;;  %8221 = vst [vmem:[%s13858_s17 + $0x1c98] sm:$0xff] %v13189_v14  ;;  %13210 = vpow2.f32 %v9354_v6  ;;  %v1082_v14 = vld [vmem:[%s13832_s30 + $0x1d80] sm:$0xff]  ;;  %v9371_v19 = vmul.f32 -1.442695, %v1081_v11 }
 0x775   : > { %v13193_v20 = vpop.eup %13192  ;;  %8222 = vst [vmem:[%s13858_s17 + $0x1ca0] sm:$0xff] %v13191_v17  ;;  %13212 = vpow2.f32 %v9355_v9  ;;  %v1083_v17 = vld [vmem:[%s13832_s30 + $0x1d88] sm:$0xff]  ;;  %v9372_v22 = vmul.f32 -1.442695, %v1082_v14 }
 0x776   : > { %v13195_v23 = vpop.eup %13194  ;;  %8223 = vst [vmem:[%s13858_s17 + $0x1ca8] sm:$0xff] %v13193_v20  ;;  %13214 = vpow2.f32 %v9356_v12  ;;  %v1084_v20 = vld [vmem:[%s13832_s30 + $0x1d90] sm:$0xff]  ;;  %v9373_v25 = vmul.f32 -1.442695, %v1083_v17 }
 0x777   : > { %v13197_v26 = vpop.eup %13196  ;;  %8224 = vst [vmem:[%s13858_s17 + $0x1cb0] sm:$0xff] %v13195_v23  ;;  %13216 = vpow2.f32 %v9357_v15  ;;  %v1085_v23 = vld [vmem:[%s13832_s30 + $0x1d98] sm:$0xff] }
 0x778   : > { %v13199_v28 = vpop.eup %13198  ;;  %8225 = vst [vmem:[%s13858_s17 + $0x1cb8] sm:$0xff] %v13197_v26  ;;  %13218 = vpow2.f32 %v9358_v18  ;;  %v1086_v26 = vld [vmem:[%s13832_s30 + $0x1da0] sm:$0xff] }
 0x779   : > { %v13201_v30 = vpop.eup %13200  ;;  %8226 = vst [vmem:[%s13858_s17 + $0x1cc0] sm:$0xff] %v13199_v28  ;;  %13220 = vpow2.f32 %v9359_v21  ;;  %v9374_v28 = vmul.f32 -1.442695, %v1084_v20 }
 0x77a   : > { %v13203_v32 = vpop.eup %13202  ;;  %8227 = vst [vmem:[%s13858_s17 + $0x1cc8] sm:$0xff] %v13201_v30  ;;  %13222 = vpow2.f32 %v9360_v24  ;;  %v9375_v30 = vmul.f32 -1.442695, %v1085_v23 }
 0x77b   : > { %v13205_v33 = vpop.eup %13204  ;;  %8228 = vst [vmem:[%s13858_s17 + $0x1cd0] sm:$0xff] %v13203_v32  ;;  %13224 = vpow2.f32 %v9361_v27  ;;  %v9376_v32 = vmul.f32 -1.442695, %v1086_v26 }
 0x77c   : > { %v13207_v34 = vpop.eup %13206  ;;  %v5157_v35 = vadd.f32 1.0, %v13205_v33  ;;  %13226 = vpow2.f32 %v9362_v29 }
 0x77d   : > { %v13209_v36 = vpop.eup %13208  ;;  %v5158_v37 = vadd.f32 1.0, %v13207_v34  ;;  %13228 = vpow2.f32 %v9363_v31 }
 0x77e   : > { %v13211_v38 = vpop.eup %13210  ;;  %13230 = vrcp.f32 %v5157_v35  ;;  %v5159_v39 = vadd.f32 1.0, %v13209_v36 }
 0x77f   : > { %v13213_v40 = vpop.eup %13212  ;;  %13232 = vrcp.f32 %v5158_v37  ;;  %v5160_v41 = vadd.f32 1.0, %v13211_v38 }
 0x780   : > { %v13215_v42 = vpop.eup %13214  ;;  %13234 = vrcp.f32 %v5159_v39  ;;  %v5161_v43 = vadd.f32 1.0, %v13213_v40 }
 0x781   : > { %v13217_v44 = vpop.eup %13216  ;;  %13236 = vrcp.f32 %v5160_v41  ;;  %v5162_v45 = vadd.f32 1.0, %v13215_v42 }
 0x782   : > { %v13219_v46 = vpop.eup %13218  ;;  %13238 = vrcp.f32 %v5161_v43  ;;  %v5163_v47 = vadd.f32 1.0, %v13217_v44 }
 0x783   : > { %v13221_v48 = vpop.eup %13220  ;;  %13240 = vrcp.f32 %v5162_v45  ;;  %v5164_v49 = vadd.f32 1.0, %v13219_v46 }
 0x784   : > { %v13223_v50 = vpop.eup %13222  ;;  %13242 = vrcp.f32 %v5163_v47  ;;  %v5165_v51 = vadd.f32 1.0, %v13221_v48 }
 0x785   : > { %v13225_v53 = vpop.eup %13224  ;;  %13244 = vrcp.f32 %v5164_v49  ;;  %v5166_v54 = vadd.f32 1.0, %v13223_v50 }
 0x786   : > { %v13227_v56 = vpop.eup %13226  ;;  %13246 = vrcp.f32 %v5165_v51  ;;  %v5167_v57 = vadd.f32 1.0, %v13225_v53  ;;  %v1087_v53 = vld [vmem:[%s13832_s30 + $0x1da8] sm:$0xff] }
 0x787   : > { %v13229_v59 = vpop.eup %13228  ;;  %13248 = vrcp.f32 %v5166_v54  ;;  %v5168_v60 = vadd.f32 1.0, %v13227_v56  ;;  %v1088_v56 = vld [vmem:[%s13832_s30 + $0x1db0] sm:$0xff]  ;;  %v9377_v62 = vmul.f32 -1.442695, %v1087_v53 }
 0x788   : > { %v13231_v63 = vpop.eup %13230  ;;  %13250 = vrcp.f32 %v5167_v57  ;;  %v5169_v0 = vadd.f32 1.0, %v13229_v59  ;;  %v1089_v59 = vld [vmem:[%s13832_s30 + $0x1db8] sm:$0xff]  ;;  %v9378_v2 = vmul.f32 -1.442695, %v1088_v56 }
 0x789   : > { %v13233_v3 = vpop.eup %13232  ;;  %8229 = vst [vmem:[%s13858_s17 + $0x1cd8] sm:$0xff] %v13231_v63  ;;  %13252 = vrcp.f32 %v5168_v60  ;;  %v1090_v63 = vld [vmem:[%s13832_s30 + $0x1dc0] sm:$0xff]  ;;  %v9379_v5 = vmul.f32 -1.442695, %v1089_v59 }
 0x78a   : > { %v13235_v6 = vpop.eup %13234  ;;  %8230 = vst [vmem:[%s13858_s17 + $0x1ce0] sm:$0xff] %v13233_v3  ;;  %13254 = vrcp.f32 %v5169_v0  ;;  %v1091_v3 = vld [vmem:[%s13832_s30 + $0x1dc8] sm:$0xff]  ;;  %v9380_v8 = vmul.f32 -1.442695, %v1090_v63 }
 0x78b   : > { %v13237_v9 = vpop.eup %13236  ;;  %8231 = vst [vmem:[%s13858_s17 + $0x1ce8] sm:$0xff] %v13235_v6  ;;  %13256 = vpow2.f32 %v9364_v61  ;;  %v1092_v6 = vld [vmem:[%s13832_s30 + $0x1dd0] sm:$0xff]  ;;  %v9381_v11 = vmul.f32 -1.442695, %v1091_v3 }
 0x78c   : > { %v13239_v12 = vpop.eup %13238  ;;  %8232 = vst [vmem:[%s13858_s17 + $0x1cf0] sm:$0xff] %v13237_v9  ;;  %13258 = vpow2.f32 %v9365_v1  ;;  %v1093_v9 = vld [vmem:[%s13832_s30 + $0x1dd8] sm:$0xff]  ;;  %v9382_v14 = vmul.f32 -1.442695, %v1092_v6 }
 0x78d   : > { %v13241_v15 = vpop.eup %13240  ;;  %8233 = vst [vmem:[%s13858_s17 + $0x1cf8] sm:$0xff] %v13239_v12  ;;  %13260 = vpow2.f32 %v9366_v4  ;;  %v1094_v12 = vld [vmem:[%s13832_s30 + $0x1de0] sm:$0xff]  ;;  %v9383_v17 = vmul.f32 -1.442695, %v1093_v9 }
 0x78e   : > { %v13243_v18 = vpop.eup %13242  ;;  %8234 = vst [vmem:[%s13858_s17 + $0x1d00] sm:$0xff] %v13241_v15  ;;  %13262 = vpow2.f32 %v9367_v7  ;;  %v1095_v15 = vld [vmem:[%s13832_s30 + $0x1de8] sm:$0xff]  ;;  %v9384_v20 = vmul.f32 -1.442695, %v1094_v12 }
 0x78f   : > { %v13245_v21 = vpop.eup %13244  ;;  %8235 = vst [vmem:[%s13858_s17 + $0x1d08] sm:$0xff] %v13243_v18  ;;  %13264 = vpow2.f32 %v9368_v10  ;;  %v1096_v18 = vld [vmem:[%s13832_s30 + $0x1df0] sm:$0xff]  ;;  %v9385_v23 = vmul.f32 -1.442695, %v1095_v15 }
 0x790   : > { %v13247_v24 = vpop.eup %13246  ;;  %8236 = vst [vmem:[%s13858_s17 + $0x1d10] sm:$0xff] %v13245_v21  ;;  %13266 = vpow2.f32 %v9369_v13  ;;  %v1097_v21 = vld [vmem:[%s13832_s30 + $0x1df8] sm:$0xff]  ;;  %v9386_v26 = vmul.f32 -1.442695, %v1096_v18 }
 0x791   : > { %v13249_v27 = vpop.eup %13248  ;;  %8237 = vst [vmem:[%s13858_s17 + $0x1d18] sm:$0xff] %v13247_v24  ;;  %13268 = vpow2.f32 %v9370_v16  ;;  %v1098_v24 = vld [vmem:[%s13832_s30 + $0x1e00] sm:$0xff] }
 0x792   : > { %v13251_v29 = vpop.eup %13250  ;;  %8238 = vst [vmem:[%s13858_s17 + $0x1d20] sm:$0xff] %v13249_v27  ;;  %13270 = vpow2.f32 %v9371_v19  ;;  %v1099_v27 = vld [vmem:[%s13832_s30 + $0x1e08] sm:$0xff] }
 0x793   : > { %v13253_v31 = vpop.eup %13252  ;;  %8239 = vst [vmem:[%s13858_s17 + $0x1d28] sm:$0xff] %v13251_v29  ;;  %13272 = vpow2.f32 %v9372_v22  ;;  %v9387_v29 = vmul.f32 -1.442695, %v1097_v21 }
 0x794   : > { %v13255_v33 = vpop.eup %13254  ;;  %8240 = vst [vmem:[%s13858_s17 + $0x1d30] sm:$0xff] %v13253_v31  ;;  %13274 = vpow2.f32 %v9373_v25  ;;  %v9388_v31 = vmul.f32 -1.442695, %v1098_v24 }
 0x795   : > { %v13257_v34 = vpop.eup %13256  ;;  %8241 = vst [vmem:[%s13858_s17 + $0x1d38] sm:$0xff] %v13255_v33  ;;  %13276 = vpow2.f32 %v9374_v28  ;;  %v9389_v33 = vmul.f32 -1.442695, %v1099_v27 }
 0x796   : > { %v13259_v35 = vpop.eup %13258  ;;  %v5170_v36 = vadd.f32 1.0, %v13257_v34  ;;  %13278 = vpow2.f32 %v9375_v30 }
 0x797   : > { %v13261_v37 = vpop.eup %13260  ;;  %v5171_v38 = vadd.f32 1.0, %v13259_v35  ;;  %13280 = vpow2.f32 %v9376_v32 }
 0x798   : > { %v13263_v39 = vpop.eup %13262  ;;  %13282 = vrcp.f32 %v5170_v36  ;;  %v5172_v40 = vadd.f32 1.0, %v13261_v37 }
 0x799   : > { %v13265_v41 = vpop.eup %13264  ;;  %13284 = vrcp.f32 %v5171_v38  ;;  %v5173_v42 = vadd.f32 1.0, %v13263_v39 }
 0x79a   : > { %v13267_v43 = vpop.eup %13266  ;;  %13286 = vrcp.f32 %v5172_v40  ;;  %v5174_v44 = vadd.f32 1.0, %v13265_v41 }
 0x79b   : > { %v13269_v45 = vpop.eup %13268  ;;  %13288 = vrcp.f32 %v5173_v42  ;;  %v5175_v46 = vadd.f32 1.0, %v13267_v43 }
 0x79c   : > { %v13271_v47 = vpop.eup %13270  ;;  %13290 = vrcp.f32 %v5174_v44  ;;  %v5176_v48 = vadd.f32 1.0, %v13269_v45 }
 0x79d   : > { %v13273_v49 = vpop.eup %13272  ;;  %13292 = vrcp.f32 %v5175_v46  ;;  %v5177_v50 = vadd.f32 1.0, %v13271_v47 }
 0x79e   : > { %v13275_v51 = vpop.eup %13274  ;;  %13294 = vrcp.f32 %v5176_v48  ;;  %v5178_v52 = vadd.f32 1.0, %v13273_v49 }
 0x79f   : > { %v13277_v54 = vpop.eup %13276  ;;  %13296 = vrcp.f32 %v5177_v50  ;;  %v5179_v55 = vadd.f32 1.0, %v13275_v51 }
 0x7a0   : > { %v13279_v57 = vpop.eup %13278  ;;  %13298 = vrcp.f32 %v5178_v52  ;;  %v5180_v58 = vadd.f32 1.0, %v13277_v54  ;;  %v1100_v54 = vld [vmem:[%s13832_s30 + $0x1e10] sm:$0xff] }
 0x7a1   : > { %v13281_v60 = vpop.eup %13280  ;;  %13300 = vrcp.f32 %v5179_v55  ;;  %v5181_v61 = vadd.f32 1.0, %v13279_v57  ;;  %v1101_v57 = vld [vmem:[%s13832_s30 + $0x1e18] sm:$0xff]  ;;  %v9390_v63 = vmul.f32 -1.442695, %v1100_v54 }
 0x7a2   : > { %v13283_v0 = vpop.eup %13282  ;;  %13302 = vrcp.f32 %v5180_v58  ;;  %v5182_v1 = vadd.f32 1.0, %v13281_v60  ;;  %v1102_v60 = vld [vmem:[%s13832_s30 + $0x1e20] sm:$0xff]  ;;  %v9391_v3 = vmul.f32 -1.442695, %v1101_v57 }
 0x7a3   : > { %v13285_v4 = vpop.eup %13284  ;;  %8242 = vst [vmem:[%s13858_s17 + $0x1d40] sm:$0xff] %v13283_v0  ;;  %13304 = vrcp.f32 %v5181_v61  ;;  %v1103_v0 = vld [vmem:[%s13832_s30 + $0x1e28] sm:$0xff]  ;;  %v9392_v6 = vmul.f32 -1.442695, %v1102_v60 }
 0x7a4   : > { %v13287_v7 = vpop.eup %13286  ;;  %8243 = vst [vmem:[%s13858_s17 + $0x1d48] sm:$0xff] %v13285_v4  ;;  %13306 = vrcp.f32 %v5182_v1  ;;  %v1104_v4 = vld [vmem:[%s13832_s30 + $0x1e30] sm:$0xff]  ;;  %v9393_v9 = vmul.f32 -1.442695, %v1103_v0 }
 0x7a5   : > { %v13289_v10 = vpop.eup %13288  ;;  %8244 = vst [vmem:[%s13858_s17 + $0x1d50] sm:$0xff] %v13287_v7  ;;  %13308 = vpow2.f32 %v9377_v62  ;;  %v1105_v7 = vld [vmem:[%s13832_s30 + $0x1e38] sm:$0xff]  ;;  %v9394_v12 = vmul.f32 -1.442695, %v1104_v4 }
 0x7a6   : > { %v13291_v13 = vpop.eup %13290  ;;  %8245 = vst [vmem:[%s13858_s17 + $0x1d58] sm:$0xff] %v13289_v10  ;;  %13310 = vpow2.f32 %v9378_v2  ;;  %v1106_v10 = vld [vmem:[%s13832_s30 + $0x1e40] sm:$0xff]  ;;  %v9395_v15 = vmul.f32 -1.442695, %v1105_v7 }
 0x7a7   : > { %v13293_v16 = vpop.eup %13292  ;;  %8246 = vst [vmem:[%s13858_s17 + $0x1d60] sm:$0xff] %v13291_v13  ;;  %13312 = vpow2.f32 %v9379_v5  ;;  %v1107_v13 = vld [vmem:[%s13832_s30 + $0x1e48] sm:$0xff]  ;;  %v9396_v18 = vmul.f32 -1.442695, %v1106_v10 }
 0x7a8   : > { %v13295_v19 = vpop.eup %13294  ;;  %8247 = vst [vmem:[%s13858_s17 + $0x1d68] sm:$0xff] %v13293_v16  ;;  %13314 = vpow2.f32 %v9380_v8  ;;  %v1108_v16 = vld [vmem:[%s13832_s30 + $0x1e50] sm:$0xff]  ;;  %v9397_v21 = vmul.f32 -1.442695, %v1107_v13 }
 0x7a9   : > { %v13297_v22 = vpop.eup %13296  ;;  %8248 = vst [vmem:[%s13858_s17 + $0x1d70] sm:$0xff] %v13295_v19  ;;  %13316 = vpow2.f32 %v9381_v11  ;;  %v1109_v19 = vld [vmem:[%s13832_s30 + $0x1e58] sm:$0xff]  ;;  %v9398_v24 = vmul.f32 -1.442695, %v1108_v16 }
 0x7aa   : > { %v13299_v25 = vpop.eup %13298  ;;  %8249 = vst [vmem:[%s13858_s17 + $0x1d78] sm:$0xff] %v13297_v22  ;;  %13318 = vpow2.f32 %v9382_v14  ;;  %v1110_v22 = vld [vmem:[%s13832_s30 + $0x1e60] sm:$0xff]  ;;  %v9399_v27 = vmul.f32 -1.442695, %v1109_v19 }
 0x7ab   : > { %v13301_v28 = vpop.eup %13300  ;;  %8250 = vst [vmem:[%s13858_s17 + $0x1d80] sm:$0xff] %v13299_v25  ;;  %13320 = vpow2.f32 %v9383_v17  ;;  %v1111_v25 = vld [vmem:[%s13832_s30 + $0x1e68] sm:$0xff] }
 0x7ac   : > { %v13303_v30 = vpop.eup %13302  ;;  %8251 = vst [vmem:[%s13858_s17 + $0x1d88] sm:$0xff] %v13301_v28  ;;  %13322 = vpow2.f32 %v9384_v20  ;;  %v1112_v28 = vld [vmem:[%s13832_s30 + $0x1e70] sm:$0xff] }
 0x7ad   : > { %v13305_v32 = vpop.eup %13304  ;;  %8252 = vst [vmem:[%s13858_s17 + $0x1d90] sm:$0xff] %v13303_v30  ;;  %13324 = vpow2.f32 %v9385_v23  ;;  %v9400_v30 = vmul.f32 -1.442695, %v1110_v22 }
 0x7ae   : > { %v13307_v34 = vpop.eup %13306  ;;  %8253 = vst [vmem:[%s13858_s17 + $0x1d98] sm:$0xff] %v13305_v32  ;;  %13326 = vpow2.f32 %v9386_v26  ;;  %v9401_v32 = vmul.f32 -1.442695, %v1111_v25 }
 0x7af   : > { %v13309_v35 = vpop.eup %13308  ;;  %8254 = vst [vmem:[%s13858_s17 + $0x1da0] sm:$0xff] %v13307_v34  ;;  %13328 = vpow2.f32 %v9387_v29  ;;  %v9402_v34 = vmul.f32 -1.442695, %v1112_v28 }
 0x7b0   : > { %v13311_v36 = vpop.eup %13310  ;;  %v5183_v37 = vadd.f32 1.0, %v13309_v35  ;;  %13330 = vpow2.f32 %v9388_v31 }
 0x7b1   : > { %v13313_v38 = vpop.eup %13312  ;;  %v5184_v39 = vadd.f32 1.0, %v13311_v36  ;;  %13332 = vpow2.f32 %v9389_v33 }
 0x7b2   : > { %v13315_v40 = vpop.eup %13314  ;;  %13334 = vrcp.f32 %v5183_v37  ;;  %v5185_v41 = vadd.f32 1.0, %v13313_v38 }
 0x7b3   : > { %v13317_v42 = vpop.eup %13316  ;;  %13336 = vrcp.f32 %v5184_v39  ;;  %v5186_v43 = vadd.f32 1.0, %v13315_v40 }
 0x7b4   : > { %v13319_v44 = vpop.eup %13318  ;;  %13338 = vrcp.f32 %v5185_v41  ;;  %v5187_v45 = vadd.f32 1.0, %v13317_v42 }
 0x7b5   : > { %v13321_v46 = vpop.eup %13320  ;;  %13340 = vrcp.f32 %v5186_v43  ;;  %v5188_v47 = vadd.f32 1.0, %v13319_v44 }
 0x7b6   : > { %v13323_v48 = vpop.eup %13322  ;;  %13342 = vrcp.f32 %v5187_v45  ;;  %v5189_v49 = vadd.f32 1.0, %v13321_v46 }
 0x7b7   : > { %v13325_v50 = vpop.eup %13324  ;;  %13344 = vrcp.f32 %v5188_v47  ;;  %v5190_v51 = vadd.f32 1.0, %v13323_v48 }
 0x7b8   : > { %v13327_v52 = vpop.eup %13326  ;;  %13346 = vrcp.f32 %v5189_v49  ;;  %v5191_v53 = vadd.f32 1.0, %v13325_v50 }
 0x7b9   : > { %v13329_v55 = vpop.eup %13328  ;;  %13348 = vrcp.f32 %v5190_v51  ;;  %v5192_v56 = vadd.f32 1.0, %v13327_v52 }
 0x7ba   : > { %v13331_v58 = vpop.eup %13330  ;;  %13350 = vrcp.f32 %v5191_v53  ;;  %v5193_v59 = vadd.f32 1.0, %v13329_v55  ;;  %v1113_v55 = vld [vmem:[%s13832_s30 + $0x1e78] sm:$0xff] }
 0x7bb   : > { %v13333_v61 = vpop.eup %13332  ;;  %13352 = vrcp.f32 %v5192_v56  ;;  %v5194_v62 = vadd.f32 1.0, %v13331_v58  ;;  %v1114_v58 = vld [vmem:[%s13832_s30 + $0x1e80] sm:$0xff]  ;;  %v9403_v0 = vmul.f32 -1.442695, %v1113_v55 }
 0x7bc   : > { %v13335_v1 = vpop.eup %13334  ;;  %13354 = vrcp.f32 %v5193_v59  ;;  %v5195_v2 = vadd.f32 1.0, %v13333_v61  ;;  %v1115_v61 = vld [vmem:[%s13832_s30 + $0x1e88] sm:$0xff]  ;;  %v9404_v4 = vmul.f32 -1.442695, %v1114_v58 }
 0x7bd   : > { %v13337_v5 = vpop.eup %13336  ;;  %8255 = vst [vmem:[%s13858_s17 + $0x1da8] sm:$0xff] %v13335_v1  ;;  %13356 = vrcp.f32 %v5194_v62  ;;  %v1116_v1 = vld [vmem:[%s13832_s30 + $0x1e90] sm:$0xff]  ;;  %v9405_v7 = vmul.f32 -1.442695, %v1115_v61 }
 0x7be   : > { %v13339_v8 = vpop.eup %13338  ;;  %8256 = vst [vmem:[%s13858_s17 + $0x1db0] sm:$0xff] %v13337_v5  ;;  %13358 = vrcp.f32 %v5195_v2  ;;  %v1117_v5 = vld [vmem:[%s13832_s30 + $0x1e98] sm:$0xff]  ;;  %v9406_v10 = vmul.f32 -1.442695, %v1116_v1 }
 0x7bf   : > { %v13341_v11 = vpop.eup %13340  ;;  %8257 = vst [vmem:[%s13858_s17 + $0x1db8] sm:$0xff] %v13339_v8  ;;  %13360 = vpow2.f32 %v9390_v63  ;;  %v1118_v8 = vld [vmem:[%s13832_s30 + $0x1ea0] sm:$0xff]  ;;  %v9407_v13 = vmul.f32 -1.442695, %v1117_v5 }
 0x7c0   : > { %v13343_v14 = vpop.eup %13342  ;;  %8258 = vst [vmem:[%s13858_s17 + $0x1dc0] sm:$0xff] %v13341_v11  ;;  %13362 = vpow2.f32 %v9391_v3  ;;  %v1119_v11 = vld [vmem:[%s13832_s30 + $0x1ea8] sm:$0xff]  ;;  %v9408_v16 = vmul.f32 -1.442695, %v1118_v8 }
 0x7c1   : > { %v13345_v17 = vpop.eup %13344  ;;  %8259 = vst [vmem:[%s13858_s17 + $0x1dc8] sm:$0xff] %v13343_v14  ;;  %13364 = vpow2.f32 %v9392_v6  ;;  %v1120_v14 = vld [vmem:[%s13832_s30 + $0x1eb0] sm:$0xff]  ;;  %v9409_v19 = vmul.f32 -1.442695, %v1119_v11 }
 0x7c2   : > { %v13347_v20 = vpop.eup %13346  ;;  %8260 = vst [vmem:[%s13858_s17 + $0x1dd0] sm:$0xff] %v13345_v17  ;;  %13366 = vpow2.f32 %v9393_v9  ;;  %v1121_v17 = vld [vmem:[%s13832_s30 + $0x1eb8] sm:$0xff]  ;;  %v9410_v22 = vmul.f32 -1.442695, %v1120_v14 }
 0x7c3   : > { %v13349_v23 = vpop.eup %13348  ;;  %8261 = vst [vmem:[%s13858_s17 + $0x1dd8] sm:$0xff] %v13347_v20  ;;  %13368 = vpow2.f32 %v9394_v12  ;;  %v1122_v20 = vld [vmem:[%s13832_s30 + $0x1ec0] sm:$0xff]  ;;  %v9411_v25 = vmul.f32 -1.442695, %v1121_v17 }
 0x7c4   : > { %v13351_v26 = vpop.eup %13350  ;;  %8262 = vst [vmem:[%s13858_s17 + $0x1de0] sm:$0xff] %v13349_v23  ;;  %13370 = vpow2.f32 %v9395_v15  ;;  %v1123_v23 = vld [vmem:[%s13832_s30 + $0x1ec8] sm:$0xff]  ;;  %v9412_v28 = vmul.f32 -1.442695, %v1122_v20 }
 0x7c5   : > { %v13353_v29 = vpop.eup %13352  ;;  %8263 = vst [vmem:[%s13858_s17 + $0x1de8] sm:$0xff] %v13351_v26  ;;  %13372 = vpow2.f32 %v9396_v18  ;;  %v1124_v26 = vld [vmem:[%s13832_s30 + $0x1ed0] sm:$0xff] }
 0x7c6   : > { %v13355_v31 = vpop.eup %13354  ;;  %8264 = vst [vmem:[%s13858_s17 + $0x1df0] sm:$0xff] %v13353_v29  ;;  %13374 = vpow2.f32 %v9397_v21  ;;  %v1125_v29 = vld [vmem:[%s13832_s30 + $0x1ed8] sm:$0xff] }
 0x7c7   : > { %v13357_v33 = vpop.eup %13356  ;;  %8265 = vst [vmem:[%s13858_s17 + $0x1df8] sm:$0xff] %v13355_v31  ;;  %13376 = vpow2.f32 %v9398_v24  ;;  %v9413_v31 = vmul.f32 -1.442695, %v1123_v23 }
 0x7c8   : > { %v13359_v35 = vpop.eup %13358  ;;  %8266 = vst [vmem:[%s13858_s17 + $0x1e00] sm:$0xff] %v13357_v33  ;;  %13378 = vpow2.f32 %v9399_v27  ;;  %v9414_v33 = vmul.f32 -1.442695, %v1124_v26 }
 0x7c9   : > { %v13361_v36 = vpop.eup %13360  ;;  %8267 = vst [vmem:[%s13858_s17 + $0x1e08] sm:$0xff] %v13359_v35  ;;  %13380 = vpow2.f32 %v9400_v30  ;;  %v9415_v35 = vmul.f32 -1.442695, %v1125_v29 }
 0x7ca   : > { %v13363_v37 = vpop.eup %13362  ;;  %v5196_v38 = vadd.f32 1.0, %v13361_v36  ;;  %13382 = vpow2.f32 %v9401_v32 }
 0x7cb   : > { %v13365_v39 = vpop.eup %13364  ;;  %v5197_v40 = vadd.f32 1.0, %v13363_v37  ;;  %13384 = vpow2.f32 %v9402_v34 }
 0x7cc   : > { %v13367_v41 = vpop.eup %13366  ;;  %13386 = vrcp.f32 %v5196_v38  ;;  %v5198_v42 = vadd.f32 1.0, %v13365_v39 }
 0x7cd   : > { %v13369_v43 = vpop.eup %13368  ;;  %13388 = vrcp.f32 %v5197_v40  ;;  %v5199_v44 = vadd.f32 1.0, %v13367_v41 }
 0x7ce   : > { %v13371_v45 = vpop.eup %13370  ;;  %13390 = vrcp.f32 %v5198_v42  ;;  %v5200_v46 = vadd.f32 1.0, %v13369_v43 }
 0x7cf   : > { %v13373_v47 = vpop.eup %13372  ;;  %13392 = vrcp.f32 %v5199_v44  ;;  %v5201_v48 = vadd.f32 1.0, %v13371_v45 }
 0x7d0   : > { %v13375_v49 = vpop.eup %13374  ;;  %13394 = vrcp.f32 %v5200_v46  ;;  %v5202_v50 = vadd.f32 1.0, %v13373_v47 }
 0x7d1   : > { %v13377_v51 = vpop.eup %13376  ;;  %13396 = vrcp.f32 %v5201_v48  ;;  %v5203_v52 = vadd.f32 1.0, %v13375_v49 }
 0x7d2   : > { %v13379_v53 = vpop.eup %13378  ;;  %13398 = vrcp.f32 %v5202_v50  ;;  %v5204_v54 = vadd.f32 1.0, %v13377_v51 }
 0x7d3   : > { %v13381_v56 = vpop.eup %13380  ;;  %13400 = vrcp.f32 %v5203_v52  ;;  %v5205_v57 = vadd.f32 1.0, %v13379_v53 }
 0x7d4   : > { %v13383_v59 = vpop.eup %13382  ;;  %13402 = vrcp.f32 %v5204_v54  ;;  %v5206_v60 = vadd.f32 1.0, %v13381_v56  ;;  %v1126_v56 = vld [vmem:[%s13832_s30 + $0x1ee0] sm:$0xff] }
 0x7d5   : > { %v13385_v62 = vpop.eup %13384  ;;  %13404 = vrcp.f32 %v5205_v57  ;;  %v5207_v63 = vadd.f32 1.0, %v13383_v59  ;;  %v1127_v59 = vld [vmem:[%s13832_s30 + $0x1ee8] sm:$0xff]  ;;  %v9416_v1 = vmul.f32 -1.442695, %v1126_v56 }
 0x7d6   : > { %v13387_v2 = vpop.eup %13386  ;;  %13406 = vrcp.f32 %v5206_v60  ;;  %v5208_v3 = vadd.f32 1.0, %v13385_v62  ;;  %v1128_v62 = vld [vmem:[%s13832_s30 + $0x1ef0] sm:$0xff]  ;;  %v9417_v5 = vmul.f32 -1.442695, %v1127_v59 }
 0x7d7   : > { %v13389_v6 = vpop.eup %13388  ;;  %8268 = vst [vmem:[%s13858_s17 + $0x1e10] sm:$0xff] %v13387_v2  ;;  %13408 = vrcp.f32 %v5207_v63  ;;  %v1129_v2 = vld [vmem:[%s13832_s30 + $0x1ef8] sm:$0xff]  ;;  %v9418_v8 = vmul.f32 -1.442695, %v1128_v62 }
 0x7d8   : > { %v13391_v9 = vpop.eup %13390  ;;  %8269 = vst [vmem:[%s13858_s17 + $0x1e18] sm:$0xff] %v13389_v6  ;;  %13410 = vrcp.f32 %v5208_v3  ;;  %v1130_v6 = vld [vmem:[%s13832_s30 + $0x1f00] sm:$0xff]  ;;  %v9419_v11 = vmul.f32 -1.442695, %v1129_v2 }
 0x7d9   : > { %v13393_v12 = vpop.eup %13392  ;;  %8270 = vst [vmem:[%s13858_s17 + $0x1e20] sm:$0xff] %v13391_v9  ;;  %13412 = vpow2.f32 %v9403_v0  ;;  %v1131_v9 = vld [vmem:[%s13832_s30 + $0x1f08] sm:$0xff]  ;;  %v9420_v14 = vmul.f32 -1.442695, %v1130_v6 }
 0x7da   : > { %v13395_v15 = vpop.eup %13394  ;;  %8271 = vst [vmem:[%s13858_s17 + $0x1e28] sm:$0xff] %v13393_v12  ;;  %13414 = vpow2.f32 %v9404_v4  ;;  %v1132_v12 = vld [vmem:[%s13832_s30 + $0x1f10] sm:$0xff]  ;;  %v9421_v17 = vmul.f32 -1.442695, %v1131_v9 }
 0x7db   : > { %v13397_v18 = vpop.eup %13396  ;;  %8272 = vst [vmem:[%s13858_s17 + $0x1e30] sm:$0xff] %v13395_v15  ;;  %13416 = vpow2.f32 %v9405_v7  ;;  %v1133_v15 = vld [vmem:[%s13832_s30 + $0x1f18] sm:$0xff]  ;;  %v9422_v20 = vmul.f32 -1.442695, %v1132_v12 }
 0x7dc   : > { %v13399_v21 = vpop.eup %13398  ;;  %8273 = vst [vmem:[%s13858_s17 + $0x1e38] sm:$0xff] %v13397_v18  ;;  %13418 = vpow2.f32 %v9406_v10  ;;  %v1134_v18 = vld [vmem:[%s13832_s30 + $0x1f20] sm:$0xff]  ;;  %v9423_v23 = vmul.f32 -1.442695, %v1133_v15 }
 0x7dd   : > { %v13401_v24 = vpop.eup %13400  ;;  %8274 = vst [vmem:[%s13858_s17 + $0x1e40] sm:$0xff] %v13399_v21  ;;  %13420 = vpow2.f32 %v9407_v13  ;;  %v1135_v21 = vld [vmem:[%s13832_s30 + $0x1f28] sm:$0xff]  ;;  %v9424_v26 = vmul.f32 -1.442695, %v1134_v18 }
 0x7de   : > { %v13403_v27 = vpop.eup %13402  ;;  %8275 = vst [vmem:[%s13858_s17 + $0x1e48] sm:$0xff] %v13401_v24  ;;  %13422 = vpow2.f32 %v9408_v16  ;;  %v1136_v24 = vld [vmem:[%s13832_s30 + $0x1f30] sm:$0xff]  ;;  %v9425_v29 = vmul.f32 -1.442695, %v1135_v21 }
 0x7df   : > { %v13405_v30 = vpop.eup %13404  ;;  %8276 = vst [vmem:[%s13858_s17 + $0x1e50] sm:$0xff] %v13403_v27  ;;  %13424 = vpow2.f32 %v9409_v19  ;;  %v1137_v27 = vld [vmem:[%s13832_s30 + $0x1f38] sm:$0xff] }
 0x7e0   : > { %v13407_v32 = vpop.eup %13406  ;;  %8277 = vst [vmem:[%s13858_s17 + $0x1e58] sm:$0xff] %v13405_v30  ;;  %13426 = vpow2.f32 %v9410_v22  ;;  %v1138_v30 = vld [vmem:[%s13832_s30 + $0x1f40] sm:$0xff] }
 0x7e1   : > { %v13409_v34 = vpop.eup %13408  ;;  %8278 = vst [vmem:[%s13858_s17 + $0x1e60] sm:$0xff] %v13407_v32  ;;  %13428 = vpow2.f32 %v9411_v25  ;;  %v9426_v32 = vmul.f32 -1.442695, %v1136_v24 }
 0x7e2   : > { %v13411_v36 = vpop.eup %13410  ;;  %8279 = vst [vmem:[%s13858_s17 + $0x1e68] sm:$0xff] %v13409_v34  ;;  %13430 = vpow2.f32 %v9412_v28  ;;  %v9427_v34 = vmul.f32 -1.442695, %v1137_v27 }
 0x7e3   : > { %v13413_v37 = vpop.eup %13412  ;;  %8280 = vst [vmem:[%s13858_s17 + $0x1e70] sm:$0xff] %v13411_v36  ;;  %13432 = vpow2.f32 %v9413_v31  ;;  %v9428_v36 = vmul.f32 -1.442695, %v1138_v30 }
 0x7e4   : > { %v13415_v38 = vpop.eup %13414  ;;  %v5209_v39 = vadd.f32 1.0, %v13413_v37  ;;  %13434 = vpow2.f32 %v9414_v33 }
 0x7e5   : > { %v13417_v40 = vpop.eup %13416  ;;  %v5210_v41 = vadd.f32 1.0, %v13415_v38  ;;  %13436 = vpow2.f32 %v9415_v35 }
 0x7e6   : > { %v13419_v42 = vpop.eup %13418  ;;  %13438 = vrcp.f32 %v5209_v39  ;;  %v5211_v43 = vadd.f32 1.0, %v13417_v40 }
 0x7e7   : > { %v13421_v44 = vpop.eup %13420  ;;  %13440 = vrcp.f32 %v5210_v41  ;;  %v5212_v45 = vadd.f32 1.0, %v13419_v42 }
 0x7e8   : > { %v13423_v46 = vpop.eup %13422  ;;  %13442 = vrcp.f32 %v5211_v43  ;;  %v5213_v47 = vadd.f32 1.0, %v13421_v44 }
 0x7e9   : > { %v13425_v48 = vpop.eup %13424  ;;  %13444 = vrcp.f32 %v5212_v45  ;;  %v5214_v49 = vadd.f32 1.0, %v13423_v46 }
 0x7ea   : > { %v13427_v50 = vpop.eup %13426  ;;  %13446 = vrcp.f32 %v5213_v47  ;;  %v5215_v51 = vadd.f32 1.0, %v13425_v48 }
 0x7eb   : > { %v13429_v52 = vpop.eup %13428  ;;  %13448 = vrcp.f32 %v5214_v49  ;;  %v5216_v53 = vadd.f32 1.0, %v13427_v50 }
 0x7ec   : > { %v13431_v54 = vpop.eup %13430  ;;  %13450 = vrcp.f32 %v5215_v51  ;;  %v5217_v55 = vadd.f32 1.0, %v13429_v52 }
 0x7ed   : > { %v13433_v57 = vpop.eup %13432  ;;  %13452 = vrcp.f32 %v5216_v53  ;;  %v5218_v58 = vadd.f32 1.0, %v13431_v54 }
 0x7ee   : > { %v13435_v60 = vpop.eup %13434  ;;  %13454 = vrcp.f32 %v5217_v55  ;;  %v5219_v61 = vadd.f32 1.0, %v13433_v57  ;;  %v1139_v57 = vld [vmem:[%s13832_s30 + $0x1f48] sm:$0xff] }
 0x7ef   : > { %v13437_v63 = vpop.eup %13436  ;;  %13456 = vrcp.f32 %v5218_v58  ;;  %v5220_v0 = vadd.f32 1.0, %v13435_v60  ;;  %v1140_v60 = vld [vmem:[%s13832_s30 + $0x1f50] sm:$0xff]  ;;  %v9429_v2 = vmul.f32 -1.442695, %v1139_v57 }
 0x7f0   : > { %v13439_v3 = vpop.eup %13438  ;;  %13458 = vrcp.f32 %v5219_v61  ;;  %v5221_v4 = vadd.f32 1.0, %v13437_v63  ;;  %v1141_v63 = vld [vmem:[%s13832_s30 + $0x1f58] sm:$0xff]  ;;  %v9430_v6 = vmul.f32 -1.442695, %v1140_v60 }
 0x7f1   : > { %v13441_v7 = vpop.eup %13440  ;;  %8281 = vst [vmem:[%s13858_s17 + $0x1e78] sm:$0xff] %v13439_v3  ;;  %13460 = vrcp.f32 %v5220_v0  ;;  %v1142_v3 = vld [vmem:[%s13832_s30 + $0x1f60] sm:$0xff]  ;;  %v9431_v9 = vmul.f32 -1.442695, %v1141_v63 }
 0x7f2   : > { %v13443_v10 = vpop.eup %13442  ;;  %8282 = vst [vmem:[%s13858_s17 + $0x1e80] sm:$0xff] %v13441_v7  ;;  %13462 = vrcp.f32 %v5221_v4  ;;  %v1143_v7 = vld [vmem:[%s13832_s30 + $0x1f68] sm:$0xff]  ;;  %v9432_v12 = vmul.f32 -1.442695, %v1142_v3 }
 0x7f3   : > { %v13445_v13 = vpop.eup %13444  ;;  %8283 = vst [vmem:[%s13858_s17 + $0x1e88] sm:$0xff] %v13443_v10  ;;  %13464 = vpow2.f32 %v9416_v1  ;;  %v1144_v10 = vld [vmem:[%s13832_s30 + $0x1f70] sm:$0xff]  ;;  %v9433_v15 = vmul.f32 -1.442695, %v1143_v7 }
 0x7f4   : > { %v13447_v16 = vpop.eup %13446  ;;  %8284 = vst [vmem:[%s13858_s17 + $0x1e90] sm:$0xff] %v13445_v13  ;;  %13466 = vpow2.f32 %v9417_v5  ;;  %v1145_v13 = vld [vmem:[%s13832_s30 + $0x1f78] sm:$0xff]  ;;  %v9434_v18 = vmul.f32 -1.442695, %v1144_v10 }
 0x7f5   : > { %v13449_v19 = vpop.eup %13448  ;;  %8285 = vst [vmem:[%s13858_s17 + $0x1e98] sm:$0xff] %v13447_v16  ;;  %13468 = vpow2.f32 %v9418_v8  ;;  %v1146_v16 = vld [vmem:[%s13832_s30 + $0x1f80] sm:$0xff]  ;;  %v9435_v21 = vmul.f32 -1.442695, %v1145_v13 }
 0x7f6   : > { %v13451_v22 = vpop.eup %13450  ;;  %8286 = vst [vmem:[%s13858_s17 + $0x1ea0] sm:$0xff] %v13449_v19  ;;  %13470 = vpow2.f32 %v9419_v11  ;;  %v1147_v19 = vld [vmem:[%s13832_s30 + $0x1f88] sm:$0xff]  ;;  %v9436_v24 = vmul.f32 -1.442695, %v1146_v16 }
 0x7f7   : > { %v13453_v25 = vpop.eup %13452  ;;  %8287 = vst [vmem:[%s13858_s17 + $0x1ea8] sm:$0xff] %v13451_v22  ;;  %13472 = vpow2.f32 %v9420_v14  ;;  %v1148_v22 = vld [vmem:[%s13832_s30 + $0x1f90] sm:$0xff]  ;;  %v9437_v27 = vmul.f32 -1.442695, %v1147_v19 }
 0x7f8   : > { %v13455_v28 = vpop.eup %13454  ;;  %8288 = vst [vmem:[%s13858_s17 + $0x1eb0] sm:$0xff] %v13453_v25  ;;  %13474 = vpow2.f32 %v9421_v17  ;;  %v1149_v25 = vld [vmem:[%s13832_s30 + $0x1f98] sm:$0xff]  ;;  %v9438_v30 = vmul.f32 -1.442695, %v1148_v22 }
 0x7f9   : > { %v13457_v31 = vpop.eup %13456  ;;  %8289 = vst [vmem:[%s13858_s17 + $0x1eb8] sm:$0xff] %v13455_v28  ;;  %13476 = vpow2.f32 %v9422_v20  ;;  %v1150_v28 = vld [vmem:[%s13832_s30 + $0x1fa0] sm:$0xff] }
 0x7fa   : > { %v13459_v33 = vpop.eup %13458  ;;  %8290 = vst [vmem:[%s13858_s17 + $0x1ec0] sm:$0xff] %v13457_v31  ;;  %13478 = vpow2.f32 %v9423_v23  ;;  %v1151_v31 = vld [vmem:[%s13832_s30 + $0x1fa8] sm:$0xff] }
 0x7fb   : > { %v13461_v35 = vpop.eup %13460  ;;  %8291 = vst [vmem:[%s13858_s17 + $0x1ec8] sm:$0xff] %v13459_v33  ;;  %13480 = vpow2.f32 %v9424_v26  ;;  %v9439_v33 = vmul.f32 -1.442695, %v1149_v25 }
 0x7fc   : > { %v13463_v37 = vpop.eup %13462  ;;  %8292 = vst [vmem:[%s13858_s17 + $0x1ed0] sm:$0xff] %v13461_v35  ;;  %13482 = vpow2.f32 %v9425_v29  ;;  %v9440_v35 = vmul.f32 -1.442695, %v1150_v28 }
 0x7fd   : > { %v13465_v38 = vpop.eup %13464  ;;  %8293 = vst [vmem:[%s13858_s17 + $0x1ed8] sm:$0xff] %v13463_v37  ;;  %13484 = vpow2.f32 %v9426_v32  ;;  %v9441_v37 = vmul.f32 -1.442695, %v1151_v31 }
 0x7fe   : > { %v13467_v39 = vpop.eup %13466  ;;  %v5222_v40 = vadd.f32 1.0, %v13465_v38  ;;  %13486 = vpow2.f32 %v9427_v34 }
 0x7ff   : > { %v13469_v41 = vpop.eup %13468  ;;  %v5223_v42 = vadd.f32 1.0, %v13467_v39  ;;  %13488 = vpow2.f32 %v9428_v36 }
 0x800   : > { %v13471_v43 = vpop.eup %13470  ;;  %13490 = vrcp.f32 %v5222_v40  ;;  %v5224_v44 = vadd.f32 1.0, %v13469_v41 }
 0x801   : > { %v13473_v45 = vpop.eup %13472  ;;  %13492 = vrcp.f32 %v5223_v42  ;;  %v5225_v46 = vadd.f32 1.0, %v13471_v43 }
 0x802   : > { %v13475_v47 = vpop.eup %13474  ;;  %13494 = vrcp.f32 %v5224_v44  ;;  %v5226_v48 = vadd.f32 1.0, %v13473_v45 }
 0x803   : > { %v13477_v49 = vpop.eup %13476  ;;  %13496 = vrcp.f32 %v5225_v46  ;;  %v5227_v50 = vadd.f32 1.0, %v13475_v47 }
 0x804   : > { %v13479_v51 = vpop.eup %13478  ;;  %13498 = vrcp.f32 %v5226_v48  ;;  %v5228_v52 = vadd.f32 1.0, %v13477_v49 }
 0x805   : > { %v13481_v53 = vpop.eup %13480  ;;  %13500 = vrcp.f32 %v5227_v50  ;;  %v5229_v54 = vadd.f32 1.0, %v13479_v51 }
 0x806   : > { %v13483_v55 = vpop.eup %13482  ;;  %13502 = vrcp.f32 %v5228_v52  ;;  %v5230_v56 = vadd.f32 1.0, %v13481_v53 }
 0x807   : > { %v13485_v58 = vpop.eup %13484  ;;  %13504 = vrcp.f32 %v5229_v54  ;;  %v5231_v59 = vadd.f32 1.0, %v13483_v55 }
 0x808   : > { %v13487_v61 = vpop.eup %13486  ;;  %13506 = vrcp.f32 %v5230_v56  ;;  %v5232_v62 = vadd.f32 1.0, %v13485_v58  ;;  %v1152_v58 = vld [vmem:[%s13832_s30 + $0x1fb0] sm:$0xff] }
 0x809   : > { %v13489_v0 = vpop.eup %13488  ;;  %13508 = vrcp.f32 %v5231_v59  ;;  %v5233_v1 = vadd.f32 1.0, %v13487_v61  ;;  %v1153_v61 = vld [vmem:[%s13832_s30 + $0x1fb8] sm:$0xff]  ;;  %v9442_v3 = vmul.f32 -1.442695, %v1152_v58 }
 0x80a   : > { %v13491_v4 = vpop.eup %13490  ;;  %13510 = vrcp.f32 %v5232_v62  ;;  %v5234_v5 = vadd.f32 1.0, %v13489_v0  ;;  %v1154_v0 = vld [vmem:[%s13832_s30 + $0x1fc0] sm:$0xff]  ;;  %v9443_v7 = vmul.f32 -1.442695, %v1153_v61 }
 0x80b   : > { %v13493_v8 = vpop.eup %13492  ;;  %8294 = vst [vmem:[%s13858_s17 + $0x1ee0] sm:$0xff] %v13491_v4  ;;  %13512 = vrcp.f32 %v5233_v1  ;;  %v1155_v4 = vld [vmem:[%s13832_s30 + $0x1fc8] sm:$0xff]  ;;  %v9444_v10 = vmul.f32 -1.442695, %v1154_v0 }
 0x80c   : > { %v13495_v11 = vpop.eup %13494  ;;  %8295 = vst [vmem:[%s13858_s17 + $0x1ee8] sm:$0xff] %v13493_v8  ;;  %13514 = vrcp.f32 %v5234_v5  ;;  %v1156_v8 = vld [vmem:[%s13832_s30 + $0x1fd0] sm:$0xff]  ;;  %v9445_v13 = vmul.f32 -1.442695, %v1155_v4 }
 0x80d   : > { %v13497_v14 = vpop.eup %13496  ;;  %8296 = vst [vmem:[%s13858_s17 + $0x1ef0] sm:$0xff] %v13495_v11  ;;  %13516 = vpow2.f32 %v9429_v2  ;;  %v1157_v11 = vld [vmem:[%s13832_s30 + $0x1fd8] sm:$0xff]  ;;  %v9446_v16 = vmul.f32 -1.442695, %v1156_v8 }
 0x80e   : > { %v13499_v17 = vpop.eup %13498  ;;  %8297 = vst [vmem:[%s13858_s17 + $0x1ef8] sm:$0xff] %v13497_v14  ;;  %13518 = vpow2.f32 %v9430_v6  ;;  %v1158_v14 = vld [vmem:[%s13832_s30 + $0x1fe0] sm:$0xff]  ;;  %v9447_v19 = vmul.f32 -1.442695, %v1157_v11 }
 0x80f   : > { %v13501_v20 = vpop.eup %13500  ;;  %8298 = vst [vmem:[%s13858_s17 + $0x1f00] sm:$0xff] %v13499_v17  ;;  %13520 = vpow2.f32 %v9431_v9  ;;  %v1159_v17 = vld [vmem:[%s13832_s30 + $0x1fe8] sm:$0xff]  ;;  %v9448_v22 = vmul.f32 -1.442695, %v1158_v14 }
 0x810   : > { %v13503_v23 = vpop.eup %13502  ;;  %8299 = vst [vmem:[%s13858_s17 + $0x1f08] sm:$0xff] %v13501_v20  ;;  %13522 = vpow2.f32 %v9432_v12  ;;  %v1160_v20 = vld [vmem:[%s13832_s30 + $0x1ff0] sm:$0xff]  ;;  %v9449_v25 = vmul.f32 -1.442695, %v1159_v17 }
 0x811   : > { %v13505_v26 = vpop.eup %13504  ;;  %8300 = vst [vmem:[%s13858_s17 + $0x1f10] sm:$0xff] %v13503_v23  ;;  %13524 = vpow2.f32 %v9433_v15  ;;  %v1161_v23 = vld [vmem:[%s13832_s30 + $0x1ff8] sm:$0xff] }
 0x812   : > { %v13507_v29 = vpop.eup %13506  ;;  %8301 = vst [vmem:[%s13858_s17 + $0x1f18] sm:$0xff] %v13505_v26  ;;  %13526 = vpow2.f32 %v9434_v18 }
 0x813   : > { %v13509_v32 = vpop.eup %13508  ;;  %8302 = vst [vmem:[%s13858_s17 + $0x1f20] sm:$0xff] %v13507_v29  ;;  %13528 = vpow2.f32 %v9435_v21  ;;  %v9451_v29 = vmul.f32 -1.442695, %v1161_v23 }
 0x814   : > { %v13511_v34 = vpop.eup %13510  ;;  %8303 = vst [vmem:[%s13858_s17 + $0x1f28] sm:$0xff] %v13509_v32  ;;  %13530 = vpow2.f32 %v9436_v24 }
 0x815   : > { %v13513_v36 = vpop.eup %13512  ;;  %8304 = vst [vmem:[%s13858_s17 + $0x1f30] sm:$0xff] %v13511_v34  ;;  %13532 = vpow2.f32 %v9437_v27  ;;  %v9450_v27 = vmul.f32 -1.442695, %v1160_v20 }
 0x816   : > { %v13515_v38 = vpop.eup %13514  ;;  %8305 = vst [vmem:[%s13858_s17 + $0x1f38] sm:$0xff] %v13513_v36  ;;  %13534 = vpow2.f32 %v9438_v30 }
 0x817   : > { %v13517_v39 = vpop.eup %13516  ;;  %8306 = vst [vmem:[%s13858_s17 + $0x1f40] sm:$0xff] %v13515_v38  ;;  %13536 = vpow2.f32 %v9439_v33 }
 0x818   : > { %v13519_v40 = vpop.eup %13518  ;;  %v5235_v41 = vadd.f32 1.0, %v13517_v39  ;;  %13538 = vpow2.f32 %v9440_v35 }
 0x819   : > { %v13521_v42 = vpop.eup %13520  ;;  %v5236_v43 = vadd.f32 1.0, %v13519_v40  ;;  %13540 = vpow2.f32 %v9441_v37 }
 0x81a   : > { %v13523_v44 = vpop.eup %13522  ;;  %13542 = vrcp.f32 %v5235_v41  ;;  %v5237_v45 = vadd.f32 1.0, %v13521_v42 }
 0x81b   : > { %v13525_v46 = vpop.eup %13524  ;;  %13544 = vrcp.f32 %v5236_v43  ;;  %v5238_v47 = vadd.f32 1.0, %v13523_v44 }
 0x81c   : > { %v13527_v48 = vpop.eup %13526  ;;  %13546 = vrcp.f32 %v5237_v45  ;;  %v5239_v49 = vadd.f32 1.0, %v13525_v46 }
 0x81d   : > { %v13529_v50 = vpop.eup %13528  ;;  %13548 = vrcp.f32 %v5238_v47  ;;  %v5240_v51 = vadd.f32 1.0, %v13527_v48 }
 0x81e   : > { %v13531_v52 = vpop.eup %13530  ;;  %13550 = vrcp.f32 %v5239_v49  ;;  %v5241_v53 = vadd.f32 1.0, %v13529_v50 }
 0x81f   : > { %v13533_v54 = vpop.eup %13532  ;;  %13552 = vrcp.f32 %v5240_v51  ;;  %v5242_v55 = vadd.f32 1.0, %v13531_v52 }
 0x820   : > { %v13535_v56 = vpop.eup %13534  ;;  %13554 = vrcp.f32 %v5241_v53  ;;  %v5243_v57 = vadd.f32 1.0, %v13533_v54 }
 0x821   : > { %v13537_v59 = vpop.eup %13536  ;;  %13556 = vrcp.f32 %v5242_v55  ;;  %v5244_v60 = vadd.f32 1.0, %v13535_v56 }
 0x822   : > { %v13539_v62 = vpop.eup %13538  ;;  %13558 = vrcp.f32 %v5243_v57  ;;  %v5245_v63 = vadd.f32 1.0, %v13537_v59 }
 0x823   : > { %v13541_v1 = vpop.eup %13540  ;;  %13560 = vrcp.f32 %v5244_v60  ;;  %v5246_v2 = vadd.f32 1.0, %v13539_v62 }
 0x824   : > { %v13543_v5 = vpop.eup %13542  ;;  %13562 = vrcp.f32 %v5245_v63  ;;  %v5247_v6 = vadd.f32 1.0, %v13541_v1 }
 0x825   : > { %v13545_v9 = vpop.eup %13544  ;;  %8307 = vst [vmem:[%s13858_s17 + $0x1f48] sm:$0xff] %v13543_v5  ;;  %13564 = vrcp.f32 %v5246_v2 }
 0x826   : > { %v13547_v12 = vpop.eup %13546  ;;  %8308 = vst [vmem:[%s13858_s17 + $0x1f50] sm:$0xff] %v13545_v9  ;;  %13566 = vrcp.f32 %v5247_v6 }
 0x827   : > { %v13549_v15 = vpop.eup %13548  ;;  %8309 = vst [vmem:[%s13858_s17 + $0x1f58] sm:$0xff] %v13547_v12  ;;  %13568 = vpow2.f32 %v9442_v3 }
 0x828   : > { %v13551_v18 = vpop.eup %13550  ;;  %8310 = vst [vmem:[%s13858_s17 + $0x1f60] sm:$0xff] %v13549_v15  ;;  %13570 = vpow2.f32 %v9443_v7 }
 0x829   : > { %v13553_v21 = vpop.eup %13552  ;;  %8311 = vst [vmem:[%s13858_s17 + $0x1f68] sm:$0xff] %v13551_v18  ;;  %13572 = vpow2.f32 %v9444_v10 }
 0x82a   : > { %v13555_v24 = vpop.eup %13554  ;;  %8312 = vst [vmem:[%s13858_s17 + $0x1f70] sm:$0xff] %v13553_v21  ;;  %13574 = vpow2.f32 %v9445_v13 }
 0x82b   : > { %v13557_v26 = vpop.eup %13556  ;;  %8313 = vst [vmem:[%s13858_s17 + $0x1f78] sm:$0xff] %v13555_v24  ;;  %13576 = vpow2.f32 %v9446_v16 }
 0x82c   : > { %v13559_v28 = vpop.eup %13558  ;;  %8314 = vst [vmem:[%s13858_s17 + $0x1f80] sm:$0xff] %v13557_v26  ;;  %13578 = vpow2.f32 %v9447_v19 }
 0x82d   : > { %v13561_v30 = vpop.eup %13560  ;;  %8315 = vst [vmem:[%s13858_s17 + $0x1f88] sm:$0xff] %v13559_v28  ;;  %13580 = vpow2.f32 %v9448_v22 }
 0x82e   : > { %v13563_v31 = vpop.eup %13562  ;;  %8316 = vst [vmem:[%s13858_s17 + $0x1f90] sm:$0xff] %v13561_v30  ;;  %13582 = vpow2.f32 %v9449_v25 }
 0x82f   : > { %v13565_v32 = vpop.eup %13564  ;;  %8317 = vst [vmem:[%s13858_s17 + $0x1f98] sm:$0xff] %v13563_v31  ;;  %13584 = vpow2.f32 %v9450_v27 }
 0x830   : > { %v13567_v33 = vpop.eup %13566  ;;  %8318 = vst [vmem:[%s13858_s17 + $0x1fa0] sm:$0xff] %v13565_v32  ;;  %13586 = vpow2.f32 %v9451_v29 }
 0x831   : > { %v13569_v34 = vpop.eup %13568  ;;  %8319 = vst [vmem:[%s13858_s17 + $0x1fa8] sm:$0xff] %v13567_v33 }
 0x832   : > { %v13571_v35 = vpop.eup %13570  ;;  %v5248_v36 = vadd.f32 1.0, %v13569_v34 }
 0x833   : > { %v13573_v37 = vpop.eup %13572  ;;  %v5249_v38 = vadd.f32 1.0, %v13571_v35 }
 0x834   : > { %v13575_v39 = vpop.eup %13574  ;;  %13588 = vrcp.f32 %v5248_v36  ;;  %v5250_v40 = vadd.f32 1.0, %v13573_v37 }
 0x835   : > { %v13577_v41 = vpop.eup %13576  ;;  %13590 = vrcp.f32 %v5249_v38  ;;  %v5251_v42 = vadd.f32 1.0, %v13575_v39 }
 0x836   : > { %v13579_v43 = vpop.eup %13578  ;;  %13592 = vrcp.f32 %v5250_v40  ;;  %v5252_v44 = vadd.f32 1.0, %v13577_v41 }
 0x837   : > { %v13581_v45 = vpop.eup %13580  ;;  %13594 = vrcp.f32 %v5251_v42  ;;  %v5253_v46 = vadd.f32 1.0, %v13579_v43 }
 0x838   : > { %v13583_v47 = vpop.eup %13582  ;;  %13596 = vrcp.f32 %v5252_v44  ;;  %v5254_v48 = vadd.f32 1.0, %v13581_v45 }
 0x839   : > { %v13585_v49 = vpop.eup %13584  ;;  %13598 = vrcp.f32 %v5253_v46  ;;  %v5255_v50 = vadd.f32 1.0, %v13583_v47 }
 0x83a   : > { %v13587_v51 = vpop.eup %13586  ;;  %13600 = vrcp.f32 %v5254_v48  ;;  %v5256_v52 = vadd.f32 1.0, %v13585_v49 }
 0x83b   : > { %13602 = vrcp.f32 %v5255_v50  ;;  %v5257_v53 = vadd.f32 1.0, %v13587_v51 }
 0x83c   : > { %13604 = vrcp.f32 %v5256_v52 }
 0x83d   : > { %13606 = vrcp.f32 %v5257_v53 }
 0x83e   : > { %v13589_v54 = vpop.eup %13588 }
 0x83f   : > { %v13591_v55 = vpop.eup %13590  ;;  %8320 = vst [vmem:[%s13858_s17 + $0x1fb0] sm:$0xff] %v13589_v54 }
 0x840   : > { %v13593_v56 = vpop.eup %13592  ;;  %8321 = vst [vmem:[%s13858_s17 + $0x1fb8] sm:$0xff] %v13591_v55 }
 0x841   : > { %v13595_v57 = vpop.eup %13594  ;;  %8322 = vst [vmem:[%s13858_s17 + $0x1fc0] sm:$0xff] %v13593_v56 }
 0x842   : > { %v13597_v58 = vpop.eup %13596  ;;  %8323 = vst [vmem:[%s13858_s17 + $0x1fc8] sm:$0xff] %v13595_v57 }
 0x843   : > { %v13599_v59 = vpop.eup %13598  ;;  %8324 = vst [vmem:[%s13858_s17 + $0x1fd0] sm:$0xff] %v13597_v58 }
 0x844   : > { %v13601_v60 = vpop.eup %13600  ;;  %8325 = vst [vmem:[%s13858_s17 + $0x1fd8] sm:$0xff] %v13599_v59 }
 0x845   : > { %v13603_v61 = vpop.eup %13602  ;;  %8326 = vst [vmem:[%s13858_s17 + $0x1fe0] sm:$0xff] %v13601_v60 }
 0x846   : > { %v13605_v62 = vpop.eup %13604  ;;  %8327 = vst [vmem:[%s13858_s17 + $0x1fe8] sm:$0xff] %v13603_v61 }
 0x847   : > { %v13607_v63 = vpop.eup %13606  ;;  %8328 = vst [vmem:[%s13858_s17 + $0x1ff0] sm:$0xff] %v13605_v62 }
 0x848   : > { %8329 = vst [vmem:[%s13858_s17 + $0x1ff8] sm:$0xff] %v13607_v63 }
 0x849   : > { %13651 = shalt.err (!%p13648_p2)
}
 0x84a   : > { %s13652_s13 = scalar_lea.hbm %s15892_s2, 131072  ;;  %s13656_s20 = scalar_lea.hbm %s15942_s1, 262144 }
 0x84b   : > { %p13653_p4 = scmp.ne.s32.totalorder %s15892_s2, %s13652_s13  ;;  %p13657_p9 = scmp.lt.u32.totalorder %s15892_s2, %s15942_s1 }
 0x84c   : > { %p13658_p1 = scmp.lt.u32.totalorder %s13656_s20, %s13652_s13  ;;  %p13660_p6 = scmp.lt.u32.totalorder %s13652_s13, %s15892_s2 }
 0x84d   : > { %p13654_p5 = pnand %p13653_p4, %p15949_p11 }
 0x84e   : > { %p13659_p3 = por %p13658_p1, %p13657_p9 }
 0x84f   : > { %p13655_p7 = pneg %p13654_p5 }
 0x850   : > { %p13661_p12 = por %p13660_p6, %p13659_p3 }
 0x852   : > { %p13662_p13 = pnand %p13661_p12, %p13655_p7 }
 0x854   : > { %13665 = shalt.err (!%p13662_p13)
}
 0x855   : > { %s13710_s24 = smov 1024   ;;  %s13711_s26 = smov 64  }
 0x856   : > { %9464 = dma.vmem_to_hbm [thread:$0]  (%p15949_p11), %s15894_s27, 131072, %s15892_s2, %s8331_s10, %s13710_s24, %s13710_s24, %s13711_s26  }
 0x857 PF: > { %s8360_s30 = sand.u32 1, %s13692_s6   ;;  %p15950_p8 = scmp.ne.s32.totalorder %s15947_s19, 0 }
 0x858   : > { %p15951_p10 = scmp.ge.s32.totalorder %s13704_s9, 2  ;;  %s8361_s17 = scalar_lea.sflag [#allocation4], %s8360_s30 }
 0x85a   : > { %p9471_p0 = pnand %p15951_p10, %p15950_p8 }
 0x85c   : > { %13687 = dma.done.wait (!%p9471_p0), %s8361_s17, 131072  }
 0x85d   : > { %13689 = vsyncadd (!%p9471_p0), %s8361_s17, 4294836224  ;;  %p14_p2 = scmp.ge.s32.totalorder %s13747_s12, 4   ;;  %s15952_s6 = smov %s13696_s7 }
 0x85e   : > { %s15953_s7 = smov %s13700_s8  ;;  %s15954_s8 = smov %s13759_s15 }
 0x85f   : > { %s15955_s9 = smov %s13747_s12  ;;  %16 = sbr.rel (!%p14_p2) target bundleno = 5 (0x5), region = 69 }
 0x866   :  { %8366 = vsyncpa [#allocation3], 1 }
 0x867   :  { %8368 = vsyncpa [#allocation3 + $0x1], 1 }
 0x868   :  { %8369 = vsyncpa [#allocation4], 1 }
 0x869   :  { %8371 = vsyncpa [#allocation4 + $0x1], 1 }

</bundles_post_ra>
